<compile_context>
chip_gen: v7x
topology: tpu7x:2x2x1
jax: 0.10.0
libtpu: 0.0.40
codegen_flags: <defaults>
</compile_context>

<pallas_src>
import functools

import jax
import jax.numpy as jnp
from jax.experimental import pallas as pl
from jax.experimental.pallas import tpu as pltpu

_VMEM_LIMIT = 48 * 1024 * 1024   # < 64 MiB (v7x physical), > 16/32 MiB scoped defaults


def _round_up(x, m):
    return ((x + m - 1) // m) * m


# ----------------------------- Pallas kernels ------------------------------

def _conv3x3_in_kernel(x_ref, w_ref, b_ref, o_ref, *, H, W, C, Co, norm, relu, eps):
    """3x3 'zero'-padded conv + bias, optionally fused InstanceNorm(+ReLU).

    x_ref: (1, H+2, W+2, C) f32 (already zero padded)
    w_ref: (9, C, Co) bf16, tap-major (dh*3+dw)
    b_ref: (1, Co) f32
    o_ref: (1, H*W, Co) f32
    One grid step == one image, so the per-(n,c) InstanceNorm statistics are a
    plain cross-sublane reduction over the H*W rows of this block.
    """
    # TODO(synk): for large H*W, tile the spatial rows and carry partial
    # mean/var sums in scratch instead of holding the whole image per step.
    xp = x_ref[0]                                              # (H+2, W+2, C) f32
    acc = jnp.broadcast_to(b_ref[...], (H * W, Co)).astype(jnp.float32)
    for dh in range(3):
        for dw in range(3):
            patch = xp[dh:dh + H, dw:dw + W, :].reshape(H * W, C)
            acc = acc + jnp.dot(patch.astype(jnp.bfloat16),
                                w_ref[dh * 3 + dw],
                                preferred_element_type=jnp.float32)
    y = acc
    if norm:
        # InstanceNorm2d(affine=False): biased variance, eps inside rsqrt.
        mean = jnp.mean(y, axis=0, keepdims=True)
        var = jnp.mean((y - mean) ** 2, axis=0, keepdims=True)
        y = (y - mean) * jax.lax.rsqrt(var + eps)
    if relu:
        y = jnp.maximum(y, 0.0)
    o_ref[0] = y


def _attention_adain_kernel(x1_ref, x2_ref, wq_ref, wk_ref, wv_ref,
                            bq_ref, bk_ref, bv_ref, o_ref, *, eps):
    """Fused q/k/v 1x1 convs + self-attention + adin + residual for one image.

    x1_ref: (1, HW, C) f32  (x1_out: query / value / style source)
    x2_ref: (1, HW, C) f32  (x2_out: key source)
    o_ref : (1, HW, C) f32  (x1_out + adin(attention_out, x1_out))
    """
    # TODO(synk): for large HW, switch to an online-softmax loop over key tiles
    # (flash-style) so the (HW, HW) energy never fully materializes in VMEM.
    x1 = x1_ref[0]
    x2 = x2_ref[0]
    x1b = x1.astype(jnp.bfloat16)

    q = jnp.dot(x1b, wq_ref[...], preferred_element_type=jnp.float32) + bq_ref[...]
    k = jnp.dot(x2.astype(jnp.bfloat16), wk_ref[...],
                preferred_element_type=jnp.float32) + bk_ref[...]
    v = jnp.dot(x1b, wv_ref[...], preferred_element_type=jnp.float32) + bv_ref[...]

    # energy[i, j] = q[i] . k[j]
    energy = jax.lax.dot_general(q.astype(jnp.bfloat16), k.astype(jnp.bfloat16),
                                 (((1,), (1,)), ((), ())),
                                 preferred_element_type=jnp.float32)   # (HW, HW)
    m = jnp.max(energy, axis=-1, keepdims=True)
    p = jnp.exp(energy - m)
    attn = p * pl.reciprocal(jnp.sum(p, axis=-1, keepdims=True), approx=True)

    # out[i, c] = sum_j attn[i, j] * v[j, c]   (== torch.bmm(value, attention^T))
    out = jnp.dot(attn.astype(jnp.bfloat16), v.astype(jnp.bfloat16),
                  preferred_element_type=jnp.float32)                  # (HW, C)

    # adin(content=out, style=x1): torch.var default (unbiased), eps inside sqrt.
    hw = out.shape[0]
    denom = jnp.float32(hw - 1)
    c_mean = jnp.mean(out, axis=0, keepdims=True)
    s_mean = jnp.mean(x1, axis=0, keepdims=True)
    c_var = jnp.sum((out - c_mean) ** 2, axis=0, keepdims=True) / denom
    s_var = jnp.sum((x1 - s_mean) ** 2, axis=0, keepdims=True) / denom
    s_std = jnp.sqrt(s_var + eps)
    adain = (out - c_mean) * (jax.lax.rsqrt(c_var + eps) * s_std) + s_mean
    o_ref[0] = x1 + adain      # x1_out = x1_out + adin(x1_out_1, x1_out)


def _matmul_bias_kernel(a_ref, b_ref, bias_ref, o_ref):
    # (tm, K) @ (K, Co) + bias ; bf16 operands on the MXU, f32 accumulate.
    o_ref[...] = jnp.dot(a_ref[...].astype(jnp.bfloat16), b_ref[...],
                         preferred_element_type=jnp.float32) + bias_ref[...]


# ----------------------------- pallas_call wrappers -------------------------

def conv3x3_in(x_nhwc, w_torch, b, *, norm, relu, eps=1e-5):
    """'zero'-padded 3x3 conv (+ optional fused InstanceNorm / ReLU) in NHWC."""
    n, h, wd, c = x_nhwc.shape
    co = w_torch.shape[0]
    # TODO(synk): move the zero padding into the kernel (VMEM scratch) to save
    # this small extra HBM pass.
    xp = jnp.pad(x_nhwc, ((0, 0), (1, 1), (1, 1), (0, 0)))
    wm = jnp.transpose(w_torch, (2, 3, 1, 0)).reshape(9, c, co).astype(jnp.bfloat16)
    b2 = b.reshape(1, co).astype(jnp.float32)
    kern = functools.partial(_conv3x3_in_kernel, H=h, W=wd, C=c, Co=co,
                             norm=norm, relu=relu, eps=eps)
    y = pl.pallas_call(
        kern,
        out_shape=jax.ShapeDtypeStruct((n, h * wd, co), jnp.float32),
        grid=(n,),
        in_specs=[pl.BlockSpec((1, h + 2, wd + 2, c), lambda i: (i, 0, 0, 0)),
                  pl.BlockSpec((9, c, co), lambda i: (0, 0, 0)),
                  pl.BlockSpec((1, co), lambda i: (0, 0))],
        out_specs=pl.BlockSpec((1, h * wd, co), lambda i: (i, 0, 0)),
        compiler_params=pltpu.CompilerParams(
            dimension_semantics=("parallel",),
            vmem_limit_bytes=_VMEM_LIMIT),
    )(xp, wm, b2)
    return y.reshape(n, h, wd, co)


def attention_adain(x1_seq, x2_seq, params, eps=1e-5):
    """Fused q/k/v projection + attention + adin + residual.  (N, HW, C) -> same."""
    n, hw, c = x1_seq.shape
    c8 = params['q_w'].shape[0]
    wq = jnp.transpose(params['q_w'].reshape(c8, c)).astype(jnp.bfloat16)   # (C, C/8)
    wk = jnp.transpose(params['k_w'].reshape(c8, c)).astype(jnp.bfloat16)
    wv = jnp.transpose(params['v_w'].reshape(c, c)).astype(jnp.bfloat16)    # (C, C)
    bq = params['q_b'].reshape(1, c8).astype(jnp.float32)
    bk = params['k_b'].reshape(1, c8).astype(jnp.float32)
    bv = params['v_b'].reshape(1, c).astype(jnp.float32)
    kern = functools.partial(_attention_adain_kernel, eps=eps)
    return pl.pallas_call(
        kern,
        out_shape=jax.ShapeDtypeStruct((n, hw, c), jnp.float32),
        grid=(n,),
        in_specs=[pl.BlockSpec((1, hw, c), lambda i: (i, 0, 0)),
                  pl.BlockSpec((1, hw, c), lambda i: (i, 0, 0)),
                  pl.BlockSpec((c, c8), lambda i: (0, 0)),
                  pl.BlockSpec((c, c8), lambda i: (0, 0)),
                  pl.BlockSpec((c, c), lambda i: (0, 0)),
                  pl.BlockSpec((1, c8), lambda i: (0, 0)),
                  pl.BlockSpec((1, c8), lambda i: (0, 0)),
                  pl.BlockSpec((1, c), lambda i: (0, 0))],
        out_specs=pl.BlockSpec((1, hw, c), lambda i: (i, 0, 0)),
        compiler_params=pltpu.CompilerParams(
            dimension_semantics=("parallel",),
            vmem_limit_bytes=_VMEM_LIMIT),
    )(x1_seq, x2_seq, wq, wk, wv, bq, bk, bv)


def _choose_row_tile(m):
    if m >= 1024:
        return 512
    # split small problems into ~2 row tiles so both v7x TensorCores get work
    return max(8, _round_up((m + 1) // 2, 8))


def matmul_bias(a, b_bf16, bias):
    """Row-tiled (M-parallel) matmul + bias.  a: (M, K) f32, b: (K, Co) bf16."""
    m, k = a.shape
    co = b_bf16.shape[1]
    tm = _choose_row_tile(m)
    mp = _round_up(m, tm)
    if mp != m:
        a = jnp.pad(a, ((0, mp - m), (0, 0)))
    bias2 = bias.reshape(1, co).astype(jnp.float32)
    out = pl.pallas_call(
        _matmul_bias_kernel,
        out_shape=jax.ShapeDtypeStruct((mp, co), jnp.float32),
        grid=(mp // tm,),
        in_specs=[pl.BlockSpec((tm, k), lambda i: (i, 0)),
                  pl.BlockSpec((k, co), lambda i: (0, 0)),
                  pl.BlockSpec((1, co), lambda i: (0, 0))],
        out_specs=pl.BlockSpec((tm, co), lambda i: (i, 0)),
        compiler_params=pltpu.CompilerParams(
            dimension_semantics=("parallel",),
            vmem_limit_bytes=_VMEM_LIMIT),
    )(a, b_bf16, bias2)
    return out if mp == m else out[:m]


# ----------------------------- conv glue -------------------------------------

def conv1x1_strided(x_nhwc, w_torch, b, stride=2):
    # torch Conv2d weight (Co, Ci, 1, 1), stride 2.
    xs = x_nhwc[:, ::stride, ::stride, :]
    n, h, wd, ci = xs.shape
    co = w_torch.shape[0]
    wm = jnp.transpose(w_torch.reshape(co, ci)).astype(jnp.bfloat16)
    y = matmul_bias(xs.reshape(n * h * wd, ci), wm, b)
    return y.reshape(n, h, wd, co)


def conv_transpose2x2_nchw(x_nhwc, w_torch, b):
    # torch ConvTranspose2d weight (Ci, Co, 2, 2), stride 2 => non-overlapping taps.
    n, h, wd, ci = x_nhwc.shape
    co = w_torch.shape[1]
    wm = jnp.transpose(w_torch, (0, 2, 3, 1)).reshape(ci, 4 * co).astype(jnp.bfloat16)
    bias4 = jnp.tile(b, 4)
    y = matmul_bias(x_nhwc.reshape(n * h * wd, ci), wm, bias4)     # (N*H*W, 4*Co)
    y = y.reshape(n, h, wd, 2, 2, co)
    # pixel-shuffle and NHWC->NCHW in a single transpose
    return jnp.transpose(y, (0, 5, 1, 3, 2, 4)).reshape(n, co, 2 * h, 2 * wd)


# ----------------------------- PATBlock forward ------------------------------

def pat_block_forward(params, x1, x2):
    # x1, x2: (N, C, H, W) float32 (PyTorch NCHW convention)
    n, c, h, w = x1.shape
    hw = h * w
    # single layout change at entry (channels onto the 128-lane axis)
    x1n = jnp.transpose(x1, (0, 2, 3, 1))
    x2n = jnp.transpose(x2, (0, 2, 3, 1))

    # conv_block_stream1: Conv3x3 -> IN -> ReLU -> Conv3x3 -> IN (norm fused)
    t = conv3x3_in(x1n, params['s1_w1'], params['s1_b1'], norm=True, relu=True)
    x1_out_n = conv3x3_in(t, params['s1_w2'], params['s1_b2'], norm=True, relu=False)

    # conv_block_stream2 (cal_att=True): Conv3x3 -> IN -> ReLU -> Conv3x3
    t = conv3x3_in(x2n, params['s2_w1'], params['s2_b1'], norm=True, relu=True)
    x2_out_n = conv3x3_in(t, params['s2_w2'], params['s2_b2'], norm=False, relu=False)

    # fused q/k/v projection + attention + adin + residual (per batch element)
    x1_new_seq = attention_adain(x1_out_n.reshape(n, hw, c),
                                 x2_out_n.reshape(n, hw, c), params)    # (N, HW, C)
    x1_new_nhwc = x1_new_seq.reshape(n, h, w, c)

    # x2_out = cat((x2_out, x1_out), channel)
    x2_cat_nhwc = jnp.concatenate([x2_out_n, x1_new_nhwc], axis=-1)     # (N,H,W,2C)

    # down / up sampling branches
    x1_down = conv1x1_strided(x1_new_nhwc, params['s1d_w'], params['s1d_b'])
    x2_down = conv1x1_strided(x2_cat_nhwc, params['s2d_w'], params['s2d_b'])
    x1_up = conv_transpose2x2_nchw(x1_new_nhwc, params['s1u_w'], params['s1u_b'])
    x2_up = conv_transpose2x2_nchw(x2_cat_nhwc, params['s2u_w'], params['s2u_b'])

    to_nchw = lambda a: jnp.transpose(a, (0, 3, 1, 2))
    return (to_nchw(x1_new_nhwc), to_nchw(x2_cat_nhwc),
            to_nchw(x1_down), x1_up, to_nchw(x2_down), x2_up)


# ----------------------------- parameter init --------------------------------

def init_params(key, dim):
    def nrm(k, shape, scale=0.05):
        return scale * jax.random.normal(k, shape, dtype=jnp.float32)

    keys = jax.random.split(key, 22)
    p = {}
    p['s1_w1'], p['s1_b1'] = nrm(keys[0], (dim, dim, 3, 3)), nrm(keys[1], (dim,))
    p['s1_w2'], p['s1_b2'] = nrm(keys[2], (dim, dim, 3, 3)), nrm(keys[3], (dim,))
    p['s2_w1'], p['s2_b1'] = nrm(keys[4], (dim, dim, 3, 3)), nrm(keys[5], (dim,))
    p['s2_w2'], p['s2_b2'] = nrm(keys[6], (dim, dim, 3, 3)), nrm(keys[7], (dim,))
    p['q_w'], p['q_b'] = nrm(keys[8], (dim // 8, dim, 1, 1)), nrm(keys[9], (dim // 8,))
    p['k_w'], p['k_b'] = nrm(keys[10], (dim // 8, dim, 1, 1)), nrm(keys[11], (dim // 8,))
    p['v_w'], p['v_b'] = nrm(keys[12], (dim, dim, 1, 1)), nrm(keys[13], (dim,))
    p['s1d_w'], p['s1d_b'] = nrm(keys[14], (dim, dim, 1, 1)), nrm(keys[15], (dim,))
    p['s1u_w'], p['s1u_b'] = nrm(keys[16], (dim, dim, 2, 2)), nrm(keys[17], (dim,))
    p['s2d_w'], p['s2d_b'] = nrm(keys[18], (dim, 2 * dim, 1, 1)), nrm(keys[19], (dim,))
    p['s2u_w'], p['s2u_b'] = nrm(keys[20], (2 * dim, dim, 2, 2)), nrm(keys[21], (dim,))
    return p


# ----------------------------- main ------------------------------------------

if __name__ == "__main__":
    dim = 256            # forced by the module's hard-coded query/key/value convs
    N, H, W = 2, 8, 8    # small spatial size

    key = jax.random.PRNGKey(0)
    k1, k2, kp = jax.random.split(key, 3)
    x1 = jax.random.normal(k1, (N, dim, H, W), dtype=jnp.float32)
    x2 = jax.random.normal(k2, (N, dim, H, W), dtype=jnp.float32)
    params = init_params(kp, dim)

    outs = jax.jit(pat_block_forward)(params, x1, x2)
    outs = jax.block_until_ready(outs)

    assert outs[0].shape == (N, dim, H, W)
    assert outs[1].shape == (N, 2 * dim, H, W)
    assert outs[2].shape == (N, dim, H // 2, W // 2)
    assert outs[3].shape == (N, dim, 2 * H, 2 * W)
    assert outs[4].shape == (N, dim, H // 2, W // 2)
    assert outs[5].shape == (N, dim, 2 * H, 2 * W)
    assert all(jnp.isfinite(o).all() for o in outs)

    print("KERNEL_OK")
</pallas_src>

<mosaic_0001>
module attributes {stable_mosaic.version = 11 : i64} {
  func.func @_conv3x3_in_kernel(%arg0: i32, %arg1: memref<1x10x10x256xf32, #tpu.memory_space<vmem>>, %arg2: memref<9x256x256xbf16, #tpu.memory_space<vmem>>, %arg3: memref<1x256xf32, #tpu.memory_space<vmem>>, %arg4: memref<1x64x256xf32, #tpu.memory_space<vmem>>) attributes {dimension_semantics = [#tpu.dimension_semantics<parallel>], iteration_bounds = array<i64: 2>, scalar_prefetch = 0 : i64, scratch_operands = 0 : i64, tpu.core_type = #tpu.core_type<tc>, window_params = [{transform_indices = @transform_0, window_bounds = array<i64: 1, 10, 10, 256>}, {pipeline_mode = #tpu.pipeline_mode<synchronous>, transform_indices = @transform_1, window_bounds = array<i64: 9, 256, 256>}, {pipeline_mode = #tpu.pipeline_mode<synchronous>, transform_indices = @transform_2, window_bounds = array<i64: 1, 256>}, {transform_indices = @transform_3, window_bounds = array<i64: 1, 64, 256>}]} {
    %c0 = arith.constant 0 : index
    %c0_0 = arith.constant 0 : index
    %c0_1 = arith.constant 0 : index
    %c0_2 = arith.constant 0 : index
    %0 = vector.load %arg1[%c0, %c0_0, %c0_1, %c0_2] : memref<1x10x10x256xf32, #tpu.memory_space<vmem>>, vector<1x10x10x256xf32>
    %1 = vector.shape_cast %0 : vector<1x10x10x256xf32> to vector<10x10x256xf32>
    %c0_3 = arith.constant 0 : index
    %c0_4 = arith.constant 0 : index
    %2 = vector.load %arg3[%c0_3, %c0_4] : memref<1x256xf32, #tpu.memory_space<vmem>>, vector<1x256xf32>
    %3 = vector.shape_cast %2 : vector<1x256xf32> to vector<1x256xf32>
    %4 = vector.broadcast %3 : vector<1x256xf32> to vector<64x256xf32>
    %5 = vector.extract_strided_slice %1 {offsets = [0, 0, 0], sizes = [8, 8, 256], strides = [1, 1, 1]} : vector<10x10x256xf32> to vector<8x8x256xf32>
    %6 = vector.shape_cast %5 : vector<8x8x256xf32> to vector<64x256xf32>
    %7 = arith.truncf %6 : vector<64x256xf32> to vector<64x256xbf16>
    %c0_5 = arith.constant 0 : index
    %c0_6 = arith.constant 0 : index
    %c0_7 = arith.constant 0 : index
    %8 = vector.load %arg2[%c0_5, %c0_6, %c0_7] : memref<9x256x256xbf16, #tpu.memory_space<vmem>>, vector<1x256x256xbf16>
    %9 = vector.shape_cast %8 : vector<1x256x256xbf16> to vector<256x256xbf16>
    %cst = arith.constant dense<0.000000e+00> : vector<64x256xf32>
    %10 = tpu.matmul %7, %9, %cst {dimension_numbers = #tpu.dot_dimension_numbers<[1], [0], [0], [1], [0, 0, 1, 1], [], []>} : vector<64x256xbf16>, vector<256x256xbf16>, vector<64x256xf32> -> vector<64x256xf32>
    %11 = arith.addf %4, %10 : vector<64x256xf32>
    %12 = vector.extract_strided_slice %1 {offsets = [0, 1, 0], sizes = [8, 8, 256], strides = [1, 1, 1]} : vector<10x10x256xf32> to vector<8x8x256xf32>
    %13 = vector.shape_cast %12 : vector<8x8x256xf32> to vector<64x256xf32>
    %14 = arith.truncf %13 : vector<64x256xf32> to vector<64x256xbf16>
    %c1 = arith.constant 1 : index
    %c0_8 = arith.constant 0 : index
    %c0_9 = arith.constant 0 : index
    %15 = vector.load %arg2[%c1, %c0_8, %c0_9] : memref<9x256x256xbf16, #tpu.memory_space<vmem>>, vector<1x256x256xbf16>
    %16 = vector.shape_cast %15 : vector<1x256x256xbf16> to vector<256x256xbf16>
    %cst_10 = arith.constant dense<0.000000e+00> : vector<64x256xf32>
    %17 = tpu.matmul %14, %16, %cst_10 {dimension_numbers = #tpu.dot_dimension_numbers<[1], [0], [0], [1], [0, 0, 1, 1], [], []>} : vector<64x256xbf16>, vector<256x256xbf16>, vector<64x256xf32> -> vector<64x256xf32>
    %18 = arith.addf %11, %17 : vector<64x256xf32>
    %19 = vector.extract_strided_slice %1 {offsets = [0, 2, 0], sizes = [8, 8, 256], strides = [1, 1, 1]} : vector<10x10x256xf32> to vector<8x8x256xf32>
    %20 = vector.shape_cast %19 : vector<8x8x256xf32> to vector<64x256xf32>
    %21 = arith.truncf %20 : vector<64x256xf32> to vector<64x256xbf16>
    %c2 = arith.constant 2 : index
    %c0_11 = arith.constant 0 : index
    %c0_12 = arith.constant 0 : index
    %22 = vector.load %arg2[%c2, %c0_11, %c0_12] : memref<9x256x256xbf16, #tpu.memory_space<vmem>>, vector<1x256x256xbf16>
    %23 = vector.shape_cast %22 : vector<1x256x256xbf16> to vector<256x256xbf16>
    %cst_13 = arith.constant dense<0.000000e+00> : vector<64x256xf32>
    %24 = tpu.matmul %21, %23, %cst_13 {dimension_numbers = #tpu.dot_dimension_numbers<[1], [0], [0], [1], [0, 0, 1, 1], [], []>} : vector<64x256xbf16>, vector<256x256xbf16>, vector<64x256xf32> -> vector<64x256xf32>
    %25 = arith.addf %18, %24 : vector<64x256xf32>
    %26 = vector.extract_strided_slice %1 {offsets = [1, 0, 0], sizes = [8, 8, 256], strides = [1, 1, 1]} : vector<10x10x256xf32> to vector<8x8x256xf32>
    %27 = vector.shape_cast %26 : vector<8x8x256xf32> to vector<64x256xf32>
    %28 = arith.truncf %27 : vector<64x256xf32> to vector<64x256xbf16>
    %c3 = arith.constant 3 : index
    %c0_14 = arith.constant 0 : index
    %c0_15 = arith.constant 0 : index
    %29 = vector.load %arg2[%c3, %c0_14, %c0_15] : memref<9x256x256xbf16, #tpu.memory_space<vmem>>, vector<1x256x256xbf16>
    %30 = vector.shape_cast %29 : vector<1x256x256xbf16> to vector<256x256xbf16>
    %cst_16 = arith.constant dense<0.000000e+00> : vector<64x256xf32>
    %31 = tpu.matmul %28, %30, %cst_16 {dimension_numbers = #tpu.dot_dimension_numbers<[1], [0], [0], [1], [0, 0, 1, 1], [], []>} : vector<64x256xbf16>, vector<256x256xbf16>, vector<64x256xf32> -> vector<64x256xf32>
    %32 = arith.addf %25, %31 : vector<64x256xf32>
    %33 = vector.extract_strided_slice %1 {offsets = [1, 1, 0], sizes = [8, 8, 256], strides = [1, 1, 1]} : vector<10x10x256xf32> to vector<8x8x256xf32>
    %34 = vector.shape_cast %33 : vector<8x8x256xf32> to vector<64x256xf32>
    %35 = arith.truncf %34 : vector<64x256xf32> to vector<64x256xbf16>
    %c4 = arith.constant 4 : index
    %c0_17 = arith.constant 0 : index
    %c0_18 = arith.constant 0 : index
    %36 = vector.load %arg2[%c4, %c0_17, %c0_18] : memref<9x256x256xbf16, #tpu.memory_space<vmem>>, vector<1x256x256xbf16>
    %37 = vector.shape_cast %36 : vector<1x256x256xbf16> to vector<256x256xbf16>
    %cst_19 = arith.constant dense<0.000000e+00> : vector<64x256xf32>
    %38 = tpu.matmul %35, %37, %cst_19 {dimension_numbers = #tpu.dot_dimension_numbers<[1], [0], [0], [1], [0, 0, 1, 1], [], []>} : vector<64x256xbf16>, vector<256x256xbf16>, vector<64x256xf32> -> vector<64x256xf32>
    %39 = arith.addf %32, %38 : vector<64x256xf32>
    %40 = vector.extract_strided_slice %1 {offsets = [1, 2, 0], sizes = [8, 8, 256], strides = [1, 1, 1]} : vector<10x10x256xf32> to vector<8x8x256xf32>
    %41 = vector.shape_cast %40 : vector<8x8x256xf32> to vector<64x256xf32>
    %42 = arith.truncf %41 : vector<64x256xf32> to vector<64x256xbf16>
    %c5 = arith.constant 5 : index
    %c0_20 = arith.constant 0 : index
    %c0_21 = arith.constant 0 : index
    %43 = vector.load %arg2[%c5, %c0_20, %c0_21] : memref<9x256x256xbf16, #tpu.memory_space<vmem>>, vector<1x256x256xbf16>
    %44 = vector.shape_cast %43 : vector<1x256x256xbf16> to vector<256x256xbf16>
    %cst_22 = arith.constant dense<0.000000e+00> : vector<64x256xf32>
    %45 = tpu.matmul %42, %44, %cst_22 {dimension_numbers = #tpu.dot_dimension_numbers<[1], [0], [0], [1], [0, 0, 1, 1], [], []>} : vector<64x256xbf16>, vector<256x256xbf16>, vector<64x256xf32> -> vector<64x256xf32>
    %46 = arith.addf %39, %45 : vector<64x256xf32>
    %47 = vector.extract_strided_slice %1 {offsets = [2, 0, 0], sizes = [8, 8, 256], strides = [1, 1, 1]} : vector<10x10x256xf32> to vector<8x8x256xf32>
    %48 = vector.shape_cast %47 : vector<8x8x256xf32> to vector<64x256xf32>
    %49 = arith.truncf %48 : vector<64x256xf32> to vector<64x256xbf16>
    %c6 = arith.constant 6 : index
    %c0_23 = arith.constant 0 : index
    %c0_24 = arith.constant 0 : index
    %50 = vector.load %arg2[%c6, %c0_23, %c0_24] : memref<9x256x256xbf16, #tpu.memory_space<vmem>>, vector<1x256x256xbf16>
    %51 = vector.shape_cast %50 : vector<1x256x256xbf16> to vector<256x256xbf16>
    %cst_25 = arith.constant dense<0.000000e+00> : vector<64x256xf32>
    %52 = tpu.matmul %49, %51, %cst_25 {dimension_numbers = #tpu.dot_dimension_numbers<[1], [0], [0], [1], [0, 0, 1, 1], [], []>} : vector<64x256xbf16>, vector<256x256xbf16>, vector<64x256xf32> -> vector<64x256xf32>
    %53 = arith.addf %46, %52 : vector<64x256xf32>
    %54 = vector.extract_strided_slice %1 {offsets = [2, 1, 0], sizes = [8, 8, 256], strides = [1, 1, 1]} : vector<10x10x256xf32> to vector<8x8x256xf32>
    %55 = vector.shape_cast %54 : vector<8x8x256xf32> to vector<64x256xf32>
    %56 = arith.truncf %55 : vector<64x256xf32> to vector<64x256xbf16>
    %c7 = arith.constant 7 : index
    %c0_26 = arith.constant 0 : index
    %c0_27 = arith.constant 0 : index
    %57 = vector.load %arg2[%c7, %c0_26, %c0_27] : memref<9x256x256xbf16, #tpu.memory_space<vmem>>, vector<1x256x256xbf16>
    %58 = vector.shape_cast %57 : vector<1x256x256xbf16> to vector<256x256xbf16>
    %cst_28 = arith.constant dense<0.000000e+00> : vector<64x256xf32>
    %59 = tpu.matmul %56, %58, %cst_28 {dimension_numbers = #tpu.dot_dimension_numbers<[1], [0], [0], [1], [0, 0, 1, 1], [], []>} : vector<64x256xbf16>, vector<256x256xbf16>, vector<64x256xf32> -> vector<64x256xf32>
    %60 = arith.addf %53, %59 : vector<64x256xf32>
    %61 = vector.extract_strided_slice %1 {offsets = [2, 2, 0], sizes = [8, 8, 256], strides = [1, 1, 1]} : vector<10x10x256xf32> to vector<8x8x256xf32>
    %62 = vector.shape_cast %61 : vector<8x8x256xf32> to vector<64x256xf32>
    %63 = arith.truncf %62 : vector<64x256xf32> to vector<64x256xbf16>
    %c8 = arith.constant 8 : index
    %c0_29 = arith.constant 0 : index
    %c0_30 = arith.constant 0 : index
    %64 = vector.load %arg2[%c8, %c0_29, %c0_30] : memref<9x256x256xbf16, #tpu.memory_space<vmem>>, vector<1x256x256xbf16>
    %65 = vector.shape_cast %64 : vector<1x256x256xbf16> to vector<256x256xbf16>
    %cst_31 = arith.constant dense<0.000000e+00> : vector<64x256xf32>
    %66 = tpu.matmul %63, %65, %cst_31 {dimension_numbers = #tpu.dot_dimension_numbers<[1], [0], [0], [1], [0, 0, 1, 1], [], []>} : vector<64x256xbf16>, vector<256x256xbf16>, vector<64x256xf32> -> vector<64x256xf32>
    %67 = arith.addf %60, %66 : vector<64x256xf32>
    %cst_32 = arith.constant dense<0.000000e+00> : vector<256xf32>
    %68 = vector.multi_reduction <add>, %67, %cst_32 [0] : vector<64x256xf32> to vector<256xf32>
    %69 = vector.shape_cast %68 : vector<256xf32> to vector<1x256xf32>
    %cst_33 = arith.constant 6.400000e+01 : f32
    %70 = vector.broadcast %cst_33 : f32 to vector<1x256xf32>
    %71 = arith.divf %69, %70 : vector<1x256xf32>
    %72 = vector.broadcast %71 : vector<1x256xf32> to vector<64x256xf32>
    %73 = arith.subf %67, %72 : vector<64x256xf32>
    %74 = arith.mulf %73, %73 : vector<64x256xf32>
    %cst_34 = arith.constant dense<0.000000e+00> : vector<256xf32>
    %75 = vector.multi_reduction <add>, %74, %cst_34 [0] : vector<64x256xf32> to vector<256xf32>
    %76 = vector.shape_cast %75 : vector<256xf32> to vector<1x256xf32>
    %cst_35 = arith.constant 6.400000e+01 : f32
    %77 = vector.broadcast %cst_35 : f32 to vector<1x256xf32>
    %78 = arith.divf %76, %77 : vector<1x256xf32>
    %79 = vector.broadcast %71 : vector<1x256xf32> to vector<64x256xf32>
    %80 = arith.subf %67, %79 : vector<64x256xf32>
    %cst_36 = arith.constant 9.99999974E-6 : f32
    %81 = vector.broadcast %cst_36 : f32 to vector<1x256xf32>
    %82 = arith.addf %78, %81 : vector<1x256xf32>
    %83 = math.rsqrt %82 : vector<1x256xf32>
    %84 = vector.broadcast %83 : vector<1x256xf32> to vector<64x256xf32>
    %85 = arith.mulf %80, %84 : vector<64x256xf32>
    %cst_37 = arith.constant 0.000000e+00 : f32
    %86 = vector.broadcast %cst_37 : f32 to vector<64x256xf32>
    %87 = arith.maximumf %85, %86 : vector<64x256xf32>
    %c0_38 = arith.constant 0 : index
    %c0_39 = arith.constant 0 : index
    %c0_40 = arith.constant 0 : index
    %88 = vector.load %arg4[%c0_38, %c0_39, %c0_40] : memref<1x64x256xf32, #tpu.memory_space<vmem>>, vector<1x64x256xf32>
    %89 = vector.shape_cast %88 : vector<1x64x256xf32> to vector<64x256xf32>
    %90 = vector.shape_cast %87 : vector<64x256xf32> to vector<1x64x256xf32>
    tpu.vector_store %arg4[%c0_38, %c0_39, %c0_40], %90 {strides = array<i32>} : memref<1x64x256xf32, #tpu.memory_space<vmem>>, vector<1x64x256xf32>,
    return
  }
  func.func @transform_0(%arg0: i32) -> (i32, i32, i32, i32) {
    %c0_i32 = arith.constant 0 : i32
    %c0_i32_0 = arith.constant 0 : i32
    %c0_i32_1 = arith.constant 0 : i32
    %c0_i32_2 = arith.constant 0 : i32
    return %arg0, %c0_i32, %c0_i32_0, %c0_i32_1 : i32, i32, i32, i32
  }
  func.func @transform_1(%arg0: i32) -> (i32, i32, i32) {
    %c0_i32 = arith.constant 0 : i32
    %c0_i32_0 = arith.constant 0 : i32
    %c0_i32_1 = arith.constant 0 : i32
    %c0_i32_2 = arith.constant 0 : i32
    return %c0_i32, %c0_i32_0, %c0_i32_1 : i32, i32, i32
  }
  func.func @transform_2(%arg0: i32) -> (i32, i32) {
    %c0_i32 = arith.constant 0 : i32
    %c0_i32_0 = arith.constant 0 : i32
    %c0_i32_1 = arith.constant 0 : i32
    return %c0_i32, %c0_i32_0 : i32, i32
  }
  func.func @transform_3(%arg0: i32) -> (i32, i32, i32) {
    %c0_i32 = arith.constant 0 : i32
    %c0_i32_0 = arith.constant 0 : i32
    %c0_i32_1 = arith.constant 0 : i32
    return %arg0, %c0_i32, %c0_i32_0 : i32, i32, i32
  }
}

module attributes {stable_mosaic.version = 11 : i64} {
  func.func @_conv3x3_in_kernel(%arg0: i32, %arg1: memref<1x10x10x256xf32, #tpu.memory_space<vmem>>, %arg2: memref<9x256x256xbf16, #tpu.memory_space<vmem>>, %arg3: memref<1x256xf32, #tpu.memory_space<vmem>>, %arg4: memref<1x64x256xf32, #tpu.memory_space<vmem>>) attributes {dimension_semantics = [#tpu.dimension_semantics<parallel>], iteration_bounds = array<i64: 2>, scalar_prefetch = 0 : i64, scratch_operands = 0 : i64, tpu.core_type = #tpu.core_type<tc>, window_params = [{transform_indices = @transform_0, window_bounds = array<i64: 1, 10, 10, 256>}, {pipeline_mode = #tpu.pipeline_mode<synchronous>, transform_indices = @transform_1, window_bounds = array<i64: 9, 256, 256>}, {pipeline_mode = #tpu.pipeline_mode<synchronous>, transform_indices = @transform_2, window_bounds = array<i64: 1, 256>}, {transform_indices = @transform_3, window_bounds = array<i64: 1, 64, 256>}]} {
    %c0 = arith.constant 0 : index
    %c0_0 = arith.constant 0 : index
    %c0_1 = arith.constant 0 : index
    %c0_2 = arith.constant 0 : index
    %0 = vector.load %arg1[%c0, %c0_0, %c0_1, %c0_2] : memref<1x10x10x256xf32, #tpu.memory_space<vmem>>, vector<1x10x10x256xf32>
    %1 = vector.shape_cast %0 : vector<1x10x10x256xf32> to vector<10x10x256xf32>
    %c0_3 = arith.constant 0 : index
    %c0_4 = arith.constant 0 : index
    %2 = vector.load %arg3[%c0_3, %c0_4] : memref<1x256xf32, #tpu.memory_space<vmem>>, vector<1x256xf32>
    %3 = vector.shape_cast %2 : vector<1x256xf32> to vector<1x256xf32>
    %4 = vector.broadcast %3 : vector<1x256xf32> to vector<64x256xf32>
    %5 = vector.extract_strided_slice %1 {offsets = [0, 0, 0], sizes = [8, 8, 256], strides = [1, 1, 1]} : vector<10x10x256xf32> to vector<8x8x256xf32>
    %6 = vector.shape_cast %5 : vector<8x8x256xf32> to vector<64x256xf32>
    %7 = arith.truncf %6 : vector<64x256xf32> to vector<64x256xbf16>
    %c0_5 = arith.constant 0 : index
    %c0_6 = arith.constant 0 : index
    %c0_7 = arith.constant 0 : index
    %8 = vector.load %arg2[%c0_5, %c0_6, %c0_7] : memref<9x256x256xbf16, #tpu.memory_space<vmem>>, vector<1x256x256xbf16>
    %9 = vector.shape_cast %8 : vector<1x256x256xbf16> to vector<256x256xbf16>
    %cst = arith.constant dense<0.000000e+00> : vector<64x256xf32>
    %10 = tpu.matmul %7, %9, %cst {dimension_numbers = #tpu.dot_dimension_numbers<[1], [0], [0], [1], [0, 0, 1, 1], [], []>} : vector<64x256xbf16>, vector<256x256xbf16>, vector<64x256xf32> -> vector<64x256xf32>
    %11 = arith.addf %4, %10 : vector<64x256xf32>
    %12 = vector.extract_strided_slice %1 {offsets = [0, 1, 0], sizes = [8, 8, 256], strides = [1, 1, 1]} : vector<10x10x256xf32> to vector<8x8x256xf32>
    %13 = vector.shape_cast %12 : vector<8x8x256xf32> to vector<64x256xf32>
    %14 = arith.truncf %13 : vector<64x256xf32> to vector<64x256xbf16>
    %c1 = arith.constant 1 : index
    %c0_8 = arith.constant 0 : index
    %c0_9 = arith.constant 0 : index
    %15 = vector.load %arg2[%c1, %c0_8, %c0_9] : memref<9x256x256xbf16, #tpu.memory_space<vmem>>, vector<1x256x256xbf16>
    %16 = vector.shape_cast %15 : vector<1x256x256xbf16> to vector<256x256xbf16>
    %cst_10 = arith.constant dense<0.000000e+00> : vector<64x256xf32>
    %17 = tpu.matmul %14, %16, %cst_10 {dimension_numbers = #tpu.dot_dimension_numbers<[1], [0], [0], [1], [0, 0, 1, 1], [], []>} : vector<64x256xbf16>, vector<256x256xbf16>, vector<64x256xf32> -> vector<64x256xf32>
    %18 = arith.addf %11, %17 : vector<64x256xf32>
    %19 = vector.extract_strided_slice %1 {offsets = [0, 2, 0], sizes = [8, 8, 256], strides = [1, 1, 1]} : vector<10x10x256xf32> to vector<8x8x256xf32>
    %20 = vector.shape_cast %19 : vector<8x8x256xf32> to vector<64x256xf32>
    %21 = arith.truncf %20 : vector<64x256xf32> to vector<64x256xbf16>
    %c2 = arith.constant 2 : index
    %c0_11 = arith.constant 0 : index
    %c0_12 = arith.constant 0 : index
    %22 = vector.load %arg2[%c2, %c0_11, %c0_12] : memref<9x256x256xbf16, #tpu.memory_space<vmem>>, vector<1x256x256xbf16>
    %23 = vector.shape_cast %22 : vector<1x256x256xbf16> to vector<256x256xbf16>
    %cst_13 = arith.constant dense<0.000000e+00> : vector<64x256xf32>
    %24 = tpu.matmul %21, %23, %cst_13 {dimension_numbers = #tpu.dot_dimension_numbers<[1], [0], [0], [1], [0, 0, 1, 1], [], []>} : vector<64x256xbf16>, vector<256x256xbf16>, vector<64x256xf32> -> vector<64x256xf32>
    %25 = arith.addf %18, %24 : vector<64x256xf32>
    %26 = vector.extract_strided_slice %1 {offsets = [1, 0, 0], sizes = [8, 8, 256], strides = [1, 1, 1]} : vector<10x10x256xf32> to vector<8x8x256xf32>
    %27 = vector.shape_cast %26 : vector<8x8x256xf32> to vector<64x256xf32>
    %28 = arith.truncf %27 : vector<64x256xf32> to vector<64x256xbf16>
    %c3 = arith.constant 3 : index
    %c0_14 = arith.constant 0 : index
    %c0_15 = arith.constant 0 : index
    %29 = vector.load %arg2[%c3, %c0_14, %c0_15] : memref<9x256x256xbf16, #tpu.memory_space<vmem>>, vector<1x256x256xbf16>
    %30 = vector.shape_cast %29 : vector<1x256x256xbf16> to vector<256x256xbf16>
    %cst_16 = arith.constant dense<0.000000e+00> : vector<64x256xf32>
    %31 = tpu.matmul %28, %30, %cst_16 {dimension_numbers = #tpu.dot_dimension_numbers<[1], [0], [0], [1], [0, 0, 1, 1], [], []>} : vector<64x256xbf16>, vector<256x256xbf16>, vector<64x256xf32> -> vector<64x256xf32>
    %32 = arith.addf %25, %31 : vector<64x256xf32>
    %33 = vector.extract_strided_slice %1 {offsets = [1, 1, 0], sizes = [8, 8, 256], strides = [1, 1, 1]} : vector<10x10x256xf32> to vector<8x8x256xf32>
    %34 = vector.shape_cast %33 : vector<8x8x256xf32> to vector<64x256xf32>
    %35 = arith.truncf %34 : vector<64x256xf32> to vector<64x256xbf16>
    %c4 = arith.constant 4 : index
    %c0_17 = arith.constant 0 : index
    %c0_18 = arith.constant 0 : index
    %36 = vector.load %arg2[%c4, %c0_17, %c0_18] : memref<9x256x256xbf16, #tpu.memory_space<vmem>>, vector<1x256x256xbf16>
    %37 = vector.shape_cast %36 : vector<1x256x256xbf16> to vector<256x256xbf16>
    %cst_19 = arith.constant dense<0.000000e+00> : vector<64x256xf32>
    %38 = tpu.matmul %35, %37, %cst_19 {dimension_numbers = #tpu.dot_dimension_numbers<[1], [0], [0], [1], [0, 0, 1, 1], [], []>} : vector<64x256xbf16>, vector<256x256xbf16>, vector<64x256xf32> -> vector<64x256xf32>
    %39 = arith.addf %32, %38 : vector<64x256xf32>
    %40 = vector.extract_strided_slice %1 {offsets = [1, 2, 0], sizes = [8, 8, 256], strides = [1, 1, 1]} : vector<10x10x256xf32> to vector<8x8x256xf32>
    %41 = vector.shape_cast %40 : vector<8x8x256xf32> to vector<64x256xf32>
    %42 = arith.truncf %41 : vector<64x256xf32> to vector<64x256xbf16>
    %c5 = arith.constant 5 : index
    %c0_20 = arith.constant 0 : index
    %c0_21 = arith.constant 0 : index
    %43 = vector.load %arg2[%c5, %c0_20, %c0_21] : memref<9x256x256xbf16, #tpu.memory_space<vmem>>, vector<1x256x256xbf16>
    %44 = vector.shape_cast %43 : vector<1x256x256xbf16> to vector<256x256xbf16>
    %cst_22 = arith.constant dense<0.000000e+00> : vector<64x256xf32>
    %45 = tpu.matmul %42, %44, %cst_22 {dimension_numbers = #tpu.dot_dimension_numbers<[1], [0], [0], [1], [0, 0, 1, 1], [], []>} : vector<64x256xbf16>, vector<256x256xbf16>, vector<64x256xf32> -> vector<64x256xf32>
    %46 = arith.addf %39, %45 : vector<64x256xf32>
    %47 = vector.extract_strided_slice %1 {offsets = [2, 0, 0], sizes = [8, 8, 256], strides = [1, 1, 1]} : vector<10x10x256xf32> to vector<8x8x256xf32>
    %48 = vector.shape_cast %47 : vector<8x8x256xf32> to vector<64x256xf32>
    %49 = arith.truncf %48 : vector<64x256xf32> to vector<64x256xbf16>
    %c6 = arith.constant 6 : index
    %c0_23 = arith.constant 0 : index
    %c0_24 = arith.constant 0 : index
    %50 = vector.load %arg2[%c6, %c0_23, %c0_24] : memref<9x256x256xbf16, #tpu.memory_space<vmem>>, vector<1x256x256xbf16>
    %51 = vector.shape_cast %50 : vector<1x256x256xbf16> to vector<256x256xbf16>
    %cst_25 = arith.constant dense<0.000000e+00> : vector<64x256xf32>
    %52 = tpu.matmul %49, %51, %cst_25 {dimension_numbers = #tpu.dot_dimension_numbers<[1], [0], [0], [1], [0, 0, 1, 1], [], []>} : vector<64x256xbf16>, vector<256x256xbf16>, vector<64x256xf32> -> vector<64x256xf32>
    %53 = arith.addf %46, %52 : vector<64x256xf32>
    %54 = vector.extract_strided_slice %1 {offsets = [2, 1, 0], sizes = [8, 8, 256], strides = [1, 1, 1]} : vector<10x10x256xf32> to vector<8x8x256xf32>
    %55 = vector.shape_cast %54 : vector<8x8x256xf32> to vector<64x256xf32>
    %56 = arith.truncf %55 : vector<64x256xf32> to vector<64x256xbf16>
    %c7 = arith.constant 7 : index
    %c0_26 = arith.constant 0 : index
    %c0_27 = arith.constant 0 : index
    %57 = vector.load %arg2[%c7, %c0_26, %c0_27] : memref<9x256x256xbf16, #tpu.memory_space<vmem>>, vector<1x256x256xbf16>
    %58 = vector.shape_cast %57 : vector<1x256x256xbf16> to vector<256x256xbf16>
    %cst_28 = arith.constant dense<0.000000e+00> : vector<64x256xf32>
    %59 = tpu.matmul %56, %58, %cst_28 {dimension_numbers = #tpu.dot_dimension_numbers<[1], [0], [0], [1], [0, 0, 1, 1], [], []>} : vector<64x256xbf16>, vector<256x256xbf16>, vector<64x256xf32> -> vector<64x256xf32>
    %60 = arith.addf %53, %59 : vector<64x256xf32>
    %61 = vector.extract_strided_slice %1 {offsets = [2, 2, 0], sizes = [8, 8, 256], strides = [1, 1, 1]} : vector<10x10x256xf32> to vector<8x8x256xf32>
    %62 = vector.shape_cast %61 : vector<8x8x256xf32> to vector<64x256xf32>
    %63 = arith.truncf %62 : vector<64x256xf32> to vector<64x256xbf16>
    %c8 = arith.constant 8 : index
    %c0_29 = arith.constant 0 : index
    %c0_30 = arith.constant 0 : index
    %64 = vector.load %arg2[%c8, %c0_29, %c0_30] : memref<9x256x256xbf16, #tpu.memory_space<vmem>>, vector<1x256x256xbf16>
    %65 = vector.shape_cast %64 : vector<1x256x256xbf16> to vector<256x256xbf16>
    %cst_31 = arith.constant dense<0.000000e+00> : vector<64x256xf32>
    %66 = tpu.matmul %63, %65, %cst_31 {dimension_numbers = #tpu.dot_dimension_numbers<[1], [0], [0], [1], [0, 0, 1, 1], [], []>} : vector<64x256xbf16>, vector<256x256xbf16>, vector<64x256xf32> -> vector<64x256xf32>
    %67 = arith.addf %60, %66 : vector<64x256xf32>
    %c0_32 = arith.constant 0 : index
    %c0_33 = arith.constant 0 : index
    %c0_34 = arith.constant 0 : index
    %68 = vector.load %arg4[%c0_32, %c0_33, %c0_34] : memref<1x64x256xf32, #tpu.memory_space<vmem>>, vector<1x64x256xf32>
    %69 = vector.shape_cast %68 : vector<1x64x256xf32> to vector<64x256xf32>
    %70 = vector.shape_cast %67 : vector<64x256xf32> to vector<1x64x256xf32>
    tpu.vector_store %arg4[%c0_32, %c0_33, %c0_34], %70 {strides = array<i32>} : memref<1x64x256xf32, #tpu.memory_space<vmem>>, vector<1x64x256xf32>,
    return
  }
  func.func @transform_0(%arg0: i32) -> (i32, i32, i32, i32) {
    %c0_i32 = arith.constant 0 : i32
    %c0_i32_0 = arith.constant 0 : i32
    %c0_i32_1 = arith.constant 0 : i32
    %c0_i32_2 = arith.constant 0 : i32
    return %arg0, %c0_i32, %c0_i32_0, %c0_i32_1 : i32, i32, i32, i32
  }
  func.func @transform_1(%arg0: i32) -> (i32, i32, i32) {
    %c0_i32 = arith.constant 0 : i32
    %c0_i32_0 = arith.constant 0 : i32
    %c0_i32_1 = arith.constant 0 : i32
    %c0_i32_2 = arith.constant 0 : i32
    return %c0_i32, %c0_i32_0, %c0_i32_1 : i32, i32, i32
  }
  func.func @transform_2(%arg0: i32) -> (i32, i32) {
    %c0_i32 = arith.constant 0 : i32
    %c0_i32_0 = arith.constant 0 : i32
    %c0_i32_1 = arith.constant 0 : i32
    return %c0_i32, %c0_i32_0 : i32, i32
  }
  func.func @transform_3(%arg0: i32) -> (i32, i32, i32) {
    %c0_i32 = arith.constant 0 : i32
    %c0_i32_0 = arith.constant 0 : i32
    %c0_i32_1 = arith.constant 0 : i32
    return %arg0, %c0_i32, %c0_i32_0 : i32, i32, i32
  }
}

module attributes {stable_mosaic.version = 11 : i64} {
  func.func @_conv3x3_in_kernel(%arg0: i32, %arg1: memref<1x10x10x256xf32, #tpu.memory_space<vmem>>, %arg2: memref<9x256x256xbf16, #tpu.memory_space<vmem>>, %arg3: memref<1x256xf32, #tpu.memory_space<vmem>>, %arg4: memref<1x64x256xf32, #tpu.memory_space<vmem>>) attributes {dimension_semantics = [#tpu.dimension_semantics<parallel>], iteration_bounds = array<i64: 2>, scalar_prefetch = 0 : i64, scratch_operands = 0 : i64, tpu.core_type = #tpu.core_type<tc>, window_params = [{transform_indices = @transform_0, window_bounds = array<i64: 1, 10, 10, 256>}, {pipeline_mode = #tpu.pipeline_mode<synchronous>, transform_indices = @transform_1, window_bounds = array<i64: 9, 256, 256>}, {pipeline_mode = #tpu.pipeline_mode<synchronous>, transform_indices = @transform_2, window_bounds = array<i64: 1, 256>}, {transform_indices = @transform_3, window_bounds = array<i64: 1, 64, 256>}]} {
    %c0 = arith.constant 0 : index
    %c0_0 = arith.constant 0 : index
    %c0_1 = arith.constant 0 : index
    %c0_2 = arith.constant 0 : index
    %0 = vector.load %arg1[%c0, %c0_0, %c0_1, %c0_2] : memref<1x10x10x256xf32, #tpu.memory_space<vmem>>, vector<1x10x10x256xf32>
    %1 = vector.shape_cast %0 : vector<1x10x10x256xf32> to vector<10x10x256xf32>
    %c0_3 = arith.constant 0 : index
    %c0_4 = arith.constant 0 : index
    %2 = vector.load %arg3[%c0_3, %c0_4] : memref<1x256xf32, #tpu.memory_space<vmem>>, vector<1x256xf32>
    %3 = vector.shape_cast %2 : vector<1x256xf32> to vector<1x256xf32>
    %4 = vector.broadcast %3 : vector<1x256xf32> to vector<64x256xf32>
    %5 = vector.extract_strided_slice %1 {offsets = [0, 0, 0], sizes = [8, 8, 256], strides = [1, 1, 1]} : vector<10x10x256xf32> to vector<8x8x256xf32>
    %6 = vector.shape_cast %5 : vector<8x8x256xf32> to vector<64x256xf32>
    %7 = arith.truncf %6 : vector<64x256xf32> to vector<64x256xbf16>
    %c0_5 = arith.constant 0 : index
    %c0_6 = arith.constant 0 : index
    %c0_7 = arith.constant 0 : index
    %8 = vector.load %arg2[%c0_5, %c0_6, %c0_7] : memref<9x256x256xbf16, #tpu.memory_space<vmem>>, vector<1x256x256xbf16>
    %9 = vector.shape_cast %8 : vector<1x256x256xbf16> to vector<256x256xbf16>
    %cst = arith.constant dense<0.000000e+00> : vector<64x256xf32>
    %10 = tpu.matmul %7, %9, %cst {dimension_numbers = #tpu.dot_dimension_numbers<[1], [0], [0], [1], [0, 0, 1, 1], [], []>} : vector<64x256xbf16>, vector<256x256xbf16>, vector<64x256xf32> -> vector<64x256xf32>
    %11 = arith.addf %4, %10 : vector<64x256xf32>
    %12 = vector.extract_strided_slice %1 {offsets = [0, 1, 0], sizes = [8, 8, 256], strides = [1, 1, 1]} : vector<10x10x256xf32> to vector<8x8x256xf32>
    %13 = vector.shape_cast %12 : vector<8x8x256xf32> to vector<64x256xf32>
    %14 = arith.truncf %13 : vector<64x256xf32> to vector<64x256xbf16>
    %c1 = arith.constant 1 : index
    %c0_8 = arith.constant 0 : index
    %c0_9 = arith.constant 0 : index
    %15 = vector.load %arg2[%c1, %c0_8, %c0_9] : memref<9x256x256xbf16, #tpu.memory_space<vmem>>, vector<1x256x256xbf16>
    %16 = vector.shape_cast %15 : vector<1x256x256xbf16> to vector<256x256xbf16>
    %cst_10 = arith.constant dense<0.000000e+00> : vector<64x256xf32>
    %17 = tpu.matmul %14, %16, %cst_10 {dimension_numbers = #tpu.dot_dimension_numbers<[1], [0], [0], [1], [0, 0, 1, 1], [], []>} : vector<64x256xbf16>, vector<256x256xbf16>, vector<64x256xf32> -> vector<64x256xf32>
    %18 = arith.addf %11, %17 : vector<64x256xf32>
    %19 = vector.extract_strided_slice %1 {offsets = [0, 2, 0], sizes = [8, 8, 256], strides = [1, 1, 1]} : vector<10x10x256xf32> to vector<8x8x256xf32>
    %20 = vector.shape_cast %19 : vector<8x8x256xf32> to vector<64x256xf32>
    %21 = arith.truncf %20 : vector<64x256xf32> to vector<64x256xbf16>
    %c2 = arith.constant 2 : index
    %c0_11 = arith.constant 0 : index
    %c0_12 = arith.constant 0 : index
    %22 = vector.load %arg2[%c2, %c0_11, %c0_12] : memref<9x256x256xbf16, #tpu.memory_space<vmem>>, vector<1x256x256xbf16>
    %23 = vector.shape_cast %22 : vector<1x256x256xbf16> to vector<256x256xbf16>
    %cst_13 = arith.constant dense<0.000000e+00> : vector<64x256xf32>
    %24 = tpu.matmul %21, %23, %cst_13 {dimension_numbers = #tpu.dot_dimension_numbers<[1], [0], [0], [1], [0, 0, 1, 1], [], []>} : vector<64x256xbf16>, vector<256x256xbf16>, vector<64x256xf32> -> vector<64x256xf32>
    %25 = arith.addf %18, %24 : vector<64x256xf32>
    %26 = vector.extract_strided_slice %1 {offsets = [1, 0, 0], sizes = [8, 8, 256], strides = [1, 1, 1]} : vector<10x10x256xf32> to vector<8x8x256xf32>
    %27 = vector.shape_cast %26 : vector<8x8x256xf32> to vector<64x256xf32>
    %28 = arith.truncf %27 : vector<64x256xf32> to vector<64x256xbf16>
    %c3 = arith.constant 3 : index
    %c0_14 = arith.constant 0 : index
    %c0_15 = arith.constant 0 : index
    %29 = vector.load %arg2[%c3, %c0_14, %c0_15] : memref<9x256x256xbf16, #tpu.memory_space<vmem>>, vector<1x256x256xbf16>
    %30 = vector.shape_cast %29 : vector<1x256x256xbf16> to vector<256x256xbf16>
    %cst_16 = arith.constant dense<0.000000e+00> : vector<64x256xf32>
    %31 = tpu.matmul %28, %30, %cst_16 {dimension_numbers = #tpu.dot_dimension_numbers<[1], [0], [0], [1], [0, 0, 1, 1], [], []>} : vector<64x256xbf16>, vector<256x256xbf16>, vector<64x256xf32> -> vector<64x256xf32>
    %32 = arith.addf %25, %31 : vector<64x256xf32>
    %33 = vector.extract_strided_slice %1 {offsets = [1, 1, 0], sizes = [8, 8, 256], strides = [1, 1, 1]} : vector<10x10x256xf32> to vector<8x8x256xf32>
    %34 = vector.shape_cast %33 : vector<8x8x256xf32> to vector<64x256xf32>
    %35 = arith.truncf %34 : vector<64x256xf32> to vector<64x256xbf16>
    %c4 = arith.constant 4 : index
    %c0_17 = arith.constant 0 : index
    %c0_18 = arith.constant 0 : index
    %36 = vector.load %arg2[%c4, %c0_17, %c0_18] : memref<9x256x256xbf16, #tpu.memory_space<vmem>>, vector<1x256x256xbf16>
    %37 = vector.shape_cast %36 : vector<1x256x256xbf16> to vector<256x256xbf16>
    %cst_19 = arith.constant dense<0.000000e+00> : vector<64x256xf32>
    %38 = tpu.matmul %35, %37, %cst_19 {dimension_numbers = #tpu.dot_dimension_numbers<[1], [0], [0], [1], [0, 0, 1, 1], [], []>} : vector<64x256xbf16>, vector<256x256xbf16>, vector<64x256xf32> -> vector<64x256xf32>
    %39 = arith.addf %32, %38 : vector<64x256xf32>
    %40 = vector.extract_strided_slice %1 {offsets = [1, 2, 0], sizes = [8, 8, 256], strides = [1, 1, 1]} : vector<10x10x256xf32> to vector<8x8x256xf32>
    %41 = vector.shape_cast %40 : vector<8x8x256xf32> to vector<64x256xf32>
    %42 = arith.truncf %41 : vector<64x256xf32> to vector<64x256xbf16>
    %c5 = arith.constant 5 : index
    %c0_20 = arith.constant 0 : index
    %c0_21 = arith.constant 0 : index
    %43 = vector.load %arg2[%c5, %c0_20, %c0_21] : memref<9x256x256xbf16, #tpu.memory_space<vmem>>, vector<1x256x256xbf16>
    %44 = vector.shape_cast %43 : vector<1x256x256xbf16> to vector<256x256xbf16>
    %cst_22 = arith.constant dense<0.000000e+00> : vector<64x256xf32>
    %45 = tpu.matmul %42, %44, %cst_22 {dimension_numbers = #tpu.dot_dimension_numbers<[1], [0], [0], [1], [0, 0, 1, 1], [], []>} : vector<64x256xbf16>, vector<256x256xbf16>, vector<64x256xf32> -> vector<64x256xf32>
    %46 = arith.addf %39, %45 : vector<64x256xf32>
    %47 = vector.extract_strided_slice %1 {offsets = [2, 0, 0], sizes = [8, 8, 256], strides = [1, 1, 1]} : vector<10x10x256xf32> to vector<8x8x256xf32>
    %48 = vector.shape_cast %47 : vector<8x8x256xf32> to vector<64x256xf32>
    %49 = arith.truncf %48 : vector<64x256xf32> to vector<64x256xbf16>
    %c6 = arith.constant 6 : index
    %c0_23 = arith.constant 0 : index
    %c0_24 = arith.constant 0 : index
    %50 = vector.load %arg2[%c6, %c0_23, %c0_24] : memref<9x256x256xbf16, #tpu.memory_space<vmem>>, vector<1x256x256xbf16>
    %51 = vector.shape_cast %50 : vector<1x256x256xbf16> to vector<256x256xbf16>
    %cst_25 = arith.constant dense<0.000000e+00> : vector<64x256xf32>
    %52 = tpu.matmul %49, %51, %cst_25 {dimension_numbers = #tpu.dot_dimension_numbers<[1], [0], [0], [1], [0, 0, 1, 1], [], []>} : vector<64x256xbf16>, vector<256x256xbf16>, vector<64x256xf32> -> vector<64x256xf32>
    %53 = arith.addf %46, %52 : vector<64x256xf32>
    %54 = vector.extract_strided_slice %1 {offsets = [2, 1, 0], sizes = [8, 8, 256], strides = [1, 1, 1]} : vector<10x10x256xf32> to vector<8x8x256xf32>
    %55 = vector.shape_cast %54 : vector<8x8x256xf32> to vector<64x256xf32>
    %56 = arith.truncf %55 : vector<64x256xf32> to vector<64x256xbf16>
    %c7 = arith.constant 7 : index
    %c0_26 = arith.constant 0 : index
    %c0_27 = arith.constant 0 : index
    %57 = vector.load %arg2[%c7, %c0_26, %c0_27] : memref<9x256x256xbf16, #tpu.memory_space<vmem>>, vector<1x256x256xbf16>
    %58 = vector.shape_cast %57 : vector<1x256x256xbf16> to vector<256x256xbf16>
    %cst_28 = arith.constant dense<0.000000e+00> : vector<64x256xf32>
    %59 = tpu.matmul %56, %58, %cst_28 {dimension_numbers = #tpu.dot_dimension_numbers<[1], [0], [0], [1], [0, 0, 1, 1], [], []>} : vector<64x256xbf16>, vector<256x256xbf16>, vector<64x256xf32> -> vector<64x256xf32>
    %60 = arith.addf %53, %59 : vector<64x256xf32>
    %61 = vector.extract_strided_slice %1 {offsets = [2, 2, 0], sizes = [8, 8, 256], strides = [1, 1, 1]} : vector<10x10x256xf32> to vector<8x8x256xf32>
    %62 = vector.shape_cast %61 : vector<8x8x256xf32> to vector<64x256xf32>
    %63 = arith.truncf %62 : vector<64x256xf32> to vector<64x256xbf16>
    %c8 = arith.constant 8 : index
    %c0_29 = arith.constant 0 : index
    %c0_30 = arith.constant 0 : index
    %64 = vector.load %arg2[%c8, %c0_29, %c0_30] : memref<9x256x256xbf16, #tpu.memory_space<vmem>>, vector<1x256x256xbf16>
    %65 = vector.shape_cast %64 : vector<1x256x256xbf16> to vector<256x256xbf16>
    %cst_31 = arith.constant dense<0.000000e+00> : vector<64x256xf32>
    %66 = tpu.matmul %63, %65, %cst_31 {dimension_numbers = #tpu.dot_dimension_numbers<[1], [0], [0], [1], [0, 0, 1, 1], [], []>} : vector<64x256xbf16>, vector<256x256xbf16>, vector<64x256xf32> -> vector<64x256xf32>
    %67 = arith.addf %60, %66 : vector<64x256xf32>
    %cst_32 = arith.constant dense<0.000000e+00> : vector<256xf32>
    %68 = vector.multi_reduction <add>, %67, %cst_32 [0] : vector<64x256xf32> to vector<256xf32>
    %69 = vector.shape_cast %68 : vector<256xf32> to vector<1x256xf32>
    %cst_33 = arith.constant 6.400000e+01 : f32
    %70 = vector.broadcast %cst_33 : f32 to vector<1x256xf32>
    %71 = arith.divf %69, %70 : vector<1x256xf32>
    %72 = vector.broadcast %71 : vector<1x256xf32> to vector<64x256xf32>
    %73 = arith.subf %67, %72 : vector<64x256xf32>
    %74 = arith.mulf %73, %73 : vector<64x256xf32>
    %cst_34 = arith.constant dense<0.000000e+00> : vector<256xf32>
    %75 = vector.multi_reduction <add>, %74, %cst_34 [0] : vector<64x256xf32> to vector<256xf32>
    %76 = vector.shape_cast %75 : vector<256xf32> to vector<1x256xf32>
    %cst_35 = arith.constant 6.400000e+01 : f32
    %77 = vector.broadcast %cst_35 : f32 to vector<1x256xf32>
    %78 = arith.divf %76, %77 : vector<1x256xf32>
    %79 = vector.broadcast %71 : vector<1x256xf32> to vector<64x256xf32>
    %80 = arith.subf %67, %79 : vector<64x256xf32>
    %cst_36 = arith.constant 9.99999974E-6 : f32
    %81 = vector.broadcast %cst_36 : f32 to vector<1x256xf32>
    %82 = arith.addf %78, %81 : vector<1x256xf32>
    %83 = math.rsqrt %82 : vector<1x256xf32>
    %84 = vector.broadcast %83 : vector<1x256xf32> to vector<64x256xf32>
    %85 = arith.mulf %80, %84 : vector<64x256xf32>
    %c0_37 = arith.constant 0 : index
    %c0_38 = arith.constant 0 : index
    %c0_39 = arith.constant 0 : index
    %86 = vector.load %arg4[%c0_37, %c0_38, %c0_39] : memref<1x64x256xf32, #tpu.memory_space<vmem>>, vector<1x64x256xf32>
    %87 = vector.shape_cast %86 : vector<1x64x256xf32> to vector<64x256xf32>
    %88 = vector.shape_cast %85 : vector<64x256xf32> to vector<1x64x256xf32>
    tpu.vector_store %arg4[%c0_37, %c0_38, %c0_39], %88 {strides = array<i32>} : memref<1x64x256xf32, #tpu.memory_space<vmem>>, vector<1x64x256xf32>,
    return
  }
  func.func @transform_0(%arg0: i32) -> (i32, i32, i32, i32) {
    %c0_i32 = arith.constant 0 : i32
    %c0_i32_0 = arith.constant 0 : i32
    %c0_i32_1 = arith.constant 0 : i32
    %c0_i32_2 = arith.constant 0 : i32
    return %arg0, %c0_i32, %c0_i32_0, %c0_i32_1 : i32, i32, i32, i32
  }
  func.func @transform_1(%arg0: i32) -> (i32, i32, i32) {
    %c0_i32 = arith.constant 0 : i32
    %c0_i32_0 = arith.constant 0 : i32
    %c0_i32_1 = arith.constant 0 : i32
    %c0_i32_2 = arith.constant 0 : i32
    return %c0_i32, %c0_i32_0, %c0_i32_1 : i32, i32, i32
  }
  func.func @transform_2(%arg0: i32) -> (i32, i32) {
    %c0_i32 = arith.constant 0 : i32
    %c0_i32_0 = arith.constant 0 : i32
    %c0_i32_1 = arith.constant 0 : i32
    return %c0_i32, %c0_i32_0 : i32, i32
  }
  func.func @transform_3(%arg0: i32) -> (i32, i32, i32) {
    %c0_i32 = arith.constant 0 : i32
    %c0_i32_0 = arith.constant 0 : i32
    %c0_i32_1 = arith.constant 0 : i32
    return %arg0, %c0_i32, %c0_i32_0 : i32, i32, i32
  }
}

module attributes {stable_mosaic.version = 11 : i64} {
  func.func @_attention_adain_kernel(%arg0: i32, %arg1: memref<1x64x256xf32, #tpu.memory_space<vmem>>, %arg2: memref<1x64x256xf32, #tpu.memory_space<vmem>>, %arg3: memref<256x32xbf16, #tpu.memory_space<vmem>>, %arg4: memref<256x32xbf16, #tpu.memory_space<vmem>>, %arg5: memref<256x256xbf16, #tpu.memory_space<vmem>>, %arg6: memref<1x32xf32, #tpu.memory_space<vmem>>, %arg7: memref<1x32xf32, #tpu.memory_space<vmem>>, %arg8: memref<1x256xf32, #tpu.memory_space<vmem>>, %arg9: memref<1x64x256xf32, #tpu.memory_space<vmem>>) attributes {dimension_semantics = [#tpu.dimension_semantics<parallel>], iteration_bounds = array<i64: 2>, scalar_prefetch = 0 : i64, scratch_operands = 0 : i64, tpu.core_type = #tpu.core_type<tc>, window_params = [{transform_indices = @transform_0, window_bounds = array<i64: 1, 64, 256>}, {transform_indices = @transform_1, window_bounds = array<i64: 1, 64, 256>}, {pipeline_mode = #tpu.pipeline_mode<synchronous>, transform_indices = @transform_2, window_bounds = array<i64: 256, 32>}, {pipeline_mode = #tpu.pipeline_mode<synchronous>, transform_indices = @transform_3, window_bounds = array<i64: 256, 32>}, {pipeline_mode = #tpu.pipeline_mode<synchronous>, transform_indices = @transform_4, window_bounds = array<i64: 256, 256>}, {pipeline_mode = #tpu.pipeline_mode<synchronous>, transform_indices = @transform_5, window_bounds = array<i64: 1, 32>}, {pipeline_mode = #tpu.pipeline_mode<synchronous>, transform_indices = @transform_6, window_bounds = array<i64: 1, 32>}, {pipeline_mode = #tpu.pipeline_mode<synchronous>, transform_indices = @transform_7, window_bounds = array<i64: 1, 256>}, {transform_indices = @transform_8, window_bounds = array<i64: 1, 64, 256>}]} {
    %c0 = arith.constant 0 : index
    %c0_0 = arith.constant 0 : index
    %c0_1 = arith.constant 0 : index
    %0 = vector.load %arg1[%c0, %c0_0, %c0_1] : memref<1x64x256xf32, #tpu.memory_space<vmem>>, vector<1x64x256xf32>
    %1 = vector.shape_cast %0 : vector<1x64x256xf32> to vector<64x256xf32>
    %c0_2 = arith.constant 0 : index
    %c0_3 = arith.constant 0 : index
    %c0_4 = arith.constant 0 : index
    %2 = vector.load %arg2[%c0_2, %c0_3, %c0_4] : memref<1x64x256xf32, #tpu.memory_space<vmem>>, vector<1x64x256xf32>
    %3 = vector.shape_cast %2 : vector<1x64x256xf32> to vector<64x256xf32>
    %4 = arith.truncf %1 : vector<64x256xf32> to vector<64x256xbf16>
    %c0_5 = arith.constant 0 : index
    %c0_6 = arith.constant 0 : index
    %5 = vector.load %arg3[%c0_5, %c0_6] : memref<256x32xbf16, #tpu.memory_space<vmem>>, vector<256x32xbf16>
    %cst = arith.constant dense<0.000000e+00> : vector<64x32xf32>
    %6 = tpu.matmul %4, %5, %cst {dimension_numbers = #tpu.dot_dimension_numbers<[1], [0], [0], [1], [0, 0, 1, 1], [], []>} : vector<64x256xbf16>, vector<256x32xbf16>, vector<64x32xf32> -> vector<64x32xf32>
    %c0_7 = arith.constant 0 : index
    %c0_8 = arith.constant 0 : index
    %7 = vector.load %arg6[%c0_7, %c0_8] : memref<1x32xf32, #tpu.memory_space<vmem>>, vector<1x32xf32>
    %8 = vector.broadcast %7 : vector<1x32xf32> to vector<64x32xf32>
    %9 = arith.addf %6, %8 : vector<64x32xf32>
    %10 = arith.truncf %3 : vector<64x256xf32> to vector<64x256xbf16>
    %c0_9 = arith.constant 0 : index
    %c0_10 = arith.constant 0 : index
    %11 = vector.load %arg4[%c0_9, %c0_10] : memref<256x32xbf16, #tpu.memory_space<vmem>>, vector<256x32xbf16>
    %cst_11 = arith.constant dense<0.000000e+00> : vector<64x32xf32>
    %12 = tpu.matmul %10, %11, %cst_11 {dimension_numbers = #tpu.dot_dimension_numbers<[1], [0], [0], [1], [0, 0, 1, 1], [], []>} : vector<64x256xbf16>, vector<256x32xbf16>, vector<64x32xf32> -> vector<64x32xf32>
    %c0_12 = arith.constant 0 : index
    %c0_13 = arith.constant 0 : index
    %13 = vector.load %arg7[%c0_12, %c0_13] : memref<1x32xf32, #tpu.memory_space<vmem>>, vector<1x32xf32>
    %14 = vector.broadcast %13 : vector<1x32xf32> to vector<64x32xf32>
    %15 = arith.addf %12, %14 : vector<64x32xf32>
    %c0_14 = arith.constant 0 : index
    %c0_15 = arith.constant 0 : index
    %16 = vector.load %arg5[%c0_14, %c0_15] : memref<256x256xbf16, #tpu.memory_space<vmem>>, vector<256x256xbf16>
    %cst_16 = arith.constant dense<0.000000e+00> : vector<64x256xf32>
    %17 = tpu.matmul %4, %16, %cst_16 {dimension_numbers = #tpu.dot_dimension_numbers<[1], [0], [0], [1], [0, 0, 1, 1], [], []>} : vector<64x256xbf16>, vector<256x256xbf16>, vector<64x256xf32> -> vector<64x256xf32>
    %c0_17 = arith.constant 0 : index
    %c0_18 = arith.constant 0 : index
    %18 = vector.load %arg8[%c0_17, %c0_18] : memref<1x256xf32, #tpu.memory_space<vmem>>, vector<1x256xf32>
    %19 = vector.broadcast %18 : vector<1x256xf32> to vector<64x256xf32>
    %20 = arith.addf %17, %19 : vector<64x256xf32>
    %21 = arith.truncf %9 : vector<64x32xf32> to vector<64x32xbf16>
    %22 = arith.truncf %15 : vector<64x32xf32> to vector<64x32xbf16>
    %cst_19 = arith.constant dense<0.000000e+00> : vector<64x64xf32>
    %23 = tpu.matmul %21, %22, %cst_19 {dimension_numbers = #tpu.dot_dimension_numbers<[1], [1], [0], [0], [0, 0, 1, 0], [], []>} : vector<64x32xbf16>, vector<64x32xbf16>, vector<64x64xf32> -> vector<64x64xf32>
    %cst_20 = arith.constant dense<0xFF800000> : vector<64xf32>
    %24 = vector.multi_reduction <maximumf>, %23, %cst_20 [1] : vector<64x64xf32> to vector<64xf32>
    %25 = vector.shape_cast %24 : vector<64xf32> to vector<64x1xf32>
    %26 = vector.broadcast %25 : vector<64x1xf32> to vector<64x64xf32>
    %27 = arith.subf %23, %26 : vector<64x64xf32>
    %28 = math.exp %27 : vector<64x64xf32>
    %cst_21 = arith.constant dense<0.000000e+00> : vector<64xf32>
    %29 = vector.multi_reduction <add>, %28, %cst_21 [1] : vector<64x64xf32> to vector<64xf32>
    %30 = vector.shape_cast %29 : vector<64xf32> to vector<64x1xf32>
    %31 = tpu.reciprocal %30 {approx = true} : vector<64x1xf32> -> vector<64x1xf32>
    %32 = vector.broadcast %31 : vector<64x1xf32> to vector<64x64xf32>
    %33 = arith.mulf %28, %32 : vector<64x64xf32>
    %34 = arith.truncf %33 : vector<64x64xf32> to vector<64x64xbf16>
    %35 = arith.truncf %20 : vector<64x256xf32> to vector<64x256xbf16>
    %cst_22 = arith.constant dense<0.000000e+00> : vector<64x256xf32>
    %36 = tpu.matmul %34, %35, %cst_22 {dimension_numbers = #tpu.dot_dimension_numbers<[1], [0], [0], [1], [0, 0, 1, 1], [], []>} : vector<64x64xbf16>, vector<64x256xbf16>, vector<64x256xf32> -> vector<64x256xf32>
    %cst_23 = arith.constant dense<0.000000e+00> : vector<256xf32>
    %37 = vector.multi_reduction <add>, %36, %cst_23 [0] : vector<64x256xf32> to vector<256xf32>
    %38 = vector.shape_cast %37 : vector<256xf32> to vector<1x256xf32>
    %cst_24 = arith.constant 6.400000e+01 : f32
    %39 = vector.broadcast %cst_24 : f32 to vector<1x256xf32>
    %40 = arith.divf %38, %39 : vector<1x256xf32>
    %cst_25 = arith.constant dense<0.000000e+00> : vector<256xf32>
    %41 = vector.multi_reduction <add>, %1, %cst_25 [0] : vector<64x256xf32> to vector<256xf32>
    %42 = vector.shape_cast %41 : vector<256xf32> to vector<1x256xf32>
    %cst_26 = arith.constant 6.400000e+01 : f32
    %43 = vector.broadcast %cst_26 : f32 to vector<1x256xf32>
    %44 = arith.divf %42, %43 : vector<1x256xf32>
    %45 = vector.broadcast %40 : vector<1x256xf32> to vector<64x256xf32>
    %46 = arith.subf %36, %45 : vector<64x256xf32>
    %47 = arith.mulf %46, %46 : vector<64x256xf32>
    %cst_27 = arith.constant dense<0.000000e+00> : vector<256xf32>
    %48 = vector.multi_reduction <add>, %47, %cst_27 [0] : vector<64x256xf32> to vector<256xf32>
    %49 = vector.shape_cast %48 : vector<256xf32> to vector<1x256xf32>
    %cst_28 = arith.constant 6.300000e+01 : f32
    %50 = vector.broadcast %cst_28 : f32 to vector<1x256xf32>
    %51 = arith.divf %49, %50 : vector<1x256xf32>
    %52 = vector.broadcast %44 : vector<1x256xf32> to vector<64x256xf32>
    %53 = arith.subf %1, %52 : vector<64x256xf32>
    %54 = arith.mulf %53, %53 : vector<64x256xf32>
    %cst_29 = arith.constant dense<0.000000e+00> : vector<256xf32>
    %55 = vector.multi_reduction <add>, %54, %cst_29 [0] : vector<64x256xf32> to vector<256xf32>
    %56 = vector.shape_cast %55 : vector<256xf32> to vector<1x256xf32>
    %cst_30 = arith.constant 6.300000e+01 : f32
    %57 = vector.broadcast %cst_30 : f32 to vector<1x256xf32>
    %58 = arith.divf %56, %57 : vector<1x256xf32>
    %cst_31 = arith.constant 9.99999974E-6 : f32
    %59 = vector.broadcast %cst_31 : f32 to vector<1x256xf32>
    %60 = arith.addf %58, %59 : vector<1x256xf32>
    %61 = math.sqrt %60 : vector<1x256xf32>
    %62 = vector.broadcast %40 : vector<1x256xf32> to vector<64x256xf32>
    %63 = arith.subf %36, %62 : vector<64x256xf32>
    %cst_32 = arith.constant 9.99999974E-6 : f32
    %64 = vector.broadcast %cst_32 : f32 to vector<1x256xf32>
    %65 = arith.addf %51, %64 : vector<1x256xf32>
    %66 = math.rsqrt %65 : vector<1x256xf32>
    %67 = arith.mulf %66, %61 : vector<1x256xf32>
    %68 = vector.broadcast %67 : vector<1x256xf32> to vector<64x256xf32>
    %69 = arith.mulf %63, %68 : vector<64x256xf32>
    %70 = vector.broadcast %44 : vector<1x256xf32> to vector<64x256xf32>
    %71 = arith.addf %69, %70 : vector<64x256xf32>
    %72 = arith.addf %1, %71 : vector<64x256xf32>
    %c0_33 = arith.constant 0 : index
    %c0_34 = arith.constant 0 : index
    %c0_35 = arith.constant 0 : index
    %73 = vector.load %arg9[%c0_33, %c0_34, %c0_35] : memref<1x64x256xf32, #tpu.memory_space<vmem>>, vector<1x64x256xf32>
    %74 = vector.shape_cast %73 : vector<1x64x256xf32> to vector<64x256xf32>
    %75 = vector.shape_cast %72 : vector<64x256xf32> to vector<1x64x256xf32>
    tpu.vector_store %arg9[%c0_33, %c0_34, %c0_35], %75 {strides = array<i32>} : memref<1x64x256xf32, #tpu.memory_space<vmem>>, vector<1x64x256xf32>,
    return
  }
  func.func @transform_0(%arg0: i32) -> (i32, i32, i32) {
    %c0_i32 = arith.constant 0 : i32
    %c0_i32_0 = arith.constant 0 : i32
    %c0_i32_1 = arith.constant 0 : i32
    return %arg0, %c0_i32, %c0_i32_0 : i32, i32, i32
  }
  func.func @transform_1(%arg0: i32) -> (i32, i32, i32) {
    %c0_i32 = arith.constant 0 : i32
    %c0_i32_0 = arith.constant 0 : i32
    %c0_i32_1 = arith.constant 0 : i32
    return %arg0, %c0_i32, %c0_i32_0 : i32, i32, i32
  }
  func.func @transform_2(%arg0: i32) -> (i32, i32) {
    %c0_i32 = arith.constant 0 : i32
    %c0_i32_0 = arith.constant 0 : i32
    %c0_i32_1 = arith.constant 0 : i32
    return %c0_i32, %c0_i32_0 : i32, i32
  }
  func.func @transform_3(%arg0: i32) -> (i32, i32) {
    %c0_i32 = arith.constant 0 : i32
    %c0_i32_0 = arith.constant 0 : i32
    %c0_i32_1 = arith.constant 0 : i32
    return %c0_i32, %c0_i32_0 : i32, i32
  }
  func.func @transform_4(%arg0: i32) -> (i32, i32) {
    %c0_i32 = arith.constant 0 : i32
    %c0_i32_0 = arith.constant 0 : i32
    %c0_i32_1 = arith.constant 0 : i32
    return %c0_i32, %c0_i32_0 : i32, i32
  }
  func.func @transform_5(%arg0: i32) -> (i32, i32) {
    %c0_i32 = arith.constant 0 : i32
    %c0_i32_0 = arith.constant 0 : i32
    %c0_i32_1 = arith.constant 0 : i32
    return %c0_i32, %c0_i32_0 : i32, i32
  }
  func.func @transform_6(%arg0: i32) -> (i32, i32) {
    %c0_i32 = arith.constant 0 : i32
    %c0_i32_0 = arith.constant 0 : i32
    %c0_i32_1 = arith.constant 0 : i32
    return %c0_i32, %c0_i32_0 : i32, i32
  }
  func.func @transform_7(%arg0: i32) -> (i32, i32) {
    %c0_i32 = arith.constant 0 : i32
    %c0_i32_0 = arith.constant 0 : i32
    %c0_i32_1 = arith.constant 0 : i32
    return %c0_i32, %c0_i32_0 : i32, i32
  }
  func.func @transform_8(%arg0: i32) -> (i32, i32, i32) {
    %c0_i32 = arith.constant 0 : i32
    %c0_i32_0 = arith.constant 0 : i32
    %c0_i32_1 = arith.constant 0 : i32
    return %arg0, %c0_i32, %c0_i32_0 : i32, i32, i32
  }
}

module attributes {stable_mosaic.version = 11 : i64} {
  func.func @_matmul_bias_kernel(%arg0: i32, %arg1: memref<16x512xf32, #tpu.memory_space<vmem>>, %arg2: memref<512x256xbf16, #tpu.memory_space<vmem>>, %arg3: memref<1x256xf32, #tpu.memory_space<vmem>>, %arg4: memref<16x256xf32, #tpu.memory_space<vmem>>) attributes {dimension_semantics = [#tpu.dimension_semantics<parallel>], iteration_bounds = array<i64: 2>, scalar_prefetch = 0 : i64, scratch_operands = 0 : i64, tpu.core_type = #tpu.core_type<tc>, window_params = [{transform_indices = @transform_0, window_bounds = array<i64: 16, 512>}, {pipeline_mode = #tpu.pipeline_mode<synchronous>, transform_indices = @transform_1, window_bounds = array<i64: 512, 256>}, {pipeline_mode = #tpu.pipeline_mode<synchronous>, transform_indices = @transform_2, window_bounds = array<i64: 1, 256>}, {transform_indices = @transform_3, window_bounds = array<i64: 16, 256>}]} {
    %c0 = arith.constant 0 : index
    %c0_0 = arith.constant 0 : index
    %0 = vector.load %arg1[%c0, %c0_0] : memref<16x512xf32, #tpu.memory_space<vmem>>, vector<16x512xf32>
    %1 = arith.truncf %0 : vector<16x512xf32> to vector<16x512xbf16>
    %c0_1 = arith.constant 0 : index
    %c0_2 = arith.constant 0 : index
    %2 = vector.load %arg2[%c0_1, %c0_2] : memref<512x256xbf16, #tpu.memory_space<vmem>>, vector<512x256xbf16>
    %cst = arith.constant dense<0.000000e+00> : vector<16x256xf32>
    %3 = tpu.matmul %1, %2, %cst {dimension_numbers = #tpu.dot_dimension_numbers<[1], [0], [0], [1], [0, 0, 1, 1], [], []>} : vector<16x512xbf16>, vector<512x256xbf16>, vector<16x256xf32> -> vector<16x256xf32>
    %c0_3 = arith.constant 0 : index
    %c0_4 = arith.constant 0 : index
    %4 = vector.load %arg3[%c0_3, %c0_4] : memref<1x256xf32, #tpu.memory_space<vmem>>, vector<1x256xf32>
    %5 = vector.broadcast %4 : vector<1x256xf32> to vector<16x256xf32>
    %6 = arith.addf %3, %5 : vector<16x256xf32>
    %c0_5 = arith.constant 0 : index
    %c0_6 = arith.constant 0 : index
    %7 = vector.load %arg4[%c0_5, %c0_6] : memref<16x256xf32, #tpu.memory_space<vmem>>, vector<16x256xf32>
    tpu.vector_store %arg4[%c0_5, %c0_6], %6 {strides = array<i32>} : memref<16x256xf32, #tpu.memory_space<vmem>>, vector<16x256xf32>,
    return
  }
  func.func @transform_0(%arg0: i32) -> (i32, i32) {
    %c0_i32 = arith.constant 0 : i32
    %c0_i32_0 = arith.constant 0 : i32
    return %arg0, %c0_i32 : i32, i32
  }
  func.func @transform_1(%arg0: i32) -> (i32, i32) {
    %c0_i32 = arith.constant 0 : i32
    %c0_i32_0 = arith.constant 0 : i32
    %c0_i32_1 = arith.constant 0 : i32
    return %c0_i32, %c0_i32_0 : i32, i32
  }
  func.func @transform_2(%arg0: i32) -> (i32, i32) {
    %c0_i32 = arith.constant 0 : i32
    %c0_i32_0 = arith.constant 0 : i32
    %c0_i32_1 = arith.constant 0 : i32
    return %c0_i32, %c0_i32_0 : i32, i32
  }
  func.func @transform_3(%arg0: i32) -> (i32, i32) {
    %c0_i32 = arith.constant 0 : i32
    %c0_i32_0 = arith.constant 0 : i32
    return %arg0, %c0_i32 : i32, i32
  }
}

module attributes {stable_mosaic.version = 11 : i64} {
  func.func @_matmul_bias_kernel(%arg0: i32, %arg1: memref<64x512xf32, #tpu.memory_space<vmem>>, %arg2: memref<512x1024xbf16, #tpu.memory_space<vmem>>, %arg3: memref<1x1024xf32, #tpu.memory_space<vmem>>, %arg4: memref<64x1024xf32, #tpu.memory_space<vmem>>) attributes {dimension_semantics = [#tpu.dimension_semantics<parallel>], iteration_bounds = array<i64: 2>, scalar_prefetch = 0 : i64, scratch_operands = 0 : i64, tpu.core_type = #tpu.core_type<tc>, window_params = [{transform_indices = @transform_0, window_bounds = array<i64: 64, 512>}, {pipeline_mode = #tpu.pipeline_mode<synchronous>, transform_indices = @transform_1, window_bounds = array<i64: 512, 1024>}, {pipeline_mode = #tpu.pipeline_mode<synchronous>, transform_indices = @transform_2, window_bounds = array<i64: 1, 1024>}, {transform_indices = @transform_3, window_bounds = array<i64: 64, 1024>}]} {
    %c0 = arith.constant 0 : index
    %c0_0 = arith.constant 0 : index
    %0 = vector.load %arg1[%c0, %c0_0] : memref<64x512xf32, #tpu.memory_space<vmem>>, vector<64x512xf32>
    %1 = arith.truncf %0 : vector<64x512xf32> to vector<64x512xbf16>
    %c0_1 = arith.constant 0 : index
    %c0_2 = arith.constant 0 : index
    %2 = vector.load %arg2[%c0_1, %c0_2] : memref<512x1024xbf16, #tpu.memory_space<vmem>>, vector<512x1024xbf16>
    %cst = arith.constant dense<0.000000e+00> : vector<64x1024xf32>
    %3 = tpu.matmul %1, %2, %cst {dimension_numbers = #tpu.dot_dimension_numbers<[1], [0], [0], [1], [0, 0, 1, 1], [], []>} : vector<64x512xbf16>, vector<512x1024xbf16>, vector<64x1024xf32> -> vector<64x1024xf32>
    %c0_3 = arith.constant 0 : index
    %c0_4 = arith.constant 0 : index
    %4 = vector.load %arg3[%c0_3, %c0_4] : memref<1x1024xf32, #tpu.memory_space<vmem>>, vector<1x1024xf32>
    %5 = vector.broadcast %4 : vector<1x1024xf32> to vector<64x1024xf32>
    %6 = arith.addf %3, %5 : vector<64x1024xf32>
    %c0_5 = arith.constant 0 : index
    %c0_6 = arith.constant 0 : index
    %7 = vector.load %arg4[%c0_5, %c0_6] : memref<64x1024xf32, #tpu.memory_space<vmem>>, vector<64x1024xf32>
    tpu.vector_store %arg4[%c0_5, %c0_6], %6 {strides = array<i32>} : memref<64x1024xf32, #tpu.memory_space<vmem>>, vector<64x1024xf32>,
    return
  }
  func.func @transform_0(%arg0: i32) -> (i32, i32) {
    %c0_i32 = arith.constant 0 : i32
    %c0_i32_0 = arith.constant 0 : i32
    return %arg0, %c0_i32 : i32, i32
  }
  func.func @transform_1(%arg0: i32) -> (i32, i32) {
    %c0_i32 = arith.constant 0 : i32
    %c0_i32_0 = arith.constant 0 : i32
    %c0_i32_1 = arith.constant 0 : i32
    return %c0_i32, %c0_i32_0 : i32, i32
  }
  func.func @transform_2(%arg0: i32) -> (i32, i32) {
    %c0_i32 = arith.constant 0 : i32
    %c0_i32_0 = arith.constant 0 : i32
    %c0_i32_1 = arith.constant 0 : i32
    return %c0_i32, %c0_i32_0 : i32, i32
  }
  func.func @transform_3(%arg0: i32) -> (i32, i32) {
    %c0_i32 = arith.constant 0 : i32
    %c0_i32_0 = arith.constant 0 : i32
    return %arg0, %c0_i32 : i32, i32
  }
}

module attributes {stable_mosaic.version = 11 : i64} {
  func.func @_matmul_bias_kernel(%arg0: i32, %arg1: memref<64x256xf32, #tpu.memory_space<vmem>>, %arg2: memref<256x1024xbf16, #tpu.memory_space<vmem>>, %arg3: memref<1x1024xf32, #tpu.memory_space<vmem>>, %arg4: memref<64x1024xf32, #tpu.memory_space<vmem>>) attributes {dimension_semantics = [#tpu.dimension_semantics<parallel>], iteration_bounds = array<i64: 2>, scalar_prefetch = 0 : i64, scratch_operands = 0 : i64, tpu.core_type = #tpu.core_type<tc>, window_params = [{transform_indices = @transform_0, window_bounds = array<i64: 64, 256>}, {pipeline_mode = #tpu.pipeline_mode<synchronous>, transform_indices = @transform_1, window_bounds = array<i64: 256, 1024>}, {pipeline_mode = #tpu.pipeline_mode<synchronous>, transform_indices = @transform_2, window_bounds = array<i64: 1, 1024>}, {transform_indices = @transform_3, window_bounds = array<i64: 64, 1024>}]} {
    %c0 = arith.constant 0 : index
    %c0_0 = arith.constant 0 : index
    %0 = vector.load %arg1[%c0, %c0_0] : memref<64x256xf32, #tpu.memory_space<vmem>>, vector<64x256xf32>
    %1 = arith.truncf %0 : vector<64x256xf32> to vector<64x256xbf16>
    %c0_1 = arith.constant 0 : index
    %c0_2 = arith.constant 0 : index
    %2 = vector.load %arg2[%c0_1, %c0_2] : memref<256x1024xbf16, #tpu.memory_space<vmem>>, vector<256x1024xbf16>
    %cst = arith.constant dense<0.000000e+00> : vector<64x1024xf32>
    %3 = tpu.matmul %1, %2, %cst {dimension_numbers = #tpu.dot_dimension_numbers<[1], [0], [0], [1], [0, 0, 1, 1], [], []>} : vector<64x256xbf16>, vector<256x1024xbf16>, vector<64x1024xf32> -> vector<64x1024xf32>
    %c0_3 = arith.constant 0 : index
    %c0_4 = arith.constant 0 : index
    %4 = vector.load %arg3[%c0_3, %c0_4] : memref<1x1024xf32, #tpu.memory_space<vmem>>, vector<1x1024xf32>
    %5 = vector.broadcast %4 : vector<1x1024xf32> to vector<64x1024xf32>
    %6 = arith.addf %3, %5 : vector<64x1024xf32>
    %c0_5 = arith.constant 0 : index
    %c0_6 = arith.constant 0 : index
    %7 = vector.load %arg4[%c0_5, %c0_6] : memref<64x1024xf32, #tpu.memory_space<vmem>>, vector<64x1024xf32>
    tpu.vector_store %arg4[%c0_5, %c0_6], %6 {strides = array<i32>} : memref<64x1024xf32, #tpu.memory_space<vmem>>, vector<64x1024xf32>,
    return
  }
  func.func @transform_0(%arg0: i32) -> (i32, i32) {
    %c0_i32 = arith.constant 0 : i32
    %c0_i32_0 = arith.constant 0 : i32
    return %arg0, %c0_i32 : i32, i32
  }
  func.func @transform_1(%arg0: i32) -> (i32, i32) {
    %c0_i32 = arith.constant 0 : i32
    %c0_i32_0 = arith.constant 0 : i32
    %c0_i32_1 = arith.constant 0 : i32
    return %c0_i32, %c0_i32_0 : i32, i32
  }
  func.func @transform_2(%arg0: i32) -> (i32, i32) {
    %c0_i32 = arith.constant 0 : i32
    %c0_i32_0 = arith.constant 0 : i32
    %c0_i32_1 = arith.constant 0 : i32
    return %c0_i32, %c0_i32_0 : i32, i32
  }
  func.func @transform_3(%arg0: i32) -> (i32, i32) {
    %c0_i32 = arith.constant 0 : i32
    %c0_i32_0 = arith.constant 0 : i32
    return %arg0, %c0_i32 : i32, i32
  }
}

module attributes {stable_mosaic.version = 11 : i64} {
  func.func @_matmul_bias_kernel(%arg0: i32, %arg1: memref<16x256xf32, #tpu.memory_space<vmem>>, %arg2: memref<256x256xbf16, #tpu.memory_space<vmem>>, %arg3: memref<1x256xf32, #tpu.memory_space<vmem>>, %arg4: memref<16x256xf32, #tpu.memory_space<vmem>>) attributes {dimension_semantics = [#tpu.dimension_semantics<parallel>], iteration_bounds = array<i64: 2>, scalar_prefetch = 0 : i64, scratch_operands = 0 : i64, tpu.core_type = #tpu.core_type<tc>, window_params = [{transform_indices = @transform_0, window_bounds = array<i64: 16, 256>}, {pipeline_mode = #tpu.pipeline_mode<synchronous>, transform_indices = @transform_1, window_bounds = array<i64: 256, 256>}, {pipeline_mode = #tpu.pipeline_mode<synchronous>, transform_indices = @transform_2, window_bounds = array<i64: 1, 256>}, {transform_indices = @transform_3, window_bounds = array<i64: 16, 256>}]} {
    %c0 = arith.constant 0 : index
    %c0_0 = arith.constant 0 : index
    %0 = vector.load %arg1[%c0, %c0_0] : memref<16x256xf32, #tpu.memory_space<vmem>>, vector<16x256xf32>
    %1 = arith.truncf %0 : vector<16x256xf32> to vector<16x256xbf16>
    %c0_1 = arith.constant 0 : index
    %c0_2 = arith.constant 0 : index
    %2 = vector.load %arg2[%c0_1, %c0_2] : memref<256x256xbf16, #tpu.memory_space<vmem>>, vector<256x256xbf16>
    %cst = arith.constant dense<0.000000e+00> : vector<16x256xf32>
    %3 = tpu.matmul %1, %2, %cst {dimension_numbers = #tpu.dot_dimension_numbers<[1], [0], [0], [1], [0, 0, 1, 1], [], []>} : vector<16x256xbf16>, vector<256x256xbf16>, vector<16x256xf32> -> vector<16x256xf32>
    %c0_3 = arith.constant 0 : index
    %c0_4 = arith.constant 0 : index
    %4 = vector.load %arg3[%c0_3, %c0_4] : memref<1x256xf32, #tpu.memory_space<vmem>>, vector<1x256xf32>
    %5 = vector.broadcast %4 : vector<1x256xf32> to vector<16x256xf32>
    %6 = arith.addf %3, %5 : vector<16x256xf32>
    %c0_5 = arith.constant 0 : index
    %c0_6 = arith.constant 0 : index
    %7 = vector.load %arg4[%c0_5, %c0_6] : memref<16x256xf32, #tpu.memory_space<vmem>>, vector<16x256xf32>
    tpu.vector_store %arg4[%c0_5, %c0_6], %6 {strides = array<i32>} : memref<16x256xf32, #tpu.memory_space<vmem>>, vector<16x256xf32>,
    return
  }
  func.func @transform_0(%arg0: i32) -> (i32, i32) {
    %c0_i32 = arith.constant 0 : i32
    %c0_i32_0 = arith.constant 0 : i32
    return %arg0, %c0_i32 : i32, i32
  }
  func.func @transform_1(%arg0: i32) -> (i32, i32) {
    %c0_i32 = arith.constant 0 : i32
    %c0_i32_0 = arith.constant 0 : i32
    %c0_i32_1 = arith.constant 0 : i32
    return %c0_i32, %c0_i32_0 : i32, i32
  }
  func.func @transform_2(%arg0: i32) -> (i32, i32) {
    %c0_i32 = arith.constant 0 : i32
    %c0_i32_0 = arith.constant 0 : i32
    %c0_i32_1 = arith.constant 0 : i32
    return %c0_i32, %c0_i32_0 : i32, i32
  }
  func.func @transform_3(%arg0: i32) -> (i32, i32) {
    %c0_i32 = arith.constant 0 : i32
    %c0_i32_0 = arith.constant 0 : i32
    return %arg0, %c0_i32 : i32, i32
  }
}

</mosaic_0001>

<bundles_post_ra>
// kernel: pat_block_forward.11
= control target key start
LH: loop header
LB: loop body
LE: loop exit
PB: predicated region body
PF: predicated region fallthrough
CT: control target
= control target key end

     0   :  { %s4427_s12 = smov 0   ;;  %s5945_s0 = inlined_call_operand.vmem [shape: f32[2,10,10,256], index: 0, kind: input, shape index: {}]   ;;  %s5946_s1 = inlined_call_operand.vmem [shape: bf16[9,256,256], index: 1, kind: input, shape index: {}]   ;;  %s5947_s2 = inlined_call_operand.vmem [shape: f32[1,256], index: 2, kind: input, shape index: {}]   ;;  %s5948_s3 = inlined_call_operand.vmem [shape: f32[2,64,256], index: 3, kind: output, shape index: {}]  }
   0x1 LB: > { %s3212_s13 = sadd.s32 4294967295, %s4405_s12   ;;  %p3216_p0 = scmp.ge.s32.totalorder %s4405_s12, 1  ;;  %s4405_s12 = sphi %s4427_s12, %s13_s12  }
   0x2   : > { %p137_p1 = scmp.lt.s32.totalorder %s4405_s12, 3 }
   0x4   : > { %p138_p2 = pnand %p3216_p0, %p137_p1 }
   0x6   : > { %141 = sbr.rel (%p138_p2) target bundleno = 640 (0x280), region = 32 }
   0xd   : > { %v3952_v0 = vld [vmem:[%s5946_s1 + $0x4] ss:$8 sps:$4 sm:$0xff]   ;;  %v3956_v2 = vld [vmem:[%s5946_s1] ss:$8 sps:$4 sm:$0xff]   ;;  %v3958_v4 = vld [vmem:[%s5946_s1 + $0x14] ss:$8 sps:$4 sm:$0xff]  }
   0xe   : > { %v3954_v1 = vld [vmem:[%s5946_s1 + $0x404] ss:$8 sps:$4 sm:$0xff]   ;;  %423 = vmatprep.subr.bf16.mxu1 %v3952_v0  ;;  %v3957_v3 = vld [vmem:[%s5946_s1 + $0x400] ss:$8 sps:$4 sm:$0xff]   ;;  %v3960_v5 = vld [vmem:[%s5946_s1 + $0x414] ss:$8 sps:$4 sm:$0xff]  }
   0xf   : > { %1757 = vmatprep.subr.bf16.mxu0 %v3954_v1  ;;  %424 = vmatpush1.bf16.msra.mxu1 %v3956_v2  ;;  %v3962_v6 = vld [vmem:[%s5946_s1 + $0x10] ss:$8 sps:$4 sm:$0xff]   ;;  %v3964_v8 = vld [vmem:[%s5946_s1 + $0x24] ss:$8 sps:$4 sm:$0xff]   ;;  %v3968_v10 = vld [vmem:[%s5946_s1 + $0x20] ss:$8 sps:$4 sm:$0xff]  }
  0x10   : > { %1758 = vmatpush1.bf16.msra.mxu0 %v3957_v3  ;;  %425 = vmatprep.subr.bf16.mxu1 %v3958_v4  ;;  %v3963_v7 = vld [vmem:[%s5946_s1 + $0x410] ss:$8 sps:$4 sm:$0xff]   ;;  %v3966_v9 = vld [vmem:[%s5946_s1 + $0x424] ss:$8 sps:$4 sm:$0xff]   ;;  %v3969_v11 = vld [vmem:[%s5946_s1 + $0x420] ss:$8 sps:$4 sm:$0xff]  }
  0x11   : > { %1759 = vmatprep.subr.bf16.mxu0 %v3960_v5  ;;  %v3970_v12 = vld [vmem:[%s5946_s1 + $0x34] ss:$8 sps:$4 sm:$0xff]   ;;  %v3974_v14 = vld [vmem:[%s5946_s1 + $0x30] ss:$8 sps:$4 sm:$0xff]   ;;  %v3976_v16 = vld [vmem:[%s5946_s1 + $0x44] ss:$8 sps:$4 sm:$0xff]  }
  0x12   : > { %v3972_v13 = vld [vmem:[%s5946_s1 + $0x434] ss:$8 sps:$4 sm:$0xff]   ;;  %v3975_v15 = vld [vmem:[%s5946_s1 + $0x430] ss:$8 sps:$4 sm:$0xff]   ;;  %v3978_v17 = vld [vmem:[%s5946_s1 + $0x444] ss:$8 sps:$4 sm:$0xff]  }
  0x13   : > { %426 = vmatpush1.bf16.msra.mxu1 %v3962_v6  ;;  %v3980_v18 = vld [vmem:[%s5946_s1 + $0x40] ss:$8 sps:$4 sm:$0xff]   ;;  %v3982_v20 = vld [vmem:[%s5946_s1 + $0x54] ss:$8 sps:$4 sm:$0xff]   ;;  %v3986_v22 = vld [vmem:[%s5946_s1 + $0x50] ss:$8 sps:$4 sm:$0xff]  }
  0x14   : > { %1760 = vmatpush1.bf16.msra.mxu0 %v3963_v7  ;;  %427 = vmatprep.subr.bf16.mxu1 %v3964_v8  ;;  %v3981_v19 = vld [vmem:[%s5946_s1 + $0x440] ss:$8 sps:$4 sm:$0xff]   ;;  %v3984_v21 = vld [vmem:[%s5946_s1 + $0x454] ss:$8 sps:$4 sm:$0xff]   ;;  %v3987_v23 = vld [vmem:[%s5946_s1 + $0x450] ss:$8 sps:$4 sm:$0xff]  }
  0x15   : > { %1761 = vmatprep.subr.bf16.mxu0 %v3966_v9  ;;  %v3988_v24 = vld [vmem:[%s5946_s1 + $0x64] ss:$8 sps:$4 sm:$0xff]   ;;  %v3992_v26 = vld [vmem:[%s5946_s1 + $0x60] ss:$8 sps:$4 sm:$0xff]   ;;  %v3994_v28 = vld [vmem:[%s5946_s1 + $0x74] ss:$8 sps:$4 sm:$0xff]  }
  0x16   : > { %v3990_v25 = vld [vmem:[%s5946_s1 + $0x464] ss:$8 sps:$4 sm:$0xff]   ;;  %v3993_v27 = vld [vmem:[%s5946_s1 + $0x460] ss:$8 sps:$4 sm:$0xff]   ;;  %v3996_v29 = vld [vmem:[%s5946_s1 + $0x474] ss:$8 sps:$4 sm:$0xff]  }
  0x17   : > { %428 = vmatpush1.bf16.msra.mxu1 %v3968_v10  ;;  %v3998_v30 = vld [vmem:[%s5946_s1 + $0x70] ss:$8 sps:$4 sm:$0xff]   ;;  %v4000_v32 = vld [vmem:[%s5946_s1 + $0x84] ss:$8 sps:$4 sm:$0xff]   ;;  %p161_p3 = scmp.lt.s32.totalorder %s3212_s13, 1  ;;  %vm544_vm0 = vcmask 1046528  }
  0x18   : > { %1762 = vmatpush1.bf16.msra.mxu0 %v3969_v11  ;;  %429 = vmatprep.subr.bf16.mxu1 %v3970_v12  ;;  %v3999_v31 = vld [vmem:[%s5946_s1 + $0x470] ss:$8 sps:$4 sm:$0xff]   ;;  %v4002_v33 = vld [vmem:[%s5946_s1 + $0x484] ss:$8 sps:$4 sm:$0xff]   ;;  %v4004_v34 = vld [vmem:[%s5946_s1 + $0x80] ss:$8 sps:$4 sm:$0xff]  }
  0x19   : > { %1763 = vmatprep.subr.bf16.mxu0 %v3972_v13  ;;  %v4005_v35 = vld [vmem:[%s5946_s1 + $0x480] ss:$8 sps:$4 sm:$0xff]   ;;  %v4006_v36 = vld [vmem:[%s5946_s1 + $0x94] ss:$8 sps:$4 sm:$0xff]   ;;  %s5967_s13 = smov (!%p161_p3, %s3212_s13), 1  ;;  %vm899_vm1 = vcmask 1045504  }
  0x1a   : > { %v4008_v37 = vld [vmem:[%s5946_s1 + $0x494] ss:$8 sps:$4 sm:$0xff]   ;;  %v4010_v38 = vld [vmem:[%s5946_s1 + $0x90] ss:$8 sps:$4 sm:$0xff]   ;;  %v4012_v40 = vld [vmem:[%s5946_s1 + $0xa4] ss:$8 sps:$4 sm:$0xff]  }
  0x1b   : > { %430 = vmatpush1.bf16.msra.mxu1 %v3974_v14  ;;  %v4011_v39 = vld [vmem:[%s5946_s1 + $0x490] ss:$8 sps:$4 sm:$0xff]   ;;  %s3943_s21 = smul.u32 320, %s5967_s13  ;;  %v4014_v41 = vld [vmem:[%s5946_s1 + $0x4a4] ss:$8 sps:$4 sm:$0xff]   ;;  %s3766_s14 = sshll.u32 %s5967_s13, 7 }
  0x1c   : > { %1764 = vmatpush1.bf16.msra.mxu0 %v3975_v15  ;;  %431 = vmatprep.subr.bf16.mxu1 %v3976_v16  ;;  %v4016_v42 = vld [vmem:[%s5946_s1 + $0xa0] ss:$8 sps:$4 sm:$0xff]   ;;  %v4018_v44 = vld [vmem:[%s5946_s1 + $0xb4] ss:$8 sps:$4 sm:$0xff]   ;;  %v4022_v46 = vld [vmem:[%s5946_s1 + $0xb0] ss:$8 sps:$4 sm:$0xff]   ;;  %s5912_s17 = scalar_lea.vmem %s5948_s3, %s3766_s14 }
  0x1d   : > { %1765 = vmatprep.subr.bf16.mxu0 %v3978_v17  ;;  %v4017_v43 = vld [vmem:[%s5946_s1 + $0x4a0] ss:$8 sps:$4 sm:$0xff]   ;;  %s4580_s5 = scalar_lea.vmem %s5945_s0, %s3943_s21  ;;  %v4020_v45 = vld [vmem:[%s5946_s1 + $0x4b4] ss:$8 sps:$4 sm:$0xff]   ;;  %v4023_v49 = vld [vmem:[%s5946_s1 + $0x4b0] ss:$8 sps:$4 sm:$0xff]  }
  0x1e   : > { %v4589_v47 = vld [vmem:[%s4580_s5 + $0x8] sm:$0xff]  ;;  %v4609_v54 = vld [vmem:[%s4580_s5 + $0x38] sm:$0x3]  ;;  %v4030_v63 = vld [vmem:[%s5946_s1 + $0xd4] ss:$8 sps:$4 sm:$0xff]  }
  0x1f   : > { %432 = vmatpush1.bf16.msra.mxu1 %v3980_v18  ;;  %v4592_v48 = vld [vmem:[%s4580_s5 + $0x28] sm:$0xff]  ;;  %v4612_v55 = vld [vmem:[%s4580_s5 + $0x58] sm:$0x3]  ;;  %v555_v57 = vrot.slane %v4609_v54, 1  ;;  %v4032_v0 = vld [vmem:[%s5946_s1 + $0x4d4] ss:$8 sps:$4 sm:$0xff]  }
  0x20   : > { %1766 = vmatpush1.bf16.msra.mxu0 %v3981_v19  ;;  %433 = vmatprep.subr.bf16.mxu1 %v3982_v20  ;;  %v4024_v50 = vld [vmem:[%s5946_s1 + $0xc4] ss:$8 sps:$4 sm:$0xff]   ;;  %v224_v51 = vpack.c.bf16 %v4592_v48, %v4589_v47  ;;  %v554_v56 = vrot.slane %v4592_v48, 1  ;;  %v561_v59 = vrot.slane %v4612_v55, 1  ;;  %v4028_v60 = vld [vmem:[%s5946_s1 + $0xc0] ss:$8 sps:$4 sm:$0xff]  }
  0x21   : > { %1767 = vmatprep.subr.bf16.mxu0 %v3984_v21  ;;  %v4603_v52 = vld [vmem:[%s4580_s5 + $0x48] sm:$0xff]  ;;  %v4034_v2 = vld [vmem:[%s5946_s1 + $0xd0] ss:$8 sps:$4 sm:$0xff]   ;;  %v175_v6 = vld [vmem:[%s4580_s5 + $0x20] sm:$0xff] }
  0x22   : > { %v4026_v53 = vld [vmem:[%s5946_s1 + $0x4c4] ss:$8 sps:$4 sm:$0xff]   ;;  %455 = vmatprep.mubr.bf16.mxu1 %v224_v51  ;;  %v560_v58 = vrot.slane %v4603_v52, 1  ;;  %v4029_v61 = vld [vmem:[%s5946_s1 + $0x4c0] ss:$8 sps:$4 sm:$0xff]   ;;  %v4625_v62 = vsel %vm544_vm0, %v554_v56, %v555_v57  ;;  %v906_v8 = vrot.slane %v175_v6, 2 }
  0x23   : > { %434 = vmatpush1.bf16.msra.mxu1 %v3986_v22  ;;  %v4035_v3 = vld [vmem:[%s5946_s1 + $0x4d0] ss:$8 sps:$4 sm:$0xff]   ;;  %v4036_v5 = vld [vmem:[%s5946_s1 + $0xe4] ss:$8 sps:$4 sm:$0xff]   ;;  %v4040_v13 = vld [vmem:[%s5946_s1 + $0xe0] ss:$8 sps:$4 sm:$0xff]  }
  0x24   : > { %1768 = vmatpush1.bf16.msra.mxu0 %v3987_v23  ;;  %435 = vmatprep.subr.bf16.mxu1 %v3988_v24  ;;  %v4634_v1 = vsel %vm544_vm0, %v560_v58, %v561_v59  ;;  %v4038_v7 = vld [vmem:[%s5946_s1 + $0x4e4] ss:$8 sps:$4 sm:$0xff]   ;;  %v177_v9 = vld [vmem:[%s4580_s5 + $0x30] sm:$0x3]  ;;  %v4041_v14 = vld [vmem:[%s5946_s1 + $0x4e0] ss:$8 sps:$4 sm:$0xff]  }
  0x25   : > { %1769 = vmatprep.subr.bf16.mxu0 %v3990_v25  ;;  %v1557_v4 = vpack.c.bf16 %v4634_v1, %v4625_v62  ;;  %v4653_v10 = vld [vmem:[%s4580_s5 + $0x40] sm:$0xff]  ;;  %v181_v11 = vld [vmem:[%s4580_s5 + $0x50] sm:$0x3]  ;;  %v907_v12 = vrot.slane %v177_v9, 2  ;;  %v4042_v16 = vld [vmem:[%s5946_s1 + $0xf4] ss:$8 sps:$4 sm:$0xff]  }
  0x26   : > { %v913_v15 = vrot.slane %v181_v11, 2  ;;  %v551_v17 = vrot.slane %v175_v6, 1  ;;  %v552_v18 = vrot.slane %v177_v9, 1  ;;  %v557_v19 = vrot.slane %v4653_v10, 1  ;;  %v4044_v23 = vld [vmem:[%s5946_s1 + $0x4f4] ss:$8 sps:$4 sm:$0xff]  }
  0x27   : > { %436 = vmatpush1.bf16.msra.mxu1 %v3992_v26  ;;  %1789 = vmatprep.mubr.bf16.mxu0 %v1557_v4  ;;  %v558_v20 = vrot.slane %v181_v11, 1  ;;  %v4667_v21 = vsel %vm899_vm1, %v906_v8, %v907_v12  ;;  %v912_v22 = vrot.slane %v4653_v10, 2  ;;  %v4046_v24 = vld [vmem:[%s5946_s1 + $0xf0] ss:$8 sps:$4 sm:$0xff]   ;;  %v4065_v51 = vld [vmem:[%s5946_s1 + $0x524] ss:$8 sps:$4 sm:$0xff]  }
  0x28   : > { %1770 = vmatpush1.bf16.msra.mxu0 %v3993_v27  ;;  %437 = vmatprep.subr.bf16.mxu1 %v3994_v28  ;;  %v4047_v25 = vld [vmem:[%s5946_s1 + $0x4f0] ss:$8 sps:$4 sm:$0xff]   ;;  %v4050_v27 = vld [vmem:[%s5946_s1 + $0x104] ss:$8 sps:$4 sm:$0xff]   ;;  %v4060_v56 = vld [vmem:[%s5946_s1 + $0x120] ss:$8 sps:$4 sm:$0xff]  }
  0x29   : > { %1771 = vmatprep.subr.bf16.mxu0 %v3996_v29  ;;  %v4680_v26 = vsel %vm899_vm1, %v912_v22, %v913_v15  ;;  %v4686_v28 = vld [vmem:[%s4580_s5] sm:$0xff]  ;;  %v4068_v58 = vld [vmem:[%s5946_s1 + $0x134] ss:$8 sps:$4 sm:$0xff]   ;;  %v4774_v4 = vld [vmem:[%s4580_s5 + $0x88] sm:$0xff] }
  0x2a   : > { %v4063_v57 = vld [vmem:[%s5946_s1 + $0x520] ss:$8 sps:$4 sm:$0xff]   ;;  %v4071_v59 = vld [vmem:[%s5946_s1 + $0x534] ss:$8 sps:$4 sm:$0xff]   ;;  %v572_v9 = vrot.slane %v4774_v4, 1 }
  0x2b   : > { %438 = vmatpush1.bf16.msra.mxu1 %v3998_v30  ;;  %v4691_v30 = vld [vmem:[%s4580_s5 + $0x10] sm:$0x3]  ;;  %v4075_v8 = vld [vmem:[%s5946_s1 + $0x540] ss:$8 sps:$4 sm:$0xff]   ;;  %v4080_v12 = vld [vmem:[%s5946_s1 + $0x154] ss:$8 sps:$4 sm:$0xff]  }
  0x2c   : > { %1772 = vmatpush1.bf16.msra.mxu0 %v3999_v31  ;;  %439 = vmatprep.subr.bf16.mxu1 %v4000_v32  ;;  %v4694_v31 = vsel %vm544_vm0, %v551_v17, %v552_v18  ;;  %v4697_v32 = vsel %vm544_vm0, %v557_v19, %v558_v20  ;;  %v4807_v17 = vld [vmem:[%s4580_s5 + $0x80] sm:$0xff]  ;;  %v4810_v18 = vld [vmem:[%s4580_s5 + $0x90] sm:$0x3]  ;;  %v4083_v22 = vld [vmem:[%s5946_s1 + $0x554] ss:$8 sps:$4 sm:$0xff]  }
  0x2d   : > { %1773 = vmatprep.subr.bf16.mxu0 %v4002_v33  ;;  %v4053_v33 = vld [vmem:[%s5946_s1 + $0x504] ss:$8 sps:$4 sm:$0xff]  }
  0x2f   : > { %440 = vmatpush1.bf16.msra.mxu1 %v4004_v34  ;;  %v900_v34 = vrot.slane %v4686_v28, 2 }
  0x30   : > { %1774 = vmatpush1.bf16.msra.mxu0 %v4005_v35  ;;  %441 = vmatprep.subr.bf16.mxu1 %v4006_v36  ;;  %v901_v35 = vrot.slane %v4691_v30, 2  ;;  %v4048_v36 = vld [vmem:[%s5946_s1 + $0x100] ss:$8 sps:$4 sm:$0xff]  }
  0x31   : > { %1775 = vmatprep.subr.bf16.mxu0 %v4008_v37  ;;  %v4708_v37 = vld [vmem:[%s4580_s5 + $0x68] sm:$0xff] }
  0x33   : > { %442 = vmatpush1.bf16.msra.mxu1 %v4010_v38  ;;  %v4051_v38 = vld [vmem:[%s5946_s1 + $0x500] ss:$8 sps:$4 sm:$0xff]  }
  0x34   : > { %1776 = vmatpush1.bf16.msra.mxu0 %v4011_v39  ;;  %443 = vmatprep.subr.bf16.mxu1 %v4012_v40  ;;  %v223_v39 = vpack.c.bf16 %v175_v6, %v4686_v28  ;;  %v1556_v40 = vpack.c.bf16 %v4697_v32, %v4694_v31 }
  0x35   : > { %1777 = vmatprep.subr.bf16.mxu0 %v4014_v41  ;;  %v4056_v41 = vld [vmem:[%s5946_s1 + $0x114] ss:$8 sps:$4 sm:$0xff]  }
  0x37   : > { %444 = vmatpush1.bf16.msra.mxu1 %v4016_v42  ;;  %v4059_v42 = vld [vmem:[%s5946_s1 + $0x514] ss:$8 sps:$4 sm:$0xff]  }
  0x38   : > { %1778 = vmatpush1.bf16.msra.mxu0 %v4017_v43  ;;  %445 = vmatprep.subr.bf16.mxu1 %v4018_v44  ;;  %v4723_v43 = vsel %vm899_vm1, %v900_v34, %v901_v35  ;;  %v4727_v44 = vpack.c.bf16 %v4708_v37, %v4603_v52  ;;  %v548_v34 = vrot.slane %v4589_v47, 1  ;;  %v4081_v35 = vld [vmem:[%s5946_s1 + $0x550] ss:$8 sps:$4 sm:$0xff]   ;;  %v4089_v47 = vld [vmem:[%s5946_s1 + $0x564] ss:$8 sps:$4 sm:$0xff]  }
  0x39   : > { %1779 = vmatprep.subr.bf16.mxu0 %v4020_v45  ;;  %5954 = vst [vmem:[#allocation2_spill] sm:$0xff] %v4723_v43  ;;  %v4973_v45 = vld [vmem:[%s4580_s5 + $0xf0] sm:$0x3] }
  0x3a   : > { %v588_v43 = vrot.slane %v4973_v45, 1 }
  0x3b   : > { %446 = vmatpush1.bf16.msra.mxu1 %v4022_v46  ;;  %v4054_v46 = vld [vmem:[%s5946_s1 + $0x110] ss:$8 sps:$4 sm:$0xff]  }
  0x3c   : > { %1780 = vmatpush1.bf16.msra.mxu0 %v4023_v49  ;;  %447 = vmatprep.subr.bf16.mxu1 %v4024_v50  ;;  %v4057_v49 = vld [vmem:[%s5946_s1 + $0x510] ss:$8 sps:$4 sm:$0xff]   ;;  %v4062_v50 = vld [vmem:[%s5946_s1 + $0x124] ss:$8 sps:$4 sm:$0xff]  }
  0x3d   : > { %1781 = vmatprep.subr.bf16.mxu0 %v4026_v53  ;;  %v4744_v53 = vld [vmem:[%s4580_s5 + $0x78] sm:$0x3] }
  0x3f   : > { %448 = vmatpush1.bf16.msra.mxu1 %v4028_v60  ;;  %v566_v60 = vrot.slane %v4708_v37, 1 }
  0x40   : > { %1782 = vmatpush1.bf16.msra.mxu0 %v4029_v61  ;;  %449 = vmatprep.subr.bf16.mxu1 %v4030_v63  ;;  %v567_v61 = vrot.slane %v4744_v53, 1  ;;  %v4066_v63 = vld [vmem:[%s5946_s1 + $0x130] ss:$8 sps:$4 sm:$0xff]  }
  0x41   : > { %1783 = vmatprep.subr.bf16.mxu0 %v4032_v0  ;;  %v4069_v0 = vld [vmem:[%s5946_s1 + $0x530] ss:$8 sps:$4 sm:$0xff]  }
  0x42   : > { %v4780_v6 = vsel %vm544_vm0, %v566_v60, %v567_v61  ;;  %v4872_v60 = vld [vmem:[%s4580_s5 + $0xa0] sm:$0xff] }
  0x43   : > { %450 = vmatpush1.bf16.msra.mxu1 %v4034_v2  ;;  %v4074_v2 = vld [vmem:[%s5946_s1 + $0x144] ss:$8 sps:$4 sm:$0xff]   ;;  %v4087_v61 = vld [vmem:[%s5946_s1 + $0x560] ss:$8 sps:$4 sm:$0xff]  }
  0x44   : > { %1784 = vmatpush1.bf16.msra.mxu0 %v4035_v3  ;;  %451 = vmatprep.subr.bf16.mxu1 %v4036_v5  ;;  %v4077_v3 = vld [vmem:[%s5946_s1 + $0x544] ss:$8 sps:$4 sm:$0xff]   ;;  %v4777_v5 = vld [vmem:[%s4580_s5 + $0x98] sm:$0x3] }
  0x45   : > { %1785 = vmatprep.subr.bf16.mxu0 %v4038_v7  ;;  %v4072_v7 = vld [vmem:[%s5946_s1 + $0x140] ss:$8 sps:$4 sm:$0xff]   ;;  %v573_v11 = vrot.slane %v4777_v5, 1 }
  0x47   : > { %452 = vmatpush1.bf16.msra.mxu1 %v4040_v13  ;;  %v4794_v13 = vld [vmem:[%s4580_s5 + $0x60] sm:$0xff]  ;;  %v4800_v15 = vsel %vm544_vm0, %v572_v9, %v573_v11  ;;  %v4897_v9 = vld [vmem:[%s4580_s5 + $0xd0] sm:$0x3]  ;;  %v575_v11 = vrot.slane %v4872_v60, 1 }
  0x48   : > { %1786 = vmatpush1.bf16.msra.mxu0 %v4041_v14  ;;  %453 = vmatprep.subr.bf16.mxu1 %v4042_v16  ;;  %v4797_v14 = vld [vmem:[%s4580_s5 + $0x70] sm:$0x3]  ;;  %v4804_v16 = vpack.c.bf16 %v4794_v13, %v4653_v10  ;;  %v563_v19 = vrot.slane %v4794_v13, 1  ;;  %v569_v10 = vrot.slane %v4807_v17, 1 }
  0x49   : > { %1787 = vmatprep.subr.bf16.mxu0 %v4044_v23  ;;  %v564_v20 = vrot.slane %v4797_v14, 1  ;;  %v1559_v23 = vpack.c.bf16 %v4800_v15, %v4780_v6 }
  0x4a   : > { %5955 = vst [vmem:[#allocation3_spill] sm:$0xff] %v4804_v16 }
  0x4b   : > { %454 = vmatpush1.bf16.msra.mxu1 %v4046_v24  ;;  %v570_v24 = vrot.slane %v4810_v18, 1 }
  0x4c   : > { %1788 = vmatpush1.bf16.msra.mxu0 %v4047_v25  ;;  %810 = vmatprep.subr.bf16.mxu1 %v4050_v27  ;;  %v4822_v25 = vld [vmem:[%s4580_s5 + $0x18] sm:$0x3] }
  0x4d   : > { %2055 = vmatprep.subr.bf16.mxu0 %v4053_v33  ;;  %v4078_v27 = vld [vmem:[%s5946_s1 + $0x150] ss:$8 sps:$4 sm:$0xff]   ;;  %v4829_v33 = vsel %vm544_vm0, %v563_v19, %v564_v20  ;;  %v4095_v19 = vld [vmem:[%s5946_s1 + $0x574] ss:$8 sps:$4 sm:$0xff]  }
  0x4e   : > { %456 = vmatmul.mubr.bf16.vlgmr.msra.gmra.mrb[0].mxu1 %v223_v39  ;;  %v4086_v39 = vld [vmem:[%s5946_s1 + $0x164] ss:$8 sps:$4 sm:$0xff]  }
  0x4f   : > { %1790 = vmatmul.mubr.bf16.vlgmr.msra.gmra.mrb[0].mxu0 %v1556_v40  ;;  %811 = vmatpush1.bf16.msra.mxu1 %v4048_v36  ;;  %v4836_v36 = vsel %vm544_vm0, %v569_v10, %v570_v24  ;;  %v909_v10 = vrot.slane %v4592_v48, 2  ;;  %v910_v24 = vrot.slane %v4609_v54, 2  ;;  %v4925_v54 = vld [vmem:[%s4580_s5 + $0xe8] sm:$0xff] }
  0x50   : > { %2056 = vmatpush1.bf16.msra.mxu0 %v4051_v38  ;;  %812 = vmatprep.subr.bf16.mxu1 %v4056_v41  ;;  %v4839_v38 = vld [vmem:[%s4580_s5 + $0xa8] sm:$0xff]  ;;  %v1558_v40 = vpack.c.bf16 %v4836_v36, %v4829_v33 }
  0x51   : > { %2057 = vmatprep.subr.bf16.mxu0 %v4059_v42  ;;  %465 = vmatprep.mubr.bf16.mxu1 %v4727_v44  ;;  %v4851_v41 = vpack.c.bf16 %v4839_v38, %v4774_v4  ;;  %v578_v42 = vrot.slane %v4839_v38, 1  ;;  %v4976_v29 = vsel %vm899_vm1, %v909_v10, %v910_v24  ;;  %v4107_v10 = vld [vmem:[%s5946_s1 + $0x594] ss:$8 sps:$4 sm:$0xff]  }
  0x52   : > { %1799 = vmatprep.mubr.bf16.mxu0 %v1559_v23  ;;  %v582_v23 = vrot.slane %v4897_v9, 1 }
  0x53   : > { %813 = vmatpush1.bf16.msra.mxu1 %v4054_v46  ;;  %5956 = vst [vmem:[#allocation4_spill] sm:$0xff] %v4851_v41  ;;  %v549_v46 = vrot.slane %v4822_v25, 1 }
  0x54   : > { %2058 = vmatpush1.bf16.msra.mxu0 %v4057_v49  ;;  %814 = vmatprep.subr.bf16.mxu1 %v4062_v50  ;;  %v4856_v49 = vld [vmem:[%s4580_s5 + $0xb8] sm:$0x3]  ;;  %v4859_v50 = vld [vmem:[%s4580_s5 + $0xc8] sm:$0xff] }
  0x55   : > { %2059 = vmatprep.subr.bf16.mxu0 %v4065_v51  ;;  %v4862_v51 = vld [vmem:[%s4580_s5 + $0xd8] sm:$0x3] }
  0x56   : > { %466 = vmatmul.mubr.bf16.gmra.mrb[4].mxu1 %v4804_v16 }
  0x57   : > { %815 = vmatpush1.bf16.msra.mxu1 %v4060_v56  ;;  %v4084_v56 = vld [vmem:[%s5946_s1 + $0x160] ss:$8 sps:$4 sm:$0xff]   ;;  %1800 = vmatmul.mubr.bf16.gmra.mrb[4].mxu0 %v1558_v40  ;;  %v915_v40 = vrot.slane %v4603_v52, 2  ;;  %v590_v52 = vrot.slane %v4925_v54, 1 }
  0x58   : > { %2060 = vmatpush1.bf16.msra.mxu0 %v4063_v57  ;;  %816 = vmatprep.subr.bf16.mxu1 %v4068_v58  ;;  %v579_v57 = vrot.slane %v4856_v49, 1  ;;  %v584_v58 = vrot.slane %v4859_v50, 1 }
  0x59   : > { %2061 = vmatprep.subr.bf16.mxu0 %v4071_v59  ;;  %475 = vmatprep.mubr.bf16.mxu1 %v4851_v41  ;;  %v585_v59 = vrot.slane %v4862_v51, 1  ;;  %v4989_v41 = vld [vmem:[%s4580_s5 + $0x110] sm:$0x3] }
  0x5b   : > { %817 = vmatpush1.bf16.msra.mxu1 %v4066_v63  ;;  %v4092_v63 = vld [vmem:[%s5946_s1 + $0x174] ss:$8 sps:$4 sm:$0xff]  }
  0x5c   : > { %2062 = vmatpush1.bf16.msra.mxu0 %v4069_v0  ;;  %818 = vmatprep.subr.bf16.mxu1 %v4074_v2  ;;  %v4882_v0 = vpack.c.bf16 %v4872_v60, %v4807_v17  ;;  %v4885_v2 = vld [vmem:[%s4580_s5 + $0xb0] sm:$0x3] }
  0x5d   : > { %2063 = vmatprep.subr.bf16.mxu0 %v4077_v3  ;;  %v4888_v3 = vsel %vm544_vm0, %v578_v42, %v579_v57  ;;  %v550_v42 = vsel %vm544_vm0, %v548_v34, %v549_v46  ;;  %v4101_v57 = vld [vmem:[%s5946_s1 + $0x584] ss:$8 sps:$4 sm:$0xff]   ;;  %v4943_v34 = vld [vmem:[%s4580_s5 + $0xf8] sm:$0x3] }
  0x5e   : > { %5957 = vst [vmem:[#allocation5_spill] sm:$0xff] %v4882_v0  ;;  %476 = vmatmul.mubr.bf16.gmra.mrb[8].mxu1 %v4882_v0  ;;  %v4946_v46 = vld [vmem:[%s4580_s5 + $0x108] sm:$0xff]  ;;  %v4986_v0 = vld [vmem:[%s4580_s5 + $0x100] sm:$0xff] }
  0x5f   : > { %819 = vmatpush1.bf16.msra.mxu1 %v4072_v7  ;;  %v4891_v7 = vsel %vm544_vm0, %v584_v58, %v585_v59  ;;  %v4939_v59 = vpack.c.bf16 %v4925_v54, %v4859_v50 }
  0x60   : > { %2064 = vmatpush1.bf16.msra.mxu0 %v4075_v8  ;;  %820 = vmatprep.subr.bf16.mxu1 %v4080_v12  ;;  %v4894_v8 = vld [vmem:[%s4580_s5 + $0xc0] sm:$0xff]  ;;  %v576_v12 = vrot.slane %v4885_v2, 1  ;;  %v1561_v20 = vpack.c.bf16 %v4891_v7, %v4888_v3 }
  0x61   : > { %2065 = vmatprep.subr.bf16.mxu0 %v4083_v22  ;;  %v581_v22 = vrot.slane %v4894_v8, 1  ;;  %5958 = vst [vmem:[#allocation6_spill] sm:$0xff] %v4939_v59  ;;  %485 = vmatprep.mubr.bf16.mxu1 %v4939_v59 }
  0x62   : > { %1809 = vmatprep.mubr.bf16.mxu0 %v1561_v20  ;;  %v610_v20 = vpack.c.bf16 %v4625_v62, %v550_v42 }
  0x63   : > { %821 = vmatpush1.bf16.msra.mxu1 %v4078_v27  ;;  %v4090_v27 = vld [vmem:[%s5946_s1 + $0x170] ss:$8 sps:$4 sm:$0xff]   ;;  %v4922_v48 = vsel %vm544_vm0, %v581_v22, %v582_v23  ;;  %v4099_v22 = vld [vmem:[%s5946_s1 + $0x580] ss:$8 sps:$4 sm:$0xff]   ;;  %v4104_v23 = vld [vmem:[%s5946_s1 + $0x194] ss:$8 sps:$4 sm:$0xff]  }
  0x64   : > { %2066 = vmatpush1.bf16.msra.mxu0 %v4081_v35  ;;  %822 = vmatprep.subr.bf16.mxu1 %v4086_v39  ;;  %v4915_v35 = vsel %vm544_vm0, %v575_v11, %v576_v12  ;;  %v916_v39 = vrot.slane %v4612_v55, 2  ;;  %v4098_v55 = vld [vmem:[%s5946_s1 + $0x184] ss:$8 sps:$4 sm:$0xff]   ;;  %v591_v11 = vrot.slane %v4943_v34, 1 }
  0x65   : > { %2067 = vmatprep.subr.bf16.mxu0 %v4089_v47  ;;  %v4093_v47 = vld [vmem:[%s5946_s1 + $0x570] ss:$8 sps:$4 sm:$0xff]   ;;  %v1560_v58 = vpack.c.bf16 %v4922_v48, %v4915_v35 }
  0x66   : > { %v917_v59 = vsel %vm899_vm1, %v915_v40, %v916_v39  ;;  %v4980_v62 = vsel %vm544_vm0, %v590_v52, %v591_v11  ;;  %v1549_v39 = vrot.slane %v4989_v41, 1  ;;  %v4102_v40 = vld [vmem:[%s5946_s1 + $0x190] ss:$8 sps:$4 sm:$0xff]   ;;  %v921_v52 = vrot.slane %v4708_v37, 2  ;;  %v4110_v37 = vld [vmem:[%s5946_s1 + $0x1a4] ss:$8 sps:$4 sm:$0xff]  }
  0x67   : > { %823 = vmatpush1.bf16.msra.mxu1 %v4084_v56  ;;  %v4949_v56 = vld [vmem:[%s4580_s5 + $0x118] sm:$0x3]  ;;  %1810 = vmatmul.mubr.bf16.gmra.mrb[8].mxu0 %v1560_v58  ;;  %v922_v11 = vrot.slane %v4744_v53, 2  ;;  %v4113_v53 = vld [vmem:[%s5946_s1 + $0x5a4] ss:$8 sps:$4 sm:$0xff]  }
  0x68   : > { %2068 = vmatpush1.bf16.msra.mxu0 %v4087_v61  ;;  %824 = vmatprep.subr.bf16.mxu1 %v4092_v63  ;;  %v4096_v61 = vld [vmem:[%s5946_s1 + $0x180] ss:$8 sps:$4 sm:$0xff]   ;;  %v1551_v63 = vrot.slane %v4946_v46, 1  ;;  %v1552_v12 = vrot.slane %v4949_v56, 1 }
  0x69   : > { %2069 = vmatprep.subr.bf16.mxu0 %v4095_v19  ;;  %v4959_v19 = vld [vmem:[%s4580_s5 + $0xe0] sm:$0xff] }
  0x6a   : > { %v4970_v58 = vpack.c.bf16 %v4959_v19, %v4894_v8  ;;  %v4983_v42 = vsel %vm544_vm0, %v1551_v63, %v1552_v12  ;;  %v587_v16 = vrot.slane %v4959_v19, 1  ;;  %v918_v63 = vrot.slane %v4794_v13, 2 }
  0x6b   : > { %825 = vmatpush1.bf16.msra.mxu1 %v4090_v27  ;;  %v1563_v24 = vpack.c.bf16 %v4983_v42, %v4980_v62  ;;  %v1548_v27 = vrot.slane %v4986_v0, 1  ;;  %v919_v12 = vrot.slane %v4797_v14, 2  ;;  %v4108_v14 = vld [vmem:[%s5946_s1 + $0x1a0] ss:$8 sps:$4 sm:$0xff]  }
  0x6c   : > { %2070 = vmatpush1.bf16.msra.mxu0 %v4093_v47  ;;  %826 = vmatprep.subr.bf16.mxu1 %v4098_v55  ;;  %v5002_v47 = vsel %vm544_vm0, %v587_v16, %v588_v43  ;;  %v4105_v43 = vld [vmem:[%s5946_s1 + $0x590] ss:$8 sps:$4 sm:$0xff]  }
  0x6d   : > { %2071 = vmatprep.subr.bf16.mxu0 %v4101_v57  ;;  %486 = vmatmul.mubr.bf16.gmra.mrb[12].mxu1 %v4970_v58  ;;  %v5008_v55 = vsel %vm544_vm0, %v1548_v27, %v1549_v39  ;;  %v1855_v57 = vpack.c.bf16 %v917_v59, %v4976_v29  ;;  %v927_v39 = vrot.slane %v4774_v4, 2  ;;  %v4114_v4 = vld [vmem:[%s5946_s1 + $0x1b0] ss:$8 sps:$4 sm:$0xff]  }
  0x6e   : > { %1819 = vmatprep.mubr.bf16.mxu0 %v1563_v24  ;;  %842 = vmatprep.mubr.bf16.mxu1 %v610_v20  ;;  %v1562_v16 = vpack.c.bf16 %v5008_v55, %v5002_v47  ;;  %v4111_v20 = vld [vmem:[%s5946_s1 + $0x5a0] ss:$8 sps:$4 sm:$0xff]   ;;  %v4119_v24 = vld [vmem:[%s5946_s1 + $0x5b4] ss:$8 sps:$4 sm:$0xff]  }
  0x6f   : > { %827 = vmatpush1.bf16.msra.mxu1 %v4096_v61  ;;  %v5027_v61 = vsel %vm899_vm1, %v921_v52, %v922_v11  ;;  %v933_v52 = vrot.slane %v4839_v38, 2  ;;  %v934_v11 = vrot.slane %v4856_v49, 2  ;;  %v4125_v49 = vld [vmem:[%s5946_s1 + $0x5c4] ss:$8 sps:$4 sm:$0xff]  }
  0x70   : > { %2072 = vmatpush1.bf16.msra.mxu0 %v4099_v22  ;;  %828 = vmatprep.subr.bf16.mxu1 %v4104_v23  ;;  %v5036_v22 = vsel %vm899_vm1, %v918_v63, %v919_v12  ;;  %v5039_v23 = vpack.c.bf16 %v5027_v61, %v917_v59  ;;  %v924_v59 = vrot.slane %v4807_v17, 2 }
  0x71   : > { %2073 = vmatprep.subr.bf16.mxu0 %v4107_v10  ;;  %1820 = vmatmul.mubr.bf16.gmra.mrb[12].mxu0 %v1562_v16  ;;  %v4116_v10 = vld [vmem:[%s5946_s1 + $0x1b4] ss:$8 sps:$4 sm:$0xff]   ;;  %v5049_v27 = vpack.c.bf16 %v5036_v22, %v4680_v26  ;;  %v931_v16 = vrot.slane %v4885_v2, 2  ;;  %v5078_v12 = vsel %vm899_vm1, %v933_v52, %v934_v11  ;;  %v937_v52 = vrot.slane %v4897_v9, 2  ;;  %v4134_v9 = vld [vmem:[%s5946_s1 + $0x1e4] ss:$8 sps:$4 sm:$0xff]  }
  0x72   : > { %2087 = vmatprep.mubr.bf16.mxu0 %v1855_v57  ;;  %v925_v57 = vrot.slane %v4810_v18, 2  ;;  %v4122_v18 = vld [vmem:[%s5946_s1 + $0x1c4] ss:$8 sps:$4 sm:$0xff]   ;;  %v945_v11 = vrot.slane %v4925_v54, 2  ;;  %v545_v54 = vrot.slane %v4686_v28, 1 }
  0x73   : > { %829 = vmatpush1.bf16.msra.mxu1 %v4102_v40  ;;  %v928_v40 = vrot.slane %v4777_v5, 2  ;;  %v4117_v5 = vld [vmem:[%s5946_s1 + $0x5b0] ss:$8 sps:$4 sm:$0xff]   ;;  %v4132_v28 = vld [vmem:[%s5946_s1 + $0x1e0] ss:$8 sps:$4 sm:$0xff]  }
  0x74   : > { %2074 = vmatpush1.bf16.msra.mxu0 %v4105_v43  ;;  %830 = vmatprep.subr.bf16.mxu1 %v4110_v37  ;;  %v930_v43 = vrot.slane %v4872_v60, 2  ;;  %v5075_v63 = vsel %vm899_vm1, %v924_v59, %v925_v57  ;;  %v940_v59 = vrot.slane %v4862_v51, 2  ;;  %v936_v57 = vrot.slane %v4894_v8, 2  ;;  %v4129_v51 = vld [vmem:[%s5946_s1 + $0x5d0] ss:$8 sps:$4 sm:$0xff]  }
  0x75   : > { %2075 = vmatprep.subr.bf16.mxu0 %v4113_v53  ;;  %v5072_v2 = vsel %vm899_vm1, %v927_v39, %v928_v40  ;;  %v4120_v53 = vld [vmem:[%s5946_s1 + $0x1c0] ss:$8 sps:$4 sm:$0xff]   ;;  %v4131_v39 = vld [vmem:[%s5946_s1 + $0x5d4] ss:$8 sps:$4 sm:$0xff]   ;;  %v939_v40 = vrot.slane %v4859_v50, 2 }
  0x76   : > { %v5081_v37 = vsel %vm899_vm1, %v930_v43, %v931_v16  ;;  %v946_v43 = vrot.slane %v4943_v34, 2  ;;  %v942_v16 = vrot.slane %v4959_v19, 2  ;;  %v5128_v19 = vsel %vm899_vm1, %v936_v57, %v937_v52  ;;  %v4138_v57 = vld [vmem:[%s5946_s1 + $0x1f0] ss:$8 sps:$4 sm:$0xff]  }
  0x77   : > { %831 = vmatpush1.bf16.msra.mxu1 %v4108_v14  ;;  %v4123_v14 = vld [vmem:[%s5946_s1 + $0x5c0] ss:$8 sps:$4 sm:$0xff]   ;;  %v5125_v34 = vsel %vm899_vm1, %v939_v40, %v940_v59  ;;  %v4143_v40 = vld [vmem:[%s5946_s1 + $0x5f4] ss:$8 sps:$4 sm:$0xff]   ;;  %v4141_v52 = vld [vmem:[%s5946_s1 + $0x5f0] ss:$8 sps:$4 sm:$0xff]  }
  0x78   : > { %2076 = vmatpush1.bf16.msra.mxu0 %v4111_v20  ;;  %832 = vmatprep.subr.bf16.mxu1 %v4116_v10  ;;  %v5091_v20 = vpack.c.bf16 %v5078_v12, %v5072_v2  ;;  %v5095_v10 = vpack.c.bf16 %v5081_v37, %v5075_v63 }
  0x79   : > { %2077 = vmatprep.subr.bf16.mxu0 %v4119_v24  ;;  %v4128_v24 = vld [vmem:[%s5946_s1 + $0x1d4] ss:$8 sps:$4 sm:$0xff]  }
  0x7b   : > { %833 = vmatpush1.bf16.msra.mxu1 %v4114_v4  ;;  %v943_v4 = vrot.slane %v4973_v45, 2  ;;  %v4137_v45 = vld [vmem:[%s5946_s1 + $0x5e4] ss:$8 sps:$4 sm:$0xff]  }
  0x7c   : > { %2078 = vmatpush1.bf16.msra.mxu0 %v4117_v5  ;;  %834 = vmatprep.subr.bf16.mxu1 %v4122_v18  ;;  %v4126_v5 = vld [vmem:[%s5946_s1 + $0x1d0] ss:$8 sps:$4 sm:$0xff]   ;;  %v5131_v18 = vsel %vm899_vm1, %v945_v11, %v946_v43  ;;  %v4146_v11 = vld [vmem:[%s5946_s1 + $0x204] ss:$8 sps:$4 sm:$0xff]  }
  0x7d   : > { %2079 = vmatprep.subr.bf16.mxu0 %v4125_v49  ;;  %v5134_v49 = vsel %vm899_vm1, %v942_v16, %v943_v4  ;;  %v4149_v43 = vld [vmem:[%s5946_s1 + $0x604] ss:$8 sps:$4 sm:$0xff]   ;;  %v4144_v4 = vld [vmem:[%s5946_s1 + $0x200] ss:$8 sps:$4 sm:$0xff]  }
  0x7f   : > { %835 = vmatpush1.bf16.msra.mxu1 %v4120_v53  ;;  %v546_v53 = vrot.slane %v4691_v30, 1  ;;  %v4140_v30 = vld [vmem:[%s5946_s1 + $0x1f4] ss:$8 sps:$4 sm:$0xff]  }
  0x80   : > { %2080 = vmatpush1.bf16.msra.mxu0 %v4123_v14  ;;  %836 = vmatprep.subr.bf16.mxu1 %v4128_v24  ;;  %v4135_v14 = vld [vmem:[%s5946_s1 + $0x5e0] ss:$8 sps:$4 sm:$0xff]   ;;  %v5145_v24 = vpack.c.bf16 %v5131_v18, %v5125_v34 }
  0x81   : > { %2081 = vmatprep.subr.bf16.mxu0 %v4131_v39  ;;  %v5149_v39 = vpack.c.bf16 %v5134_v49, %v5128_v19  ;;  %v547_v59 = vsel %vm544_vm0, %v545_v54, %v546_v53  ;;  %v5959_v54 = vpack.c.bf16 %v4680_v26, %v4667_v21  ;;  %v4150_v53 = vld [vmem:[%s5946_s1 + $0x210] ss:$8 sps:$4 sm:$0xff]   ;;  %v4161_v26 = vld [vmem:[%s5946_s1 + $0x624] ss:$8 sps:$4 sm:$0xff]  }
  0x82   : > { %v609_v16 = vpack.c.bf16 %v4694_v31, %v547_v59  ;;  %v4155_v31 = vld [vmem:[%s5946_s1 + $0x614] ss:$8 sps:$4 sm:$0xff]   ;;  %v1850_v59 = vrot.slane %v4949_v56, 2  ;;  %v5249_v56 = vpack.c.bf16 %v4915_v35, %v4836_v36  ;;  %v4171_v36 = vld [vmem:[%s5946_s1 + $0x640] ss:$8 sps:$4 sm:$0xff]   ;;  %v1847_v35 = vrot.slane %v4989_v41, 2 }
  0x83   : > { %837 = vmatpush1.bf16.msra.mxu1 %v4126_v5  ;;  %v4147_v5 = vld [vmem:[%s5946_s1 + $0x600] ss:$8 sps:$4 sm:$0xff]  }
  0x84   : > { %2082 = vmatpush1.bf16.msra.mxu0 %v4129_v51  ;;  %838 = vmatprep.subr.bf16.mxu1 %v4134_v9  ;;  %v4152_v51 = vld [vmem:[%s5946_s1 + $0x214] ss:$8 sps:$4 sm:$0xff]   ;;  %v5185_v9 = vpack.c.bf16 %v4780_v6, %v4634_v1  ;;  %v4158_v1 = vld [vmem:[%s5946_s1 + $0x224] ss:$8 sps:$4 sm:$0xff]   ;;  %v5207_v6 = vpack.c.bf16 %v4829_v33, %v4697_v32 }
  0x85   : > { %2083 = vmatprep.subr.bf16.mxu0 %v4137_v45  ;;  %v1857_v45 = vpack.c.bf16 %v5072_v2, %v5027_v61  ;;  %v1856_v61 = vpack.c.bf16 %v5075_v63, %v5036_v22  ;;  %v4156_v2 = vld [vmem:[%s5946_s1 + $0x220] ss:$8 sps:$4 sm:$0xff]   ;;  %v4164_v32 = vld [vmem:[%s5946_s1 + $0x234] ss:$8 sps:$4 sm:$0xff]   ;;  %v5227_v22 = vpack.c.bf16 %v4888_v3, %v4800_v15  ;;  %v1859_v63 = vpack.c.bf16 %v5125_v34, %v5078_v12  ;;  %v4165_v15 = vld [vmem:[%s5946_s1 + $0x630] ss:$8 sps:$4 sm:$0xff]  }
  0x86   : > { %v4167_v33 = vld [vmem:[%s5946_s1 + $0x634] ss:$8 sps:$4 sm:$0xff]   ;;  %v4170_v3 = vld [vmem:[%s5946_s1 + $0x244] ss:$8 sps:$4 sm:$0xff]   ;;  %v1858_v12 = vpack.c.bf16 %v5128_v19, %v5081_v37  ;;  %v1259_v37 = vpack.c.bf16 %v4859_v50, %v4839_v38  ;;  %v1258_v19 = vpack.c.bf16 %v4894_v8, %v4872_v60 }
  0x87   : > { %839 = vmatpush1.bf16.msra.mxu1 %v4132_v28  ;;  %v4153_v28 = vld [vmem:[%s5946_s1 + $0x610] ss:$8 sps:$4 sm:$0xff]   ;;  %v4353_v38 = vld [vmem:[%s5946_s1 + $0x854] ss:$8 sps:$4 sm:$0xff]   ;;  %v4396_v50 = vld [vmem:[%s4580_s5 + $0xe8] sm:$0xff] }
  0x88   : > { %2084 = vmatpush1.bf16.msra.mxu0 %v4135_v14  ;;  %840 = vmatprep.subr.bf16.mxu1 %v4140_v30  ;;  %v4159_v14 = vld [vmem:[%s5946_s1 + $0x620] ss:$8 sps:$4 sm:$0xff]   ;;  %v1256_v30 = vpack.c.bf16 %v4807_v17, %v4794_v13 }
  0x89   : > { %2085 = vmatprep.subr.bf16.mxu0 %v4143_v40  ;;  %v1849_v40 = vrot.slane %v4946_v46, 2  ;;  %v4173_v46 = vld [vmem:[%s5946_s1 + $0x644] ss:$8 sps:$4 sm:$0xff]  }
  0x8a   : > { %v4397_v60 = vld [vmem:[%s4580_s5 + $0xe0] sm:$0xff] }
  0x8b   : > { %841 = vmatpush1.bf16.msra.mxu1 %v4138_v57  ;;  %v4162_v57 = vld [vmem:[%s5946_s1 + $0x230] ss:$8 sps:$4 sm:$0xff]   ;;  %v5254_v34 = vsel %vm899_vm1, %v1849_v40, %v1850_v59  ;;  %v4398_v8 = vld [vmem:[%s4580_s5 + $0x100] sm:$0xff] }
  0x8c   : > { %2086 = vmatpush1.bf16.msra.mxu0 %v4141_v52  ;;  %1165 = vmatprep.subr.bf16.mxu1 %v4146_v11  ;;  %v1846_v52 = vrot.slane %v4986_v0, 2  ;;  %v4168_v11 = vld [vmem:[%s5946_s1 + $0x240] ss:$8 sps:$4 sm:$0xff]   ;;  %v1861_v41 = vpack.c.bf16 %v5254_v34, %v5131_v18  ;;  %v4182_v18 = vld [vmem:[%s5946_s1 + $0x264] ss:$8 sps:$4 sm:$0xff]  }
  0x8d   : > { %2339 = vmatprep.subr.bf16.mxu0 %v4149_v43  ;;  %v4176_v43 = vld [vmem:[%s5946_s1 + $0x254] ss:$8 sps:$4 sm:$0xff]   ;;  %v4198_v40 = vld [vmem:[%s5946_s1 + $0x290] ss:$8 sps:$4 sm:$0xff]  }
  0x8e   : > { %843 = vmatmul.mubr.bf16.vlgmr.msra.gmra.mrb[0].mxu1 %v609_v16  ;;  %v4179_v16 = vld [vmem:[%s5946_s1 + $0x654] ss:$8 sps:$4 sm:$0xff]   ;;  %v4201_v59 = vld [vmem:[%s5946_s1 + $0x690] ss:$8 sps:$4 sm:$0xff]  }
  0x8f   : > { %2088 = vmatmul.mubr.bf16.vlgmr.msra.gmra.mrb[0].mxu0 %v5959_v54  ;;  %1166 = vmatpush1.bf16.msra.mxu1 %v4144_v4  ;;  %v5276_v4 = vpack.c.bf16 %v4980_v62, %v4891_v7  ;;  %v4177_v7 = vld [vmem:[%s5946_s1 + $0x650] ss:$8 sps:$4 sm:$0xff]   ;;  %v5290_v62 = vsel %vm899_vm1, %v1846_v52, %v1847_v35  ;;  %v5301_v54 = vpack.c.bf16 %v5002_v47, %v4922_v48  ;;  %v4188_v48 = vld [vmem:[%s5946_s1 + $0x274] ss:$8 sps:$4 sm:$0xff]   ;;  %v4218_v35 = vld [vmem:[%s5946_s1 + $0x2c4] ss:$8 sps:$4 sm:$0xff]  }
  0x90   : > { %2340 = vmatpush1.bf16.msra.mxu0 %v4147_v5  ;;  %1167 = vmatprep.subr.bf16.mxu1 %v4152_v51  ;;  %v4388_v5 = vld [vmem:[%s4580_s5 + $0x8] sm:$0xff]  ;;  %v4191_v47 = vld [vmem:[%s5946_s1 + $0x674] ss:$8 sps:$4 sm:$0xff]  }
  0x91   : > { %2341 = vmatprep.subr.bf16.mxu0 %v4155_v31  ;;  %852 = vmatprep.mubr.bf16.mxu1 %v5185_v9  ;;  %v903_v51 = vrot.slane %v4388_v5, 2  ;;  %v904_v31 = vrot.slane %v4822_v25, 2  ;;  %v4185_v25 = vld [vmem:[%s5946_s1 + $0x664] ss:$8 sps:$4 sm:$0xff]   ;;  %v4215_v52 = vld [vmem:[%s5946_s1 + $0x6b4] ss:$8 sps:$4 sm:$0xff]  }
  0x92   : > { %2097 = vmatprep.mubr.bf16.mxu0 %v1857_v45  ;;  %v4174_v45 = vld [vmem:[%s5946_s1 + $0x250] ss:$8 sps:$4 sm:$0xff]   ;;  %v4224_v5 = vld [vmem:[%s5946_s1 + $0x2d4] ss:$8 sps:$4 sm:$0xff]  }
  0x93   : > { %1168 = vmatpush1.bf16.msra.mxu1 %v4150_v53  ;;  %v1860_v53 = vpack.c.bf16 %v5290_v62, %v5134_v49 }
  0x94   : > { %2342 = vmatpush1.bf16.msra.mxu0 %v4153_v28  ;;  %1169 = vmatprep.subr.bf16.mxu1 %v4158_v1  ;;  %v905_v28 = vsel %vm899_vm1, %v903_v51, %v904_v31  ;;  %v4180_v1 = vld [vmem:[%s5946_s1 + $0x260] ss:$8 sps:$4 sm:$0xff]   ;;  %v4227_v51 = vld [vmem:[%s5946_s1 + $0x6d4] ss:$8 sps:$4 sm:$0xff]   ;;  %v4222_v31 = vld [vmem:[%s5946_s1 + $0x2d0] ss:$8 sps:$4 sm:$0xff]  }
  0x95   : > { %2343 = vmatprep.subr.bf16.mxu0 %v4161_v26  ;;  %v4183_v26 = vld [vmem:[%s5946_s1 + $0x660] ss:$8 sps:$4 sm:$0xff]   ;;  %v965_v49 = vpack.c.bf16 %v4976_v29, %v905_v28  ;;  %v4197_v29 = vld [vmem:[%s5946_s1 + $0x684] ss:$8 sps:$4 sm:$0xff]   ;;  %v4236_v28 = vld [vmem:[%s5946_s1 + $0x2f4] ss:$8 sps:$4 sm:$0xff]  }
  0x96   : > { %853 = vmatmul.mubr.bf16.gmra.mrb[4].mxu1 %v5207_v6 }
  0x97   : > { %2098 = vmatmul.mubr.bf16.gmra.mrb[4].mxu0 %v1856_v61  ;;  %1170 = vmatpush1.bf16.msra.mxu1 %v4156_v2  ;;  %v4186_v61 = vld [vmem:[%s5946_s1 + $0x270] ss:$8 sps:$4 sm:$0xff]  }
  0x98   : > { %2344 = vmatpush1.bf16.msra.mxu0 %v4159_v14  ;;  %1171 = vmatprep.subr.bf16.mxu1 %v4164_v32  ;;  %v4189_v2 = vld [vmem:[%s5946_s1 + $0x670] ss:$8 sps:$4 sm:$0xff]   ;;  %v4194_v14 = vld [vmem:[%s5946_s1 + $0x284] ss:$8 sps:$4 sm:$0xff]   ;;  %v4192_v32 = vld [vmem:[%s5946_s1 + $0x280] ss:$8 sps:$4 sm:$0xff]  }
  0x99   : > { %2345 = vmatprep.subr.bf16.mxu0 %v4167_v33  ;;  %862 = vmatprep.mubr.bf16.mxu1 %v5227_v22  ;;  %v4195_v33 = vld [vmem:[%s5946_s1 + $0x680] ss:$8 sps:$4 sm:$0xff]  }
  0x9a   : > { %2107 = vmatprep.mubr.bf16.mxu0 %v1859_v63  ;;  %v4200_v63 = vld [vmem:[%s5946_s1 + $0x294] ss:$8 sps:$4 sm:$0xff]  }
  0x9b   : > { %1172 = vmatpush1.bf16.msra.mxu1 %v4162_v57  ;;  %v4206_v57 = vld [vmem:[%s5946_s1 + $0x2a4] ss:$8 sps:$4 sm:$0xff]  }
  0x9c   : > { %2346 = vmatpush1.bf16.msra.mxu0 %v4165_v15  ;;  %1173 = vmatprep.subr.bf16.mxu1 %v4170_v3  ;;  %v4209_v15 = vld [vmem:[%s5946_s1 + $0x6a4] ss:$8 sps:$4 sm:$0xff]   ;;  %v4204_v3 = vld [vmem:[%s5946_s1 + $0x2a0] ss:$8 sps:$4 sm:$0xff]  }
  0x9d   : > { %2347 = vmatprep.subr.bf16.mxu0 %v4173_v46  ;;  %v4207_v46 = vld [vmem:[%s5946_s1 + $0x6a0] ss:$8 sps:$4 sm:$0xff]  }
  0x9e   : > { %863 = vmatmul.mubr.bf16.gmra.mrb[8].mxu1 %v5249_v56 }
  0x9f   : > { %2108 = vmatmul.mubr.bf16.gmra.mrb[8].mxu0 %v1858_v12  ;;  %1174 = vmatpush1.bf16.msra.mxu1 %v4168_v11  ;;  %v4212_v12 = vld [vmem:[%s5946_s1 + $0x2b4] ss:$8 sps:$4 sm:$0xff]   ;;  %v4210_v11 = vld [vmem:[%s5946_s1 + $0x2b0] ss:$8 sps:$4 sm:$0xff]  }
  0xa0   : > { %2348 = vmatpush1.bf16.msra.mxu0 %v4171_v36  ;;  %1175 = vmatprep.subr.bf16.mxu1 %v4176_v43  ;;  %v4213_v36 = vld [vmem:[%s5946_s1 + $0x6b0] ss:$8 sps:$4 sm:$0xff]   ;;  %v4221_v43 = vld [vmem:[%s5946_s1 + $0x6c4] ss:$8 sps:$4 sm:$0xff]  }
  0xa1   : > { %2349 = vmatprep.subr.bf16.mxu0 %v4179_v16  ;;  %872 = vmatprep.mubr.bf16.mxu1 %v5276_v4  ;;  %v4216_v16 = vld [vmem:[%s5946_s1 + $0x2c0] ss:$8 sps:$4 sm:$0xff]  }
  0xa2   : > { %2117 = vmatprep.mubr.bf16.mxu0 %v1861_v41  ;;  %v4219_v41 = vld [vmem:[%s5946_s1 + $0x6c0] ss:$8 sps:$4 sm:$0xff]  }
  0xa3   : > { %1176 = vmatpush1.bf16.msra.mxu1 %v4174_v45  ;;  %v4225_v45 = vld [vmem:[%s5946_s1 + $0x6d0] ss:$8 sps:$4 sm:$0xff]  }
  0xa4   : > { %2350 = vmatpush1.bf16.msra.mxu0 %v4177_v7  ;;  %1177 = vmatprep.subr.bf16.mxu1 %v4182_v18  ;;  %v4230_v7 = vld [vmem:[%s5946_s1 + $0x2e4] ss:$8 sps:$4 sm:$0xff]  }
  0xa5   : > { %2351 = vmatprep.subr.bf16.mxu0 %v4185_v25  ;;  %v4233_v18 = vld [vmem:[%s5946_s1 + $0x6e4] ss:$8 sps:$4 sm:$0xff]   ;;  %v4228_v25 = vld [vmem:[%s5946_s1 + $0x2e0] ss:$8 sps:$4 sm:$0xff]  }
  0xa6   : > { %873 = vmatmul.mubr.bf16.gmra.mrb[12].mxu1 %v5301_v54 }
  0xa7   : > { %2118 = vmatmul.mubr.bf16.gmra.mrb[12].mxu0 %v1860_v53  ;;  %1178 = vmatpush1.bf16.msra.mxu1 %v4180_v1  ;;  %v4231_v53 = vld [vmem:[%s5946_s1 + $0x6e0] ss:$8 sps:$4 sm:$0xff]   ;;  %v4239_v1 = vld [vmem:[%s5946_s1 + $0x6f4] ss:$8 sps:$4 sm:$0xff]  }
  0xa8   : > { %2352 = vmatpush1.bf16.msra.mxu0 %v4183_v26  ;;  %1179 = vmatprep.subr.bf16.mxu1 %v4188_v48  ;;  %v4234_v26 = vld [vmem:[%s5946_s1 + $0x2f0] ss:$8 sps:$4 sm:$0xff]  }
  0xa9   : > { %2353 = vmatprep.subr.bf16.mxu0 %v4191_v47  ;;  %1197 = vmatprep.mubr.bf16.mxu1 %v965_v49  ;;  %v4237_v48 = vld [vmem:[%s5946_s1 + $0x6f0] ss:$8 sps:$4 sm:$0xff]   ;;  %v4242_v47 = vld [vmem:[%s5946_s1 + $0x304] ss:$8 sps:$4 sm:$0xff]  }
  0xaa   : > { %2371 = vmatprep.mubr.bf16.mxu0 %v4727_v44  ;;  %v4203_v44 = vld [vmem:[%s5946_s1 + $0x694] ss:$8 sps:$4 sm:$0xff]   ;;  %v4245_v49 = vld [vmem:[%s5946_s1 + $0x704] ss:$8 sps:$4 sm:$0xff]  }
  0xab   : > { %1180 = vmatpush1.bf16.msra.mxu1 %v4186_v61  ;;  %v4240_v61 = vld [vmem:[%s5946_s1 + $0x300] ss:$8 sps:$4 sm:$0xff]  }
  0xac   : > { %2354 = vmatpush1.bf16.msra.mxu0 %v4189_v2  ;;  %1181 = vmatprep.subr.bf16.mxu1 %v4194_v14  ;;  %v4243_v2 = vld [vmem:[%s5946_s1 + $0x700] ss:$8 sps:$4 sm:$0xff]   ;;  %v4248_v14 = vld [vmem:[%s5946_s1 + $0x314] ss:$8 sps:$4 sm:$0xff]  }
  0xad   : > { %2355 = vmatprep.subr.bf16.mxu0 %v4197_v29  ;;  %v4251_v29 = vld [vmem:[%s5946_s1 + $0x714] ss:$8 sps:$4 sm:$0xff]  }
  0xaf   : > { %1182 = vmatpush1.bf16.msra.mxu1 %v4192_v32  ;;  %v5960_v32 = vld [vmem:[#allocation2_spill] sm:$0xff] }
  0xb0   : > { %2356 = vmatpush1.bf16.msra.mxu0 %v4195_v33  ;;  %1183 = vmatprep.subr.bf16.mxu1 %v4200_v63  ;;  %v5961_v33 = vpack.c.bf16 %v4667_v21, %v5960_v32  ;;  %v5962_v63 = vld [vmem:[#allocation3_spill] sm:$0xff]  ;;  %v4285_v32 = vld [vmem:[%s5946_s1 + $0x770] ss:$8 sps:$4 sm:$0xff]  }
  0xb1   : > { %2357 = vmatprep.subr.bf16.mxu0 %v4203_v44  ;;  %v4246_v44 = vld [vmem:[%s5946_s1 + $0x310] ss:$8 sps:$4 sm:$0xff]   ;;  %v4257_v21 = vld [vmem:[%s5946_s1 + $0x724] ss:$8 sps:$4 sm:$0xff]  }
  0xb3   : > { %1184 = vmatpush1.bf16.msra.mxu1 %v4198_v40  ;;  %v4249_v40 = vld [vmem:[%s5946_s1 + $0x710] ss:$8 sps:$4 sm:$0xff]  }
  0xb4   : > { %2358 = vmatpush1.bf16.msra.mxu0 %v4201_v59  ;;  %1185 = vmatprep.subr.bf16.mxu1 %v4206_v57  ;;  %v4254_v59 = vld [vmem:[%s5946_s1 + $0x324] ss:$8 sps:$4 sm:$0xff]   ;;  %v5963_v57 = vld [vmem:[#allocation4_spill] sm:$0xff] }
  0xb5   : > { %2359 = vmatprep.subr.bf16.mxu0 %v4209_v15  ;;  %v4252_v15 = vld [vmem:[%s5946_s1 + $0x320] ss:$8 sps:$4 sm:$0xff]  }
  0xb7   : > { %1186 = vmatpush1.bf16.msra.mxu1 %v4204_v3  ;;  %v4255_v3 = vld [vmem:[%s5946_s1 + $0x720] ss:$8 sps:$4 sm:$0xff]  }
  0xb8   : > { %2360 = vmatpush1.bf16.msra.mxu0 %v4207_v46  ;;  %1187 = vmatprep.subr.bf16.mxu1 %v4212_v12  ;;  %v4260_v46 = vld [vmem:[%s5946_s1 + $0x334] ss:$8 sps:$4 sm:$0xff]  }
  0xb9   : > { %2361 = vmatprep.subr.bf16.mxu0 %v4215_v52  ;;  %v4263_v12 = vld [vmem:[%s5946_s1 + $0x734] ss:$8 sps:$4 sm:$0xff]  }
  0xba   : > { %v5964_v52 = vld [vmem:[#allocation5_spill] sm:$0xff] }
  0xbb   : > { %1188 = vmatpush1.bf16.msra.mxu1 %v4210_v11  ;;  %v4258_v11 = vld [vmem:[%s5946_s1 + $0x330] ss:$8 sps:$4 sm:$0xff]  }
  0xbc   : > { %2362 = vmatpush1.bf16.msra.mxu0 %v4213_v36  ;;  %1189 = vmatprep.subr.bf16.mxu1 %v4218_v35  ;;  %v4261_v36 = vld [vmem:[%s5946_s1 + $0x730] ss:$8 sps:$4 sm:$0xff]   ;;  %v4266_v35 = vld [vmem:[%s5946_s1 + $0x344] ss:$8 sps:$4 sm:$0xff]  }
  0xbd   : > { %2363 = vmatprep.subr.bf16.mxu0 %v4221_v43  ;;  %v4269_v43 = vld [vmem:[%s5946_s1 + $0x744] ss:$8 sps:$4 sm:$0xff]  }
  0xbf   : > { %1190 = vmatpush1.bf16.msra.mxu1 %v4216_v16  ;;  %v5965_v16 = vld [vmem:[#allocation6_spill] sm:$0xff] }
  0xc0   : > { %2364 = vmatpush1.bf16.msra.mxu0 %v4219_v41  ;;  %1191 = vmatprep.subr.bf16.mxu1 %v4224_v5  ;;  %v5488_v41 = vld [vmem:[%s4580_s5 + $0x128] sm:$0xff] }
  0xc1   : > { %2365 = vmatprep.subr.bf16.mxu0 %v4227_v51  ;;  %v4264_v5 = vld [vmem:[%s5946_s1 + $0x340] ss:$8 sps:$4 sm:$0xff]  }
  0xc2   : > { %v4267_v51 = vld [vmem:[%s5946_s1 + $0x740] ss:$8 sps:$4 sm:$0xff]  }
  0xc3   : > { %1192 = vmatpush1.bf16.msra.mxu1 %v4222_v31  ;;  %v4272_v31 = vld [vmem:[%s5946_s1 + $0x354] ss:$8 sps:$4 sm:$0xff]  }
  0xc4   : > { %2366 = vmatpush1.bf16.msra.mxu0 %v4225_v45  ;;  %1193 = vmatprep.subr.bf16.mxu1 %v4230_v7  ;;  %v4275_v45 = vld [vmem:[%s5946_s1 + $0x754] ss:$8 sps:$4 sm:$0xff]   ;;  %v5503_v7 = vld [vmem:[%s4580_s5 + $0x108] sm:$0xff] }
  0xc5   : > { %2367 = vmatprep.subr.bf16.mxu0 %v4233_v18  ;;  %v2145_v18 = vpack.c.bf16 %v5488_v41, %v5503_v7 }
  0xc7   : > { %1194 = vmatpush1.bf16.msra.mxu1 %v4228_v25  ;;  %v4270_v25 = vld [vmem:[%s5946_s1 + $0x350] ss:$8 sps:$4 sm:$0xff]  }
  0xc8   : > { %2368 = vmatpush1.bf16.msra.mxu0 %v4231_v53  ;;  %1195 = vmatprep.subr.bf16.mxu1 %v4236_v28  ;;  %v4273_v53 = vld [vmem:[%s5946_s1 + $0x750] ss:$8 sps:$4 sm:$0xff]   ;;  %v5516_v28 = vld [vmem:[%s4580_s5 + $0x120] sm:$0xff] }
  0xc9   : > { %2369 = vmatprep.subr.bf16.mxu0 %v4239_v1  ;;  %v4281_v1 = vld [vmem:[%s5946_s1 + $0x764] ss:$8 sps:$4 sm:$0xff]   ;;  %v2432_v17 = vrot.slane %v5516_v28, 1 }
  0xcb   : > { %1196 = vmatpush1.bf16.msra.mxu1 %v4234_v26  ;;  %v2144_v26 = vpack.c.bf16 %v5516_v28, %v4986_v0  ;;  %v4287_v0 = vld [vmem:[%s5946_s1 + $0x774] ss:$8 sps:$4 sm:$0xff]  }
  0xcc   : > { %2370 = vmatpush1.bf16.msra.mxu0 %v4237_v48  ;;  %1455 = vmatprep.subr.bf16.mxu1 %v4242_v47  ;;  %v4276_v48 = vld [vmem:[%s5946_s1 + $0x360] ss:$8 sps:$4 sm:$0xff]  }
  0xcd   : > { %2635 = vmatprep.subr.bf16.mxu0 %v4245_v49  ;;  %v4279_v47 = vld [vmem:[%s5946_s1 + $0x760] ss:$8 sps:$4 sm:$0xff]   ;;  %v4284_v49 = vld [vmem:[%s5946_s1 + $0x374] ss:$8 sps:$4 sm:$0xff]  }
  0xce   : > { %1198 = vmatmul.mubr.bf16.vlgmr.msra.gmra.mrb[0].mxu1 %v5961_v33  ;;  %v4290_v33 = vld [vmem:[%s5946_s1 + $0x384] ss:$8 sps:$4 sm:$0xff]  }
  0xcf   : > { %2372 = vmatmul.mubr.bf16.vlgmr.msra.gmra.mrb[0].mxu0 %v5962_v63  ;;  %1456 = vmatpush1.bf16.msra.mxu1 %v4240_v61  ;;  %v4390_v61 = vld [vmem:[%s4580_s5 + $0x28] sm:$0xff] }
  0xd0   : > { %2636 = vmatpush1.bf16.msra.mxu0 %v4243_v2  ;;  %1457 = vmatprep.subr.bf16.mxu1 %v4248_v14  ;;  %v4391_v2 = vld [vmem:[%s4580_s5 + $0x48] sm:$0xff] }
  0xd1   : > { %2637 = vmatprep.subr.bf16.mxu0 %v4251_v29  ;;  %1207 = vmatprep.mubr.bf16.mxu1 %v5039_v23  ;;  %v1255_v14 = vpack.c.bf16 %v4391_v2, %v4390_v61  ;;  %v4282_v29 = vld [vmem:[%s5946_s1 + $0x370] ss:$8 sps:$4 sm:$0xff]   ;;  %v4293_v63 = vld [vmem:[%s5946_s1 + $0x784] ss:$8 sps:$4 sm:$0xff]  }
  0xd2   : > { %2381 = vmatprep.mubr.bf16.mxu0 %v5963_v57  ;;  %v4297_v57 = vld [vmem:[%s5946_s1 + $0x790] ss:$8 sps:$4 sm:$0xff]   ;;  %v4338_v61 = vld [vmem:[%s5946_s1 + $0x804] ss:$8 sps:$4 sm:$0xff]  }
  0xd3   : > { %1458 = vmatpush1.bf16.msra.mxu1 %v4246_v44  ;;  %v4288_v44 = vld [vmem:[%s5946_s1 + $0x380] ss:$8 sps:$4 sm:$0xff]  }
  0xd4   : > { %2638 = vmatpush1.bf16.msra.mxu0 %v4249_v40  ;;  %1459 = vmatprep.subr.bf16.mxu1 %v4254_v59  ;;  %v4291_v40 = vld [vmem:[%s5946_s1 + $0x780] ss:$8 sps:$4 sm:$0xff]   ;;  %v4296_v59 = vld [vmem:[%s5946_s1 + $0x394] ss:$8 sps:$4 sm:$0xff]  }
  0xd5   : > { %2639 = vmatprep.subr.bf16.mxu0 %v4257_v21  ;;  %v4294_v21 = vld [vmem:[%s5946_s1 + $0x390] ss:$8 sps:$4 sm:$0xff]   ;;  %v4392_v2 = vld [vmem:[%s4580_s5 + $0x20] sm:$0xff] }
  0xd6   : > { %1208 = vmatmul.mubr.bf16.gmra.mrb[4].mxu1 %v5049_v27 }
  0xd7   : > { %2382 = vmatmul.mubr.bf16.gmra.mrb[4].mxu0 %v5964_v52  ;;  %1460 = vmatpush1.bf16.msra.mxu1 %v4252_v15  ;;  %v4302_v15 = vld [vmem:[%s5946_s1 + $0x3a4] ss:$8 sps:$4 sm:$0xff]   ;;  %v4308_v52 = vld [vmem:[%s5946_s1 + $0x3b4] ss:$8 sps:$4 sm:$0xff]  }
  0xd8   : > { %2640 = vmatpush1.bf16.msra.mxu0 %v4255_v3  ;;  %1461 = vmatprep.subr.bf16.mxu1 %v4260_v46  ;;  %v4305_v3 = vld [vmem:[%s5946_s1 + $0x7a4] ss:$8 sps:$4 sm:$0xff]   ;;  %v4300_v46 = vld [vmem:[%s5946_s1 + $0x3a0] ss:$8 sps:$4 sm:$0xff]  }
  0xd9   : > { %2641 = vmatprep.subr.bf16.mxu0 %v4263_v12  ;;  %1217 = vmatprep.mubr.bf16.mxu1 %v5091_v20  ;;  %v4303_v12 = vld [vmem:[%s5946_s1 + $0x7a0] ss:$8 sps:$4 sm:$0xff]  }
  0xda   : > { %2391 = vmatprep.mubr.bf16.mxu0 %v5965_v16  ;;  %v4317_v16 = vld [vmem:[%s5946_s1 + $0x7c4] ss:$8 sps:$4 sm:$0xff]  }
  0xdb   : > { %1462 = vmatpush1.bf16.msra.mxu1 %v4258_v11  ;;  %v4311_v11 = vld [vmem:[%s5946_s1 + $0x7b4] ss:$8 sps:$4 sm:$0xff]  }
  0xdc   : > { %2642 = vmatpush1.bf16.msra.mxu0 %v4261_v36  ;;  %1463 = vmatprep.subr.bf16.mxu1 %v4266_v35  ;;  %v4306_v36 = vld [vmem:[%s5946_s1 + $0x3b0] ss:$8 sps:$4 sm:$0xff]  }
  0xdd   : > { %2643 = vmatprep.subr.bf16.mxu0 %v4269_v43  ;;  %v4309_v35 = vld [vmem:[%s5946_s1 + $0x7b0] ss:$8 sps:$4 sm:$0xff]   ;;  %v4314_v43 = vld [vmem:[%s5946_s1 + $0x3c4] ss:$8 sps:$4 sm:$0xff]  }
  0xde   : > { %1218 = vmatmul.mubr.bf16.gmra.mrb[8].mxu1 %v5095_v10 }
  0xdf   : > { %2392 = vmatmul.mubr.bf16.gmra.mrb[8].mxu0 %v4970_v58  ;;  %1464 = vmatpush1.bf16.msra.mxu1 %v4264_v5  ;;  %v4278_v58 = vld [vmem:[%s5946_s1 + $0x364] ss:$8 sps:$4 sm:$0xff]   ;;  %v4312_v5 = vld [vmem:[%s5946_s1 + $0x3c0] ss:$8 sps:$4 sm:$0xff]  }
  0xe0   : > { %2644 = vmatpush1.bf16.msra.mxu0 %v4267_v51  ;;  %1465 = vmatprep.subr.bf16.mxu1 %v4272_v31  ;;  %v4315_v51 = vld [vmem:[%s5946_s1 + $0x7c0] ss:$8 sps:$4 sm:$0xff]   ;;  %v4320_v31 = vld [vmem:[%s5946_s1 + $0x3d4] ss:$8 sps:$4 sm:$0xff]  }
  0xe1   : > { %2645 = vmatprep.subr.bf16.mxu0 %v4275_v45  ;;  %1227 = vmatprep.mubr.bf16.mxu1 %v5145_v24  ;;  %v4323_v45 = vld [vmem:[%s5946_s1 + $0x7d4] ss:$8 sps:$4 sm:$0xff]  }
  0xe2   : > { %2401 = vmatprep.mubr.bf16.mxu0 %v2145_v18  ;;  %v4318_v18 = vld [vmem:[%s5946_s1 + $0x3d0] ss:$8 sps:$4 sm:$0xff]  }
  0xe3   : > { %1466 = vmatpush1.bf16.msra.mxu1 %v4270_v25  ;;  %v4321_v25 = vld [vmem:[%s5946_s1 + $0x7d0] ss:$8 sps:$4 sm:$0xff]  }
  0xe4   : > { %2646 = vmatpush1.bf16.msra.mxu0 %v4273_v53  ;;  %1467 = vmatprep.subr.bf16.mxu1 %v4278_v58  ;;  %v4326_v53 = vld [vmem:[%s5946_s1 + $0x3e4] ss:$8 sps:$4 sm:$0xff]  }
  0xe5   : > { %2647 = vmatprep.subr.bf16.mxu0 %v4281_v1  ;;  %v4329_v58 = vld [vmem:[%s5946_s1 + $0x7e4] ss:$8 sps:$4 sm:$0xff]   ;;  %v4324_v1 = vld [vmem:[%s5946_s1 + $0x3e0] ss:$8 sps:$4 sm:$0xff]  }
  0xe6   : > { %1228 = vmatmul.mubr.bf16.gmra.mrb[12].mxu1 %v5149_v39 }
  0xe7   : > { %2402 = vmatmul.mubr.bf16.gmra.mrb[12].mxu0 %v2144_v26  ;;  %1468 = vmatpush1.bf16.msra.mxu1 %v4276_v48  ;;  %v4327_v26 = vld [vmem:[%s5946_s1 + $0x7e0] ss:$8 sps:$4 sm:$0xff]   ;;  %v4332_v48 = vld [vmem:[%s5946_s1 + $0x3f4] ss:$8 sps:$4 sm:$0xff]  }
  0xe8   : > { %2648 = vmatpush1.bf16.msra.mxu0 %v4279_v47  ;;  %1469 = vmatprep.subr.bf16.mxu1 %v4284_v49  ;;  %v4335_v47 = vld [vmem:[%s5946_s1 + $0x7f4] ss:$8 sps:$4 sm:$0xff]   ;;  %v4330_v49 = vld [vmem:[%s5946_s1 + $0x3f0] ss:$8 sps:$4 sm:$0xff]  }
  0xe9   : > { %2649 = vmatprep.subr.bf16.mxu0 %v4287_v0  ;;  %1487 = vmatprep.mubr.bf16.mxu1 %v1255_v14  ;;  %v4333_v0 = vld [vmem:[%s5946_s1 + $0x7f0] ss:$8 sps:$4 sm:$0xff]   ;;  %v4393_v14 = vld [vmem:[%s4580_s5 + $0x40] sm:$0xff] }
  0xea   : > { %2667 = vmatprep.mubr.bf16.mxu0 %v5185_v9  ;;  %v4299_v9 = vld [vmem:[%s5946_s1 + $0x794] ss:$8 sps:$4 sm:$0xff]  }
  0xeb   : > { %1470 = vmatpush1.bf16.msra.mxu1 %v4282_v29  ;;  %v1254_v29 = vpack.c.bf16 %v4393_v14, %v4392_v2 }
  0xec   : > { %2650 = vmatpush1.bf16.msra.mxu0 %v4285_v32  ;;  %1471 = vmatprep.subr.bf16.mxu1 %v4290_v33  ;;  %v4336_v32 = vld [vmem:[%s5946_s1 + $0x800] ss:$8 sps:$4 sm:$0xff]   ;;  %v4341_v33 = vld [vmem:[%s5946_s1 + $0x814] ss:$8 sps:$4 sm:$0xff]  }
  0xed   : > { %2651 = vmatprep.subr.bf16.mxu0 %v4293_v63  ;;  %v4394_v63 = vld [vmem:[%s4580_s5 + $0x68] sm:$0xff] }
  0xef   : > { %1472 = vmatpush1.bf16.msra.mxu1 %v4288_v44  ;;  %v4395_v44 = vld [vmem:[%s4580_s5 + $0x88] sm:$0xff] }
  0xf0   : > { %2652 = vmatpush1.bf16.msra.mxu0 %v4291_v40  ;;  %1473 = vmatprep.subr.bf16.mxu1 %v4296_v59  ;;  %v1257_v40 = vpack.c.bf16 %v4395_v44, %v4394_v63  ;;  %v4339_v59 = vld [vmem:[%s5946_s1 + $0x810] ss:$8 sps:$4 sm:$0xff]  }
  0xf1   : > { %2653 = vmatprep.subr.bf16.mxu0 %v4299_v9  ;;  %v4344_v9 = vld [vmem:[%s5946_s1 + $0x824] ss:$8 sps:$4 sm:$0xff]  }
  0xf3   : > { %1474 = vmatpush1.bf16.msra.mxu1 %v4294_v21  ;;  %v5670_v21 = vld [vmem:[%s4580_s5 + $0x138] sm:$0x3] }
  0xf4   : > { %2654 = vmatpush1.bf16.msra.mxu0 %v4297_v57  ;;  %1475 = vmatprep.subr.bf16.mxu1 %v4302_v15  ;;  %v4347_v57 = vld [vmem:[%s5946_s1 + $0x834] ss:$8 sps:$4 sm:$0xff]   ;;  %v2435_v15 = vrot.slane %v5488_v41, 1 }
  0xf5   : > { %2655 = vmatprep.subr.bf16.mxu0 %v4305_v3  ;;  %v4345_v3 = vld [vmem:[%s5946_s1 + $0x830] ss:$8 sps:$4 sm:$0xff]  }
  0xf7   : > { %1476 = vmatpush1.bf16.msra.mxu1 %v4300_v46  ;;  %v4350_v46 = vld [vmem:[%s5946_s1 + $0x844] ss:$8 sps:$4 sm:$0xff]  }
  0xf8   : > { %2656 = vmatpush1.bf16.msra.mxu0 %v4303_v12  ;;  %1477 = vmatprep.subr.bf16.mxu1 %v4308_v52  ;;  %v5688_v12 = vld [vmem:[%s4580_s5 + $0x130] sm:$0x3] }
  0xf9   : > { %2657 = vmatprep.subr.bf16.mxu0 %v4311_v11  ;;  %v4351_v52 = vld [vmem:[%s5946_s1 + $0x850] ss:$8 sps:$4 sm:$0xff]   ;;  %v2725_v2 = vrot.slane %v5688_v12, 2 }
  0xfb   : > { %1478 = vmatpush1.bf16.msra.mxu1 %v4306_v36  ;;  %v4359_v36 = vld [vmem:[%s5946_s1 + $0x874] ss:$8 sps:$4 sm:$0xff]  }
  0xfc   : > { %2658 = vmatpush1.bf16.msra.mxu0 %v4309_v35  ;;  %1479 = vmatprep.subr.bf16.mxu1 %v4314_v43  ;;  %v4362_v35 = vld [vmem:[%s5946_s1 + $0x884] ss:$8 sps:$4 sm:$0xff]   ;;  %v4360_v43 = vld [vmem:[%s5946_s1 + $0x880] ss:$8 sps:$4 sm:$0xff]  }
  0xfd   : > { %2659 = vmatprep.subr.bf16.mxu0 %v4317_v16  ;;  %v4365_v16 = vld [vmem:[%s5946_s1 + $0x894] ss:$8 sps:$4 sm:$0xff]  }
  0xff   : > { %1480 = vmatpush1.bf16.msra.mxu1 %v4312_v5  ;;  %v4366_v5 = vld [vmem:[%s5946_s1 + $0x8a0] ss:$8 sps:$4 sm:$0xff]  }
 0x100   : > { %2660 = vmatpush1.bf16.msra.mxu0 %v4315_v51  ;;  %1481 = vmatprep.subr.bf16.mxu1 %v4320_v31  ;;  %v4371_v51 = vld [vmem:[%s5946_s1 + $0x8b4] ss:$8 sps:$4 sm:$0xff]   ;;  %v4369_v31 = vld [vmem:[%s5946_s1 + $0x8b0] ss:$8 sps:$4 sm:$0xff]  }
 0x101   : > { %2661 = vmatprep.subr.bf16.mxu0 %v4323_v45  ;;  %v4374_v45 = vld [vmem:[%s5946_s1 + $0x8c4] ss:$8 sps:$4 sm:$0xff]  }
 0x103   : > { %1482 = vmatpush1.bf16.msra.mxu1 %v4318_v18  ;;  %v4372_v18 = vld [vmem:[%s5946_s1 + $0x8c0] ss:$8 sps:$4 sm:$0xff]  }
 0x104   : > { %2662 = vmatpush1.bf16.msra.mxu0 %v4321_v25  ;;  %1483 = vmatprep.subr.bf16.mxu1 %v4326_v53  ;;  %v4377_v25 = vld [vmem:[%s5946_s1 + $0x8d4] ss:$8 sps:$4 sm:$0xff]   ;;  %v4375_v53 = vld [vmem:[%s5946_s1 + $0x8d0] ss:$8 sps:$4 sm:$0xff]  }
 0x105   : > { %2663 = vmatprep.subr.bf16.mxu0 %v4329_v58  ;;  %v4380_v58 = vld [vmem:[%s5946_s1 + $0x8e4] ss:$8 sps:$4 sm:$0xff]  }
 0x107   : > { %1484 = vmatpush1.bf16.msra.mxu1 %v4324_v1  ;;  %v4378_v1 = vld [vmem:[%s5946_s1 + $0x8e0] ss:$8 sps:$4 sm:$0xff]  }
 0x108   : > { %2664 = vmatpush1.bf16.msra.mxu0 %v4327_v26  ;;  %1485 = vmatprep.subr.bf16.mxu1 %v4332_v48  ;;  %v2727_v26 = vrot.slane %v5488_v41, 2  ;;  %v4383_v48 = vld [vmem:[%s5946_s1 + $0x8f4] ss:$8 sps:$4 sm:$0xff]   ;;  %v2724_v41 = vrot.slane %v5516_v28, 2 }
 0x109   : > { %2665 = vmatprep.subr.bf16.mxu0 %v4335_v47  ;;  %v2728_v47 = vrot.slane %v5670_v21, 2 }
 0x10a   : > { %v2726_v14 = vsel %vm899_vm1, %v2724_v41, %v2725_v2 }
 0x10b   : > { %1486 = vmatpush1.bf16.msra.mxu1 %v4330_v49  ;;  %v4381_v49 = vld [vmem:[%s5946_s1 + $0x8f0] ss:$8 sps:$4 sm:$0xff]  }
 0x10c   : > { %2666 = vmatpush1.bf16.msra.mxu0 %v4333_v0  ;;  %3767 = vmatprep.subr.bf16.mxu1 %v4338_v61  ;;  %v2729_v0 = vsel %vm899_vm1, %v2727_v26, %v2728_v47 }
 0x10d   : > { %2927 = vmatprep.subr.bf16.mxu0 %v4338_v61  ;;  %v2733_v61 = vpack.c.bf16 %v2729_v0, %v5254_v34  ;;  %v213_v34 = vlaneseq }
 0x10e   : > { %1488 = vmatmul.mubr.bf16.vlgmr.msra.gmra.mrb[0].mxu1 %v1254_v29  ;;  %v2732_v29 = vpack.c.bf16 %v2726_v14, %v5290_v62 }
 0x10f   : > { %2668 = vmatmul.mubr.bf16.vlgmr.msra.gmra.mrb[0].mxu0 %v5207_v6  ;;  %3783 = vmatpush1.bf16.msra.mxu1 %v4336_v32  ;;  %v4342_v6 = vld [vmem:[%s5946_s1 + $0x820] ss:$8 sps:$4 sm:$0xff]   ;;  %v214_v44 = vshrl.u32 %v213_v34, 7 }
 0x110   : > { %2928 = vmatpush1.bf16.msra.mxu0 %v4336_v32  ;;  %3768 = vmatprep.subr.bf16.mxu1 %v4341_v33 }
 0x111   : > { %2929 = vmatprep.subr.bf16.mxu0 %v4341_v33  ;;  %1497 = vmatprep.mubr.bf16.mxu1 %v1257_v40  ;;  %v219_v62 = vsub.s32 1, %v214_v44 }
 0x112   : > { %2677 = vmatprep.mubr.bf16.mxu0 %v5227_v22  ;;  %v2436_v22 = vrot.slane %v5670_v21, 1 }
 0x113   : > { %3784 = vmatpush1.bf16.msra.mxu1 %v4339_v59 }
 0x114   : > { %2930 = vmatpush1.bf16.msra.mxu0 %v4339_v59  ;;  %3769 = vmatprep.subr.bf16.mxu1 %v4344_v9  ;;  %v2437_v13 = vsel %vm544_vm0, %v2435_v15, %v2436_v22 }
 0x115   : > { %2931 = vmatprep.subr.bf16.mxu0 %v4344_v9 }
 0x116   : > { %1498 = vmatmul.mubr.bf16.gmra.mrb[4].mxu1 %v1256_v30  ;;  %v4348_v30 = vld [vmem:[%s5946_s1 + $0x840] ss:$8 sps:$4 sm:$0xff]  }
 0x117   : > { %2678 = vmatmul.mubr.bf16.gmra.mrb[4].mxu0 %v5249_v56  ;;  %3785 = vmatpush1.bf16.msra.mxu1 %v4342_v6  ;;  %v2433_v56 = vrot.slane %v5688_v12, 1 }
 0x118   : > { %2932 = vmatpush1.bf16.msra.mxu0 %v4342_v6  ;;  %3770 = vmatprep.subr.bf16.mxu1 %v4347_v57 }
 0x119   : > { %2933 = vmatprep.subr.bf16.mxu0 %v4347_v57  ;;  %1507 = vmatprep.mubr.bf16.mxu1 %v1259_v37  ;;  %v1261_v37 = vpack.c.bf16 %v5503_v7, %v4396_v50  ;;  %v2434_v11 = vsel %vm544_vm0, %v2432_v17, %v2433_v56  ;;  %v4354_v7 = vld [vmem:[%s5946_s1 + $0x860] ss:$8 sps:$4 sm:$0xff]  }
 0x11a   : > { %2687 = vmatprep.mubr.bf16.mxu0 %v5276_v4  ;;  %v2441_v4 = vpack.c.bf16 %v2437_v13, %v4983_v42  ;;  %v4356_v42 = vld [vmem:[%s5946_s1 + $0x864] ss:$8 sps:$4 sm:$0xff]  }
 0x11b   : > { %3786 = vmatpush1.bf16.msra.mxu1 %v4345_v3 }
 0x11c   : > { %2934 = vmatpush1.bf16.msra.mxu0 %v4345_v3  ;;  %3771 = vmatprep.subr.bf16.mxu1 %v4350_v46 }
 0x11d   : > { %2935 = vmatprep.subr.bf16.mxu0 %v4350_v46 }
 0x11e   : > { %1508 = vmatmul.mubr.bf16.gmra.mrb[8].mxu1 %v1258_v19  ;;  %v1260_v19 = vpack.c.bf16 %v4398_v8, %v4397_v60 }
 0x11f   : > { %2688 = vmatmul.mubr.bf16.gmra.mrb[8].mxu0 %v5301_v54  ;;  %3787 = vmatpush1.bf16.msra.mxu1 %v4348_v30  ;;  %v2440_v54 = vpack.c.bf16 %v2434_v11, %v5008_v55  ;;  %v4357_v55 = vld [vmem:[%s5946_s1 + $0x870] ss:$8 sps:$4 sm:$0xff]  }
 0x120   : > { %2936 = vmatpush1.bf16.msra.mxu0 %v4348_v30  ;;  %3772 = vmatprep.subr.bf16.mxu1 %v4353_v38 }
 0x121   : > { %2937 = vmatprep.subr.bf16.mxu0 %v4353_v38  ;;  %1517 = vmatprep.mubr.bf16.mxu1 %v1261_v37 }
 0x122   : > { %2697 = vmatprep.mubr.bf16.mxu0 %v2441_v4 }
 0x123   : > { %3788 = vmatpush1.bf16.msra.mxu1 %v4351_v52 }
 0x124   : > { %2938 = vmatpush1.bf16.msra.mxu0 %v4351_v52  ;;  %3773 = vmatprep.subr.bf16.mxu1 %v4356_v42 }
 0x125   : > { %2939 = vmatprep.subr.bf16.mxu0 %v4356_v42 }
 0x126   : > { %1518 = vmatmul.mubr.bf16.gmra.mrb[12].mxu1 %v1260_v19 }
 0x127   : > { %2698 = vmatmul.mubr.bf16.gmra.mrb[12].mxu0 %v2440_v54  ;;  %3789 = vmatpush1.bf16.msra.mxu1 %v4354_v7 }
 0x128   : > { %2940 = vmatpush1.bf16.msra.mxu0 %v4354_v7  ;;  %3774 = vmatprep.subr.bf16.mxu1 %v4359_v36 }
 0x129   : > { %2941 = vmatprep.subr.bf16.mxu0 %v4359_v36  ;;  %2959 = vmatprep.mubr.bf16.mxu0 %v5039_v23  ;;  %v4363_v23 = vld [vmem:[%s5946_s1 + $0x890] ss:$8 sps:$4 sm:$0xff]  }
 0x12a   : > { %2979 = vmatprep.mubr.bf16.mxu1 %v5145_v24  ;;  %v4368_v24 = vld [vmem:[%s5946_s1 + $0x8a4] ss:$8 sps:$4 sm:$0xff]  }
 0x12b   : > { %3790 = vmatpush1.bf16.msra.mxu1 %v4357_v55 }
 0x12c   : > { %2942 = vmatpush1.bf16.msra.mxu0 %v4357_v55  ;;  %3775 = vmatprep.subr.bf16.mxu1 %v4362_v35 }
 0x12d   : > { %2943 = vmatprep.subr.bf16.mxu0 %v4362_v35 }
 0x12f   : > { %3791 = vmatpush1.bf16.msra.mxu1 %v4360_v43 }
 0x130   : > { %2944 = vmatpush1.bf16.msra.mxu0 %v4360_v43  ;;  %3776 = vmatprep.subr.bf16.mxu1 %v4365_v16 }
 0x131   : > { %2945 = vmatprep.subr.bf16.mxu0 %v4365_v16 }
 0x133   : > { %3792 = vmatpush1.bf16.msra.mxu1 %v4363_v23 }
 0x134   : > { %2946 = vmatpush1.bf16.msra.mxu0 %v4363_v23  ;;  %3777 = vmatprep.subr.bf16.mxu1 %v4368_v24 }
 0x135   : > { %2947 = vmatprep.subr.bf16.mxu0 %v4368_v24 }
 0x137   : > { %3793 = vmatpush1.bf16.msra.mxu1 %v4366_v5 }
 0x138   : > { %2948 = vmatpush1.bf16.msra.mxu0 %v4366_v5  ;;  %3778 = vmatprep.subr.bf16.mxu1 %v4371_v51 }
 0x139   : > { %2949 = vmatprep.subr.bf16.mxu0 %v4371_v51 }
 0x13b   : > { %3794 = vmatpush1.bf16.msra.mxu1 %v4369_v31 }
 0x13c   : > { %2950 = vmatpush1.bf16.msra.mxu0 %v4369_v31  ;;  %3779 = vmatprep.subr.bf16.mxu1 %v4374_v45 }
 0x13d   : > { %2951 = vmatprep.subr.bf16.mxu0 %v4374_v45 }
 0x13f   : > { %3795 = vmatpush1.bf16.msra.mxu1 %v4372_v18 }
 0x140   : > { %2952 = vmatpush1.bf16.msra.mxu0 %v4372_v18  ;;  %3780 = vmatprep.subr.bf16.mxu1 %v4377_v25 }
 0x141   : > { %2953 = vmatprep.subr.bf16.mxu0 %v4377_v25 }
 0x143   : > { %3796 = vmatpush1.bf16.msra.mxu1 %v4375_v53 }
 0x144   : > { %2954 = vmatpush1.bf16.msra.mxu0 %v4375_v53  ;;  %3781 = vmatprep.subr.bf16.mxu1 %v4380_v58 }
 0x145   : > { %2955 = vmatprep.subr.bf16.mxu0 %v4380_v58 }
 0x147   : > { %3797 = vmatpush1.bf16.msra.mxu1 %v4378_v1 }
 0x148   : > { %2956 = vmatpush1.bf16.msra.mxu0 %v4378_v1  ;;  %3782 = vmatprep.subr.bf16.mxu1 %v4383_v48 }
 0x149   : > { %2957 = vmatprep.subr.bf16.mxu0 %v4383_v48 }
 0x14b   : > { %3798 = vmatpush1.bf16.msra.mxu1 %v4381_v49 }
 0x14c   : > { %2958 = vmatpush1.bf16.msra.mxu0 %v4381_v49 }
 0x14e   : > { %2980 = vmatmul.mubr.bf16.vlgmr.msra.gmra.mrb[16].mxu1 %v5149_v39 }
 0x14f   : > { %2960 = vmatmul.mubr.bf16.vlgmr.msra.gmra.mrb[0].mxu0 %v5049_v27  ;;  %2989 = vmatprep.mubr.bf16.mxu1 %v2733_v61 }
 0x150   : > { %2969 = vmatprep.mubr.bf16.mxu0 %v5091_v20  ;;  %v215_v20 = vsub.s32 0, %v214_v44 }
 0x156   : > { %2990 = vmatmul.mubr.bf16.gmra.mrb[20].mxu1 %v2732_v29 }
 0x157   : > { %2970 = vmatmul.mubr.bf16.gmra.mrb[4].mxu0 %v5095_v10  ;;  %v211_v10 = vld [vmem:[%s5947_s2] sm:$0x3] }
 0x158   : > { %v216_v9 = vrot.slane %v211_v10, %v215_v20  ;;  %v5802_v6 = vrot.slane %v211_v10, %v219_v62 }
 0x1e1   : > { %v1489_v28 = vpop.f32.mrb[0].mxu1 }
 0x1e2   : > { %v1491_v32 = vpop.f32.mrb[1].mxu1  ;;  %v3799_v31 = vadd.f32 %v1489_v28, %v216_v9 }
 0x1e3   : > { %v1493_v33 = vpop.f32.mrb[2].mxu1  ;;  %v3801_v45 = vadd.f32 %v1491_v32, %v5802_v6 }
 0x1e4   : > { %v1495_v63 = vpop.f32.mrb[3].mxu1  ;;  %v3803_v53 = vadd.f32 %v1493_v33, %v216_v9 }
 0x1e5   : > { %v3805_v47 = vadd.f32 %v1495_v63, %v5802_v6 }
 0x1e9   : > { %v5791_v40 = vpop.f32.mrb[4].mxu1 }
 0x1ea   : > { %v5793_v27 = vpop.f32.mrb[5].mxu1  ;;  %v3807_v63 = vadd.f32 %v5791_v40, %v216_v9 }
 0x1eb   : > { %v5795_v39 = vpop.f32.mrb[6].mxu1  ;;  %v3809_v20 = vadd.f32 %v5793_v27, %v5802_v6 }
 0x1ec   : > { %v5797_v59 = vpop.f32.mrb[7].mxu1 }
 0x1f1   : > { %v1509_v21 = vpop.f32.mrb[8].mxu1 }
 0x1f2   : > { %v2689_v57 = vpop.f32.mrb[8].mxu0  ;;  %v3815_v15 = vadd.f32 %v1509_v21, %v216_v9  ;;  %v1511_v22 = vpop.f32.mrb[9].mxu1  ;;  %v3811_v21 = vadd.f32 %v5795_v39, %v216_v9 }
 0x1f3   : > { %v2691_v3 = vpop.f32.mrb[9].mxu0  ;;  %v3818_v46 = vadd.f32 %v1511_v22, %v5802_v6  ;;  %v1513_v12 = vpop.f32.mrb[10].mxu1 }
 0x1f4   : > { %v2693_v13 = vpop.f32.mrb[10].mxu0  ;;  %v3816_v17 = vadd.f32 %v3815_v15, %v2689_v57  ;;  %v3821_v30 = vadd.f32 %v1513_v12, %v216_v9  ;;  %v1515_v56 = vpop.f32.mrb[11].mxu1 }
 0x1f5   : > { %v2695_v38 = vpop.f32.mrb[11].mxu0  ;;  %v3819_v50 = vadd.f32 %v3818_v46, %v2691_v3  ;;  %v3824_v37 = vadd.f32 %v1515_v56, %v5802_v6  ;;  %v3813_v46 = vadd.f32 %v5797_v59, %v5802_v6 }
 0x1f6   : > { %v3822_v4 = vadd.f32 %v3821_v30, %v2693_v13 }
 0x1f7   : > { %v3825_v52 = vadd.f32 %v3824_v37, %v2695_v38 }
 0x1f9   : > { %v1519_v11 = vpop.f32.mrb[12].mxu1 }
 0x1fa   : > { %v2699_v42 = vpop.f32.mrb[12].mxu0  ;;  %v3827_v60 = vadd.f32 %v1519_v11, %v216_v9  ;;  %v1521_v8 = vpop.f32.mrb[13].mxu1 }
 0x1fb   : > { %v2701_v19 = vpop.f32.mrb[13].mxu0  ;;  %v3830_v54 = vadd.f32 %v1521_v8, %v5802_v6  ;;  %v1523_v7 = vpop.f32.mrb[14].mxu1 }
 0x1fc   : > { %v2703_v36 = vpop.f32.mrb[14].mxu0  ;;  %v3828_v55 = vadd.f32 %v3827_v60, %v2699_v42  ;;  %v3833_v35 = vadd.f32 %v1523_v7, %v216_v9  ;;  %v1525_v43 = vpop.f32.mrb[15].mxu1 }
 0x1fd   : > { %v2705_v16 = vpop.f32.mrb[15].mxu0  ;;  %v3831_v23 = vadd.f32 %v3830_v54, %v2701_v19  ;;  %v3836_v24 = vadd.f32 %v1525_v43, %v5802_v6 }
 0x1fe   : > { %v3834_v5 = vadd.f32 %v3833_v35, %v2703_v36 }
 0x1ff   : > { %v3837_v51 = vadd.f32 %v3836_v24, %v2705_v16 }
 0x221   : > { %v2981_v25 = vpop.f32.mrb[16].mxu1 }
 0x222   : > { %v2961_v18 = vpop.f32.mrb[0].mxu0  ;;  %v5811_v1 = vadd.f32 %v3816_v17, %v2981_v25  ;;  %v2983_v48 = vpop.f32.mrb[17].mxu1 }
 0x223   : > { %v5809_v58 = vadd.f32 %v3799_v31, %v2961_v18  ;;  %v2963_v26 = vpop.f32.mrb[1].mxu0  ;;  %v5816_v0 = vadd.f32 %v3819_v50, %v2983_v48  ;;  %v2985_v61 = vpop.f32.mrb[18].mxu1 }
 0x224   : > { %v5814_v49 = vadd.f32 %v3801_v45, %v2963_v26  ;;  %v2965_v41 = vpop.f32.mrb[2].mxu0  ;;  %v3823_v14 = vadd.f32 %v3822_v4, %v2985_v61  ;;  %v2987_v28 = vpop.f32.mrb[19].mxu1 }
 0x225   : > { %v3804_v2 = vadd.f32 %v3803_v53, %v2965_v41  ;;  %v2967_v29 = vpop.f32.mrb[3].mxu0  ;;  %v5820_v33 = vadd.f32 %v3825_v52, %v2987_v28 }
 0x226   : > { %v5818_v32 = vadd.f32 %v3805_v47, %v2967_v29 }
 0x227   : > { %v3016_v34 = vadd.f32 %v3804_v2, %v5809_v58 }
 0x228   : > { %v3029_v44 = vadd.f32 %v5818_v32, %v5814_v49 }
 0x229   : > { %v2991_v62 = vpop.f32.mrb[20].mxu1 }
 0x22a   : > { %v2971_v10 = vpop.f32.mrb[4].mxu0  ;;  %v3829_v15 = vadd.f32 %v3828_v55, %v2991_v62  ;;  %v2993_v3 = vpop.f32.mrb[21].mxu1 }
 0x22b   : > { %v3808_v57 = vadd.f32 %v3807_v63, %v2971_v10  ;;  %v2973_v22 = vpop.f32.mrb[5].mxu0  ;;  %v3832_v13 = vadd.f32 %v3831_v23, %v2993_v3  ;;  %v2995_v30 = vpop.f32.mrb[22].mxu1 }
 0x22c   : > { %v3810_v12 = vadd.f32 %v3809_v20, %v2973_v22  ;;  %v2975_v17 = vpop.f32.mrb[6].mxu0  ;;  %v3835_v38 = vadd.f32 %v3834_v5, %v2995_v30  ;;  %v2997_v27 = vpop.f32.mrb[23].mxu1 }
 0x22d   : > { %v3017_v56 = vadd.f32 %v3808_v57, %v3016_v34  ;;  %v3812_v40 = vadd.f32 %v3811_v21, %v2975_v17  ;;  %v2977_v50 = vpop.f32.mrb[7].mxu0  ;;  %v3838_v52 = vadd.f32 %v3837_v51, %v2997_v27 }
 0x22e   : > { %v3030_v37 = vadd.f32 %v3810_v12, %v3029_v44  ;;  %v3814_v4 = vadd.f32 %v3813_v46, %v2977_v50 }
 0x22f   : > { %v3018_v39 = vadd.f32 %v3812_v40, %v3017_v56 }
 0x230   : > { %v3031_v9 = vadd.f32 %v3814_v4, %v3030_v37 }
 0x231   : > { %v3019_v11 = vadd.f32 %v5811_v1, %v3018_v39 }
 0x232   : > { %v3032_v42 = vadd.f32 %v5816_v0, %v3031_v9 }
 0x233   : > { %v3020_v60 = vadd.f32 %v3823_v14, %v3019_v11 }
 0x234   : > { %v3033_v59 = vadd.f32 %v5820_v33, %v3032_v42 }
 0x235   : > { %v3021_v6 = vadd.f32 %v3829_v15, %v3020_v60 }
 0x236   : > { %v3034_v8 = vadd.f32 %v3832_v13, %v3033_v59 }
 0x237   : > { %v3022_v19 = vadd.f32 %v3835_v38, %v3021_v6 }
 0x238   : > { %v3035_v54 = vadd.f32 %v3838_v52, %v3034_v8 }
 0x239   : > { %v3023_v7 = vrot.slane %v3022_v19, 4 }
 0x23a   : > { %v3036_v36 = vrot.slane %v3035_v54, 4 }
 0x23b   : > { %v3024_v55 = vadd.f32 %v3023_v7, %v3022_v19 }
 0x23c   : > { %v3037_v35 = vadd.f32 %v3036_v36, %v3035_v54 }
 0x23d   : > { %v3025_v43 = vrot.slane %v3024_v55, 2 }
 0x23e   : > { %v3038_v16 = vrot.slane %v3037_v35, 2 }
 0x23f   : > { %v3026_v23 = vadd.f32 %v3025_v43, %v3024_v55 }
 0x240   : > { %v3039_v24 = vadd.f32 %v3038_v16, %v3037_v35 }
 0x241   : > { %v3027_v5 = vrot.slane %v3026_v23, 1 }
 0x242   : > { %v3040_v51 = vrot.slane %v3039_v24, 1 }
 0x243   : > { %v3028_v31 = vadd.f32 %v3027_v5, %v3026_v23 }
 0x244   : > { %v3041_v45 = vadd.f32 %v3040_v51, %v3039_v24 }
 0x245   : > { %v3043_v18 = vmul.f32 0.015625, %v3028_v31 }
 0x246   : > { %v3044_v25 = vmul.f32 0.015625, %v3041_v45 }
 0x247   : > { %v5835_v53 = vsub.f32 %v5809_v58, %v3043_v18  ;;  %v5837_v26 = vsub.f32 %v3804_v2, %v3043_v18  ;;  %v5839_v48 = vsub.f32 %v3808_v57, %v3043_v18  ;;  %v5841_v47 = vsub.f32 %v3812_v40, %v3043_v18 }
 0x248   : > { %v5844_v41 = vsub.f32 %v5811_v1, %v3043_v18  ;;  %v5846_v61 = vsub.f32 %v3823_v14, %v3043_v18  ;;  %v5848_v29 = vsub.f32 %v3829_v15, %v3043_v18  ;;  %v5850_v28 = vsub.f32 %v3835_v38, %v3043_v18 }
 0x249   : > { %v3061_v34 = vmul.f32 %v5835_v53, %v5835_v53  ;;  %v3063_v58 = vmul.f32 %v5837_v26, %v5837_v26  ;;  %v3065_v2 = vmul.f32 %v5839_v48, %v5839_v48  ;;  %v3067_v44 = vmul.f32 %v5841_v47, %v5841_v47 }
 0x24a   : > { %v5861_v14 = vsub.f32 %v5814_v49, %v3044_v25  ;;  %v5864_v63 = vsub.f32 %v5818_v32, %v3044_v25  ;;  %v5866_v20 = vsub.f32 %v3810_v12, %v3044_v25  ;;  %v5868_v10 = vsub.f32 %v3814_v4, %v3044_v25 }
 0x24b   : > { %v3077_v1 = vadd.f32 %v3063_v58, %v3061_v34  ;;  %v5871_v62 = vsub.f32 %v5816_v0, %v3044_v25  ;;  %v5874_v21 = vsub.f32 %v5820_v33, %v3044_v25  ;;  %v5876_v57 = vsub.f32 %v3832_v13, %v3044_v25 }
 0x24c   : > { %v5878_v22 = vsub.f32 %v3838_v52, %v3044_v25  ;;  %v3062_v49 = vmul.f32 %v5861_v14, %v5861_v14  ;;  %v3064_v32 = vmul.f32 %v5864_v63, %v5864_v63  ;;  %v3069_v3 = vmul.f32 %v5844_v41, %v5844_v41 }
 0x24d   : > { %v3078_v15 = vadd.f32 %v3077_v1, %v3065_v2  ;;  %v3066_v0 = vmul.f32 %v5866_v20, %v5866_v20  ;;  %v3071_v12 = vmul.f32 %v5846_v61, %v5846_v61  ;;  %v3068_v17 = vmul.f32 %v5868_v10, %v5868_v10 }
 0x24e   : > { %v3090_v33 = vadd.f32 %v3064_v32, %v3062_v49  ;;  %v3073_v56 = vmul.f32 %v5848_v29, %v5848_v29  ;;  %v3070_v38 = vmul.f32 %v5871_v62, %v5871_v62  ;;  %v3075_v27 = vmul.f32 %v5850_v28, %v5850_v28 }
 0x24f   : > { %v3079_v46 = vadd.f32 %v3078_v15, %v3067_v44  ;;  %v3072_v4 = vmul.f32 %v5874_v21, %v5874_v21  ;;  %v3074_v9 = vmul.f32 %v5876_v57, %v5876_v57  ;;  %v3076_v60 = vmul.f32 %v5878_v22, %v5878_v22 }
 0x250   : > { %v3091_v30 = vadd.f32 %v3090_v33, %v3066_v0 }
 0x251   : > { %v3080_v13 = vadd.f32 %v3079_v46, %v3069_v3 }
 0x252   : > { %v3092_v50 = vadd.f32 %v3091_v30, %v3068_v17 }
 0x253   : > { %v3081_v40 = vadd.f32 %v3080_v13, %v3071_v12 }
 0x254   : > { %v3093_v52 = vadd.f32 %v3092_v50, %v3070_v38 }
 0x255   : > { %v3082_v37 = vadd.f32 %v3081_v40, %v3073_v56 }
 0x256   : > { %v3094_v11 = vadd.f32 %v3093_v52, %v3072_v4 }
 0x257   : > { %v3083_v39 = vadd.f32 %v3082_v37, %v3075_v27 }
 0x258   : > { %v3095_v59 = vadd.f32 %v3094_v11, %v3074_v9 }
 0x259   : > { %v3084_v42 = vrot.slane %v3083_v39, 4 }
 0x25a   : > { %v3096_v8 = vadd.f32 %v3095_v59, %v3076_v60 }
 0x25b   : > { %v3085_v6 = vadd.f32 %v3084_v42, %v3083_v39 }
 0x25c   : > { %v3097_v54 = vrot.slane %v3096_v8, 4 }
 0x25d   : > { %v3086_v19 = vrot.slane %v3085_v6, 2 }
 0x25e   : > { %v3098_v36 = vadd.f32 %v3097_v54, %v3096_v8 }
 0x25f   : > { %v3087_v7 = vadd.f32 %v3086_v19, %v3085_v6 }
 0x260   : > { %v3099_v35 = vrot.slane %v3098_v36, 2 }
 0x261   : > { %v3088_v55 = vrot.slane %v3087_v7, 1 }
 0x262   : > { %v3100_v16 = vadd.f32 %v3099_v35, %v3098_v36 }
 0x263   : > { %v3089_v43 = vadd.f32 %v3088_v55, %v3087_v7 }
 0x264   : > { %v3101_v24 = vrot.slane %v3100_v16, 1 }
 0x265   : > { %v3103_v23 = vmul.f32 0.015625, %v3089_v43 }
 0x266   : > { %v3102_v51 = vadd.f32 %v3101_v24, %v3100_v16 }
 0x267   : > { %v3105_v5 = vadd.f32 1e-05, %v3103_v23 }
 0x268   : > { %v3104_v31 = vmul.f32 0.015625, %v3102_v51 }
 0x269   : > { %4384 = vrsqrt.f32 %v3105_v5 }
 0x26a   : > { %v3106_v45 = vadd.f32 1e-05, %v3104_v31 }
 0x26c   : > { %4386 = vrsqrt.f32 %v3106_v45 }
 0x273   : > { %v4385_v18 = vpop.eup %4384 }
 0x274   : > { %v3109_v25 = vmul.f32 %v4385_v18, %v5835_v53  ;;  %v3111_v34 = vmul.f32 %v4385_v18, %v5837_v26  ;;  %v3113_v58 = vmul.f32 %v4385_v18, %v5839_v48  ;;  %v3115_v2 = vmul.f32 %v4385_v18, %v5841_v47 }
 0x275   : > { %v3117_v44 = vmul.f32 %v4385_v18, %v5844_v41  ;;  %v3119_v1 = vmul.f32 %v4385_v18, %v5846_v61  ;;  %v3121_v53 = vmul.f32 %v4385_v18, %v5848_v29  ;;  %v3123_v26 = vmul.f32 %v4385_v18, %v5850_v28 }
 0x276   : > { %v3125_v48 = vmax.f32 %v3109_v25, 0.0  ;;  %v3127_v15 = vmax.f32 %v3111_v34, 0.0  ;;  %v3129_v47 = vmax.f32 %v3113_v58, 0.0  ;;  %v3131_v49 = vmax.f32 %v3115_v2, 0.0  ;;  %v4387_v32 = vpop.eup %4386 }
 0x277   : > { %v3133_v3 = vmax.f32 %v3117_v44, 0.0  ;;  %v3135_v46 = vmax.f32 %v3119_v1, 0.0  ;;  %v3137_v0 = vmax.f32 %v3121_v53, 0.0  ;;  %v3139_v41 = vmax.f32 %v3123_v26, 0.0 }
 0x278   : > { %3141 = vst [vmem:[%s5912_s17] sm:$0xff] %v3125_v48  ;;  %3143 = vst [vmem:[%s5912_s17 + $0x10] sm:$0xff] %v3127_v15  ;;  %v3110_v61 = vmul.f32 %v4387_v32, %v5861_v14  ;;  %v3112_v29 = vmul.f32 %v4387_v32, %v5864_v63  ;;  %v3114_v28 = vmul.f32 %v4387_v32, %v5866_v20 }
 0x279   : > { %3145 = vst [vmem:[%s5912_s17 + $0x20] sm:$0xff] %v3129_v47  ;;  %3147 = vst [vmem:[%s5912_s17 + $0x30] sm:$0xff] %v3131_v49  ;;  %v3116_v33 = vmul.f32 %v4387_v32, %v5868_v10  ;;  %v3118_v12 = vmul.f32 %v4387_v32, %v5871_v62  ;;  %v3120_v13 = vmul.f32 %v4387_v32, %v5874_v21 }
 0x27a   : > { %3149 = vst [vmem:[%s5912_s17 + $0x40] sm:$0xff] %v3133_v3  ;;  %3151 = vst [vmem:[%s5912_s17 + $0x50] sm:$0xff] %v3135_v46  ;;  %v3122_v14 = vmul.f32 %v4387_v32, %v5876_v57  ;;  %v3124_v63 = vmul.f32 %v4387_v32, %v5878_v22  ;;  %v3126_v20 = vmax.f32 %v3110_v61, 0.0  ;;  %v3128_v10 = vmax.f32 %v3112_v29, 0.0 }
 0x27b   : > { %3153 = vst [vmem:[%s5912_s17 + $0x60] sm:$0xff] %v3137_v0  ;;  %3155 = vst [vmem:[%s5912_s17 + $0x70] sm:$0xff] %v3139_v41  ;;  %v3130_v17 = vmax.f32 %v3114_v28, 0.0  ;;  %v3132_v30 = vmax.f32 %v3116_v33, 0.0  ;;  %v3134_v56 = vmax.f32 %v3118_v12, 0.0  ;;  %v3136_v40 = vmax.f32 %v3120_v13, 0.0 }
 0x27c   : > { %v3138_v38 = vmax.f32 %v3122_v14, 0.0  ;;  %v3140_v50 = vmax.f32 %v3124_v63, 0.0  ;;  %3142 = vst [vmem:[%s5912_s17 + $0x8] sm:$0xff] %v3126_v20  ;;  %3144 = vst [vmem:[%s5912_s17 + $0x18] sm:$0xff] %v3128_v10 }
 0x27d   : > { %3146 = vst [vmem:[%s5912_s17 + $0x28] sm:$0xff] %v3130_v17  ;;  %3148 = vst [vmem:[%s5912_s17 + $0x38] sm:$0xff] %v3132_v30 }
 0x27e   : > { %3150 = vst [vmem:[%s5912_s17 + $0x48] sm:$0xff] %v3134_v56  ;;  %3152 = vst [vmem:[%s5912_s17 + $0x58] sm:$0xff] %v3136_v40 }
 0x27f   : > { %3154 = vst [vmem:[%s5912_s17 + $0x68] sm:$0xff] %v3138_v38  ;;  %3156 = vst [vmem:[%s5912_s17 + $0x78] sm:$0xff] %v3140_v50 }
 0x280 PF: > { %s13_s12 = sadd.s32 1, %s4405_s12  }
 0x281   : > { %p10_p4 = scmp.ge.s32.totalorder %s13_s12, 4  }
 0x283   :  { %12 = sbr.rel (!%p10_p4) target bundleno = 1 (0x1), region = 70 }

// kernel: pat_block_forward.12
= control target key start
LH: loop header
LB: loop body
LE: loop exit
PB: predicated region body
PF: predicated region fallthrough
CT: control target
= control target key end

     0   :  { %s4298_s12 = smov 0   ;;  %s5722_s0 = inlined_call_operand.vmem [shape: f32[2,10,10,256], index: 0, kind: input, shape index: {}]   ;;  %s5723_s1 = inlined_call_operand.vmem [shape: bf16[9,256,256], index: 1, kind: input, shape index: {}]   ;;  %s5724_s2 = inlined_call_operand.vmem [shape: f32[1,256], index: 2, kind: input, shape index: {}]   ;;  %s5725_s3 = inlined_call_operand.vmem [shape: f32[2,64,256], index: 3, kind: output, shape index: {}]  }
   0x1 LB: > { %s3087_s13 = sadd.s32 4294967295, %s4276_s12   ;;  %p3091_p0 = scmp.ge.s32.totalorder %s4276_s12, 1  ;;  %s4276_s12 = sphi %s4298_s12, %s13_s12  }
   0x2   : > { %p137_p1 = scmp.lt.s32.totalorder %s4276_s12, 3 }
   0x4   : > { %p138_p2 = pnand %p3091_p0, %p137_p1 }
   0x6   : > { %141 = sbr.rel (%p138_p2) target bundleno = 561 (0x231), region = 32 }
   0xd   : > { %v3827_v0 = vld [vmem:[%s5723_s1 + $0x4] ss:$8 sps:$4 sm:$0xff]   ;;  %v3831_v2 = vld [vmem:[%s5723_s1] ss:$8 sps:$4 sm:$0xff]   ;;  %v3833_v4 = vld [vmem:[%s5723_s1 + $0x14] ss:$8 sps:$4 sm:$0xff]  }
   0xe   : > { %v3829_v1 = vld [vmem:[%s5723_s1 + $0x404] ss:$8 sps:$4 sm:$0xff]   ;;  %423 = vmatprep.subr.bf16.mxu1 %v3827_v0  ;;  %v3832_v3 = vld [vmem:[%s5723_s1 + $0x400] ss:$8 sps:$4 sm:$0xff]   ;;  %v3835_v5 = vld [vmem:[%s5723_s1 + $0x414] ss:$8 sps:$4 sm:$0xff]  }
   0xf   : > { %1757 = vmatprep.subr.bf16.mxu0 %v3829_v1  ;;  %424 = vmatpush1.bf16.msra.mxu1 %v3831_v2  ;;  %v3837_v6 = vld [vmem:[%s5723_s1 + $0x10] ss:$8 sps:$4 sm:$0xff]   ;;  %v3839_v8 = vld [vmem:[%s5723_s1 + $0x24] ss:$8 sps:$4 sm:$0xff]   ;;  %v3843_v10 = vld [vmem:[%s5723_s1 + $0x20] ss:$8 sps:$4 sm:$0xff]  }
  0x10   : > { %1758 = vmatpush1.bf16.msra.mxu0 %v3832_v3  ;;  %425 = vmatprep.subr.bf16.mxu1 %v3833_v4  ;;  %v3838_v7 = vld [vmem:[%s5723_s1 + $0x410] ss:$8 sps:$4 sm:$0xff]   ;;  %v3841_v9 = vld [vmem:[%s5723_s1 + $0x424] ss:$8 sps:$4 sm:$0xff]   ;;  %v3844_v11 = vld [vmem:[%s5723_s1 + $0x420] ss:$8 sps:$4 sm:$0xff]  }
  0x11   : > { %1759 = vmatprep.subr.bf16.mxu0 %v3835_v5  ;;  %v3845_v12 = vld [vmem:[%s5723_s1 + $0x34] ss:$8 sps:$4 sm:$0xff]   ;;  %v3849_v14 = vld [vmem:[%s5723_s1 + $0x30] ss:$8 sps:$4 sm:$0xff]   ;;  %v3851_v16 = vld [vmem:[%s5723_s1 + $0x44] ss:$8 sps:$4 sm:$0xff]  }
  0x12   : > { %v3847_v13 = vld [vmem:[%s5723_s1 + $0x434] ss:$8 sps:$4 sm:$0xff]   ;;  %v3850_v15 = vld [vmem:[%s5723_s1 + $0x430] ss:$8 sps:$4 sm:$0xff]   ;;  %v3853_v17 = vld [vmem:[%s5723_s1 + $0x444] ss:$8 sps:$4 sm:$0xff]  }
  0x13   : > { %426 = vmatpush1.bf16.msra.mxu1 %v3837_v6  ;;  %v3855_v18 = vld [vmem:[%s5723_s1 + $0x40] ss:$8 sps:$4 sm:$0xff]   ;;  %v3857_v20 = vld [vmem:[%s5723_s1 + $0x54] ss:$8 sps:$4 sm:$0xff]   ;;  %v3861_v22 = vld [vmem:[%s5723_s1 + $0x50] ss:$8 sps:$4 sm:$0xff]  }
  0x14   : > { %1760 = vmatpush1.bf16.msra.mxu0 %v3838_v7  ;;  %427 = vmatprep.subr.bf16.mxu1 %v3839_v8  ;;  %v3856_v19 = vld [vmem:[%s5723_s1 + $0x440] ss:$8 sps:$4 sm:$0xff]   ;;  %v3859_v21 = vld [vmem:[%s5723_s1 + $0x454] ss:$8 sps:$4 sm:$0xff]   ;;  %v3862_v23 = vld [vmem:[%s5723_s1 + $0x450] ss:$8 sps:$4 sm:$0xff]  }
  0x15   : > { %1761 = vmatprep.subr.bf16.mxu0 %v3841_v9  ;;  %v3863_v24 = vld [vmem:[%s5723_s1 + $0x64] ss:$8 sps:$4 sm:$0xff]   ;;  %v3867_v26 = vld [vmem:[%s5723_s1 + $0x60] ss:$8 sps:$4 sm:$0xff]   ;;  %v3869_v28 = vld [vmem:[%s5723_s1 + $0x74] ss:$8 sps:$4 sm:$0xff]  }
  0x16   : > { %v3865_v25 = vld [vmem:[%s5723_s1 + $0x464] ss:$8 sps:$4 sm:$0xff]   ;;  %v3868_v27 = vld [vmem:[%s5723_s1 + $0x460] ss:$8 sps:$4 sm:$0xff]   ;;  %v3871_v29 = vld [vmem:[%s5723_s1 + $0x474] ss:$8 sps:$4 sm:$0xff]  }
  0x17   : > { %428 = vmatpush1.bf16.msra.mxu1 %v3843_v10  ;;  %v3873_v30 = vld [vmem:[%s5723_s1 + $0x70] ss:$8 sps:$4 sm:$0xff]   ;;  %v3875_v32 = vld [vmem:[%s5723_s1 + $0x84] ss:$8 sps:$4 sm:$0xff]   ;;  %p161_p3 = scmp.lt.s32.totalorder %s3087_s13, 1  ;;  %vm544_vm0 = vcmask 1046528  }
  0x18   : > { %1762 = vmatpush1.bf16.msra.mxu0 %v3844_v11  ;;  %429 = vmatprep.subr.bf16.mxu1 %v3845_v12  ;;  %v3874_v31 = vld [vmem:[%s5723_s1 + $0x470] ss:$8 sps:$4 sm:$0xff]   ;;  %v3877_v33 = vld [vmem:[%s5723_s1 + $0x484] ss:$8 sps:$4 sm:$0xff]   ;;  %v3879_v34 = vld [vmem:[%s5723_s1 + $0x80] ss:$8 sps:$4 sm:$0xff]  }
  0x19   : > { %1763 = vmatprep.subr.bf16.mxu0 %v3847_v13  ;;  %v3880_v35 = vld [vmem:[%s5723_s1 + $0x480] ss:$8 sps:$4 sm:$0xff]   ;;  %v3881_v36 = vld [vmem:[%s5723_s1 + $0x94] ss:$8 sps:$4 sm:$0xff]   ;;  %s5744_s13 = smov (!%p161_p3, %s3087_s13), 1  ;;  %vm899_vm1 = vcmask 1045504  }
  0x1a   : > { %v3883_v37 = vld [vmem:[%s5723_s1 + $0x494] ss:$8 sps:$4 sm:$0xff]   ;;  %v3885_v38 = vld [vmem:[%s5723_s1 + $0x90] ss:$8 sps:$4 sm:$0xff]   ;;  %v3887_v40 = vld [vmem:[%s5723_s1 + $0xa4] ss:$8 sps:$4 sm:$0xff]  }
  0x1b   : > { %430 = vmatpush1.bf16.msra.mxu1 %v3849_v14  ;;  %v3886_v39 = vld [vmem:[%s5723_s1 + $0x490] ss:$8 sps:$4 sm:$0xff]   ;;  %s3818_s21 = smul.u32 320, %s5744_s13  ;;  %v3889_v41 = vld [vmem:[%s5723_s1 + $0x4a4] ss:$8 sps:$4 sm:$0xff]   ;;  %s3641_s14 = sshll.u32 %s5744_s13, 7 }
  0x1c   : > { %1764 = vmatpush1.bf16.msra.mxu0 %v3850_v15  ;;  %431 = vmatprep.subr.bf16.mxu1 %v3851_v16  ;;  %v3891_v42 = vld [vmem:[%s5723_s1 + $0xa0] ss:$8 sps:$4 sm:$0xff]   ;;  %v3893_v44 = vld [vmem:[%s5723_s1 + $0xb4] ss:$8 sps:$4 sm:$0xff]   ;;  %v3897_v46 = vld [vmem:[%s5723_s1 + $0xb0] ss:$8 sps:$4 sm:$0xff]   ;;  %s5691_s17 = scalar_lea.vmem %s5725_s3, %s3641_s14 }
  0x1d   : > { %1765 = vmatprep.subr.bf16.mxu0 %v3853_v17  ;;  %v3892_v43 = vld [vmem:[%s5723_s1 + $0x4a0] ss:$8 sps:$4 sm:$0xff]   ;;  %s4451_s5 = scalar_lea.vmem %s5722_s0, %s3818_s21  ;;  %v3895_v45 = vld [vmem:[%s5723_s1 + $0x4b4] ss:$8 sps:$4 sm:$0xff]   ;;  %v3898_v49 = vld [vmem:[%s5723_s1 + $0x4b0] ss:$8 sps:$4 sm:$0xff]  }
  0x1e   : > { %v4460_v47 = vld [vmem:[%s4451_s5 + $0x8] sm:$0xff]  ;;  %v4480_v54 = vld [vmem:[%s4451_s5 + $0x38] sm:$0x3]  ;;  %v3905_v63 = vld [vmem:[%s5723_s1 + $0xd4] ss:$8 sps:$4 sm:$0xff]  }
  0x1f   : > { %432 = vmatpush1.bf16.msra.mxu1 %v3855_v18  ;;  %v4463_v48 = vld [vmem:[%s4451_s5 + $0x28] sm:$0xff]  ;;  %v4483_v55 = vld [vmem:[%s4451_s5 + $0x58] sm:$0x3]  ;;  %v555_v57 = vrot.slane %v4480_v54, 1  ;;  %v3907_v0 = vld [vmem:[%s5723_s1 + $0x4d4] ss:$8 sps:$4 sm:$0xff]  }
  0x20   : > { %1766 = vmatpush1.bf16.msra.mxu0 %v3856_v19  ;;  %433 = vmatprep.subr.bf16.mxu1 %v3857_v20  ;;  %v3899_v50 = vld [vmem:[%s5723_s1 + $0xc4] ss:$8 sps:$4 sm:$0xff]   ;;  %v224_v51 = vpack.c.bf16 %v4463_v48, %v4460_v47  ;;  %v554_v56 = vrot.slane %v4463_v48, 1  ;;  %v561_v59 = vrot.slane %v4483_v55, 1  ;;  %v3903_v60 = vld [vmem:[%s5723_s1 + $0xc0] ss:$8 sps:$4 sm:$0xff]  }
  0x21   : > { %1767 = vmatprep.subr.bf16.mxu0 %v3859_v21  ;;  %v4474_v52 = vld [vmem:[%s4451_s5 + $0x48] sm:$0xff]  ;;  %v3909_v2 = vld [vmem:[%s5723_s1 + $0xd0] ss:$8 sps:$4 sm:$0xff]   ;;  %v175_v6 = vld [vmem:[%s4451_s5 + $0x20] sm:$0xff] }
  0x22   : > { %v3901_v53 = vld [vmem:[%s5723_s1 + $0x4c4] ss:$8 sps:$4 sm:$0xff]   ;;  %455 = vmatprep.mubr.bf16.mxu1 %v224_v51  ;;  %v560_v58 = vrot.slane %v4474_v52, 1  ;;  %v3904_v61 = vld [vmem:[%s5723_s1 + $0x4c0] ss:$8 sps:$4 sm:$0xff]   ;;  %v4496_v62 = vsel %vm544_vm0, %v554_v56, %v555_v57  ;;  %v906_v8 = vrot.slane %v175_v6, 2 }
  0x23   : > { %434 = vmatpush1.bf16.msra.mxu1 %v3861_v22  ;;  %v3910_v3 = vld [vmem:[%s5723_s1 + $0x4d0] ss:$8 sps:$4 sm:$0xff]   ;;  %v3911_v5 = vld [vmem:[%s5723_s1 + $0xe4] ss:$8 sps:$4 sm:$0xff]   ;;  %v3915_v13 = vld [vmem:[%s5723_s1 + $0xe0] ss:$8 sps:$4 sm:$0xff]  }
  0x24   : > { %1768 = vmatpush1.bf16.msra.mxu0 %v3862_v23  ;;  %435 = vmatprep.subr.bf16.mxu1 %v3863_v24  ;;  %v4505_v1 = vsel %vm544_vm0, %v560_v58, %v561_v59  ;;  %v3913_v7 = vld [vmem:[%s5723_s1 + $0x4e4] ss:$8 sps:$4 sm:$0xff]   ;;  %v177_v9 = vld [vmem:[%s4451_s5 + $0x30] sm:$0x3]  ;;  %v3916_v14 = vld [vmem:[%s5723_s1 + $0x4e0] ss:$8 sps:$4 sm:$0xff]  }
  0x25   : > { %1769 = vmatprep.subr.bf16.mxu0 %v3865_v25  ;;  %v1557_v4 = vpack.c.bf16 %v4505_v1, %v4496_v62  ;;  %v4524_v10 = vld [vmem:[%s4451_s5 + $0x40] sm:$0xff]  ;;  %v181_v11 = vld [vmem:[%s4451_s5 + $0x50] sm:$0x3]  ;;  %v907_v12 = vrot.slane %v177_v9, 2  ;;  %v3917_v16 = vld [vmem:[%s5723_s1 + $0xf4] ss:$8 sps:$4 sm:$0xff]  }
  0x26   : > { %v913_v15 = vrot.slane %v181_v11, 2  ;;  %v551_v17 = vrot.slane %v175_v6, 1  ;;  %v552_v18 = vrot.slane %v177_v9, 1  ;;  %v557_v19 = vrot.slane %v4524_v10, 1  ;;  %v3919_v23 = vld [vmem:[%s5723_s1 + $0x4f4] ss:$8 sps:$4 sm:$0xff]  }
  0x27   : > { %436 = vmatpush1.bf16.msra.mxu1 %v3867_v26  ;;  %1789 = vmatprep.mubr.bf16.mxu0 %v1557_v4  ;;  %v558_v20 = vrot.slane %v181_v11, 1  ;;  %v4538_v21 = vsel %vm899_vm1, %v906_v8, %v907_v12  ;;  %v912_v22 = vrot.slane %v4524_v10, 2  ;;  %v3921_v24 = vld [vmem:[%s5723_s1 + $0xf0] ss:$8 sps:$4 sm:$0xff]   ;;  %v3940_v51 = vld [vmem:[%s5723_s1 + $0x524] ss:$8 sps:$4 sm:$0xff]  }
  0x28   : > { %1770 = vmatpush1.bf16.msra.mxu0 %v3868_v27  ;;  %437 = vmatprep.subr.bf16.mxu1 %v3869_v28  ;;  %v3922_v25 = vld [vmem:[%s5723_s1 + $0x4f0] ss:$8 sps:$4 sm:$0xff]   ;;  %v3925_v27 = vld [vmem:[%s5723_s1 + $0x104] ss:$8 sps:$4 sm:$0xff]   ;;  %v3935_v56 = vld [vmem:[%s5723_s1 + $0x120] ss:$8 sps:$4 sm:$0xff]  }
  0x29   : > { %1771 = vmatprep.subr.bf16.mxu0 %v3871_v29  ;;  %v4551_v26 = vsel %vm899_vm1, %v912_v22, %v913_v15  ;;  %v4557_v28 = vld [vmem:[%s4451_s5] sm:$0xff]  ;;  %v3943_v58 = vld [vmem:[%s5723_s1 + $0x134] ss:$8 sps:$4 sm:$0xff]   ;;  %v4645_v4 = vld [vmem:[%s4451_s5 + $0x88] sm:$0xff] }
  0x2a   : > { %v3938_v57 = vld [vmem:[%s5723_s1 + $0x520] ss:$8 sps:$4 sm:$0xff]   ;;  %v3946_v59 = vld [vmem:[%s5723_s1 + $0x534] ss:$8 sps:$4 sm:$0xff]   ;;  %v572_v9 = vrot.slane %v4645_v4, 1 }
  0x2b   : > { %438 = vmatpush1.bf16.msra.mxu1 %v3873_v30  ;;  %v4562_v30 = vld [vmem:[%s4451_s5 + $0x10] sm:$0x3]  ;;  %v3950_v8 = vld [vmem:[%s5723_s1 + $0x540] ss:$8 sps:$4 sm:$0xff]   ;;  %v3955_v12 = vld [vmem:[%s5723_s1 + $0x154] ss:$8 sps:$4 sm:$0xff]  }
  0x2c   : > { %1772 = vmatpush1.bf16.msra.mxu0 %v3874_v31  ;;  %439 = vmatprep.subr.bf16.mxu1 %v3875_v32  ;;  %v4565_v31 = vsel %vm544_vm0, %v551_v17, %v552_v18  ;;  %v4568_v32 = vsel %vm544_vm0, %v557_v19, %v558_v20  ;;  %v4678_v17 = vld [vmem:[%s4451_s5 + $0x80] sm:$0xff]  ;;  %v4681_v18 = vld [vmem:[%s4451_s5 + $0x90] sm:$0x3]  ;;  %v3958_v22 = vld [vmem:[%s5723_s1 + $0x554] ss:$8 sps:$4 sm:$0xff]  }
  0x2d   : > { %1773 = vmatprep.subr.bf16.mxu0 %v3877_v33  ;;  %v3928_v33 = vld [vmem:[%s5723_s1 + $0x504] ss:$8 sps:$4 sm:$0xff]  }
  0x2f   : > { %440 = vmatpush1.bf16.msra.mxu1 %v3879_v34  ;;  %v900_v34 = vrot.slane %v4557_v28, 2 }
  0x30   : > { %1774 = vmatpush1.bf16.msra.mxu0 %v3880_v35  ;;  %441 = vmatprep.subr.bf16.mxu1 %v3881_v36  ;;  %v901_v35 = vrot.slane %v4562_v30, 2  ;;  %v3923_v36 = vld [vmem:[%s5723_s1 + $0x100] ss:$8 sps:$4 sm:$0xff]  }
  0x31   : > { %1775 = vmatprep.subr.bf16.mxu0 %v3883_v37  ;;  %v4579_v37 = vld [vmem:[%s4451_s5 + $0x68] sm:$0xff] }
  0x33   : > { %442 = vmatpush1.bf16.msra.mxu1 %v3885_v38  ;;  %v3926_v38 = vld [vmem:[%s5723_s1 + $0x500] ss:$8 sps:$4 sm:$0xff]  }
  0x34   : > { %1776 = vmatpush1.bf16.msra.mxu0 %v3886_v39  ;;  %443 = vmatprep.subr.bf16.mxu1 %v3887_v40  ;;  %v223_v39 = vpack.c.bf16 %v175_v6, %v4557_v28  ;;  %v1556_v40 = vpack.c.bf16 %v4568_v32, %v4565_v31 }
  0x35   : > { %1777 = vmatprep.subr.bf16.mxu0 %v3889_v41  ;;  %v3931_v41 = vld [vmem:[%s5723_s1 + $0x114] ss:$8 sps:$4 sm:$0xff]  }
  0x37   : > { %444 = vmatpush1.bf16.msra.mxu1 %v3891_v42  ;;  %v3934_v42 = vld [vmem:[%s5723_s1 + $0x514] ss:$8 sps:$4 sm:$0xff]  }
  0x38   : > { %1778 = vmatpush1.bf16.msra.mxu0 %v3892_v43  ;;  %445 = vmatprep.subr.bf16.mxu1 %v3893_v44  ;;  %v4594_v43 = vsel %vm899_vm1, %v900_v34, %v901_v35  ;;  %v4598_v44 = vpack.c.bf16 %v4579_v37, %v4474_v52  ;;  %v548_v34 = vrot.slane %v4460_v47, 1  ;;  %v3956_v35 = vld [vmem:[%s5723_s1 + $0x550] ss:$8 sps:$4 sm:$0xff]   ;;  %v3964_v47 = vld [vmem:[%s5723_s1 + $0x564] ss:$8 sps:$4 sm:$0xff]  }
  0x39   : > { %1779 = vmatprep.subr.bf16.mxu0 %v3895_v45  ;;  %5731 = vst [vmem:[#allocation2_spill] sm:$0xff] %v4594_v43  ;;  %v4844_v45 = vld [vmem:[%s4451_s5 + $0xf0] sm:$0x3] }
  0x3a   : > { %v588_v43 = vrot.slane %v4844_v45, 1 }
  0x3b   : > { %446 = vmatpush1.bf16.msra.mxu1 %v3897_v46  ;;  %v3929_v46 = vld [vmem:[%s5723_s1 + $0x110] ss:$8 sps:$4 sm:$0xff]  }
  0x3c   : > { %1780 = vmatpush1.bf16.msra.mxu0 %v3898_v49  ;;  %447 = vmatprep.subr.bf16.mxu1 %v3899_v50  ;;  %v3932_v49 = vld [vmem:[%s5723_s1 + $0x510] ss:$8 sps:$4 sm:$0xff]   ;;  %v3937_v50 = vld [vmem:[%s5723_s1 + $0x124] ss:$8 sps:$4 sm:$0xff]  }
  0x3d   : > { %1781 = vmatprep.subr.bf16.mxu0 %v3901_v53  ;;  %v4615_v53 = vld [vmem:[%s4451_s5 + $0x78] sm:$0x3] }
  0x3f   : > { %448 = vmatpush1.bf16.msra.mxu1 %v3903_v60  ;;  %v566_v60 = vrot.slane %v4579_v37, 1 }
  0x40   : > { %1782 = vmatpush1.bf16.msra.mxu0 %v3904_v61  ;;  %449 = vmatprep.subr.bf16.mxu1 %v3905_v63  ;;  %v567_v61 = vrot.slane %v4615_v53, 1  ;;  %v3941_v63 = vld [vmem:[%s5723_s1 + $0x130] ss:$8 sps:$4 sm:$0xff]  }
  0x41   : > { %1783 = vmatprep.subr.bf16.mxu0 %v3907_v0  ;;  %v3944_v0 = vld [vmem:[%s5723_s1 + $0x530] ss:$8 sps:$4 sm:$0xff]  }
  0x42   : > { %v4651_v6 = vsel %vm544_vm0, %v566_v60, %v567_v61  ;;  %v4743_v60 = vld [vmem:[%s4451_s5 + $0xa0] sm:$0xff] }
  0x43   : > { %450 = vmatpush1.bf16.msra.mxu1 %v3909_v2  ;;  %v3949_v2 = vld [vmem:[%s5723_s1 + $0x144] ss:$8 sps:$4 sm:$0xff]   ;;  %v3962_v61 = vld [vmem:[%s5723_s1 + $0x560] ss:$8 sps:$4 sm:$0xff]  }
  0x44   : > { %1784 = vmatpush1.bf16.msra.mxu0 %v3910_v3  ;;  %451 = vmatprep.subr.bf16.mxu1 %v3911_v5  ;;  %v3952_v3 = vld [vmem:[%s5723_s1 + $0x544] ss:$8 sps:$4 sm:$0xff]   ;;  %v4648_v5 = vld [vmem:[%s4451_s5 + $0x98] sm:$0x3] }
  0x45   : > { %1785 = vmatprep.subr.bf16.mxu0 %v3913_v7  ;;  %v3947_v7 = vld [vmem:[%s5723_s1 + $0x140] ss:$8 sps:$4 sm:$0xff]   ;;  %v573_v11 = vrot.slane %v4648_v5, 1 }
  0x47   : > { %452 = vmatpush1.bf16.msra.mxu1 %v3915_v13  ;;  %v4665_v13 = vld [vmem:[%s4451_s5 + $0x60] sm:$0xff]  ;;  %v4671_v15 = vsel %vm544_vm0, %v572_v9, %v573_v11  ;;  %v4768_v9 = vld [vmem:[%s4451_s5 + $0xd0] sm:$0x3]  ;;  %v575_v11 = vrot.slane %v4743_v60, 1 }
  0x48   : > { %1786 = vmatpush1.bf16.msra.mxu0 %v3916_v14  ;;  %453 = vmatprep.subr.bf16.mxu1 %v3917_v16  ;;  %v4668_v14 = vld [vmem:[%s4451_s5 + $0x70] sm:$0x3]  ;;  %v4675_v16 = vpack.c.bf16 %v4665_v13, %v4524_v10  ;;  %v563_v19 = vrot.slane %v4665_v13, 1  ;;  %v569_v10 = vrot.slane %v4678_v17, 1 }
  0x49   : > { %1787 = vmatprep.subr.bf16.mxu0 %v3919_v23  ;;  %v564_v20 = vrot.slane %v4668_v14, 1  ;;  %v1559_v23 = vpack.c.bf16 %v4671_v15, %v4651_v6 }
  0x4a   : > { %5732 = vst [vmem:[#allocation3_spill] sm:$0xff] %v4675_v16 }
  0x4b   : > { %454 = vmatpush1.bf16.msra.mxu1 %v3921_v24  ;;  %v570_v24 = vrot.slane %v4681_v18, 1 }
  0x4c   : > { %1788 = vmatpush1.bf16.msra.mxu0 %v3922_v25  ;;  %810 = vmatprep.subr.bf16.mxu1 %v3925_v27  ;;  %v4693_v25 = vld [vmem:[%s4451_s5 + $0x18] sm:$0x3] }
  0x4d   : > { %2055 = vmatprep.subr.bf16.mxu0 %v3928_v33  ;;  %v3953_v27 = vld [vmem:[%s5723_s1 + $0x150] ss:$8 sps:$4 sm:$0xff]   ;;  %v4700_v33 = vsel %vm544_vm0, %v563_v19, %v564_v20  ;;  %v3970_v19 = vld [vmem:[%s5723_s1 + $0x574] ss:$8 sps:$4 sm:$0xff]  }
  0x4e   : > { %456 = vmatmul.mubr.bf16.vlgmr.msra.gmra.mrb[0].mxu1 %v223_v39  ;;  %v3961_v39 = vld [vmem:[%s5723_s1 + $0x164] ss:$8 sps:$4 sm:$0xff]  }
  0x4f   : > { %1790 = vmatmul.mubr.bf16.vlgmr.msra.gmra.mrb[0].mxu0 %v1556_v40  ;;  %811 = vmatpush1.bf16.msra.mxu1 %v3923_v36  ;;  %v4707_v36 = vsel %vm544_vm0, %v569_v10, %v570_v24  ;;  %v909_v10 = vrot.slane %v4463_v48, 2  ;;  %v910_v24 = vrot.slane %v4480_v54, 2  ;;  %v4796_v54 = vld [vmem:[%s4451_s5 + $0xe8] sm:$0xff] }
  0x50   : > { %2056 = vmatpush1.bf16.msra.mxu0 %v3926_v38  ;;  %812 = vmatprep.subr.bf16.mxu1 %v3931_v41  ;;  %v4710_v38 = vld [vmem:[%s4451_s5 + $0xa8] sm:$0xff]  ;;  %v1558_v40 = vpack.c.bf16 %v4707_v36, %v4700_v33 }
  0x51   : > { %2057 = vmatprep.subr.bf16.mxu0 %v3934_v42  ;;  %465 = vmatprep.mubr.bf16.mxu1 %v4598_v44  ;;  %v4722_v41 = vpack.c.bf16 %v4710_v38, %v4645_v4  ;;  %v578_v42 = vrot.slane %v4710_v38, 1  ;;  %v4847_v29 = vsel %vm899_vm1, %v909_v10, %v910_v24  ;;  %v3982_v10 = vld [vmem:[%s5723_s1 + $0x594] ss:$8 sps:$4 sm:$0xff]  }
  0x52   : > { %1799 = vmatprep.mubr.bf16.mxu0 %v1559_v23  ;;  %v582_v23 = vrot.slane %v4768_v9, 1 }
  0x53   : > { %813 = vmatpush1.bf16.msra.mxu1 %v3929_v46  ;;  %5733 = vst [vmem:[#allocation4_spill] sm:$0xff] %v4722_v41  ;;  %v549_v46 = vrot.slane %v4693_v25, 1 }
  0x54   : > { %2058 = vmatpush1.bf16.msra.mxu0 %v3932_v49  ;;  %814 = vmatprep.subr.bf16.mxu1 %v3937_v50  ;;  %v4727_v49 = vld [vmem:[%s4451_s5 + $0xb8] sm:$0x3]  ;;  %v4730_v50 = vld [vmem:[%s4451_s5 + $0xc8] sm:$0xff] }
  0x55   : > { %2059 = vmatprep.subr.bf16.mxu0 %v3940_v51  ;;  %v4733_v51 = vld [vmem:[%s4451_s5 + $0xd8] sm:$0x3] }
  0x56   : > { %466 = vmatmul.mubr.bf16.gmra.mrb[4].mxu1 %v4675_v16 }
  0x57   : > { %815 = vmatpush1.bf16.msra.mxu1 %v3935_v56  ;;  %v3959_v56 = vld [vmem:[%s5723_s1 + $0x160] ss:$8 sps:$4 sm:$0xff]   ;;  %1800 = vmatmul.mubr.bf16.gmra.mrb[4].mxu0 %v1558_v40  ;;  %v915_v40 = vrot.slane %v4474_v52, 2  ;;  %v590_v52 = vrot.slane %v4796_v54, 1 }
  0x58   : > { %2060 = vmatpush1.bf16.msra.mxu0 %v3938_v57  ;;  %816 = vmatprep.subr.bf16.mxu1 %v3943_v58  ;;  %v579_v57 = vrot.slane %v4727_v49, 1  ;;  %v584_v58 = vrot.slane %v4730_v50, 1 }
  0x59   : > { %2061 = vmatprep.subr.bf16.mxu0 %v3946_v59  ;;  %475 = vmatprep.mubr.bf16.mxu1 %v4722_v41  ;;  %v585_v59 = vrot.slane %v4733_v51, 1  ;;  %v4860_v41 = vld [vmem:[%s4451_s5 + $0x110] sm:$0x3] }
  0x5b   : > { %817 = vmatpush1.bf16.msra.mxu1 %v3941_v63  ;;  %v3967_v63 = vld [vmem:[%s5723_s1 + $0x174] ss:$8 sps:$4 sm:$0xff]  }
  0x5c   : > { %2062 = vmatpush1.bf16.msra.mxu0 %v3944_v0  ;;  %818 = vmatprep.subr.bf16.mxu1 %v3949_v2  ;;  %v4753_v0 = vpack.c.bf16 %v4743_v60, %v4678_v17  ;;  %v4756_v2 = vld [vmem:[%s4451_s5 + $0xb0] sm:$0x3] }
  0x5d   : > { %2063 = vmatprep.subr.bf16.mxu0 %v3952_v3  ;;  %v4759_v3 = vsel %vm544_vm0, %v578_v42, %v579_v57  ;;  %v550_v42 = vsel %vm544_vm0, %v548_v34, %v549_v46  ;;  %v3976_v57 = vld [vmem:[%s5723_s1 + $0x584] ss:$8 sps:$4 sm:$0xff]   ;;  %v4814_v34 = vld [vmem:[%s4451_s5 + $0xf8] sm:$0x3] }
  0x5e   : > { %5734 = vst [vmem:[#allocation5_spill] sm:$0xff] %v4753_v0  ;;  %476 = vmatmul.mubr.bf16.gmra.mrb[8].mxu1 %v4753_v0  ;;  %v4817_v46 = vld [vmem:[%s4451_s5 + $0x108] sm:$0xff]  ;;  %v4857_v0 = vld [vmem:[%s4451_s5 + $0x100] sm:$0xff] }
  0x5f   : > { %819 = vmatpush1.bf16.msra.mxu1 %v3947_v7  ;;  %v4762_v7 = vsel %vm544_vm0, %v584_v58, %v585_v59  ;;  %v4810_v59 = vpack.c.bf16 %v4796_v54, %v4730_v50 }
  0x60   : > { %2064 = vmatpush1.bf16.msra.mxu0 %v3950_v8  ;;  %820 = vmatprep.subr.bf16.mxu1 %v3955_v12  ;;  %v4765_v8 = vld [vmem:[%s4451_s5 + $0xc0] sm:$0xff]  ;;  %v576_v12 = vrot.slane %v4756_v2, 1  ;;  %v1561_v20 = vpack.c.bf16 %v4762_v7, %v4759_v3 }
  0x61   : > { %2065 = vmatprep.subr.bf16.mxu0 %v3958_v22  ;;  %v581_v22 = vrot.slane %v4765_v8, 1  ;;  %5735 = vst [vmem:[#allocation6_spill] sm:$0xff] %v4810_v59  ;;  %485 = vmatprep.mubr.bf16.mxu1 %v4810_v59 }
  0x62   : > { %1809 = vmatprep.mubr.bf16.mxu0 %v1561_v20  ;;  %v610_v20 = vpack.c.bf16 %v4496_v62, %v550_v42 }
  0x63   : > { %821 = vmatpush1.bf16.msra.mxu1 %v3953_v27  ;;  %v3965_v27 = vld [vmem:[%s5723_s1 + $0x170] ss:$8 sps:$4 sm:$0xff]   ;;  %v4793_v48 = vsel %vm544_vm0, %v581_v22, %v582_v23  ;;  %v3974_v22 = vld [vmem:[%s5723_s1 + $0x580] ss:$8 sps:$4 sm:$0xff]   ;;  %v3979_v23 = vld [vmem:[%s5723_s1 + $0x194] ss:$8 sps:$4 sm:$0xff]  }
  0x64   : > { %2066 = vmatpush1.bf16.msra.mxu0 %v3956_v35  ;;  %822 = vmatprep.subr.bf16.mxu1 %v3961_v39  ;;  %v4786_v35 = vsel %vm544_vm0, %v575_v11, %v576_v12  ;;  %v916_v39 = vrot.slane %v4483_v55, 2  ;;  %v3973_v55 = vld [vmem:[%s5723_s1 + $0x184] ss:$8 sps:$4 sm:$0xff]   ;;  %v591_v11 = vrot.slane %v4814_v34, 1 }
  0x65   : > { %2067 = vmatprep.subr.bf16.mxu0 %v3964_v47  ;;  %v3968_v47 = vld [vmem:[%s5723_s1 + $0x570] ss:$8 sps:$4 sm:$0xff]   ;;  %v1560_v58 = vpack.c.bf16 %v4793_v48, %v4786_v35 }
  0x66   : > { %v917_v59 = vsel %vm899_vm1, %v915_v40, %v916_v39  ;;  %v4851_v62 = vsel %vm544_vm0, %v590_v52, %v591_v11  ;;  %v1549_v39 = vrot.slane %v4860_v41, 1  ;;  %v3977_v40 = vld [vmem:[%s5723_s1 + $0x190] ss:$8 sps:$4 sm:$0xff]   ;;  %v921_v52 = vrot.slane %v4579_v37, 2  ;;  %v3985_v37 = vld [vmem:[%s5723_s1 + $0x1a4] ss:$8 sps:$4 sm:$0xff]  }
  0x67   : > { %823 = vmatpush1.bf16.msra.mxu1 %v3959_v56  ;;  %v4820_v56 = vld [vmem:[%s4451_s5 + $0x118] sm:$0x3]  ;;  %1810 = vmatmul.mubr.bf16.gmra.mrb[8].mxu0 %v1560_v58  ;;  %v922_v11 = vrot.slane %v4615_v53, 2  ;;  %v3988_v53 = vld [vmem:[%s5723_s1 + $0x5a4] ss:$8 sps:$4 sm:$0xff]  }
  0x68   : > { %2068 = vmatpush1.bf16.msra.mxu0 %v3962_v61  ;;  %824 = vmatprep.subr.bf16.mxu1 %v3967_v63  ;;  %v3971_v61 = vld [vmem:[%s5723_s1 + $0x180] ss:$8 sps:$4 sm:$0xff]   ;;  %v1551_v63 = vrot.slane %v4817_v46, 1  ;;  %v1552_v12 = vrot.slane %v4820_v56, 1 }
  0x69   : > { %2069 = vmatprep.subr.bf16.mxu0 %v3970_v19  ;;  %v4830_v19 = vld [vmem:[%s4451_s5 + $0xe0] sm:$0xff] }
  0x6a   : > { %v4841_v58 = vpack.c.bf16 %v4830_v19, %v4765_v8  ;;  %v4854_v42 = vsel %vm544_vm0, %v1551_v63, %v1552_v12  ;;  %v587_v16 = vrot.slane %v4830_v19, 1  ;;  %v918_v63 = vrot.slane %v4665_v13, 2 }
  0x6b   : > { %825 = vmatpush1.bf16.msra.mxu1 %v3965_v27  ;;  %v1563_v24 = vpack.c.bf16 %v4854_v42, %v4851_v62  ;;  %v1548_v27 = vrot.slane %v4857_v0, 1  ;;  %v919_v12 = vrot.slane %v4668_v14, 2  ;;  %v3983_v14 = vld [vmem:[%s5723_s1 + $0x1a0] ss:$8 sps:$4 sm:$0xff]  }
  0x6c   : > { %2070 = vmatpush1.bf16.msra.mxu0 %v3968_v47  ;;  %826 = vmatprep.subr.bf16.mxu1 %v3973_v55  ;;  %v4873_v47 = vsel %vm544_vm0, %v587_v16, %v588_v43  ;;  %v3980_v43 = vld [vmem:[%s5723_s1 + $0x590] ss:$8 sps:$4 sm:$0xff]  }
  0x6d   : > { %2071 = vmatprep.subr.bf16.mxu0 %v3976_v57  ;;  %486 = vmatmul.mubr.bf16.gmra.mrb[12].mxu1 %v4841_v58  ;;  %v4879_v55 = vsel %vm544_vm0, %v1548_v27, %v1549_v39  ;;  %v1855_v57 = vpack.c.bf16 %v917_v59, %v4847_v29  ;;  %v927_v39 = vrot.slane %v4645_v4, 2  ;;  %v3989_v4 = vld [vmem:[%s5723_s1 + $0x1b0] ss:$8 sps:$4 sm:$0xff]  }
  0x6e   : > { %1819 = vmatprep.mubr.bf16.mxu0 %v1563_v24  ;;  %842 = vmatprep.mubr.bf16.mxu1 %v610_v20  ;;  %v1562_v16 = vpack.c.bf16 %v4879_v55, %v4873_v47  ;;  %v3986_v20 = vld [vmem:[%s5723_s1 + $0x5a0] ss:$8 sps:$4 sm:$0xff]   ;;  %v3994_v24 = vld [vmem:[%s5723_s1 + $0x5b4] ss:$8 sps:$4 sm:$0xff]  }
  0x6f   : > { %827 = vmatpush1.bf16.msra.mxu1 %v3971_v61  ;;  %v4898_v61 = vsel %vm899_vm1, %v921_v52, %v922_v11  ;;  %v933_v52 = vrot.slane %v4710_v38, 2  ;;  %v934_v11 = vrot.slane %v4727_v49, 2  ;;  %v4000_v49 = vld [vmem:[%s5723_s1 + $0x5c4] ss:$8 sps:$4 sm:$0xff]  }
  0x70   : > { %2072 = vmatpush1.bf16.msra.mxu0 %v3974_v22  ;;  %828 = vmatprep.subr.bf16.mxu1 %v3979_v23  ;;  %v4907_v22 = vsel %vm899_vm1, %v918_v63, %v919_v12  ;;  %v4910_v23 = vpack.c.bf16 %v4898_v61, %v917_v59  ;;  %v924_v59 = vrot.slane %v4678_v17, 2 }
  0x71   : > { %2073 = vmatprep.subr.bf16.mxu0 %v3982_v10  ;;  %1820 = vmatmul.mubr.bf16.gmra.mrb[12].mxu0 %v1562_v16  ;;  %v3991_v10 = vld [vmem:[%s5723_s1 + $0x1b4] ss:$8 sps:$4 sm:$0xff]   ;;  %v4920_v27 = vpack.c.bf16 %v4907_v22, %v4551_v26  ;;  %v931_v16 = vrot.slane %v4756_v2, 2  ;;  %v4949_v12 = vsel %vm899_vm1, %v933_v52, %v934_v11  ;;  %v937_v52 = vrot.slane %v4768_v9, 2  ;;  %v4009_v9 = vld [vmem:[%s5723_s1 + $0x1e4] ss:$8 sps:$4 sm:$0xff]  }
  0x72   : > { %2087 = vmatprep.mubr.bf16.mxu0 %v1855_v57  ;;  %v925_v57 = vrot.slane %v4681_v18, 2  ;;  %v3997_v18 = vld [vmem:[%s5723_s1 + $0x1c4] ss:$8 sps:$4 sm:$0xff]   ;;  %v945_v11 = vrot.slane %v4796_v54, 2  ;;  %v545_v54 = vrot.slane %v4557_v28, 1 }
  0x73   : > { %829 = vmatpush1.bf16.msra.mxu1 %v3977_v40  ;;  %v928_v40 = vrot.slane %v4648_v5, 2  ;;  %v3992_v5 = vld [vmem:[%s5723_s1 + $0x5b0] ss:$8 sps:$4 sm:$0xff]   ;;  %v4007_v28 = vld [vmem:[%s5723_s1 + $0x1e0] ss:$8 sps:$4 sm:$0xff]  }
  0x74   : > { %2074 = vmatpush1.bf16.msra.mxu0 %v3980_v43  ;;  %830 = vmatprep.subr.bf16.mxu1 %v3985_v37  ;;  %v930_v43 = vrot.slane %v4743_v60, 2  ;;  %v4946_v63 = vsel %vm899_vm1, %v924_v59, %v925_v57  ;;  %v940_v59 = vrot.slane %v4733_v51, 2  ;;  %v936_v57 = vrot.slane %v4765_v8, 2  ;;  %v4004_v51 = vld [vmem:[%s5723_s1 + $0x5d0] ss:$8 sps:$4 sm:$0xff]  }
  0x75   : > { %2075 = vmatprep.subr.bf16.mxu0 %v3988_v53  ;;  %v4943_v2 = vsel %vm899_vm1, %v927_v39, %v928_v40  ;;  %v3995_v53 = vld [vmem:[%s5723_s1 + $0x1c0] ss:$8 sps:$4 sm:$0xff]   ;;  %v4006_v39 = vld [vmem:[%s5723_s1 + $0x5d4] ss:$8 sps:$4 sm:$0xff]   ;;  %v939_v40 = vrot.slane %v4730_v50, 2 }
  0x76   : > { %v4952_v37 = vsel %vm899_vm1, %v930_v43, %v931_v16  ;;  %v946_v43 = vrot.slane %v4814_v34, 2  ;;  %v942_v16 = vrot.slane %v4830_v19, 2  ;;  %v4999_v19 = vsel %vm899_vm1, %v936_v57, %v937_v52  ;;  %v4013_v57 = vld [vmem:[%s5723_s1 + $0x1f0] ss:$8 sps:$4 sm:$0xff]  }
  0x77   : > { %831 = vmatpush1.bf16.msra.mxu1 %v3983_v14  ;;  %v3998_v14 = vld [vmem:[%s5723_s1 + $0x5c0] ss:$8 sps:$4 sm:$0xff]   ;;  %v4996_v34 = vsel %vm899_vm1, %v939_v40, %v940_v59  ;;  %v4018_v40 = vld [vmem:[%s5723_s1 + $0x5f4] ss:$8 sps:$4 sm:$0xff]   ;;  %v4016_v52 = vld [vmem:[%s5723_s1 + $0x5f0] ss:$8 sps:$4 sm:$0xff]  }
  0x78   : > { %2076 = vmatpush1.bf16.msra.mxu0 %v3986_v20  ;;  %832 = vmatprep.subr.bf16.mxu1 %v3991_v10  ;;  %v4962_v20 = vpack.c.bf16 %v4949_v12, %v4943_v2  ;;  %v4966_v10 = vpack.c.bf16 %v4952_v37, %v4946_v63 }
  0x79   : > { %2077 = vmatprep.subr.bf16.mxu0 %v3994_v24  ;;  %v4003_v24 = vld [vmem:[%s5723_s1 + $0x1d4] ss:$8 sps:$4 sm:$0xff]  }
  0x7b   : > { %833 = vmatpush1.bf16.msra.mxu1 %v3989_v4  ;;  %v943_v4 = vrot.slane %v4844_v45, 2  ;;  %v4012_v45 = vld [vmem:[%s5723_s1 + $0x5e4] ss:$8 sps:$4 sm:$0xff]  }
  0x7c   : > { %2078 = vmatpush1.bf16.msra.mxu0 %v3992_v5  ;;  %834 = vmatprep.subr.bf16.mxu1 %v3997_v18  ;;  %v4001_v5 = vld [vmem:[%s5723_s1 + $0x1d0] ss:$8 sps:$4 sm:$0xff]   ;;  %v5002_v18 = vsel %vm899_vm1, %v945_v11, %v946_v43  ;;  %v4021_v11 = vld [vmem:[%s5723_s1 + $0x204] ss:$8 sps:$4 sm:$0xff]  }
  0x7d   : > { %2079 = vmatprep.subr.bf16.mxu0 %v4000_v49  ;;  %v5005_v49 = vsel %vm899_vm1, %v942_v16, %v943_v4  ;;  %v4024_v43 = vld [vmem:[%s5723_s1 + $0x604] ss:$8 sps:$4 sm:$0xff]   ;;  %v4019_v4 = vld [vmem:[%s5723_s1 + $0x200] ss:$8 sps:$4 sm:$0xff]  }
  0x7f   : > { %835 = vmatpush1.bf16.msra.mxu1 %v3995_v53  ;;  %v546_v53 = vrot.slane %v4562_v30, 1  ;;  %v4015_v30 = vld [vmem:[%s5723_s1 + $0x1f4] ss:$8 sps:$4 sm:$0xff]  }
  0x80   : > { %2080 = vmatpush1.bf16.msra.mxu0 %v3998_v14  ;;  %836 = vmatprep.subr.bf16.mxu1 %v4003_v24  ;;  %v4010_v14 = vld [vmem:[%s5723_s1 + $0x5e0] ss:$8 sps:$4 sm:$0xff]   ;;  %v5016_v24 = vpack.c.bf16 %v5002_v18, %v4996_v34 }
  0x81   : > { %2081 = vmatprep.subr.bf16.mxu0 %v4006_v39  ;;  %v5020_v39 = vpack.c.bf16 %v5005_v49, %v4999_v19  ;;  %v547_v59 = vsel %vm544_vm0, %v545_v54, %v546_v53  ;;  %v5736_v54 = vpack.c.bf16 %v4551_v26, %v4538_v21  ;;  %v4025_v53 = vld [vmem:[%s5723_s1 + $0x210] ss:$8 sps:$4 sm:$0xff]   ;;  %v4036_v26 = vld [vmem:[%s5723_s1 + $0x624] ss:$8 sps:$4 sm:$0xff]  }
  0x82   : > { %v609_v16 = vpack.c.bf16 %v4565_v31, %v547_v59  ;;  %v4030_v31 = vld [vmem:[%s5723_s1 + $0x614] ss:$8 sps:$4 sm:$0xff]   ;;  %v1850_v59 = vrot.slane %v4820_v56, 2  ;;  %v5120_v56 = vpack.c.bf16 %v4786_v35, %v4707_v36  ;;  %v4046_v36 = vld [vmem:[%s5723_s1 + $0x640] ss:$8 sps:$4 sm:$0xff]   ;;  %v1847_v35 = vrot.slane %v4860_v41, 2 }
  0x83   : > { %837 = vmatpush1.bf16.msra.mxu1 %v4001_v5  ;;  %v4022_v5 = vld [vmem:[%s5723_s1 + $0x600] ss:$8 sps:$4 sm:$0xff]  }
  0x84   : > { %2082 = vmatpush1.bf16.msra.mxu0 %v4004_v51  ;;  %838 = vmatprep.subr.bf16.mxu1 %v4009_v9  ;;  %v4027_v51 = vld [vmem:[%s5723_s1 + $0x214] ss:$8 sps:$4 sm:$0xff]   ;;  %v5056_v9 = vpack.c.bf16 %v4651_v6, %v4505_v1  ;;  %v4033_v1 = vld [vmem:[%s5723_s1 + $0x224] ss:$8 sps:$4 sm:$0xff]   ;;  %v5078_v6 = vpack.c.bf16 %v4700_v33, %v4568_v32 }
  0x85   : > { %2083 = vmatprep.subr.bf16.mxu0 %v4012_v45  ;;  %v1857_v45 = vpack.c.bf16 %v4943_v2, %v4898_v61  ;;  %v1856_v61 = vpack.c.bf16 %v4946_v63, %v4907_v22  ;;  %v4031_v2 = vld [vmem:[%s5723_s1 + $0x220] ss:$8 sps:$4 sm:$0xff]   ;;  %v4039_v32 = vld [vmem:[%s5723_s1 + $0x234] ss:$8 sps:$4 sm:$0xff]   ;;  %v5098_v22 = vpack.c.bf16 %v4759_v3, %v4671_v15  ;;  %v1859_v63 = vpack.c.bf16 %v4996_v34, %v4949_v12  ;;  %v4040_v15 = vld [vmem:[%s5723_s1 + $0x630] ss:$8 sps:$4 sm:$0xff]  }
  0x86   : > { %v4042_v33 = vld [vmem:[%s5723_s1 + $0x634] ss:$8 sps:$4 sm:$0xff]   ;;  %v4045_v3 = vld [vmem:[%s5723_s1 + $0x244] ss:$8 sps:$4 sm:$0xff]   ;;  %v1858_v12 = vpack.c.bf16 %v4999_v19, %v4952_v37  ;;  %v1259_v37 = vpack.c.bf16 %v4730_v50, %v4710_v38  ;;  %v1258_v19 = vpack.c.bf16 %v4765_v8, %v4743_v60 }
  0x87   : > { %839 = vmatpush1.bf16.msra.mxu1 %v4007_v28  ;;  %v4028_v28 = vld [vmem:[%s5723_s1 + $0x610] ss:$8 sps:$4 sm:$0xff]   ;;  %v4228_v38 = vld [vmem:[%s5723_s1 + $0x854] ss:$8 sps:$4 sm:$0xff]   ;;  %v4267_v50 = vld [vmem:[%s4451_s5 + $0xe8] sm:$0xff] }
  0x88   : > { %2084 = vmatpush1.bf16.msra.mxu0 %v4010_v14  ;;  %840 = vmatprep.subr.bf16.mxu1 %v4015_v30  ;;  %v4034_v14 = vld [vmem:[%s5723_s1 + $0x620] ss:$8 sps:$4 sm:$0xff]   ;;  %v1256_v30 = vpack.c.bf16 %v4678_v17, %v4665_v13 }
  0x89   : > { %2085 = vmatprep.subr.bf16.mxu0 %v4018_v40  ;;  %v1849_v40 = vrot.slane %v4817_v46, 2  ;;  %v4048_v46 = vld [vmem:[%s5723_s1 + $0x644] ss:$8 sps:$4 sm:$0xff]  }
  0x8a   : > { %v4268_v60 = vld [vmem:[%s4451_s5 + $0xe0] sm:$0xff] }
  0x8b   : > { %841 = vmatpush1.bf16.msra.mxu1 %v4013_v57  ;;  %v4037_v57 = vld [vmem:[%s5723_s1 + $0x230] ss:$8 sps:$4 sm:$0xff]   ;;  %v5125_v34 = vsel %vm899_vm1, %v1849_v40, %v1850_v59  ;;  %v4269_v8 = vld [vmem:[%s4451_s5 + $0x100] sm:$0xff] }
  0x8c   : > { %2086 = vmatpush1.bf16.msra.mxu0 %v4016_v52  ;;  %1165 = vmatprep.subr.bf16.mxu1 %v4021_v11  ;;  %v1846_v52 = vrot.slane %v4857_v0, 2  ;;  %v4043_v11 = vld [vmem:[%s5723_s1 + $0x240] ss:$8 sps:$4 sm:$0xff]   ;;  %v1861_v41 = vpack.c.bf16 %v5125_v34, %v5002_v18  ;;  %v4057_v18 = vld [vmem:[%s5723_s1 + $0x264] ss:$8 sps:$4 sm:$0xff]  }
  0x8d   : > { %2339 = vmatprep.subr.bf16.mxu0 %v4024_v43  ;;  %v4051_v43 = vld [vmem:[%s5723_s1 + $0x254] ss:$8 sps:$4 sm:$0xff]   ;;  %v4073_v40 = vld [vmem:[%s5723_s1 + $0x290] ss:$8 sps:$4 sm:$0xff]  }
  0x8e   : > { %843 = vmatmul.mubr.bf16.vlgmr.msra.gmra.mrb[0].mxu1 %v609_v16  ;;  %v4054_v16 = vld [vmem:[%s5723_s1 + $0x654] ss:$8 sps:$4 sm:$0xff]   ;;  %v4076_v59 = vld [vmem:[%s5723_s1 + $0x690] ss:$8 sps:$4 sm:$0xff]  }
  0x8f   : > { %2088 = vmatmul.mubr.bf16.vlgmr.msra.gmra.mrb[0].mxu0 %v5736_v54  ;;  %1166 = vmatpush1.bf16.msra.mxu1 %v4019_v4  ;;  %v5147_v4 = vpack.c.bf16 %v4851_v62, %v4762_v7  ;;  %v4052_v7 = vld [vmem:[%s5723_s1 + $0x650] ss:$8 sps:$4 sm:$0xff]   ;;  %v5161_v62 = vsel %vm899_vm1, %v1846_v52, %v1847_v35  ;;  %v5172_v54 = vpack.c.bf16 %v4873_v47, %v4793_v48  ;;  %v4063_v48 = vld [vmem:[%s5723_s1 + $0x274] ss:$8 sps:$4 sm:$0xff]   ;;  %v4093_v35 = vld [vmem:[%s5723_s1 + $0x2c4] ss:$8 sps:$4 sm:$0xff]  }
  0x90   : > { %2340 = vmatpush1.bf16.msra.mxu0 %v4022_v5  ;;  %1167 = vmatprep.subr.bf16.mxu1 %v4027_v51  ;;  %v4259_v5 = vld [vmem:[%s4451_s5 + $0x8] sm:$0xff]  ;;  %v4066_v47 = vld [vmem:[%s5723_s1 + $0x674] ss:$8 sps:$4 sm:$0xff]  }
  0x91   : > { %2341 = vmatprep.subr.bf16.mxu0 %v4030_v31  ;;  %852 = vmatprep.mubr.bf16.mxu1 %v5056_v9  ;;  %v903_v51 = vrot.slane %v4259_v5, 2  ;;  %v904_v31 = vrot.slane %v4693_v25, 2  ;;  %v4060_v25 = vld [vmem:[%s5723_s1 + $0x664] ss:$8 sps:$4 sm:$0xff]   ;;  %v4090_v52 = vld [vmem:[%s5723_s1 + $0x6b4] ss:$8 sps:$4 sm:$0xff]  }
  0x92   : > { %2097 = vmatprep.mubr.bf16.mxu0 %v1857_v45  ;;  %v4049_v45 = vld [vmem:[%s5723_s1 + $0x250] ss:$8 sps:$4 sm:$0xff]   ;;  %v4099_v5 = vld [vmem:[%s5723_s1 + $0x2d4] ss:$8 sps:$4 sm:$0xff]  }
  0x93   : > { %1168 = vmatpush1.bf16.msra.mxu1 %v4025_v53  ;;  %v1860_v53 = vpack.c.bf16 %v5161_v62, %v5005_v49 }
  0x94   : > { %2342 = vmatpush1.bf16.msra.mxu0 %v4028_v28  ;;  %1169 = vmatprep.subr.bf16.mxu1 %v4033_v1  ;;  %v905_v28 = vsel %vm899_vm1, %v903_v51, %v904_v31  ;;  %v4055_v1 = vld [vmem:[%s5723_s1 + $0x260] ss:$8 sps:$4 sm:$0xff]   ;;  %v4102_v51 = vld [vmem:[%s5723_s1 + $0x6d4] ss:$8 sps:$4 sm:$0xff]   ;;  %v4097_v31 = vld [vmem:[%s5723_s1 + $0x2d0] ss:$8 sps:$4 sm:$0xff]  }
  0x95   : > { %2343 = vmatprep.subr.bf16.mxu0 %v4036_v26  ;;  %v4058_v26 = vld [vmem:[%s5723_s1 + $0x660] ss:$8 sps:$4 sm:$0xff]   ;;  %v965_v49 = vpack.c.bf16 %v4847_v29, %v905_v28  ;;  %v4072_v29 = vld [vmem:[%s5723_s1 + $0x684] ss:$8 sps:$4 sm:$0xff]   ;;  %v4111_v28 = vld [vmem:[%s5723_s1 + $0x2f4] ss:$8 sps:$4 sm:$0xff]  }
  0x96   : > { %853 = vmatmul.mubr.bf16.gmra.mrb[4].mxu1 %v5078_v6 }
  0x97   : > { %2098 = vmatmul.mubr.bf16.gmra.mrb[4].mxu0 %v1856_v61  ;;  %1170 = vmatpush1.bf16.msra.mxu1 %v4031_v2  ;;  %v4061_v61 = vld [vmem:[%s5723_s1 + $0x270] ss:$8 sps:$4 sm:$0xff]  }
  0x98   : > { %2344 = vmatpush1.bf16.msra.mxu0 %v4034_v14  ;;  %1171 = vmatprep.subr.bf16.mxu1 %v4039_v32  ;;  %v4064_v2 = vld [vmem:[%s5723_s1 + $0x670] ss:$8 sps:$4 sm:$0xff]   ;;  %v4069_v14 = vld [vmem:[%s5723_s1 + $0x284] ss:$8 sps:$4 sm:$0xff]   ;;  %v4067_v32 = vld [vmem:[%s5723_s1 + $0x280] ss:$8 sps:$4 sm:$0xff]  }
  0x99   : > { %2345 = vmatprep.subr.bf16.mxu0 %v4042_v33  ;;  %862 = vmatprep.mubr.bf16.mxu1 %v5098_v22  ;;  %v4070_v33 = vld [vmem:[%s5723_s1 + $0x680] ss:$8 sps:$4 sm:$0xff]  }
  0x9a   : > { %2107 = vmatprep.mubr.bf16.mxu0 %v1859_v63  ;;  %v4075_v63 = vld [vmem:[%s5723_s1 + $0x294] ss:$8 sps:$4 sm:$0xff]  }
  0x9b   : > { %1172 = vmatpush1.bf16.msra.mxu1 %v4037_v57  ;;  %v4081_v57 = vld [vmem:[%s5723_s1 + $0x2a4] ss:$8 sps:$4 sm:$0xff]  }
  0x9c   : > { %2346 = vmatpush1.bf16.msra.mxu0 %v4040_v15  ;;  %1173 = vmatprep.subr.bf16.mxu1 %v4045_v3  ;;  %v4084_v15 = vld [vmem:[%s5723_s1 + $0x6a4] ss:$8 sps:$4 sm:$0xff]   ;;  %v4079_v3 = vld [vmem:[%s5723_s1 + $0x2a0] ss:$8 sps:$4 sm:$0xff]  }
  0x9d   : > { %2347 = vmatprep.subr.bf16.mxu0 %v4048_v46  ;;  %v4082_v46 = vld [vmem:[%s5723_s1 + $0x6a0] ss:$8 sps:$4 sm:$0xff]  }
  0x9e   : > { %863 = vmatmul.mubr.bf16.gmra.mrb[8].mxu1 %v5120_v56 }
  0x9f   : > { %2108 = vmatmul.mubr.bf16.gmra.mrb[8].mxu0 %v1858_v12  ;;  %1174 = vmatpush1.bf16.msra.mxu1 %v4043_v11  ;;  %v4087_v12 = vld [vmem:[%s5723_s1 + $0x2b4] ss:$8 sps:$4 sm:$0xff]   ;;  %v4085_v11 = vld [vmem:[%s5723_s1 + $0x2b0] ss:$8 sps:$4 sm:$0xff]  }
  0xa0   : > { %2348 = vmatpush1.bf16.msra.mxu0 %v4046_v36  ;;  %1175 = vmatprep.subr.bf16.mxu1 %v4051_v43  ;;  %v4088_v36 = vld [vmem:[%s5723_s1 + $0x6b0] ss:$8 sps:$4 sm:$0xff]   ;;  %v4096_v43 = vld [vmem:[%s5723_s1 + $0x6c4] ss:$8 sps:$4 sm:$0xff]  }
  0xa1   : > { %2349 = vmatprep.subr.bf16.mxu0 %v4054_v16  ;;  %872 = vmatprep.mubr.bf16.mxu1 %v5147_v4  ;;  %v4091_v16 = vld [vmem:[%s5723_s1 + $0x2c0] ss:$8 sps:$4 sm:$0xff]  }
  0xa2   : > { %2117 = vmatprep.mubr.bf16.mxu0 %v1861_v41  ;;  %v4094_v41 = vld [vmem:[%s5723_s1 + $0x6c0] ss:$8 sps:$4 sm:$0xff]  }
  0xa3   : > { %1176 = vmatpush1.bf16.msra.mxu1 %v4049_v45  ;;  %v4100_v45 = vld [vmem:[%s5723_s1 + $0x6d0] ss:$8 sps:$4 sm:$0xff]  }
  0xa4   : > { %2350 = vmatpush1.bf16.msra.mxu0 %v4052_v7  ;;  %1177 = vmatprep.subr.bf16.mxu1 %v4057_v18  ;;  %v4105_v7 = vld [vmem:[%s5723_s1 + $0x2e4] ss:$8 sps:$4 sm:$0xff]  }
  0xa5   : > { %2351 = vmatprep.subr.bf16.mxu0 %v4060_v25  ;;  %v4108_v18 = vld [vmem:[%s5723_s1 + $0x6e4] ss:$8 sps:$4 sm:$0xff]   ;;  %v4103_v25 = vld [vmem:[%s5723_s1 + $0x2e0] ss:$8 sps:$4 sm:$0xff]  }
  0xa6   : > { %873 = vmatmul.mubr.bf16.gmra.mrb[12].mxu1 %v5172_v54 }
  0xa7   : > { %2118 = vmatmul.mubr.bf16.gmra.mrb[12].mxu0 %v1860_v53  ;;  %1178 = vmatpush1.bf16.msra.mxu1 %v4055_v1  ;;  %v4106_v53 = vld [vmem:[%s5723_s1 + $0x6e0] ss:$8 sps:$4 sm:$0xff]   ;;  %v4114_v1 = vld [vmem:[%s5723_s1 + $0x6f4] ss:$8 sps:$4 sm:$0xff]  }
  0xa8   : > { %2352 = vmatpush1.bf16.msra.mxu0 %v4058_v26  ;;  %1179 = vmatprep.subr.bf16.mxu1 %v4063_v48  ;;  %v4109_v26 = vld [vmem:[%s5723_s1 + $0x2f0] ss:$8 sps:$4 sm:$0xff]  }
  0xa9   : > { %2353 = vmatprep.subr.bf16.mxu0 %v4066_v47  ;;  %1197 = vmatprep.mubr.bf16.mxu1 %v965_v49  ;;  %v4112_v48 = vld [vmem:[%s5723_s1 + $0x6f0] ss:$8 sps:$4 sm:$0xff]   ;;  %v4117_v47 = vld [vmem:[%s5723_s1 + $0x304] ss:$8 sps:$4 sm:$0xff]  }
  0xaa   : > { %2371 = vmatprep.mubr.bf16.mxu0 %v4598_v44  ;;  %v4078_v44 = vld [vmem:[%s5723_s1 + $0x694] ss:$8 sps:$4 sm:$0xff]   ;;  %v4120_v49 = vld [vmem:[%s5723_s1 + $0x704] ss:$8 sps:$4 sm:$0xff]  }
  0xab   : > { %1180 = vmatpush1.bf16.msra.mxu1 %v4061_v61  ;;  %v4115_v61 = vld [vmem:[%s5723_s1 + $0x300] ss:$8 sps:$4 sm:$0xff]  }
  0xac   : > { %2354 = vmatpush1.bf16.msra.mxu0 %v4064_v2  ;;  %1181 = vmatprep.subr.bf16.mxu1 %v4069_v14  ;;  %v4118_v2 = vld [vmem:[%s5723_s1 + $0x700] ss:$8 sps:$4 sm:$0xff]   ;;  %v4123_v14 = vld [vmem:[%s5723_s1 + $0x314] ss:$8 sps:$4 sm:$0xff]  }
  0xad   : > { %2355 = vmatprep.subr.bf16.mxu0 %v4072_v29  ;;  %v4126_v29 = vld [vmem:[%s5723_s1 + $0x714] ss:$8 sps:$4 sm:$0xff]  }
  0xaf   : > { %1182 = vmatpush1.bf16.msra.mxu1 %v4067_v32  ;;  %v5737_v32 = vld [vmem:[#allocation2_spill] sm:$0xff] }
  0xb0   : > { %2356 = vmatpush1.bf16.msra.mxu0 %v4070_v33  ;;  %1183 = vmatprep.subr.bf16.mxu1 %v4075_v63  ;;  %v5738_v33 = vpack.c.bf16 %v4538_v21, %v5737_v32  ;;  %v5739_v63 = vld [vmem:[#allocation3_spill] sm:$0xff]  ;;  %v4160_v32 = vld [vmem:[%s5723_s1 + $0x770] ss:$8 sps:$4 sm:$0xff]  }
  0xb1   : > { %2357 = vmatprep.subr.bf16.mxu0 %v4078_v44  ;;  %v4121_v44 = vld [vmem:[%s5723_s1 + $0x310] ss:$8 sps:$4 sm:$0xff]   ;;  %v4132_v21 = vld [vmem:[%s5723_s1 + $0x724] ss:$8 sps:$4 sm:$0xff]  }
  0xb3   : > { %1184 = vmatpush1.bf16.msra.mxu1 %v4073_v40  ;;  %v4124_v40 = vld [vmem:[%s5723_s1 + $0x710] ss:$8 sps:$4 sm:$0xff]  }
  0xb4   : > { %2358 = vmatpush1.bf16.msra.mxu0 %v4076_v59  ;;  %1185 = vmatprep.subr.bf16.mxu1 %v4081_v57  ;;  %v4129_v59 = vld [vmem:[%s5723_s1 + $0x324] ss:$8 sps:$4 sm:$0xff]   ;;  %v5740_v57 = vld [vmem:[#allocation4_spill] sm:$0xff] }
  0xb5   : > { %2359 = vmatprep.subr.bf16.mxu0 %v4084_v15  ;;  %v4127_v15 = vld [vmem:[%s5723_s1 + $0x320] ss:$8 sps:$4 sm:$0xff]  }
  0xb7   : > { %1186 = vmatpush1.bf16.msra.mxu1 %v4079_v3  ;;  %v4130_v3 = vld [vmem:[%s5723_s1 + $0x720] ss:$8 sps:$4 sm:$0xff]  }
  0xb8   : > { %2360 = vmatpush1.bf16.msra.mxu0 %v4082_v46  ;;  %1187 = vmatprep.subr.bf16.mxu1 %v4087_v12  ;;  %v4135_v46 = vld [vmem:[%s5723_s1 + $0x334] ss:$8 sps:$4 sm:$0xff]  }
  0xb9   : > { %2361 = vmatprep.subr.bf16.mxu0 %v4090_v52  ;;  %v4138_v12 = vld [vmem:[%s5723_s1 + $0x734] ss:$8 sps:$4 sm:$0xff]  }
  0xba   : > { %v5741_v52 = vld [vmem:[#allocation5_spill] sm:$0xff] }
  0xbb   : > { %1188 = vmatpush1.bf16.msra.mxu1 %v4085_v11  ;;  %v4133_v11 = vld [vmem:[%s5723_s1 + $0x330] ss:$8 sps:$4 sm:$0xff]  }
  0xbc   : > { %2362 = vmatpush1.bf16.msra.mxu0 %v4088_v36  ;;  %1189 = vmatprep.subr.bf16.mxu1 %v4093_v35  ;;  %v4136_v36 = vld [vmem:[%s5723_s1 + $0x730] ss:$8 sps:$4 sm:$0xff]   ;;  %v4141_v35 = vld [vmem:[%s5723_s1 + $0x344] ss:$8 sps:$4 sm:$0xff]  }
  0xbd   : > { %2363 = vmatprep.subr.bf16.mxu0 %v4096_v43  ;;  %v4144_v43 = vld [vmem:[%s5723_s1 + $0x744] ss:$8 sps:$4 sm:$0xff]  }
  0xbf   : > { %1190 = vmatpush1.bf16.msra.mxu1 %v4091_v16  ;;  %v5742_v16 = vld [vmem:[#allocation6_spill] sm:$0xff] }
  0xc0   : > { %2364 = vmatpush1.bf16.msra.mxu0 %v4094_v41  ;;  %1191 = vmatprep.subr.bf16.mxu1 %v4099_v5  ;;  %v5359_v41 = vld [vmem:[%s4451_s5 + $0x128] sm:$0xff] }
  0xc1   : > { %2365 = vmatprep.subr.bf16.mxu0 %v4102_v51  ;;  %v4139_v5 = vld [vmem:[%s5723_s1 + $0x340] ss:$8 sps:$4 sm:$0xff]  }
  0xc2   : > { %v4142_v51 = vld [vmem:[%s5723_s1 + $0x740] ss:$8 sps:$4 sm:$0xff]  }
  0xc3   : > { %1192 = vmatpush1.bf16.msra.mxu1 %v4097_v31  ;;  %v4147_v31 = vld [vmem:[%s5723_s1 + $0x354] ss:$8 sps:$4 sm:$0xff]  }
  0xc4   : > { %2366 = vmatpush1.bf16.msra.mxu0 %v4100_v45  ;;  %1193 = vmatprep.subr.bf16.mxu1 %v4105_v7  ;;  %v4150_v45 = vld [vmem:[%s5723_s1 + $0x754] ss:$8 sps:$4 sm:$0xff]   ;;  %v5374_v7 = vld [vmem:[%s4451_s5 + $0x108] sm:$0xff] }
  0xc5   : > { %2367 = vmatprep.subr.bf16.mxu0 %v4108_v18  ;;  %v2145_v18 = vpack.c.bf16 %v5359_v41, %v5374_v7 }
  0xc7   : > { %1194 = vmatpush1.bf16.msra.mxu1 %v4103_v25  ;;  %v4145_v25 = vld [vmem:[%s5723_s1 + $0x350] ss:$8 sps:$4 sm:$0xff]  }
  0xc8   : > { %2368 = vmatpush1.bf16.msra.mxu0 %v4106_v53  ;;  %1195 = vmatprep.subr.bf16.mxu1 %v4111_v28  ;;  %v4148_v53 = vld [vmem:[%s5723_s1 + $0x750] ss:$8 sps:$4 sm:$0xff]   ;;  %v5387_v28 = vld [vmem:[%s4451_s5 + $0x120] sm:$0xff] }
  0xc9   : > { %2369 = vmatprep.subr.bf16.mxu0 %v4114_v1  ;;  %v4156_v1 = vld [vmem:[%s5723_s1 + $0x764] ss:$8 sps:$4 sm:$0xff]   ;;  %v2432_v17 = vrot.slane %v5387_v28, 1 }
  0xcb   : > { %1196 = vmatpush1.bf16.msra.mxu1 %v4109_v26  ;;  %v2144_v26 = vpack.c.bf16 %v5387_v28, %v4857_v0  ;;  %v4162_v0 = vld [vmem:[%s5723_s1 + $0x774] ss:$8 sps:$4 sm:$0xff]  }
  0xcc   : > { %2370 = vmatpush1.bf16.msra.mxu0 %v4112_v48  ;;  %1455 = vmatprep.subr.bf16.mxu1 %v4117_v47  ;;  %v4151_v48 = vld [vmem:[%s5723_s1 + $0x360] ss:$8 sps:$4 sm:$0xff]  }
  0xcd   : > { %2635 = vmatprep.subr.bf16.mxu0 %v4120_v49  ;;  %v4154_v47 = vld [vmem:[%s5723_s1 + $0x760] ss:$8 sps:$4 sm:$0xff]   ;;  %v4159_v49 = vld [vmem:[%s5723_s1 + $0x374] ss:$8 sps:$4 sm:$0xff]  }
  0xce   : > { %1198 = vmatmul.mubr.bf16.vlgmr.msra.gmra.mrb[0].mxu1 %v5738_v33  ;;  %v4165_v33 = vld [vmem:[%s5723_s1 + $0x384] ss:$8 sps:$4 sm:$0xff]  }
  0xcf   : > { %2372 = vmatmul.mubr.bf16.vlgmr.msra.gmra.mrb[0].mxu0 %v5739_v63  ;;  %1456 = vmatpush1.bf16.msra.mxu1 %v4115_v61  ;;  %v4261_v61 = vld [vmem:[%s4451_s5 + $0x28] sm:$0xff] }
  0xd0   : > { %2636 = vmatpush1.bf16.msra.mxu0 %v4118_v2  ;;  %1457 = vmatprep.subr.bf16.mxu1 %v4123_v14  ;;  %v4262_v2 = vld [vmem:[%s4451_s5 + $0x48] sm:$0xff] }
  0xd1   : > { %2637 = vmatprep.subr.bf16.mxu0 %v4126_v29  ;;  %1207 = vmatprep.mubr.bf16.mxu1 %v4910_v23  ;;  %v1255_v14 = vpack.c.bf16 %v4262_v2, %v4261_v61  ;;  %v4157_v29 = vld [vmem:[%s5723_s1 + $0x370] ss:$8 sps:$4 sm:$0xff]   ;;  %v4168_v63 = vld [vmem:[%s5723_s1 + $0x784] ss:$8 sps:$4 sm:$0xff]  }
  0xd2   : > { %2381 = vmatprep.mubr.bf16.mxu0 %v5740_v57  ;;  %v4172_v57 = vld [vmem:[%s5723_s1 + $0x790] ss:$8 sps:$4 sm:$0xff]   ;;  %v4213_v61 = vld [vmem:[%s5723_s1 + $0x804] ss:$8 sps:$4 sm:$0xff]  }
  0xd3   : > { %1458 = vmatpush1.bf16.msra.mxu1 %v4121_v44  ;;  %v4163_v44 = vld [vmem:[%s5723_s1 + $0x380] ss:$8 sps:$4 sm:$0xff]  }
  0xd4   : > { %2638 = vmatpush1.bf16.msra.mxu0 %v4124_v40  ;;  %1459 = vmatprep.subr.bf16.mxu1 %v4129_v59  ;;  %v4166_v40 = vld [vmem:[%s5723_s1 + $0x780] ss:$8 sps:$4 sm:$0xff]   ;;  %v4171_v59 = vld [vmem:[%s5723_s1 + $0x394] ss:$8 sps:$4 sm:$0xff]  }
  0xd5   : > { %2639 = vmatprep.subr.bf16.mxu0 %v4132_v21  ;;  %v4169_v21 = vld [vmem:[%s5723_s1 + $0x390] ss:$8 sps:$4 sm:$0xff]   ;;  %v4263_v2 = vld [vmem:[%s4451_s5 + $0x20] sm:$0xff] }
  0xd6   : > { %1208 = vmatmul.mubr.bf16.gmra.mrb[4].mxu1 %v4920_v27 }
  0xd7   : > { %2382 = vmatmul.mubr.bf16.gmra.mrb[4].mxu0 %v5741_v52  ;;  %1460 = vmatpush1.bf16.msra.mxu1 %v4127_v15  ;;  %v4177_v15 = vld [vmem:[%s5723_s1 + $0x3a4] ss:$8 sps:$4 sm:$0xff]   ;;  %v4183_v52 = vld [vmem:[%s5723_s1 + $0x3b4] ss:$8 sps:$4 sm:$0xff]  }
  0xd8   : > { %2640 = vmatpush1.bf16.msra.mxu0 %v4130_v3  ;;  %1461 = vmatprep.subr.bf16.mxu1 %v4135_v46  ;;  %v4180_v3 = vld [vmem:[%s5723_s1 + $0x7a4] ss:$8 sps:$4 sm:$0xff]   ;;  %v4175_v46 = vld [vmem:[%s5723_s1 + $0x3a0] ss:$8 sps:$4 sm:$0xff]  }
  0xd9   : > { %2641 = vmatprep.subr.bf16.mxu0 %v4138_v12  ;;  %1217 = vmatprep.mubr.bf16.mxu1 %v4962_v20  ;;  %v4178_v12 = vld [vmem:[%s5723_s1 + $0x7a0] ss:$8 sps:$4 sm:$0xff]  }
  0xda   : > { %2391 = vmatprep.mubr.bf16.mxu0 %v5742_v16  ;;  %v4192_v16 = vld [vmem:[%s5723_s1 + $0x7c4] ss:$8 sps:$4 sm:$0xff]  }
  0xdb   : > { %1462 = vmatpush1.bf16.msra.mxu1 %v4133_v11  ;;  %v4186_v11 = vld [vmem:[%s5723_s1 + $0x7b4] ss:$8 sps:$4 sm:$0xff]  }
  0xdc   : > { %2642 = vmatpush1.bf16.msra.mxu0 %v4136_v36  ;;  %1463 = vmatprep.subr.bf16.mxu1 %v4141_v35  ;;  %v4181_v36 = vld [vmem:[%s5723_s1 + $0x3b0] ss:$8 sps:$4 sm:$0xff]  }
  0xdd   : > { %2643 = vmatprep.subr.bf16.mxu0 %v4144_v43  ;;  %v4184_v35 = vld [vmem:[%s5723_s1 + $0x7b0] ss:$8 sps:$4 sm:$0xff]   ;;  %v4189_v43 = vld [vmem:[%s5723_s1 + $0x3c4] ss:$8 sps:$4 sm:$0xff]  }
  0xde   : > { %1218 = vmatmul.mubr.bf16.gmra.mrb[8].mxu1 %v4966_v10 }
  0xdf   : > { %2392 = vmatmul.mubr.bf16.gmra.mrb[8].mxu0 %v4841_v58  ;;  %1464 = vmatpush1.bf16.msra.mxu1 %v4139_v5  ;;  %v4153_v58 = vld [vmem:[%s5723_s1 + $0x364] ss:$8 sps:$4 sm:$0xff]   ;;  %v4187_v5 = vld [vmem:[%s5723_s1 + $0x3c0] ss:$8 sps:$4 sm:$0xff]  }
  0xe0   : > { %2644 = vmatpush1.bf16.msra.mxu0 %v4142_v51  ;;  %1465 = vmatprep.subr.bf16.mxu1 %v4147_v31  ;;  %v4190_v51 = vld [vmem:[%s5723_s1 + $0x7c0] ss:$8 sps:$4 sm:$0xff]   ;;  %v4195_v31 = vld [vmem:[%s5723_s1 + $0x3d4] ss:$8 sps:$4 sm:$0xff]  }
  0xe1   : > { %2645 = vmatprep.subr.bf16.mxu0 %v4150_v45  ;;  %1227 = vmatprep.mubr.bf16.mxu1 %v5016_v24  ;;  %v4198_v45 = vld [vmem:[%s5723_s1 + $0x7d4] ss:$8 sps:$4 sm:$0xff]  }
  0xe2   : > { %2401 = vmatprep.mubr.bf16.mxu0 %v2145_v18  ;;  %v4193_v18 = vld [vmem:[%s5723_s1 + $0x3d0] ss:$8 sps:$4 sm:$0xff]  }
  0xe3   : > { %1466 = vmatpush1.bf16.msra.mxu1 %v4145_v25  ;;  %v4196_v25 = vld [vmem:[%s5723_s1 + $0x7d0] ss:$8 sps:$4 sm:$0xff]  }
  0xe4   : > { %2646 = vmatpush1.bf16.msra.mxu0 %v4148_v53  ;;  %1467 = vmatprep.subr.bf16.mxu1 %v4153_v58  ;;  %v4201_v53 = vld [vmem:[%s5723_s1 + $0x3e4] ss:$8 sps:$4 sm:$0xff]  }
  0xe5   : > { %2647 = vmatprep.subr.bf16.mxu0 %v4156_v1  ;;  %v4204_v58 = vld [vmem:[%s5723_s1 + $0x7e4] ss:$8 sps:$4 sm:$0xff]   ;;  %v4199_v1 = vld [vmem:[%s5723_s1 + $0x3e0] ss:$8 sps:$4 sm:$0xff]  }
  0xe6   : > { %1228 = vmatmul.mubr.bf16.gmra.mrb[12].mxu1 %v5020_v39 }
  0xe7   : > { %2402 = vmatmul.mubr.bf16.gmra.mrb[12].mxu0 %v2144_v26  ;;  %1468 = vmatpush1.bf16.msra.mxu1 %v4151_v48  ;;  %v4202_v26 = vld [vmem:[%s5723_s1 + $0x7e0] ss:$8 sps:$4 sm:$0xff]   ;;  %v4207_v48 = vld [vmem:[%s5723_s1 + $0x3f4] ss:$8 sps:$4 sm:$0xff]  }
  0xe8   : > { %2648 = vmatpush1.bf16.msra.mxu0 %v4154_v47  ;;  %1469 = vmatprep.subr.bf16.mxu1 %v4159_v49  ;;  %v4210_v47 = vld [vmem:[%s5723_s1 + $0x7f4] ss:$8 sps:$4 sm:$0xff]   ;;  %v4205_v49 = vld [vmem:[%s5723_s1 + $0x3f0] ss:$8 sps:$4 sm:$0xff]  }
  0xe9   : > { %2649 = vmatprep.subr.bf16.mxu0 %v4162_v0  ;;  %1487 = vmatprep.mubr.bf16.mxu1 %v1255_v14  ;;  %v4208_v0 = vld [vmem:[%s5723_s1 + $0x7f0] ss:$8 sps:$4 sm:$0xff]   ;;  %v4264_v14 = vld [vmem:[%s4451_s5 + $0x40] sm:$0xff] }
  0xea   : > { %2667 = vmatprep.mubr.bf16.mxu0 %v5056_v9  ;;  %v4174_v9 = vld [vmem:[%s5723_s1 + $0x794] ss:$8 sps:$4 sm:$0xff]  }
  0xeb   : > { %1470 = vmatpush1.bf16.msra.mxu1 %v4157_v29  ;;  %v1254_v29 = vpack.c.bf16 %v4264_v14, %v4263_v2 }
  0xec   : > { %2650 = vmatpush1.bf16.msra.mxu0 %v4160_v32  ;;  %1471 = vmatprep.subr.bf16.mxu1 %v4165_v33  ;;  %v4211_v32 = vld [vmem:[%s5723_s1 + $0x800] ss:$8 sps:$4 sm:$0xff]   ;;  %v4216_v33 = vld [vmem:[%s5723_s1 + $0x814] ss:$8 sps:$4 sm:$0xff]  }
  0xed   : > { %2651 = vmatprep.subr.bf16.mxu0 %v4168_v63  ;;  %v4265_v63 = vld [vmem:[%s4451_s5 + $0x68] sm:$0xff] }
  0xef   : > { %1472 = vmatpush1.bf16.msra.mxu1 %v4163_v44  ;;  %v4266_v44 = vld [vmem:[%s4451_s5 + $0x88] sm:$0xff] }
  0xf0   : > { %2652 = vmatpush1.bf16.msra.mxu0 %v4166_v40  ;;  %1473 = vmatprep.subr.bf16.mxu1 %v4171_v59  ;;  %v1257_v40 = vpack.c.bf16 %v4266_v44, %v4265_v63  ;;  %v4214_v59 = vld [vmem:[%s5723_s1 + $0x810] ss:$8 sps:$4 sm:$0xff]  }
  0xf1   : > { %2653 = vmatprep.subr.bf16.mxu0 %v4174_v9  ;;  %v4219_v9 = vld [vmem:[%s5723_s1 + $0x824] ss:$8 sps:$4 sm:$0xff]  }
  0xf3   : > { %1474 = vmatpush1.bf16.msra.mxu1 %v4169_v21  ;;  %v5541_v21 = vld [vmem:[%s4451_s5 + $0x138] sm:$0x3] }
  0xf4   : > { %2654 = vmatpush1.bf16.msra.mxu0 %v4172_v57  ;;  %1475 = vmatprep.subr.bf16.mxu1 %v4177_v15  ;;  %v4222_v57 = vld [vmem:[%s5723_s1 + $0x834] ss:$8 sps:$4 sm:$0xff]   ;;  %v2435_v15 = vrot.slane %v5359_v41, 1 }
  0xf5   : > { %2655 = vmatprep.subr.bf16.mxu0 %v4180_v3  ;;  %v4220_v3 = vld [vmem:[%s5723_s1 + $0x830] ss:$8 sps:$4 sm:$0xff]  }
  0xf7   : > { %1476 = vmatpush1.bf16.msra.mxu1 %v4175_v46  ;;  %v4225_v46 = vld [vmem:[%s5723_s1 + $0x844] ss:$8 sps:$4 sm:$0xff]  }
  0xf8   : > { %2656 = vmatpush1.bf16.msra.mxu0 %v4178_v12  ;;  %1477 = vmatprep.subr.bf16.mxu1 %v4183_v52  ;;  %v5559_v12 = vld [vmem:[%s4451_s5 + $0x130] sm:$0x3] }
  0xf9   : > { %2657 = vmatprep.subr.bf16.mxu0 %v4186_v11  ;;  %v4226_v52 = vld [vmem:[%s5723_s1 + $0x850] ss:$8 sps:$4 sm:$0xff]   ;;  %v2725_v2 = vrot.slane %v5559_v12, 2 }
  0xfb   : > { %1478 = vmatpush1.bf16.msra.mxu1 %v4181_v36  ;;  %v4234_v36 = vld [vmem:[%s5723_s1 + $0x874] ss:$8 sps:$4 sm:$0xff]  }
  0xfc   : > { %2658 = vmatpush1.bf16.msra.mxu0 %v4184_v35  ;;  %1479 = vmatprep.subr.bf16.mxu1 %v4189_v43  ;;  %v4237_v35 = vld [vmem:[%s5723_s1 + $0x884] ss:$8 sps:$4 sm:$0xff]   ;;  %v4235_v43 = vld [vmem:[%s5723_s1 + $0x880] ss:$8 sps:$4 sm:$0xff]  }
  0xfd   : > { %2659 = vmatprep.subr.bf16.mxu0 %v4192_v16  ;;  %v4240_v16 = vld [vmem:[%s5723_s1 + $0x894] ss:$8 sps:$4 sm:$0xff]  }
  0xff   : > { %1480 = vmatpush1.bf16.msra.mxu1 %v4187_v5  ;;  %v4241_v5 = vld [vmem:[%s5723_s1 + $0x8a0] ss:$8 sps:$4 sm:$0xff]  }
 0x100   : > { %2660 = vmatpush1.bf16.msra.mxu0 %v4190_v51  ;;  %1481 = vmatprep.subr.bf16.mxu1 %v4195_v31  ;;  %v4246_v51 = vld [vmem:[%s5723_s1 + $0x8b4] ss:$8 sps:$4 sm:$0xff]   ;;  %v4244_v31 = vld [vmem:[%s5723_s1 + $0x8b0] ss:$8 sps:$4 sm:$0xff]  }
 0x101   : > { %2661 = vmatprep.subr.bf16.mxu0 %v4198_v45  ;;  %v4249_v45 = vld [vmem:[%s5723_s1 + $0x8c4] ss:$8 sps:$4 sm:$0xff]  }
 0x103   : > { %1482 = vmatpush1.bf16.msra.mxu1 %v4193_v18  ;;  %v4247_v18 = vld [vmem:[%s5723_s1 + $0x8c0] ss:$8 sps:$4 sm:$0xff]  }
 0x104   : > { %2662 = vmatpush1.bf16.msra.mxu0 %v4196_v25  ;;  %1483 = vmatprep.subr.bf16.mxu1 %v4201_v53  ;;  %v4252_v25 = vld [vmem:[%s5723_s1 + $0x8d4] ss:$8 sps:$4 sm:$0xff]   ;;  %v4250_v53 = vld [vmem:[%s5723_s1 + $0x8d0] ss:$8 sps:$4 sm:$0xff]  }
 0x105   : > { %2663 = vmatprep.subr.bf16.mxu0 %v4204_v58  ;;  %v4255_v58 = vld [vmem:[%s5723_s1 + $0x8e4] ss:$8 sps:$4 sm:$0xff]  }
 0x107   : > { %1484 = vmatpush1.bf16.msra.mxu1 %v4199_v1  ;;  %v4253_v1 = vld [vmem:[%s5723_s1 + $0x8e0] ss:$8 sps:$4 sm:$0xff]  }
 0x108   : > { %2664 = vmatpush1.bf16.msra.mxu0 %v4202_v26  ;;  %1485 = vmatprep.subr.bf16.mxu1 %v4207_v48  ;;  %v2727_v26 = vrot.slane %v5359_v41, 2  ;;  %v4258_v48 = vld [vmem:[%s5723_s1 + $0x8f4] ss:$8 sps:$4 sm:$0xff]   ;;  %v2724_v41 = vrot.slane %v5387_v28, 2 }
 0x109   : > { %2665 = vmatprep.subr.bf16.mxu0 %v4210_v47  ;;  %v2728_v47 = vrot.slane %v5541_v21, 2 }
 0x10a   : > { %v2726_v14 = vsel %vm899_vm1, %v2724_v41, %v2725_v2 }
 0x10b   : > { %1486 = vmatpush1.bf16.msra.mxu1 %v4205_v49  ;;  %v4256_v49 = vld [vmem:[%s5723_s1 + $0x8f0] ss:$8 sps:$4 sm:$0xff]  }
 0x10c   : > { %2666 = vmatpush1.bf16.msra.mxu0 %v4208_v0  ;;  %3642 = vmatprep.subr.bf16.mxu1 %v4213_v61  ;;  %v2729_v0 = vsel %vm899_vm1, %v2727_v26, %v2728_v47 }
 0x10d   : > { %2927 = vmatprep.subr.bf16.mxu0 %v4213_v61  ;;  %v2733_v61 = vpack.c.bf16 %v2729_v0, %v5125_v34  ;;  %v213_v34 = vlaneseq }
 0x10e   : > { %1488 = vmatmul.mubr.bf16.vlgmr.msra.gmra.mrb[0].mxu1 %v1254_v29  ;;  %v2732_v29 = vpack.c.bf16 %v2726_v14, %v5161_v62 }
 0x10f   : > { %2668 = vmatmul.mubr.bf16.vlgmr.msra.gmra.mrb[0].mxu0 %v5078_v6  ;;  %3658 = vmatpush1.bf16.msra.mxu1 %v4211_v32  ;;  %v4217_v6 = vld [vmem:[%s5723_s1 + $0x820] ss:$8 sps:$4 sm:$0xff]   ;;  %v214_v44 = vshrl.u32 %v213_v34, 7 }
 0x110   : > { %2928 = vmatpush1.bf16.msra.mxu0 %v4211_v32  ;;  %3643 = vmatprep.subr.bf16.mxu1 %v4216_v33 }
 0x111   : > { %2929 = vmatprep.subr.bf16.mxu0 %v4216_v33  ;;  %1497 = vmatprep.mubr.bf16.mxu1 %v1257_v40  ;;  %v219_v62 = vsub.s32 1, %v214_v44 }
 0x112   : > { %2677 = vmatprep.mubr.bf16.mxu0 %v5098_v22  ;;  %v2436_v22 = vrot.slane %v5541_v21, 1 }
 0x113   : > { %3659 = vmatpush1.bf16.msra.mxu1 %v4214_v59 }
 0x114   : > { %2930 = vmatpush1.bf16.msra.mxu0 %v4214_v59  ;;  %3644 = vmatprep.subr.bf16.mxu1 %v4219_v9  ;;  %v2437_v13 = vsel %vm544_vm0, %v2435_v15, %v2436_v22 }
 0x115   : > { %2931 = vmatprep.subr.bf16.mxu0 %v4219_v9 }
 0x116   : > { %1498 = vmatmul.mubr.bf16.gmra.mrb[4].mxu1 %v1256_v30  ;;  %v4223_v30 = vld [vmem:[%s5723_s1 + $0x840] ss:$8 sps:$4 sm:$0xff]  }
 0x117   : > { %2678 = vmatmul.mubr.bf16.gmra.mrb[4].mxu0 %v5120_v56  ;;  %3660 = vmatpush1.bf16.msra.mxu1 %v4217_v6  ;;  %v2433_v56 = vrot.slane %v5559_v12, 1 }
 0x118   : > { %2932 = vmatpush1.bf16.msra.mxu0 %v4217_v6  ;;  %3645 = vmatprep.subr.bf16.mxu1 %v4222_v57 }
 0x119   : > { %2933 = vmatprep.subr.bf16.mxu0 %v4222_v57  ;;  %1507 = vmatprep.mubr.bf16.mxu1 %v1259_v37  ;;  %v1261_v37 = vpack.c.bf16 %v5374_v7, %v4267_v50  ;;  %v2434_v11 = vsel %vm544_vm0, %v2432_v17, %v2433_v56  ;;  %v4229_v7 = vld [vmem:[%s5723_s1 + $0x860] ss:$8 sps:$4 sm:$0xff]  }
 0x11a   : > { %2687 = vmatprep.mubr.bf16.mxu0 %v5147_v4  ;;  %v2441_v4 = vpack.c.bf16 %v2437_v13, %v4854_v42  ;;  %v4231_v42 = vld [vmem:[%s5723_s1 + $0x864] ss:$8 sps:$4 sm:$0xff]  }
 0x11b   : > { %3661 = vmatpush1.bf16.msra.mxu1 %v4220_v3 }
 0x11c   : > { %2934 = vmatpush1.bf16.msra.mxu0 %v4220_v3  ;;  %3646 = vmatprep.subr.bf16.mxu1 %v4225_v46 }
 0x11d   : > { %2935 = vmatprep.subr.bf16.mxu0 %v4225_v46 }
 0x11e   : > { %1508 = vmatmul.mubr.bf16.gmra.mrb[8].mxu1 %v1258_v19  ;;  %v1260_v19 = vpack.c.bf16 %v4269_v8, %v4268_v60 }
 0x11f   : > { %2688 = vmatmul.mubr.bf16.gmra.mrb[8].mxu0 %v5172_v54  ;;  %3662 = vmatpush1.bf16.msra.mxu1 %v4223_v30  ;;  %v2440_v54 = vpack.c.bf16 %v2434_v11, %v4879_v55  ;;  %v4232_v55 = vld [vmem:[%s5723_s1 + $0x870] ss:$8 sps:$4 sm:$0xff]  }
 0x120   : > { %2936 = vmatpush1.bf16.msra.mxu0 %v4223_v30  ;;  %3647 = vmatprep.subr.bf16.mxu1 %v4228_v38 }
 0x121   : > { %2937 = vmatprep.subr.bf16.mxu0 %v4228_v38  ;;  %1517 = vmatprep.mubr.bf16.mxu1 %v1261_v37 }
 0x122   : > { %2697 = vmatprep.mubr.bf16.mxu0 %v2441_v4 }
 0x123   : > { %3663 = vmatpush1.bf16.msra.mxu1 %v4226_v52 }
 0x124   : > { %2938 = vmatpush1.bf16.msra.mxu0 %v4226_v52  ;;  %3648 = vmatprep.subr.bf16.mxu1 %v4231_v42 }
 0x125   : > { %2939 = vmatprep.subr.bf16.mxu0 %v4231_v42 }
 0x126   : > { %1518 = vmatmul.mubr.bf16.gmra.mrb[12].mxu1 %v1260_v19 }
 0x127   : > { %2698 = vmatmul.mubr.bf16.gmra.mrb[12].mxu0 %v2440_v54  ;;  %3664 = vmatpush1.bf16.msra.mxu1 %v4229_v7 }
 0x128   : > { %2940 = vmatpush1.bf16.msra.mxu0 %v4229_v7  ;;  %3649 = vmatprep.subr.bf16.mxu1 %v4234_v36 }
 0x129   : > { %2941 = vmatprep.subr.bf16.mxu0 %v4234_v36  ;;  %2959 = vmatprep.mubr.bf16.mxu0 %v4910_v23  ;;  %v4238_v23 = vld [vmem:[%s5723_s1 + $0x890] ss:$8 sps:$4 sm:$0xff]  }
 0x12a   : > { %2979 = vmatprep.mubr.bf16.mxu1 %v5016_v24  ;;  %v4243_v24 = vld [vmem:[%s5723_s1 + $0x8a4] ss:$8 sps:$4 sm:$0xff]  }
 0x12b   : > { %3665 = vmatpush1.bf16.msra.mxu1 %v4232_v55 }
 0x12c   : > { %2942 = vmatpush1.bf16.msra.mxu0 %v4232_v55  ;;  %3650 = vmatprep.subr.bf16.mxu1 %v4237_v35 }
 0x12d   : > { %2943 = vmatprep.subr.bf16.mxu0 %v4237_v35 }
 0x12f   : > { %3666 = vmatpush1.bf16.msra.mxu1 %v4235_v43 }
 0x130   : > { %2944 = vmatpush1.bf16.msra.mxu0 %v4235_v43  ;;  %3651 = vmatprep.subr.bf16.mxu1 %v4240_v16 }
 0x131   : > { %2945 = vmatprep.subr.bf16.mxu0 %v4240_v16 }
 0x133   : > { %3667 = vmatpush1.bf16.msra.mxu1 %v4238_v23 }
 0x134   : > { %2946 = vmatpush1.bf16.msra.mxu0 %v4238_v23  ;;  %3652 = vmatprep.subr.bf16.mxu1 %v4243_v24 }
 0x135   : > { %2947 = vmatprep.subr.bf16.mxu0 %v4243_v24 }
 0x137   : > { %3668 = vmatpush1.bf16.msra.mxu1 %v4241_v5 }
 0x138   : > { %2948 = vmatpush1.bf16.msra.mxu0 %v4241_v5  ;;  %3653 = vmatprep.subr.bf16.mxu1 %v4246_v51 }
 0x139   : > { %2949 = vmatprep.subr.bf16.mxu0 %v4246_v51 }
 0x13b   : > { %3669 = vmatpush1.bf16.msra.mxu1 %v4244_v31 }
 0x13c   : > { %2950 = vmatpush1.bf16.msra.mxu0 %v4244_v31  ;;  %3654 = vmatprep.subr.bf16.mxu1 %v4249_v45 }
 0x13d   : > { %2951 = vmatprep.subr.bf16.mxu0 %v4249_v45 }
 0x13f   : > { %3670 = vmatpush1.bf16.msra.mxu1 %v4247_v18 }
 0x140   : > { %2952 = vmatpush1.bf16.msra.mxu0 %v4247_v18  ;;  %3655 = vmatprep.subr.bf16.mxu1 %v4252_v25 }
 0x141   : > { %2953 = vmatprep.subr.bf16.mxu0 %v4252_v25 }
 0x143   : > { %3671 = vmatpush1.bf16.msra.mxu1 %v4250_v53 }
 0x144   : > { %2954 = vmatpush1.bf16.msra.mxu0 %v4250_v53  ;;  %3656 = vmatprep.subr.bf16.mxu1 %v4255_v58 }
 0x145   : > { %2955 = vmatprep.subr.bf16.mxu0 %v4255_v58 }
 0x147   : > { %3672 = vmatpush1.bf16.msra.mxu1 %v4253_v1 }
 0x148   : > { %2956 = vmatpush1.bf16.msra.mxu0 %v4253_v1  ;;  %3657 = vmatprep.subr.bf16.mxu1 %v4258_v48 }
 0x149   : > { %2957 = vmatprep.subr.bf16.mxu0 %v4258_v48 }
 0x14b   : > { %3673 = vmatpush1.bf16.msra.mxu1 %v4256_v49 }
 0x14c   : > { %2958 = vmatpush1.bf16.msra.mxu0 %v4256_v49 }
 0x14e   : > { %2980 = vmatmul.mubr.bf16.vlgmr.msra.gmra.mrb[16].mxu1 %v5020_v39 }
 0x14f   : > { %2960 = vmatmul.mubr.bf16.vlgmr.msra.gmra.mrb[0].mxu0 %v4920_v27  ;;  %2989 = vmatprep.mubr.bf16.mxu1 %v2733_v61 }
 0x150   : > { %2969 = vmatprep.mubr.bf16.mxu0 %v4962_v20  ;;  %v215_v20 = vsub.s32 0, %v214_v44 }
 0x156   : > { %2990 = vmatmul.mubr.bf16.gmra.mrb[20].mxu1 %v2732_v29 }
 0x157   : > { %2970 = vmatmul.mubr.bf16.gmra.mrb[4].mxu0 %v4966_v10  ;;  %v211_v10 = vld [vmem:[%s5724_s2] sm:$0x3] }
 0x158   : > { %v5673_v9 = vrot.slane %v211_v10, %v215_v20  ;;  %v5675_v6 = vrot.slane %v211_v10, %v219_v62 }
 0x1e1   : > { %v1489_v28 = vpop.f32.mrb[0].mxu1 }
 0x1e2   : > { %v1491_v32 = vpop.f32.mrb[1].mxu1  ;;  %v3674_v31 = vadd.f32 %v1489_v28, %v5673_v9 }
 0x1e3   : > { %v1493_v33 = vpop.f32.mrb[2].mxu1  ;;  %v3676_v45 = vadd.f32 %v1491_v32, %v5675_v6 }
 0x1e4   : > { %v1495_v63 = vpop.f32.mrb[3].mxu1  ;;  %v3678_v53 = vadd.f32 %v1493_v33, %v5673_v9 }
 0x1e5   : > { %v3680_v47 = vadd.f32 %v1495_v63, %v5675_v6 }
 0x1e9   : > { %v5662_v40 = vpop.f32.mrb[4].mxu1 }
 0x1ea   : > { %v5664_v27 = vpop.f32.mrb[5].mxu1  ;;  %v3682_v34 = vadd.f32 %v5662_v40, %v5673_v9 }
 0x1eb   : > { %v5666_v39 = vpop.f32.mrb[6].mxu1  ;;  %v3684_v63 = vadd.f32 %v5664_v27, %v5675_v6 }
 0x1ec   : > { %v5668_v59 = vpop.f32.mrb[7].mxu1  ;;  %v3686_v10 = vadd.f32 %v5666_v39, %v5673_v9 }
 0x1f1   : > { %v1509_v21 = vpop.f32.mrb[8].mxu1 }
 0x1f2   : > { %v2689_v57 = vpop.f32.mrb[8].mxu0  ;;  %v3690_v15 = vadd.f32 %v1509_v21, %v5673_v9  ;;  %v1511_v22 = vpop.f32.mrb[9].mxu1 }
 0x1f3   : > { %v2691_v3 = vpop.f32.mrb[9].mxu0  ;;  %v3693_v46 = vadd.f32 %v1511_v22, %v5675_v6  ;;  %v1513_v12 = vpop.f32.mrb[10].mxu1  ;;  %v3688_v22 = vadd.f32 %v5668_v59, %v5675_v6 }
 0x1f4   : > { %v2693_v13 = vpop.f32.mrb[10].mxu0  ;;  %v3691_v17 = vadd.f32 %v3690_v15, %v2689_v57  ;;  %v3696_v30 = vadd.f32 %v1513_v12, %v5673_v9  ;;  %v1515_v56 = vpop.f32.mrb[11].mxu1 }
 0x1f5   : > { %v2695_v38 = vpop.f32.mrb[11].mxu0  ;;  %v3694_v50 = vadd.f32 %v3693_v46, %v2691_v3  ;;  %v3699_v37 = vadd.f32 %v1515_v56, %v5675_v6 }
 0x1f6   : > { %v3697_v4 = vadd.f32 %v3696_v30, %v2693_v13 }
 0x1f7   : > { %v3700_v52 = vadd.f32 %v3699_v37, %v2695_v38 }
 0x1f9   : > { %v1519_v11 = vpop.f32.mrb[12].mxu1 }
 0x1fa   : > { %v2699_v42 = vpop.f32.mrb[12].mxu0  ;;  %v3702_v60 = vadd.f32 %v1519_v11, %v5673_v9  ;;  %v1521_v8 = vpop.f32.mrb[13].mxu1 }
 0x1fb   : > { %v2701_v19 = vpop.f32.mrb[13].mxu0  ;;  %v3705_v54 = vadd.f32 %v1521_v8, %v5675_v6  ;;  %v1523_v7 = vpop.f32.mrb[14].mxu1 }
 0x1fc   : > { %v2703_v36 = vpop.f32.mrb[14].mxu0  ;;  %v3703_v55 = vadd.f32 %v3702_v60, %v2699_v42  ;;  %v3708_v35 = vadd.f32 %v1523_v7, %v5673_v9  ;;  %v1525_v43 = vpop.f32.mrb[15].mxu1 }
 0x1fd   : > { %v2705_v16 = vpop.f32.mrb[15].mxu0  ;;  %v3706_v23 = vadd.f32 %v3705_v54, %v2701_v19  ;;  %v3711_v24 = vadd.f32 %v1525_v43, %v5675_v6 }
 0x1fe   : > { %v3709_v5 = vadd.f32 %v3708_v35, %v2703_v36 }
 0x1ff   : > { %v3712_v51 = vadd.f32 %v3711_v24, %v2705_v16 }
 0x221   : > { %v2981_v25 = vpop.f32.mrb[16].mxu1 }
 0x222   : > { %v2961_v18 = vpop.f32.mrb[0].mxu0  ;;  %v3692_v1 = vadd.f32 %v3691_v17, %v2981_v25  ;;  %v2983_v48 = vpop.f32.mrb[17].mxu1 }
 0x223   : > { %v3675_v58 = vadd.f32 %v3674_v31, %v2961_v18  ;;  %v2963_v26 = vpop.f32.mrb[1].mxu0  ;;  %v3695_v0 = vadd.f32 %v3694_v50, %v2983_v48  ;;  %v2985_v61 = vpop.f32.mrb[18].mxu1 }
 0x224   : > { %v3677_v49 = vadd.f32 %v3676_v45, %v2963_v26  ;;  %v2965_v41 = vpop.f32.mrb[2].mxu0  ;;  %3024 = vst [vmem:[%s5691_s17 + $0x40] sm:$0xff] %v3692_v1  ;;  %v3698_v14 = vadd.f32 %v3697_v4, %v2985_v61  ;;  %v2987_v28 = vpop.f32.mrb[19].mxu1 }
 0x225   : > { %3016 = vst [vmem:[%s5691_s17] sm:$0xff] %v3675_v58  ;;  %v3679_v2 = vadd.f32 %v3678_v53, %v2965_v41  ;;  %v2967_v29 = vpop.f32.mrb[3].mxu0  ;;  %3025 = vst [vmem:[%s5691_s17 + $0x48] sm:$0xff] %v3695_v0  ;;  %v3701_v33 = vadd.f32 %v3700_v52, %v2987_v28 }
 0x226   : > { %3017 = vst [vmem:[%s5691_s17 + $0x8] sm:$0xff] %v3677_v49  ;;  %v3681_v32 = vadd.f32 %v3680_v47, %v2967_v29  ;;  %3026 = vst [vmem:[%s5691_s17 + $0x50] sm:$0xff] %v3698_v14 }
 0x227   : > { %3018 = vst [vmem:[%s5691_s17 + $0x10] sm:$0xff] %v3679_v2  ;;  %3027 = vst [vmem:[%s5691_s17 + $0x58] sm:$0xff] %v3701_v33 }
 0x228   : > { %3019 = vst [vmem:[%s5691_s17 + $0x18] sm:$0xff] %v3681_v32 }
 0x229   : > { %v2991_v20 = vpop.f32.mrb[20].mxu1 }
 0x22a   : > { %v2971_v44 = vpop.f32.mrb[4].mxu0  ;;  %v3704_v21 = vadd.f32 %v3703_v55, %v2991_v20  ;;  %v2993_v15 = vpop.f32.mrb[21].mxu1 }
 0x22b   : > { %v3683_v62 = vadd.f32 %v3682_v34, %v2971_v44  ;;  %v2973_v57 = vpop.f32.mrb[5].mxu0  ;;  %v3707_v3 = vadd.f32 %v3706_v23, %v2993_v15  ;;  %v2995_v46 = vpop.f32.mrb[22].mxu1 }
 0x22c   : > { %v3685_v40 = vadd.f32 %v3684_v63, %v2973_v57  ;;  %v2975_v27 = vpop.f32.mrb[6].mxu0  ;;  %3028 = vst [vmem:[%s5691_s17 + $0x60] sm:$0xff] %v3704_v21  ;;  %v3710_v9 = vadd.f32 %v3709_v5, %v2995_v46  ;;  %v2997_v13 = vpop.f32.mrb[23].mxu1 }
 0x22d   : > { %3020 = vst [vmem:[%s5691_s17 + $0x20] sm:$0xff] %v3683_v62  ;;  %v3687_v39 = vadd.f32 %v3686_v10, %v2975_v27  ;;  %v2977_v12 = vpop.f32.mrb[7].mxu0  ;;  %3029 = vst [vmem:[%s5691_s17 + $0x68] sm:$0xff] %v3707_v3  ;;  %v3713_v30 = vadd.f32 %v3712_v51, %v2997_v13 }
 0x22e   : > { %3021 = vst [vmem:[%s5691_s17 + $0x28] sm:$0xff] %v3685_v40  ;;  %v3689_v17 = vadd.f32 %v3688_v22, %v2977_v12  ;;  %3030 = vst [vmem:[%s5691_s17 + $0x70] sm:$0xff] %v3710_v9 }
 0x22f   : > { %3022 = vst [vmem:[%s5691_s17 + $0x30] sm:$0xff] %v3687_v39  ;;  %3031 = vst [vmem:[%s5691_s17 + $0x78] sm:$0xff] %v3713_v30 }
 0x230   : > { %3023 = vst [vmem:[%s5691_s17 + $0x38] sm:$0xff] %v3689_v17 }
 0x231 PF: > { %s13_s12 = sadd.s32 1, %s4276_s12  }
 0x232   : > { %p10_p4 = scmp.ge.s32.totalorder %s13_s12, 4  }
 0x234   :  { %12 = sbr.rel (!%p10_p4) target bundleno = 1 (0x1), region = 70 }

// kernel: pat_block_forward.13
= control target key start
LH: loop header
LB: loop body
LE: loop exit
PB: predicated region body
PF: predicated region fallthrough
CT: control target
= control target key end

     0   :  { %s2064_s27 = smov 0   ;;  %s2728_s0 = inlined_call_operand.vmem [shape: f32[2,64,256], index: 0, kind: input, shape index: {}]   ;;  %s2729_s1 = inlined_call_operand.vmem [shape: f32[2,64,256], index: 1, kind: input, shape index: {}]   ;;  %s2730_s2 = inlined_call_operand.vmem [shape: bf16[256,32], index: 2, kind: input, shape index: {}]   ;;  %s2731_s3 = inlined_call_operand.vmem [shape: bf16[256,32], index: 3, kind: input, shape index: {}]   ;;  %s2732_s4 = inlined_call_operand.vmem [shape: bf16[256,256], index: 4, kind: input, shape index: {}]   ;;  %s2733_s5 = inlined_call_operand.vmem [shape: f32[1,32], index: 5, kind: input, shape index: {}]   ;;  %s2734_s6 = inlined_call_operand.vmem [shape: f32[1,32], index: 6, kind: input, shape index: {}]   ;;  %s2735_s7 = inlined_call_operand.vmem [shape: f32[1,256], index: 7, kind: input, shape index: {}]   ;;  %s2736_s8 = inlined_call_operand.vmem [shape: f32[2,64,256], index: 8, kind: output, shape index: {}]  }
   0x1 LB: > { %s1667_s28 = sadd.s32 4294967295, %s2016_s27   ;;  %p1671_p0 = scmp.ge.s32.totalorder %s2016_s27, 1  ;;  %s2016_s27 = sphi %s2064_s27, %s18_s27  }
   0x2   : > { %p272_p1 = scmp.lt.s32.totalorder %s2016_s27, 3 }
   0x4   : > { %p273_p2 = pnand %p1671_p0, %p272_p1 }
   0x5   : > { %v1874_v0 = vld [vmem:[%s2731_s3 + $0x40] sm:$0xff] (!%p273_p2)   ;;  %v1876_v2 = vld [vmem:[%s2731_s3 + $0x48] sm:$0xff] (!%p273_p2)   ;;  %v1878_v4 = vld [vmem:[%s2731_s3 + $0x50] sm:$0xff] (!%p273_p2)   ;;  %p311_p3 = scmp.lt.s32.totalorder (!%p273_p2), %s1667_s28, 1  ;;  %vm1060_vm0 = vcmask (!%p273_p2), 261120   ;;  %vm1150_vm1 = vcmask (!%p273_p2), 523264  }
   0x6   : > { %276 = sbr.rel (%p273_p2) target bundleno = 1143 (0x477), region = 52  ;;  %v1875_v1 = vld [vmem:[%s2731_s3] sm:$0xff] (!%p273_p2)   ;;  %1797 = vmatprep.subr.bf16.mxu1 (!%p273_p2), %v1874_v0  ;;  %v1877_v3 = vld [vmem:[%s2731_s3 + $0x8] sm:$0xff] (!%p273_p2)   ;;  %v1879_v5 = vld [vmem:[%s2731_s3 + $0x10] sm:$0xff] (!%p273_p2)  }
   0x7   : > { %1798 = vmatpush3.bf16.msra.mxu1 (!%p273_p2), %v1875_v1  ;;  %v1880_v6 = vld [vmem:[%s2731_s3 + $0x58] sm:$0xff] (!%p273_p2)   ;;  %v1882_v7 = vld [vmem:[%s2730_s2 + $0x40] sm:$0xff] (!%p273_p2)   ;;  %v1886_v11 = vld [vmem:[%s2730_s2 + $0x48] sm:$0xff] (!%p273_p2)  }
   0x8   : > { %1799 = vmatprep.subr.bf16.mxu1 (!%p273_p2), %v1876_v2  ;;  %v1881_v8 = vld [vmem:[%s2731_s3 + $0x18] sm:$0xff] (!%p273_p2)   ;;  %1757 = vmatprep.subr.bf16.mxu0 (!%p273_p2), %v1882_v7  ;;  %v1884_v9 = vld [vmem:[%s2730_s2] sm:$0xff] (!%p273_p2)   ;;  %v1888_v13 = vld [vmem:[%s2730_s2 + $0x8] sm:$0xff] (!%p273_p2)  }
   0x9   : > { %v1883_v10 = vld [vmem:[%s2731_s3 + $0x60] sm:$0xff] (!%p273_p2)   ;;  %1758 = vmatpush3.bf16.msra.mxu0 (!%p273_p2), %v1884_v9  ;;  %v1887_v14 = vld [vmem:[%s2731_s3 + $0x68] sm:$0xff] (!%p273_p2)   ;;  %v1890_v15 = vld [vmem:[%s2730_s2 + $0x50] sm:$0xff] (!%p273_p2)  }
   0xa   : > { %v1885_v12 = vld [vmem:[%s2731_s3 + $0x20] sm:$0xff] (!%p273_p2)   ;;  %1759 = vmatprep.subr.bf16.mxu0 (!%p273_p2), %v1886_v11  ;;  %v1889_v16 = vld [vmem:[%s2731_s3 + $0x28] sm:$0xff] (!%p273_p2)   ;;  %v1892_v17 = vld [vmem:[%s2730_s2 + $0x10] sm:$0xff] (!%p273_p2)  }
   0xb   : > { %1800 = vmatpush3.bf16.msra.mxu1 (!%p273_p2), %v1877_v3  ;;  %v1891_v18 = vld [vmem:[%s2731_s3 + $0x70] sm:$0xff] (!%p273_p2)   ;;  %v1894_v19 = vld [vmem:[%s2730_s2 + $0x58] sm:$0xff] (!%p273_p2)   ;;  %v1898_v27 = vld [vmem:[%s2730_s2 + $0x60] sm:$0xff] (!%p273_p2)  }
   0xc   : > { %1801 = vmatprep.subr.bf16.mxu1 (!%p273_p2), %v1878_v4  ;;  %v1893_v20 = vld [vmem:[%s2731_s3 + $0x30] sm:$0xff] (!%p273_p2)   ;;  %v1896_v21 = vld [vmem:[%s2730_s2 + $0x18] sm:$0xff] (!%p273_p2)   ;;  %v1899_v30 = vld [vmem:[%s2730_s2 + $0x20] sm:$0xff] (!%p273_p2)  }
   0xd   : > { %s2738_s28 = smov (!%p311_p3, %s1667_s28), 1  ;;  %1760 = vmatpush3.bf16.msra.mxu0 %v1888_v13  ;;  %v1895_v22 = vld [vmem:[%s2731_s3 + $0x78] sm:$0xff]   ;;  %v1900_v31 = vld [vmem:[%s2730_s2 + $0x68] sm:$0xff]   ;;  %v1902_v36 = vld [vmem:[%s2730_s2 + $0x70] sm:$0xff]  }
   0xe   : > { %1761 = vmatprep.subr.bf16.mxu0 %v1890_v15  ;;  %s2130_s23 = sshll.u32 %s2738_s28, 7  ;;  %v1897_v25 = vld [vmem:[%s2731_s3 + $0x38] sm:$0xff]   ;;  %v1901_v32 = vld [vmem:[%s2730_s2 + $0x28] sm:$0xff]   ;;  %v1903_v38 = vld [vmem:[%s2730_s2 + $0x30] sm:$0xff]  }
   0xf   : > { %1802 = vmatpush3.bf16.msra.mxu1 %v1879_v5  ;;  %s2145_s28 = scalar_lea.vmem %s2729_s1, %s2130_s23  ;;  %s2181_s11 = scalar_lea.vmem %s2728_s0, %s2130_s23  ;;  %v1904_v39 = vld [vmem:[%s2730_s2 + $0x78] sm:$0xff]  }
  0x10   : > { %1803 = vmatprep.subr.bf16.mxu1 %v1880_v6  ;;  %v344_v23 = vld [vmem:[%s2145_s28 + $0x8] sm:$0xff]  ;;  %v346_v24 = vld [vmem:[%s2145_s28 + $0x18] sm:$0xff]  ;;  %v343_v28 = vld [vmem:[%s2145_s28] sm:$0xff]  ;;  %s2671_s14 = scalar_lea.vmem %s2736_s8, %s2130_s23 }
  0x11   : > { %1762 = vmatpush3.bf16.msra.mxu0 %v1892_v17  ;;  %v568_v26 = vpack.c.bf16 %v346_v24, %v344_v23  ;;  %v345_v29 = vld [vmem:[%s2145_s28 + $0x10] sm:$0xff]  ;;  %v348_v33 = vld [vmem:[%s2145_s28 + $0x28] sm:$0xff]  ;;  %v350_v34 = vld [vmem:[%s2145_s28 + $0x38] sm:$0xff] }
  0x12   : > { %1763 = vmatprep.subr.bf16.mxu0 %v1894_v19  ;;  %v567_v35 = vpack.c.bf16 %v345_v29, %v343_v28  ;;  %v570_v37 = vpack.c.bf16 %v350_v34, %v348_v33  ;;  %v2190_v40 = vld [vmem:[%s2181_s11 + $0x8] sm:$0xff]  ;;  %v347_v41 = vld [vmem:[%s2145_s28 + $0x20] sm:$0xff]  ;;  %v349_v42 = vld [vmem:[%s2145_s28 + $0x30] sm:$0xff] }
  0x13   : > { %1804 = vmatpush3.bf16.msra.mxu1 %v1881_v8  ;;  %742 = vmatprep.mubr.bf16.mxu1 %v568_v26  ;;  %v2195_v43 = vld [vmem:[%s2181_s11 + $0x18] sm:$0xff]  ;;  %v352_v45 = vld [vmem:[%s2145_s28 + $0x48] sm:$0xff]  ;;  %v2205_v48 = vld [vmem:[%s2181_s11] sm:$0xff]  ;;  %v569_v50 = vpack.c.bf16 %v349_v42, %v347_v41 }
  0x14   : > { %1805 = vmatprep.subr.bf16.mxu1 %v1883_v10  ;;  %v360_v44 = vpack.c.bf16 %v2195_v43, %v2190_v40  ;;  %v354_v46 = vld [vmem:[%s2145_s28 + $0x58] sm:$0xff]  ;;  %v2208_v49 = vld [vmem:[%s2181_s11 + $0x10] sm:$0xff]  ;;  %v2211_v51 = vld [vmem:[%s2181_s11 + $0x28] sm:$0xff] }
  0x15   : > { %1764 = vmatpush3.bf16.msra.mxu0 %v1896_v21  ;;  %v1905_v47 = vld [vmem:[%s2730_s2 + $0x38] sm:$0xff]   ;;  %v572_v53 = vpack.c.bf16 %v354_v46, %v352_v45  ;;  %v2218_v54 = vpack.c.bf16 %v2208_v49, %v2205_v48  ;;  %v351_v55 = vld [vmem:[%s2145_s28 + $0x40] sm:$0xff]  ;;  %v353_v56 = vld [vmem:[%s2145_s28 + $0x50] sm:$0xff] }
  0x16   : > { %1765 = vmatprep.subr.bf16.mxu0 %v1898_v27  ;;  %534 = vmatprep.mubr.bf16.mxu0 %v360_v44  ;;  %v2214_v52 = vld [vmem:[%s2181_s11 + $0x38] sm:$0xff]  ;;  %v356_v58 = vld [vmem:[%s2145_s28 + $0x68] sm:$0xff]  ;;  %v2229_v60 = vld [vmem:[%s2181_s11 + $0x20] sm:$0xff]  ;;  %v571_v0 = vpack.c.bf16 %v353_v56, %v351_v55 }
  0x17   : > { %1806 = vmatpush3.bf16.msra.mxu1 %v1885_v12  ;;  %v2224_v57 = vpack.c.bf16 %v2214_v52, %v2211_v51  ;;  %v358_v59 = vld [vmem:[%s2145_s28 + $0x78] sm:$0xff]  ;;  %v2232_v61 = vld [vmem:[%s2181_s11 + $0x30] sm:$0xff]  ;;  %v2236_v62 = vld [vmem:[%s2181_s11 + $0x48] sm:$0xff] }
  0x18   : > { %1807 = vmatprep.subr.bf16.mxu1 %v1887_v14  ;;  %v2239_v63 = vld [vmem:[%s2181_s11 + $0x58] sm:$0xff]  ;;  %v574_v1 = vpack.c.bf16 %v358_v59, %v356_v58  ;;  %v2244_v2 = vpack.c.bf16 %v2232_v61, %v2229_v60  ;;  %v355_v3 = vld [vmem:[%s2145_s28 + $0x60] sm:$0xff]  ;;  %v357_v4 = vld [vmem:[%s2145_s28 + $0x70] sm:$0xff] }
  0x19   : > { %1766 = vmatpush3.bf16.msra.mxu0 %v1899_v30  ;;  %v2250_v5 = vpack.c.bf16 %v2239_v63, %v2236_v62  ;;  %v2255_v6 = vld [vmem:[%s2181_s11 + $0x40] sm:$0xff]  ;;  %v2258_v7 = vld [vmem:[%s2181_s11 + $0x50] sm:$0xff]  ;;  %v573_v8 = vpack.c.bf16 %v357_v4, %v355_v3  ;;  %v2261_v9 = vld [vmem:[%s2181_s11 + $0x68] sm:$0xff] }
  0x1a   : > { %1767 = vmatprep.subr.bf16.mxu0 %v1900_v31  ;;  %v2264_v10 = vld [vmem:[%s2181_s11 + $0x78] sm:$0xff]  ;;  %v2268_v11 = vpack.c.bf16 %v2258_v7, %v2255_v6  ;;  %v2277_v13 = vld [vmem:[%s2181_s11 + $0x60] sm:$0xff]  ;;  %v2280_v14 = vld [vmem:[%s2181_s11 + $0x70] sm:$0xff] }
  0x1b   : > { %1808 = vmatpush3.bf16.msra.mxu1 %v1889_v16  ;;  %v2272_v12 = vpack.c.bf16 %v2264_v10, %v2261_v9  ;;  %v2284_v15 = vpack.c.bf16 %v2280_v14, %v2277_v13  ;;  %v2299_v33 = vld [vmem:[%s2733_s5] ss:$0 sm:$0xff] }
  0x1c   : > { %1809 = vmatprep.subr.bf16.mxu1 %v1891_v18 }
  0x1d   : > { %1768 = vmatpush3.bf16.msra.mxu0 %v1901_v32 }
  0x1e   : > { %1769 = vmatprep.subr.bf16.mxu0 %v1902_v36 }
  0x1f   : > { %1810 = vmatpush3.bf16.msra.mxu1 %v1893_v20  ;;  %v2290_v20 = vld [vmem:[%s2734_s6] ss:$0 sm:$0xff] }
  0x20   : > { %1811 = vmatprep.subr.bf16.mxu1 %v1895_v22 }
  0x21   : > { %1770 = vmatpush3.bf16.msra.mxu0 %v1903_v38 }
  0x22   : > { %1771 = vmatprep.subr.bf16.mxu0 %v1904_v39 }
  0x23   : > { %1812 = vmatpush3.bf16.msra.mxu1 %v1897_v25 }
  0x25   : > { %1772 = vmatpush3.bf16.msra.mxu0 %v1905_v47 }
  0x26   : > { %743 = vmatmul.mubr.bf16.vlgmr.msra.gmra.mrb[0].mxu1 %v567_v35 }
  0x27   : > { %750 = vmatprep.mubr.bf16.mxu1 %v570_v37 }
  0x28   : > { %535 = vmatmul.mubr.bf16.vlgmr.msra.gmra.mrb[0].mxu0 %v2218_v54 }
  0x29   : > { %542 = vmatprep.mubr.bf16.mxu0 %v2224_v57 }
  0x2e   : > { %751 = vmatmul.mubr.bf16.gmra.mrb[4].mxu1 %v569_v50 }
  0x2f   : > { %758 = vmatprep.mubr.bf16.mxu1 %v572_v53 }
  0x30   : > { %543 = vmatmul.mubr.bf16.gmra.mrb[4].mxu0 %v2244_v2 }
  0x31   : > { %550 = vmatprep.mubr.bf16.mxu0 %v2250_v5 }
  0x36   : > { %759 = vmatmul.mubr.bf16.gmra.mrb[8].mxu1 %v571_v0 }
  0x37   : > { %766 = vmatprep.mubr.bf16.mxu1 %v574_v1 }
  0x38   : > { %551 = vmatmul.mubr.bf16.gmra.mrb[8].mxu0 %v2268_v11 }
  0x39   : > { %558 = vmatprep.mubr.bf16.mxu0 %v2272_v12 }
  0x3e   : > { %767 = vmatmul.mubr.bf16.gmra.mrb[12].mxu1 %v573_v8 }
  0x40   : > { %559 = vmatmul.mubr.bf16.gmra.mrb[12].mxu0 %v2284_v15 }
  0x41   : > { %1011 = vmatprep.mubr.bf16.mxu0 %v360_v44 }
  0xf9   : > { %v1813_v16 = vpop.f32.mrb[0].mxu1 }
  0xfa   : > { %v1814_v17 = vpop.f32.mrb[1].mxu1 }
  0xfb   : > { %v1815_v18 = vadd.f32 %v1814_v17, %v1813_v16  ;;  %v1816_v19 = vpop.f32.mrb[2].mxu1  ;;  %v1773_v31 = vpop.f32.mrb[0].mxu0 }
  0xfc   : > { %v1817_v21 = vpop.f32.mrb[3].mxu1  ;;  %v1774_v34 = vpop.f32.mrb[1].mxu0 }
  0xfd   : > { %v1818_v22 = vadd.f32 %v1817_v21, %v1816_v19  ;;  %v745_v23 = vadd.f32 %v1815_v18, %v2290_v20  ;;  %v1775_v36 = vadd.f32 %v1774_v34, %v1773_v31  ;;  %v1776_v37 = vpop.f32.mrb[2].mxu0 }
  0xfe   : > { %v1777_v38 = vpop.f32.mrb[3].mxu0 }
  0xff   : > { %v748_v24 = vadd.f32 %v1818_v22, %v2290_v20  ;;  %v537_v42 = vadd.f32 %v1775_v36, %v2299_v33  ;;  %v1778_v44 = vadd.f32 %v1777_v38, %v1776_v37 }
 0x101   : > { %v1056_v25 = vpack.c.bf16 %v748_v24, %v745_v23  ;;  %v1819_v26 = vpop.f32.mrb[4].mxu1  ;;  %v540_v47 = vadd.f32 %v1778_v44, %v2299_v33 }
 0x102   : > { %v1820_v27 = vpop.f32.mrb[5].mxu1 }
 0x103   : > { %v1821_v28 = vadd.f32 %v1820_v27, %v1819_v26  ;;  %v1822_v29 = vpop.f32.mrb[6].mxu1  ;;  %1861 = vmatprep.subr.msk.bf16.mxu1 %vm1060_vm0, %v1056_v25  ;;  %v1074_v30 = vsel %vm1060_vm0, %v1056_v25, 0  ;;  %v1052_v58 = vpack.c.bf16 %v540_v47, %v537_v42  ;;  %v1779_v59 = vpop.f32.mrb[4].mxu0 }
 0x104   : > { %v1823_v32 = vpop.f32.mrb[7].mxu1  ;;  %1846 = vmatpush3.bf16.xpose.msra.mxu1 %v1074_v30  ;;  %v1780_v1 = vpop.f32.mrb[5].mxu0 }
 0x105   : > { %v1824_v35 = vadd.f32 %v1823_v32, %v1822_v29  ;;  %v753_v39 = vadd.f32 %v1821_v28, %v2290_v20  ;;  %v1781_v4 = vadd.f32 %v1780_v1, %v1779_v59  ;;  %v1782_v8 = vpop.f32.mrb[6].mxu0  ;;  %1853 = vmatprep.mubr.msk.bf16.mxu1 %vm1060_vm0, %v1052_v58 }
 0x106   : > { %v1783_v16 = vpop.f32.mrb[7].mxu0 }
 0x107   : > { %v756_v41 = vadd.f32 %v1824_v35, %v2290_v20  ;;  %v545_v19 = vadd.f32 %v1781_v4, %v2299_v33  ;;  %v1784_v21 = vadd.f32 %v1783_v16, %v1782_v8  ;;  %v1906_v4 = vld [vmem:[%s2732_s4] ss:$8 sps:$4 sm:$0xff]   ;;  %v1909_v8 = vld [vmem:[%s2732_s4 + $0x10] ss:$8 sps:$4 sm:$0xff]  }
 0x108   : > { %v1912_v16 = vld [vmem:[%s2732_s4 + $0x20] ss:$8 sps:$4 sm:$0xff]  }
 0x109   : > { %v1057_v45 = vpack.c.bf16 %v756_v41, %v753_v39  ;;  %v1825_v46 = vpop.f32.mrb[8].mxu1  ;;  %v548_v24 = vadd.f32 %v1784_v21, %v2299_v33  ;;  %v1920_v21 = vld [vmem:[%s2732_s4 + $0x44] ss:$8 sps:$4 sm:$0xff]  }
 0x10a   : > { %v1826_v50 = vpop.f32.mrb[9].mxu1 }
 0x10b   : > { %v1827_v53 = vadd.f32 %v1826_v50, %v1825_v46  ;;  %v1828_v55 = vpop.f32.mrb[10].mxu1  ;;  %1862 = vmatprep.subr.msk.bf16.mxu1 %vm1060_vm0, %v1057_v45  ;;  %v1077_v56 = vsel %vm1060_vm0, %v1057_v45, 0  ;;  %v1053_v29 = vpack.c.bf16 %v548_v24, %v545_v19  ;;  %v1785_v30 = vpop.f32.mrb[8].mxu0  ;;  %v1917_v19 = vld [vmem:[%s2732_s4 + $0x34] ss:$8 sps:$4 sm:$0xff]  }
 0x10c   : > { %v1829_v0 = vpop.f32.mrb[11].mxu1  ;;  %1848 = vmatpush3.bf16.xpose.msra.mxu1 %v1077_v56  ;;  %v1786_v32 = vpop.f32.mrb[9].mxu0  ;;  %v1921_v24 = vld [vmem:[%s2732_s4 + $0x50] ss:$8 sps:$4 sm:$0xff]  }
 0x10d   : > { %v1830_v3 = vadd.f32 %v1829_v0, %v1828_v55  ;;  %v761_v17 = vadd.f32 %v1827_v53, %v2290_v20  ;;  %v1787_v35 = vadd.f32 %v1786_v32, %v1785_v30  ;;  %v1788_v36 = vpop.f32.mrb[10].mxu0  ;;  %v1930_v30 = vld [vmem:[%s2732_s4 + $0x80] ss:$8 sps:$4 sm:$0xff]   ;;  %v1933_v32 = vld [vmem:[%s2732_s4 + $0x90] ss:$8 sps:$4 sm:$0xff]  }
 0x10e   : > { %v1789_v37 = vpop.f32.mrb[11].mxu0 }
 0x10f   : > { %v764_v18 = vadd.f32 %v1830_v3, %v2290_v20  ;;  %v553_v41 = vadd.f32 %v1787_v35, %v2299_v33  ;;  %v1790_v42 = vadd.f32 %v1789_v37, %v1788_v36  ;;  %v1908_v3 = vld [vmem:[%s2732_s4 + $0x4] ss:$8 sps:$4 sm:$0xff]   ;;  %v1936_v35 = vld [vmem:[%s2732_s4 + $0xa0] ss:$8 sps:$4 sm:$0xff]   ;;  %v1941_v36 = vld [vmem:[%s2732_s4 + $0xb4] ss:$8 sps:$4 sm:$0xff]  }
 0x110   : > { %979 = vmatprep.subr.bf16.mxu0 %v1908_v3  ;;  %v1939_v37 = vld [vmem:[%s2732_s4 + $0xb0] ss:$8 sps:$4 sm:$0xff]   ;;  %v809_v3 = vlaneseq }
 0x111   : > { %v1058_v22 = vpack.c.bf16 %v764_v18, %v761_v17  ;;  %v1831_v23 = vpop.f32.mrb[12].mxu1  ;;  %v556_v45 = vadd.f32 %v1790_v42, %v2299_v33  ;;  %980 = vmatpush1.bf16.msra.mxu0 %v1906_v4  ;;  %v1914_v17 = vld [vmem:[%s2732_s4 + $0x24] ss:$8 sps:$4 sm:$0xff]   ;;  %v1915_v18 = vld [vmem:[%s2732_s4 + $0x30] ss:$8 sps:$4 sm:$0xff]  }
 0x112   : > { %v1832_v25 = vpop.f32.mrb[13].mxu1  ;;  %v1945_v42 = vld [vmem:[%s2732_s4 + $0xd0] ss:$8 sps:$4 sm:$0xff]  }
 0x113   : > { %v1833_v26 = vadd.f32 %v1832_v25, %v1831_v23  ;;  %v1834_v27 = vpop.f32.mrb[14].mxu1  ;;  %1863 = vmatprep.subr.msk.bf16.mxu1 %vm1060_vm0, %v1058_v22  ;;  %v1080_v28 = vsel %vm1060_vm0, %v1058_v22, 0  ;;  %v1054_v47 = vpack.c.bf16 %v556_v45, %v553_v41  ;;  %v1791_v50 = vpop.f32.mrb[12].mxu0  ;;  %v1918_v22 = vld [vmem:[%s2732_s4 + $0x40] ss:$8 sps:$4 sm:$0xff]  }
 0x114   : > { %v1835_v31 = vpop.f32.mrb[15].mxu1  ;;  %1850 = vmatpush3.bf16.xpose.msra.mxu1 %v1080_v28  ;;  %v1792_v53 = vpop.f32.mrb[13].mxu0  ;;  %v1923_v23 = vld [vmem:[%s2732_s4 + $0x54] ss:$8 sps:$4 sm:$0xff]   ;;  %v1926_v25 = vld [vmem:[%s2732_s4 + $0x64] ss:$8 sps:$4 sm:$0xff]  }
 0x115   : > { %v1836_v34 = vadd.f32 %v1835_v31, %v1834_v27  ;;  %v769_v38 = vadd.f32 %v1833_v26, %v2290_v20  ;;  %v1793_v55 = vadd.f32 %v1792_v53, %v1791_v50  ;;  %v1794_v56 = vpop.f32.mrb[14].mxu0  ;;  %v1924_v26 = vld [vmem:[%s2732_s4 + $0x60] ss:$8 sps:$4 sm:$0xff]   ;;  %v1929_v27 = vld [vmem:[%s2732_s4 + $0x74] ss:$8 sps:$4 sm:$0xff]  }
 0x116   : > { %v1795_v58 = vpop.f32.mrb[15].mxu0  ;;  %v1927_v28 = vld [vmem:[%s2732_s4 + $0x70] ss:$8 sps:$4 sm:$0xff]   ;;  %v1935_v31 = vld [vmem:[%s2732_s4 + $0x94] ss:$8 sps:$4 sm:$0xff]  }
 0x117   : > { %v772_v39 = vadd.f32 %v1836_v34, %v2290_v20  ;;  %v561_v59 = vadd.f32 %v1793_v55, %v2299_v33  ;;  %v1796_v20 = vadd.f32 %v1795_v58, %v1794_v56  ;;  %v1938_v34 = vld [vmem:[%s2732_s4 + $0xa4] ss:$8 sps:$4 sm:$0xff]   ;;  %v1947_v41 = vld [vmem:[%s2732_s4 + $0xd4] ss:$8 sps:$4 sm:$0xff]   ;;  %v1948_v45 = vld [vmem:[%s2732_s4 + $0xe0] ss:$8 sps:$4 sm:$0xff]  }
 0x119   : > { %v1059_v44 = vpack.c.bf16 %v772_v39, %v769_v38  ;;  %v564_v0 = vadd.f32 %v1796_v20, %v2299_v33  ;;  %v1911_v33 = vld [vmem:[%s2732_s4 + $0x14] ss:$8 sps:$4 sm:$0xff]   ;;  %v1944_v38 = vld [vmem:[%s2732_s4 + $0xc4] ss:$8 sps:$4 sm:$0xff]   ;;  %v1942_v39 = vld [vmem:[%s2732_s4 + $0xc0] ss:$8 sps:$4 sm:$0xff]  }
 0x11a   : > { %981 = vmatprep.subr.bf16.mxu0 %v1911_v33 }
 0x11b   : > { %1864 = vmatprep.subr.msk.bf16.mxu1 %vm1060_vm0, %v1059_v44  ;;  %v1083_v46 = vsel %vm1060_vm0, %v1059_v44, 0  ;;  %v1055_v1 = vpack.c.bf16 %v564_v0, %v561_v59  ;;  %982 = vmatpush1.bf16.msra.mxu0 %v1909_v8  ;;  %v1950_v44 = vld [vmem:[%s2732_s4 + $0xe4] ss:$8 sps:$4 sm:$0xff]  }
 0x11c   : > { %1852 = vmatpush3.bf16.xpose.msra.mxu1 %v1083_v46  ;;  %983 = vmatprep.subr.bf16.mxu0 %v1914_v17  ;;  %v1953_v46 = vld [vmem:[%s2732_s4 + $0xf4] ss:$8 sps:$4 sm:$0xff]  }
 0x11f   : > { %984 = vmatpush1.bf16.msra.mxu0 %v1912_v16  ;;  %v810_v16 = vshrl.u32 %v809_v3, 7 }
 0x120   : > { %985 = vmatprep.subr.bf16.mxu0 %v1917_v19 }
 0x123   : > { %1854 = vmatmul.mubr.msk.bf16.vlgmr.msra.gmra.mrb[16].mxu1 %vm1060_vm0, %v1053_v29  ;;  %986 = vmatpush1.bf16.msra.mxu0 %v1915_v18  ;;  %v1932_v29 = vld [vmem:[%s2732_s4 + $0x84] ss:$8 sps:$4 sm:$0xff]  }
 0x124   : > { %1857 = vmatprep.mubr.msk.bf16.mxu1 %vm1060_vm0, %v1054_v47  ;;  %987 = vmatprep.subr.bf16.mxu0 %v1920_v21  ;;  %v1951_v47 = vld [vmem:[%s2732_s4 + $0xf0] ss:$8 sps:$4 sm:$0xff]  }
 0x127   : > { %988 = vmatpush1.bf16.msra.mxu0 %v1918_v22 }
 0x128   : > { %989 = vmatprep.subr.bf16.mxu0 %v1923_v23 }
 0x12b   : > { %1858 = vmatmul.mubr.msk.bf16.gmra.mrb[20].mxu1 %vm1060_vm0, %v1055_v1  ;;  %990 = vmatpush1.bf16.msra.mxu0 %v1921_v24  ;;  %v811_v24 = vsub.s32 0, %v810_v16 }
 0x12c   : > { %991 = vmatprep.subr.bf16.mxu0 %v1926_v25  ;;  %v815_v25 = vsub.s32 1, %v810_v16 }
 0x12f   : > { %992 = vmatpush1.bf16.msra.mxu0 %v1924_v26 }
 0x130   : > { %993 = vmatprep.subr.bf16.mxu0 %v1929_v27  ;;  %v807_v27 = vld [vmem:[%s2735_s7] sm:$0x3] }
 0x133   : > { %994 = vmatpush1.bf16.msra.mxu0 %v1927_v28 }
 0x134   : > { %995 = vmatprep.subr.bf16.mxu0 %v1932_v29 }
 0x137   : > { %996 = vmatpush1.bf16.msra.mxu0 %v1930_v30 }
 0x138   : > { %997 = vmatprep.subr.bf16.mxu0 %v1935_v31  ;;  %v2439_v31 = vrot.slane %v807_v27, %v811_v24 }
 0x13b   : > { %998 = vmatpush1.bf16.msra.mxu0 %v1933_v32  ;;  %v2441_v32 = vrot.slane %v807_v27, %v815_v25 }
 0x13c   : > { %999 = vmatprep.subr.bf16.mxu0 %v1938_v34 }
 0x13f   : > { %1000 = vmatpush1.bf16.msra.mxu0 %v1936_v35 }
 0x140   : > { %1001 = vmatprep.subr.bf16.mxu0 %v1941_v36 }
 0x143   : > { %1002 = vmatpush1.bf16.msra.mxu0 %v1939_v37 }
 0x144   : > { %1003 = vmatprep.subr.bf16.mxu0 %v1944_v38 }
 0x147   : > { %1004 = vmatpush1.bf16.msra.mxu0 %v1942_v39 }
 0x148   : > { %1005 = vmatprep.subr.bf16.mxu0 %v1947_v41 }
 0x14b   : > { %1006 = vmatpush1.bf16.msra.mxu0 %v1945_v42 }
 0x14c   : > { %1007 = vmatprep.subr.bf16.mxu0 %v1950_v44 }
 0x14f   : > { %1008 = vmatpush1.bf16.msra.mxu0 %v1948_v45 }
 0x150   : > { %1009 = vmatprep.subr.bf16.mxu0 %v1953_v46 }
 0x153   : > { %1010 = vmatpush1.bf16.msra.mxu0 %v1951_v47 }
 0x156   : > { %1012 = vmatmul.mubr.bf16.vlgmr.msra.gmra.mrb[16].mxu0 %v2218_v54 }
 0x157   : > { %1021 = vmatprep.mubr.bf16.mxu0 %v2224_v57 }
 0x15e   : > { %1022 = vmatmul.mubr.bf16.gmra.mrb[20].mxu0 %v2244_v2 }
 0x15f   : > { %1031 = vmatprep.mubr.bf16.mxu0 %v2250_v5 }
 0x166   : > { %1032 = vmatmul.mubr.bf16.gmra.mrb[24].mxu0 %v2268_v11 }
 0x167   : > { %1041 = vmatprep.mubr.bf16.mxu0 %v2272_v12 }
 0x16e   : > { %1042 = vmatmul.mubr.bf16.gmra.mrb[28].mxu0 %v2284_v15 }
 0x1f6   : > { %v1855_v50 = vpop.f32.mrb[16].mxu1 }
 0x1f7   : > { %v1119_v53 = vpop.f32.mrb[17].mxu1  ;;  %v1157_v55 = vsel %vm1150_vm1, %v1855_v50, -inf }
 0x1f8   : > { %1158 = vmax.xlane.f32.xlu1 %v1157_v55  ;;  %v1856_v56 = vpop.f32.mrb[18].mxu1  ;;  %v1151_v54 = vsel %vm1150_vm1, %v1119_v53, -inf }
 0x1f9   : > { %1152 = vmax.xlane.f32.xlu0 %v1151_v54  ;;  %v1122_v57 = vpop.f32.mrb[19].mxu1  ;;  %v1160_v2 = vsel %vm1150_vm1, %v1856_v56, -inf }
 0x1fa   : > { %v1154_v5 = vsel %vm1150_vm1, %v1122_v57, -inf }
 0x1fc   : > { %1161 = vmax.xlane.f32.xlu1 %v1160_v2 }
 0x1fd   : > { %1155 = vmax.xlane.f32.xlu0 %v1154_v5 }
 0x1fe   : > { %v1859_v11 = vpop.f32.mrb[20].mxu1 }
 0x1ff   : > { %v1135_v12 = vpop.f32.mrb[21].mxu1  ;;  %v1169_v0 = vsel %vm1150_vm1, %v1859_v11, -inf }
 0x200   : > { %v1860_v15 = vpop.f32.mrb[22].mxu1  ;;  %v1163_v58 = vsel %vm1150_vm1, %v1135_v12, -inf }
 0x201   : > { %1164 = vmax.xlane.f32.xlu0 %v1163_v58  ;;  %v1138_v59 = vpop.f32.mrb[23].mxu1  ;;  %v1172_v1 = vsel %vm1150_vm1, %v1860_v15, -inf }
 0x202   : > { %v1166_v20 = vsel %vm1150_vm1, %v1138_v59, -inf }
 0x203   : > { %1167 = vmax.xlane.f32.xlu1 %v1166_v20 }
 0x205   : > { %1170 = vmax.xlane.f32.xlu0 %v1169_v0 }
 0x207   : > { %1173 = vmax.xlane.f32.xlu1 %v1172_v1 }
 0x229   : > { %v1013_v36 = vpop.f32.mrb[16].mxu0 }
 0x22a   : > { %v1015_v39 = vpop.f32.mrb[17].mxu0  ;;  %v1014_v42 = vadd.f32 %v1013_v36, %v2439_v31 }
 0x22b   : > { %v1016_v44 = vadd.f32 %v1015_v39, %v2441_v32  ;;  %v1017_v45 = vpop.f32.mrb[18].mxu0 }
 0x285   : > { %v1159_v4 = vpop.xlane.xlu1 %1158 }
 0x286   : > { %v1177_v33 = vsub.f32 %v1855_v50, %v1159_v4  ;;  %v1153_v8 = vpop.xlane.xlu0 %1152  ;;  %v1018_v50 = vadd.f32 %v1017_v45, %v2439_v31 }
 0x287   : > { %v1175_v17 = vsub.f32 %v1119_v53, %v1153_v8  ;;  %v1019_v53 = vpop.f32.mrb[19].mxu0 }
 0x288   : > { %v1187_v18 = vmul.f32 1.442695, %v1177_v33  ;;  %v1023_v20 = vpop.f32.mrb[20].mxu0 }
 0x289   : > { %v1183_v19 = vmul.f32 1.442695, %v1175_v17  ;;  %v1162_v21 = vpop.xlane.xlu1 %1161  ;;  %v1024_v1 = vadd.f32 %v1023_v20, %v2439_v31  ;;  %v1025_v3 = vpop.f32.mrb[21].mxu0 }
 0x28a   : > { %v1178_v22 = vsub.f32 %v1856_v56, %v1162_v21  ;;  %v1156_v23 = vpop.xlane.xlu0 %1155  ;;  %v1020_v56 = vadd.f32 %v1019_v53, %v2441_v32  ;;  %v1026_v33 = vadd.f32 %v1025_v3, %v2441_v32  ;;  %v1027_v8 = vpop.f32.mrb[22].mxu0 }
 0x28b   : > { %1954 = vpow2.f32 %v1183_v19  ;;  %v1176_v26 = vsub.f32 %v1122_v57, %v1156_v23  ;;  %v1028_v17 = vadd.f32 %v1027_v8, %v2439_v31 }
 0x28c   : > { %1956 = vpow2.f32 %v1187_v18  ;;  %v1189_v28 = vmul.f32 1.442695, %v1178_v22  ;;  %v1244_v58 = vpack.c.bf16 %v1020_v56, %v1016_v44  ;;  %v1029_v18 = vpop.f32.mrb[23].mxu0 }
 0x28d   : > { %v1185_v29 = vmul.f32 1.442695, %v1176_v26  ;;  %v1030_v19 = vadd.f32 %v1029_v18, %v2441_v32  ;;  %v1245_v22 = vpack.c.bf16 %v1028_v17, %v1024_v1  ;;  %v1033_v27 = vpop.f32.mrb[24].mxu0 }
 0x28e   : > { %v1165_v30 = vpop.xlane.xlu0 %1164  ;;  %1263 = vmatprep.subr.bf16.mxu1 %v1244_v58 }
 0x28f   : > { %1958 = vpow2.f32 %v1185_v29  ;;  %v1179_v34 = vsub.f32 %v1135_v12, %v1165_v30  ;;  %v1243_v12 = vpack.c.bf16 %v1018_v50, %v1014_v42  ;;  %v1246_v25 = vpack.c.bf16 %v1030_v19, %v1026_v33  ;;  %v1035_v30 = vpop.f32.mrb[25].mxu0 }
 0x290   : > { %v1168_v35 = vpop.xlane.xlu1 %1167  ;;  %1960 = vpow2.f32 %v1189_v28  ;;  %v1034_v29 = vadd.f32 %v1033_v27, %v2439_v31  ;;  %v1036_v36 = vadd.f32 %v1035_v30, %v2441_v32 }
 0x291   : > { %v1191_v37 = vmul.f32 1.442695, %v1179_v34  ;;  %v1180_v38 = vsub.f32 %v1138_v59, %v1168_v35  ;;  %1264 = vmatpush1.bf16.msra.mxu1 %v1243_v12 }
 0x292   : > { %v1171_v41 = vpop.xlane.xlu0 %1170  ;;  %1265 = vmatprep.subr.bf16.mxu1 %v1246_v25 }
 0x293   : > { %1962 = vpow2.f32 %v1191_v37  ;;  %v1193_v46 = vmul.f32 1.442695, %v1180_v38  ;;  %v1181_v47 = vsub.f32 %v1859_v11, %v1171_v41  ;;  %v1037_v37 = vpop.f32.mrb[26].mxu0 }
 0x294   : > { %v1174_v55 = vpop.xlane.xlu1 %1173  ;;  %v1038_v39 = vadd.f32 %v1037_v37, %v2439_v31  ;;  %v1039_v41 = vpop.f32.mrb[27].mxu0 }
 0x295   : > { %v2447_v54 = vpop.eup %1954  ;;  %1964 = vpow2.f32 %v1193_v46  ;;  %v1195_v57 = vmul.f32 1.442695, %v1181_v47  ;;  %v1182_v2 = vsub.f32 %v1860_v15, %v1174_v55  ;;  %1266 = vmatpush1.bf16.msra.mxu1 %v1245_v22  ;;  %v1040_v42 = vadd.f32 %v1039_v41, %v2441_v32  ;;  %v1043_v47 = vpop.f32.mrb[28].mxu0 }
 0x296   : > { %v1199_v5 = vsel %vm1150_vm1, %v2447_v54, 0.0  ;;  %v2451_v59 = vpop.eup %1956  ;;  %v1247_v44 = vpack.c.bf16 %v1038_v39, %v1034_v29  ;;  %v1045_v50 = vpop.f32.mrb[29].mxu0  ;;  %v1044_v56 = vadd.f32 %v1043_v47, %v2439_v31  ;;  %v1365_v41 = vadd.f32 %v2208_v49, %v2205_v48 }
 0x297   : > { %1966 = vpow2.f32 %v1195_v57  ;;  %v1197_v11 = vmul.f32 1.442695, %v1182_v2  ;;  %1200 = vadd.xlane.f32.xlu0 %v1199_v5  ;;  %v1205_v15 = vsel %vm1150_vm1, %v2451_v59, 0.0  ;;  %v1248_v46 = vpack.c.bf16 %v1040_v42, %v1036_v36  ;;  %v1047_v53 = vpop.f32.mrb[30].mxu0 }
 0x298   : > { %v1049_v55 = vpop.f32.mrb[31].mxu0  ;;  %v1046_v57 = vadd.f32 %v1045_v50, %v2441_v32  ;;  %v1048_v5 = vadd.f32 %v1047_v53, %v2439_v31 }
 0x299   : > { %v2453_v0 = vpop.eup %1958  ;;  %1968 = vpow2.f32 %v1197_v11  ;;  %1267 = vmatprep.subr.bf16.mxu1 %v1248_v46  ;;  %v1050_v2 = vadd.f32 %v1049_v55, %v2441_v32  ;;  %v2018_v11 = vmov 0  }
 0x29a   : > { %v1202_v4 = vsel %vm1150_vm1, %v2453_v0, 0.0  ;;  %v2461_v16 = vpop.eup %1960  ;;  %1268 = vmatpush1.bf16.msra.mxu1 %v1247_v44  ;;  %v1249_v58 = vpack.c.bf16 %v1048_v5, %v1044_v56  ;;  %1295 = vmatprep.mubr.bf16.mxu1 %v2018_v11 }
 0x29b   : > { %1206 = vadd.xlane.f32.xlu0 %v1205_v15  ;;  %1203 = vadd.xlane.f32.xlu1 %v1202_v4  ;;  %v1208_v24 = vsel %vm1150_vm1, %v2461_v16, 0.0  ;;  %v1250_v12 = vpack.c.bf16 %v1050_v2, %v1046_v57 }
 0x29d   : > { %v2465_v21 = vpop.eup %1962  ;;  %1269 = vmatprep.subr.bf16.mxu1 %v1250_v12 }
 0x29e   : > { %v1211_v23 = vsel %vm1150_vm1, %v2465_v21, 0.0  ;;  %1270 = vmatpush1.bf16.msra.mxu1 %v1249_v58 }
 0x29f   : > { %v2471_v26 = vpop.eup %1964  ;;  %1212 = vadd.xlane.f32.xlu0 %v1211_v23  ;;  %1209 = vadd.xlane.f32.xlu1 %v1208_v24 }
 0x2a0   : > { %v1214_v35 = vsel %vm1150_vm1, %v2471_v26, 0.0 }
 0x2a1   : > { %v2473_v28 = vpop.eup %1966 }
 0x2a2   : > { %v1217_v34 = vsel %vm1150_vm1, %v2473_v28, 0.0 }
 0x2a3   : > { %v2481_v38 = vpop.eup %1968  ;;  %1218 = vadd.xlane.f32.xlu0 %v1217_v34  ;;  %1215 = vadd.xlane.f32.xlu1 %v1214_v35 }
 0x2a4   : > { %v1220_v45 = vsel %vm1150_vm1, %v2481_v38, 0.0 }
 0x2a7   : > { %1221 = vadd.xlane.f32.xlu1 %v1220_v45 }
 0x324   : > { %v1201_v20 = vpop.xlane.xlu0 %1200 }
 0x325   : > { %1970 = vrcp.f32 %v1201_v20 }
 0x328   : > { %v1204_v1 = vpop.xlane.xlu1 %1203  ;;  %v1207_v15 = vpop.xlane.xlu0 %1206 }
 0x329   : > { %1972 = vrcp.f32 %v1204_v1 }
 0x32c   : > { %v1210_v3 = vpop.xlane.xlu1 %1209  ;;  %v1213_v17 = vpop.xlane.xlu0 %1212 }
 0x32d   : > { %1974 = vrcp.f32 %v1210_v3 }
 0x32e   : > { %1976 = vrcp.f32 %v1207_v15 }
 0x32f   : > { %v1971_v4 = vpop.eup %1970 }
 0x330   : > { %v1216_v33 = vpop.xlane.xlu1 %1215  ;;  %v1231_v32 = vmul.f32 %v1971_v4, %v2447_v54  ;;  %v1219_v25 = vpop.xlane.xlu0 %1218 }
 0x331   : > { %1978 = vrcp.f32 %v1216_v33 }
 0x332   : > { %1980 = vrcp.f32 %v1213_v17 }
 0x333   : > { %v1973_v8 = vpop.eup %1972 }
 0x334   : > { %v1232_v31 = vmul.f32 %v1973_v8, %v2453_v0  ;;  %v1222_v23 = vpop.xlane.xlu1 %1221 }
 0x335   : > { %1982 = vrcp.f32 %v1222_v23 }
 0x336   : > { %v1239_v18 = vpack.c.bf16 %v1232_v31, %v1231_v32  ;;  %1984 = vrcp.f32 %v1219_v25 }
 0x337   : > { %v1975_v19 = vpop.eup %1974 }
 0x338   : > { %1748 = vmatmul.mubr.msk.bf16.vlgmr.msra.gmra.mrb[24].mxu1 %vm1150_vm1, %v1239_v18  ;;  %v1977_v22 = vpop.eup %1976  ;;  %v1234_v24 = vmul.f32 %v1975_v19, %v2461_v16 }
 0x339   : > { %1305 = vmatprep.mubr.bf16.mxu1 %v2018_v11  ;;  %v1233_v27 = vmul.f32 %v1977_v22, %v2451_v59 }
 0x33b   : > { %v1240_v29 = vpack.c.bf16 %v1234_v24, %v1233_v27  ;;  %v1979_v54 = vpop.eup %1978 }
 0x33c   : > { %v1981_v0 = vpop.eup %1980  ;;  %v1236_v30 = vmul.f32 %v1979_v54, %v2471_v26  ;;  %v1366_v26 = vadd.f32 %v1365_v41, %v2229_v60 }
 0x33d   : > { %v1235_v34 = vmul.f32 %v1981_v0, %v2465_v21  ;;  %v1378_v21 = vadd.f32 %v2195_v43, %v2190_v40 }
 0x33e   : > { %v1367_v42 = vadd.f32 %v1366_v26, %v2232_v61 }
 0x33f   : > { %v1241_v35 = vpack.c.bf16 %v1236_v30, %v1235_v34  ;;  %v1983_v36 = vpop.eup %1982  ;;  %v1379_v44 = vadd.f32 %v1378_v21, %v2211_v51 }
 0x340   : > { %1749 = vmatmul.mubr.msk.bf16.gmra.mrb[28].mxu1 %vm1150_vm1, %v1240_v29  ;;  %v1985_v16 = vpop.eup %1984  ;;  %v1238_v59 = vmul.f32 %v1983_v36, %v2481_v38  ;;  %v1368_v45 = vadd.f32 %v1367_v42, %v2255_v6 }
 0x341   : > { %1315 = vmatprep.mubr.bf16.mxu1 %v2018_v11  ;;  %v1237_v37 = vmul.f32 %v1985_v16, %v2473_v28  ;;  %v1380_v38 = vadd.f32 %v1379_v44, %v2214_v52 }
 0x342   : > { %v1369_v28 = vadd.f32 %v1368_v45, %v2258_v7 }
 0x343   : > { %v1242_v39 = vpack.c.bf16 %v1238_v59, %v1237_v37  ;;  %v1381_v46 = vadd.f32 %v1380_v38, %v2236_v62 }
 0x344   : > { %v1370_v47 = vadd.f32 %v1369_v28, %v2277_v13 }
 0x345   : > { %v1382_v50 = vadd.f32 %v1381_v46, %v2239_v63 }
 0x346   : > { %v1371_v53 = vadd.f32 %v1370_v47, %v2280_v14 }
 0x347   : > { %v1383_v55 = vadd.f32 %v1382_v50, %v2261_v9 }
 0x348   : > { %1750 = vmatmul.mubr.msk.bf16.gmra.mrb[32].mxu1 %vm1150_vm1, %v1241_v35  ;;  %v1372_v56 = vrot.slane %v1371_v53, 4 }
 0x349   : > { %1325 = vmatprep.mubr.bf16.mxu1 %v2018_v11  ;;  %v1384_v57 = vadd.f32 %v1383_v55, %v2264_v10 }
 0x34a   : > { %v1373_v2 = vadd.f32 %v1372_v56, %v1371_v53 }
 0x34b   : > { %v1385_v5 = vrot.slane %v1384_v57, 4 }
 0x34c   : > { %v1374_v12 = vrot.slane %v1373_v2, 2 }
 0x34d   : > { %v1386_v58 = vadd.f32 %v1385_v5, %v1384_v57 }
 0x34e   : > { %v1375_v11 = vadd.f32 %v1374_v12, %v1373_v2 }
 0x34f   : > { %v1387_v20 = vrot.slane %v1386_v58, 2 }
 0x350   : > { %1751 = vmatmul.mubr.msk.bf16.gmra.mrb[36].mxu1 %vm1150_vm1, %v1242_v39  ;;  %v1376_v1 = vrot.slane %v1375_v11, 1 }
 0x351   : > { %v1388_v3 = vadd.f32 %v1387_v20, %v1386_v58 }
 0x352   : > { %v1377_v15 = vadd.f32 %v1376_v1, %v1375_v11 }
 0x353   : > { %v1389_v4 = vrot.slane %v1388_v3, 1 }
 0x354   : > { %v2519_v33 = vmul.f32 0.015625, %v1377_v15 }
 0x355   : > { %v1390_v8 = vadd.f32 %v1389_v4, %v1388_v3 }
 0x356   : > { %v1454_v32 = vsub.f32 %v2205_v48, %v2519_v33  ;;  %v1456_v31 = vsub.f32 %v2208_v49, %v2519_v33  ;;  %v1458_v18 = vsub.f32 %v2229_v60, %v2519_v33  ;;  %v1460_v48 = vsub.f32 %v2232_v61, %v2519_v33 }
 0x357   : > { %v2525_v17 = vmul.f32 0.015625, %v1390_v8  ;;  %v1462_v61 = vsub.f32 %v2255_v6, %v2519_v33  ;;  %v1464_v39 = vsub.f32 %v2258_v7, %v2519_v33  ;;  %v1466_v47 = vsub.f32 %v2277_v13, %v2519_v33 }
 0x358   : > { %v1470_v19 = vmul.f32 %v1454_v32, %v1454_v32  ;;  %v1472_v22 = vmul.f32 %v1456_v31, %v1456_v31  ;;  %v1474_v27 = vmul.f32 %v1458_v18, %v1458_v18  ;;  %v1476_v35 = vmul.f32 %v1460_v48, %v1460_v48 }
 0x359   : > { %v1455_v23 = vsub.f32 %v2190_v40, %v2525_v17  ;;  %v1457_v24 = vsub.f32 %v2195_v43, %v2525_v17  ;;  %v1459_v60 = vsub.f32 %v2211_v51, %v2525_v17  ;;  %v1461_v16 = vsub.f32 %v2214_v52, %v2525_v17 }
 0x35a   : > { %v1486_v49 = vadd.f32 %v1472_v22, %v1470_v19  ;;  %v1478_v41 = vmul.f32 %v1462_v61, %v1462_v61  ;;  %v1463_v52 = vsub.f32 %v2236_v62, %v2525_v17  ;;  %v1480_v50 = vmul.f32 %v1464_v39, %v1464_v39 }
 0x35b   : > { %v1471_v0 = vmul.f32 %v1455_v23, %v1455_v23  ;;  %v1473_v30 = vmul.f32 %v1457_v24, %v1457_v24  ;;  %v1475_v59 = vmul.f32 %v1459_v60, %v1459_v60  ;;  %v1477_v45 = vmul.f32 %v1461_v16, %v1461_v16 }
 0x35c   : > { %v1487_v36 = vadd.f32 %v1486_v49, %v1474_v27  ;;  %v1465_v55 = vsub.f32 %v2239_v63, %v2525_v17  ;;  %v1479_v56 = vmul.f32 %v1463_v52, %v1463_v52  ;;  %v1467_v62 = vsub.f32 %v2261_v9, %v2525_v17 }
 0x35d   : > { %v1499_v51 = vadd.f32 %v1473_v30, %v1471_v0  ;;  %v1468_v5 = vsub.f32 %v2280_v14, %v2519_v33  ;;  %v1482_v12 = vmul.f32 %v1466_v47, %v1466_v47  ;;  %v1469_v32 = vsub.f32 %v2264_v10, %v2525_v17 }
 0x35e   : > { %v1488_v26 = vadd.f32 %v1487_v36, %v1476_v35  ;;  %v1481_v3 = vmul.f32 %v1465_v55, %v1465_v55  ;;  %v1483_v9 = vmul.f32 %v1467_v62, %v1467_v62 }
 0x35f   : > { %v1500_v38 = vadd.f32 %v1499_v51, %v1475_v59  ;;  %v1484_v31 = vmul.f32 %v1468_v5, %v1468_v5  ;;  %v1485_v24 = vmul.f32 %v1469_v32, %v1469_v32 }
 0x360   : > { %v1489_v53 = vadd.f32 %v1488_v26, %v1478_v41 }
 0x361   : > { %v1501_v57 = vadd.f32 %v1500_v38, %v1477_v45 }
 0x362   : > { %v1490_v20 = vadd.f32 %v1489_v53, %v1480_v50 }
 0x363   : > { %v1502_v15 = vadd.f32 %v1501_v57, %v1479_v56 }
 0x364   : > { %v1491_v18 = vadd.f32 %v1490_v20, %v1482_v12 }
 0x365   : > { %v1503_v14 = vadd.f32 %v1502_v15, %v1481_v3 }
 0x366   : > { %v1492_v48 = vadd.f32 %v1491_v18, %v1484_v31 }
 0x367   : > { %v1504_v60 = vadd.f32 %v1503_v14, %v1483_v9 }
 0x368   : > { %v1493_v61 = vrot.slane %v1492_v48, 4 }
 0x369   : > { %v1505_v36 = vadd.f32 %v1504_v60, %v1485_v24 }
 0x36a   : > { %v1494_v51 = vadd.f32 %v1493_v61, %v1492_v48 }
 0x36b   : > { %v1506_v41 = vrot.slane %v1505_v36, 4 }
 0x36c   : > { %v1495_v52 = vrot.slane %v1494_v51, 2 }
 0x36d   : > { %v1507_v38 = vadd.f32 %v1506_v41, %v1505_v36 }
 0x36e   : > { %v1496_v50 = vadd.f32 %v1495_v52, %v1494_v51 }
 0x36f   : > { %v1508_v55 = vrot.slane %v1507_v38, 2 }
 0x370   : > { %v1497_v3 = vrot.slane %v1496_v50, 1 }
 0x40b   : > { %v2533_v25 = vpop.f32.mrb[24].mxu1 }
 0x40c   : > { %v2537_v29 = vpop.f32.mrb[25].mxu1 }
 0x40d   : > { %v2539_v54 = vpop.f32.mrb[26].mxu1 }
 0x40e   : > { %v1336_v40 = vadd.f32 %v2539_v54, %v2533_v25  ;;  %v2545_v43 = vpop.f32.mrb[27].mxu1 }
 0x40f   : > { %v1349_v34 = vadd.f32 %v2545_v43, %v2537_v29 }
 0x413   : > { %v2553_v37 = vpop.f32.mrb[28].mxu1 }
 0x414   : > { %v1337_v21 = vadd.f32 %v1336_v40, %v2553_v37  ;;  %v2558_v42 = vpop.f32.mrb[29].mxu1 }
 0x415   : > { %v1350_v6 = vadd.f32 %v1349_v34, %v2558_v42  ;;  %v2561_v44 = vpop.f32.mrb[30].mxu1 }
 0x416   : > { %v1338_v28 = vadd.f32 %v1337_v21, %v2561_v44  ;;  %v2566_v46 = vpop.f32.mrb[31].mxu1 }
 0x417   : > { %v1351_v7 = vadd.f32 %v1350_v6, %v2566_v46 }
 0x41b   : > { %v1317_v2 = vpop.f32.mrb[32].mxu1 }
 0x41c   : > { %v1339_v58 = vadd.f32 %v1338_v28, %v1317_v2  ;;  %v2577_v11 = vpop.f32.mrb[33].mxu1 }
 0x41d   : > { %v1352_v13 = vadd.f32 %v1351_v7, %v2577_v11  ;;  %v1321_v1 = vpop.f32.mrb[34].mxu1 }
 0x41e   : > { %v1340_v63 = vadd.f32 %v1339_v58, %v1321_v1  ;;  %v1323_v4 = vpop.f32.mrb[35].mxu1 }
 0x41f   : > { %v1353_v8 = vadd.f32 %v1352_v13, %v1323_v4 }
 0x423   : > { %v1327_v19 = vpop.f32.mrb[36].mxu1 }
 0x424   : > { %v1341_v22 = vadd.f32 %v1340_v63, %v1327_v19  ;;  %v1329_v23 = vpop.f32.mrb[37].mxu1 }
 0x425   : > { %v1354_v27 = vadd.f32 %v1353_v8, %v1329_v23  ;;  %v1331_v49 = vpop.f32.mrb[38].mxu1 }
 0x426   : > { %v1342_v0 = vadd.f32 %v1341_v22, %v1331_v49  ;;  %v1333_v30 = vpop.f32.mrb[39].mxu1  ;;  %v1498_v22 = vadd.f32 %v1497_v3, %v1496_v50 }
 0x427   : > { %v1355_v40 = vadd.f32 %v1354_v27, %v1333_v30 }
 0x428   : > { %v1343_v34 = vrot.slane %v1342_v0, 4 }
 0x429   : > { %v1356_v35 = vrot.slane %v1355_v40, 4 }
 0x42a   : > { %v1344_v10 = vadd.f32 %v1343_v34, %v1342_v0  ;;  %v1512_v34 = vmul.f32 0.015873017, %v1498_v22 }
 0x42b   : > { %v1357_v16 = vadd.f32 %v1356_v35, %v1355_v40 }
 0x42c   : > { %v1345_v59 = vrot.slane %v1344_v10, 2  ;;  %v1514_v41 = vadd.f32 1e-05, %v1512_v34 }
 0x42d   : > { %v1358_v39 = vrot.slane %v1357_v16, 2 }
 0x42e   : > { %v1346_v26 = vadd.f32 %v1345_v59, %v1344_v10  ;;  %1986 = vrsqrt.f32 %v1514_v41  ;;  %vm1518_vm2 = vcmp.eq.f32.partialorder %v1514_v41, inf  ;;  %vm1520_vm3 = vcmp.eq.f32.partialorder %v1514_v41, 0.0 }
 0x42f   : > { %v1359_v21 = vadd.f32 %v1358_v39, %v1357_v16 }
 0x430   : > { %v1347_v6 = vrot.slane %v1346_v26, 1 }
 0x431   : > { %v1360_v45 = vrot.slane %v1359_v21, 1 }
 0x432   : > { %v1348_v28 = vadd.f32 %v1347_v6, %v1346_v26 }
 0x433   : > { %v1361_v7 = vadd.f32 %v1360_v45, %v1359_v21 }
 0x434   : > { %v1363_v47 = vmul.f32 0.015625, %v1348_v28 }
 0x435   : > { %v1364_v53 = vmul.f32 0.015625, %v1361_v7 }
 0x436   : > { %v2583_v56 = vsub.f32 %v2533_v25, %v1363_v47  ;;  %v2586_v57 = vsub.f32 %v2539_v54, %v1363_v47  ;;  %v2589_v62 = vsub.f32 %v2553_v37, %v1363_v47  ;;  %v2592_v5 = vsub.f32 %v2561_v44, %v1363_v47 }
 0x437   : > { %v2594_v12 = vsub.f32 %v1317_v2, %v1363_v47  ;;  %v2596_v58 = vsub.f32 %v1321_v1, %v1363_v47  ;;  %v2598_v20 = vsub.f32 %v1327_v19, %v1363_v47  ;;  %v2600_v13 = vsub.f32 %v1331_v49, %v1363_v47 }
 0x438   : > { %v1409_v25 = vmul.f32 %v2583_v56, %v2583_v56  ;;  %v1411_v54 = vmul.f32 %v2586_v57, %v2586_v57  ;;  %v1413_v37 = vmul.f32 %v2589_v62, %v2589_v62  ;;  %v1415_v44 = vmul.f32 %v2592_v5, %v2592_v5 }
 0x439   : > { %v1509_v2 = vadd.f32 %v1508_v55, %v1507_v38  ;;  %v2611_v15 = vsub.f32 %v2537_v29, %v1364_v53  ;;  %v2614_v63 = vsub.f32 %v2545_v43, %v1364_v53  ;;  %v2617_v8 = vsub.f32 %v2558_v42, %v1364_v53 }
 0x43a   : > { %v1425_v1 = vadd.f32 %v1411_v54, %v1409_v25  ;;  %v2620_v32 = vsub.f32 %v2566_v46, %v1364_v53  ;;  %v2623_v9 = vsub.f32 %v2577_v11, %v1364_v53  ;;  %v2625_v31 = vsub.f32 %v1323_v4, %v1364_v53 }
 0x43b   : > { %v2627_v18 = vsub.f32 %v1329_v23, %v1364_v53  ;;  %v2629_v19 = vsub.f32 %v1333_v30, %v1364_v53  ;;  %v1410_v29 = vmul.f32 %v2611_v15, %v2611_v15  ;;  %v1412_v43 = vmul.f32 %v2614_v63, %v2614_v63 }
 0x43c   : > { %v1426_v14 = vadd.f32 %v1425_v1, %v1413_v37  ;;  %v1417_v42 = vmul.f32 %v2594_v12, %v2594_v12  ;;  %v1414_v11 = vmul.f32 %v2617_v8, %v2617_v8  ;;  %v1510_v23 = vrot.slane %v1509_v2, 1 }
 0x43d   : > { %v1438_v4 = vadd.f32 %v1412_v43, %v1410_v29  ;;  %v1419_v24 = vmul.f32 %v2596_v58, %v2596_v58  ;;  %v1416_v27 = vmul.f32 %v2620_v32, %v2620_v32  ;;  %v1421_v60 = vmul.f32 %v2598_v20, %v2598_v20 }
 0x43e   : > { %v1427_v46 = vadd.f32 %v1426_v14, %v1415_v44  ;;  %v1418_v30 = vmul.f32 %v2623_v9, %v2623_v9  ;;  %v1511_v61 = vadd.f32 %v1510_v23, %v1509_v2  ;;  %v1423_v35 = vmul.f32 %v2600_v13, %v2600_v13  ;;  %v1987_v2 = vpop.eup %1986 }
 0x43f   : > { %v1439_v49 = vadd.f32 %v1438_v4, %v1414_v11  ;;  %v1420_v10 = vmul.f32 %v2625_v31, %v2625_v31  ;;  %v1422_v51 = vmul.f32 %v2627_v18, %v2627_v18  ;;  %v1424_v21 = vmul.f32 %v2629_v19, %v2629_v19 }
 0x440   : > { %v1428_v48 = vadd.f32 %v1427_v46, %v1417_v42  ;;  %v1513_v52 = vmul.f32 0.015873017, %v1511_v61  ;;  %v1517_v43 = vmul.f32 %v1987_v2, %v1514_v41  ;;  %v1521_v11 = vand.u32 2147483648, %v1514_v41 }
 0x441   : > { %v1440_v40 = vadd.f32 %v1439_v49, %v1416_v27 }
 0x442   : > { %v1429_v0 = vadd.f32 %v1428_v48, %v1419_v24  ;;  %v1515_v47 = vadd.f32 1e-05, %v1513_v52  ;;  %v1519_v4 = vsel %vm1518_vm2, %v1514_v41, %v1517_v43 }
 0x443   : > { %v1441_v16 = vadd.f32 %v1440_v40, %v1418_v30  ;;  %v1522_v23 = vsel %vm1520_vm3, %v1521_v11, %v1519_v4  ;;  %v2004_v11 = vld [vmem:[%s2181_s11 + $0x28] sm:$0xff] }
 0x444   : > { %v1430_v36 = vadd.f32 %v1429_v0, %v1421_v60  ;;  %1988 = vrsqrt.f32 %v1515_v47  ;;  %vm1525_vm4 = vcmp.eq.f32.partialorder %v1515_v47, inf  ;;  %v1528_v24 = vand.u32 2147483648, %v1515_v47 }
 0x445   : > { %v1442_v39 = vadd.f32 %v1441_v16, %v1420_v10  ;;  %vm1527_vm5 = vcmp.eq.f32.partialorder %v1515_v47, 0.0 }
 0x446   : > { %v1431_v59 = vadd.f32 %v1430_v36, %v1423_v35 }
 0x447   : > { %v1443_v6 = vadd.f32 %v1442_v39, %v1422_v51  ;;  %v1995_v39 = vld [vmem:[%s2181_s11 + $0x10] sm:$0xff] }
 0x448   : > { %v1432_v26 = vrot.slane %v1431_v59, 4 }
 0x449   : > { %v1444_v38 = vadd.f32 %v1443_v6, %v1424_v21  ;;  %v1997_v6 = vld [vmem:[%s2181_s11 + $0x30] sm:$0xff] }
 0x44a   : > { %v1433_v45 = vadd.f32 %v1432_v26, %v1431_v59  ;;  %v1994_v59 = vld [vmem:[%s2181_s11] sm:$0xff] }
 0x44b   : > { %v1445_v7 = vrot.slane %v1444_v38, 4  ;;  %v1996_v26 = vld [vmem:[%s2181_s11 + $0x20] sm:$0xff] }
 0x44c   : > { %v1434_v28 = vrot.slane %v1433_v45, 2 }
 0x44d   : > { %v1446_v53 = vadd.f32 %v1445_v7, %v1444_v38  ;;  %v2000_v7 = vld [vmem:[%s2181_s11 + $0x60] sm:$0xff] }
 0x44e   : > { %v1435_v50 = vadd.f32 %v1434_v28, %v1433_v45  ;;  %v1989_v42 = vpop.eup %1988  ;;  %v1998_v45 = vld [vmem:[%s2181_s11 + $0x40] sm:$0xff]  ;;  %v1999_v28 = vld [vmem:[%s2181_s11 + $0x50] sm:$0xff] }
 0x44f   : > { %v1447_v25 = vrot.slane %v1446_v53, 2  ;;  %v1524_v22 = vmul.f32 %v1989_v42, %v1515_v47  ;;  %v2003_v42 = vld [vmem:[%s2181_s11 + $0x18] sm:$0xff] }
 0x450   : > { %v1436_v55 = vrot.slane %v1435_v50, 1 }
 0x451   : > { %v1448_v3 = vadd.f32 %v1447_v25, %v1446_v53  ;;  %v1526_v48 = vsel %vm1525_vm4, %v1515_v47, %v1524_v22  ;;  %v2005_v22 = vld [vmem:[%s2181_s11 + $0x38] sm:$0xff] }
 0x452   : > { %v1437_v54 = vadd.f32 %v1436_v55, %v1435_v50  ;;  %v1529_v60 = vsel %vm1527_vm5, %v1528_v24, %v1526_v48  ;;  %v2001_v50 = vld [vmem:[%s2181_s11 + $0x70] sm:$0xff]  ;;  %v2006_v24 = vld [vmem:[%s2181_s11 + $0x48] sm:$0xff] }
 0x453   : > { %v1449_v44 = vrot.slane %v1448_v3, 1 }
 0x454   : > { %v1452_v37 = vmul.f32 0.015873017, %v1437_v54 }
 0x455   : > { %v1450_v14 = vadd.f32 %v1449_v44, %v1448_v3 }
 0x456   : > { %v1530_v1 = vadd.f32 1e-05, %v1452_v37 }
 0x457   : > { %v1453_v29 = vmul.f32 0.015873017, %v1450_v14 }
 0x458   : > { %1990 = vrsqrt.f32 %v1530_v1 }
 0x459   : > { %v1531_v46 = vadd.f32 1e-05, %v1453_v29  ;;  %v2002_v29 = vld [vmem:[%s2181_s11 + $0x8] sm:$0xff] }
 0x45b   : > { %1992 = vrsqrt.f32 %v1531_v46 }
 0x462   : > { %v1991_v27 = vpop.eup %1990 }
 0x463   : > { %v1534_v49 = vmul.f32 %v1991_v27, %v1522_v23  ;;  %v2007_v27 = vld [vmem:[%s2181_s11 + $0x58] sm:$0xff] }
 0x465   : > { %v1536_v0 = vmul.f32 %v1534_v49, %v2583_v56  ;;  %v1538_v30 = vmul.f32 %v1534_v49, %v2586_v57  ;;  %v1540_v40 = vmul.f32 %v1534_v49, %v2589_v62  ;;  %v1542_v34 = vmul.f32 %v1534_v49, %v2592_v5  ;;  %v1993_v5 = vpop.eup %1992 }
 0x466   : > { %v1544_v61 = vmul.f32 %v1534_v49, %v2594_v12  ;;  %v1546_v35 = vmul.f32 %v1534_v49, %v2596_v58  ;;  %v1548_v36 = vmul.f32 %v1534_v49, %v2598_v20  ;;  %v1550_v10 = vmul.f32 %v1534_v49, %v2600_v13  ;;  %v2008_v49 = vld [vmem:[%s2181_s11 + $0x68] sm:$0xff] }
 0x467   : > { %v1552_v16 = vadd.f32 %v1536_v0, %v2519_v33  ;;  %v1554_v56 = vadd.f32 %v1538_v30, %v2519_v33  ;;  %v1556_v57 = vadd.f32 %v1540_v40, %v2519_v33  ;;  %v1558_v62 = vadd.f32 %v1542_v34, %v2519_v33  ;;  %v2009_v0 = vld [vmem:[%s2181_s11 + $0x78] sm:$0xff] }
 0x468   : > { %v1560_v12 = vadd.f32 %v1544_v61, %v2519_v33  ;;  %v1562_v58 = vadd.f32 %v1546_v35, %v2519_v33  ;;  %v1564_v20 = vadd.f32 %v1548_v36, %v2519_v33  ;;  %v1566_v13 = vadd.f32 %v1550_v10, %v2519_v33 }
 0x469   : > { %v1568_v51 = vadd.f32 %v1994_v59, %v1552_v16  ;;  %v1570_v41 = vadd.f32 %v1995_v39, %v1554_v56  ;;  %v1572_v21 = vadd.f32 %v1996_v26, %v1556_v57  ;;  %v1574_v52 = vadd.f32 %v1997_v6, %v1558_v62 }
 0x46a   : > { %v1576_v38 = vadd.f32 %v1998_v45, %v1560_v12  ;;  %v1578_v33 = vadd.f32 %v1999_v28, %v1562_v58  ;;  %v1580_v47 = vadd.f32 %v2000_v7, %v1564_v20  ;;  %v1582_v53 = vadd.f32 %v2001_v50, %v1566_v13 }
 0x46b   : > { %1584 = vst [vmem:[%s2671_s14] sm:$0xff] %v1568_v51  ;;  %1586 = vst [vmem:[%s2671_s14 + $0x10] sm:$0xff] %v1570_v41  ;;  %v1535_v55 = vmul.f32 %v1993_v5, %v1529_v60 }
 0x46c   : > { %1588 = vst [vmem:[%s2671_s14 + $0x20] sm:$0xff] %v1572_v21  ;;  %1590 = vst [vmem:[%s2671_s14 + $0x30] sm:$0xff] %v1574_v52 }
 0x46d   : > { %1592 = vst [vmem:[%s2671_s14 + $0x40] sm:$0xff] %v1576_v38  ;;  %1594 = vst [vmem:[%s2671_s14 + $0x50] sm:$0xff] %v1578_v33  ;;  %v1537_v25 = vmul.f32 %v1535_v55, %v2611_v15  ;;  %v1539_v54 = vmul.f32 %v1535_v55, %v2614_v63  ;;  %v1541_v3 = vmul.f32 %v1535_v55, %v2617_v8 }
 0x46e   : > { %1596 = vst [vmem:[%s2671_s14 + $0x60] sm:$0xff] %v1580_v47  ;;  %1598 = vst [vmem:[%s2671_s14 + $0x70] sm:$0xff] %v1582_v53  ;;  %v1543_v37 = vmul.f32 %v1535_v55, %v2620_v32  ;;  %v1545_v44 = vmul.f32 %v1535_v55, %v2623_v9  ;;  %v1547_v2 = vmul.f32 %v1535_v55, %v2625_v31 }
 0x46f   : > { %v1549_v1 = vmul.f32 %v1535_v55, %v2627_v18  ;;  %v1551_v14 = vmul.f32 %v1535_v55, %v2629_v19  ;;  %v1553_v15 = vadd.f32 %v1537_v25, %v2525_v17  ;;  %v1555_v63 = vadd.f32 %v1539_v54, %v2525_v17 }
 0x470   : > { %v1557_v8 = vadd.f32 %v1541_v3, %v2525_v17  ;;  %v1559_v32 = vadd.f32 %v1543_v37, %v2525_v17  ;;  %v1561_v9 = vadd.f32 %v1545_v44, %v2525_v17  ;;  %v1563_v31 = vadd.f32 %v1547_v2, %v2525_v17 }
 0x471   : > { %v1565_v18 = vadd.f32 %v1549_v1, %v2525_v17  ;;  %v1567_v19 = vadd.f32 %v1551_v14, %v2525_v17  ;;  %v1569_v43 = vadd.f32 %v2002_v29, %v1553_v15  ;;  %v1571_v46 = vadd.f32 %v2003_v42, %v1555_v63 }
 0x472   : > { %v1573_v4 = vadd.f32 %v2004_v11, %v1557_v8  ;;  %v1575_v23 = vadd.f32 %v2005_v22, %v1559_v32  ;;  %v1577_v48 = vadd.f32 %v2006_v24, %v1561_v9  ;;  %v1579_v17 = vadd.f32 %v2007_v27, %v1563_v31 }
 0x473   : > { %v1581_v60 = vadd.f32 %v2008_v49, %v1565_v18  ;;  %v1583_v30 = vadd.f32 %v2009_v0, %v1567_v19  ;;  %1585 = vst [vmem:[%s2671_s14 + $0x8] sm:$0xff] %v1569_v43  ;;  %1587 = vst [vmem:[%s2671_s14 + $0x18] sm:$0xff] %v1571_v46 }
 0x474   : > { %1589 = vst [vmem:[%s2671_s14 + $0x28] sm:$0xff] %v1573_v4  ;;  %1591 = vst [vmem:[%s2671_s14 + $0x38] sm:$0xff] %v1575_v23 }
 0x475   : > { %1593 = vst [vmem:[%s2671_s14 + $0x48] sm:$0xff] %v1577_v48  ;;  %1595 = vst [vmem:[%s2671_s14 + $0x58] sm:$0xff] %v1579_v17 }
 0x476   : > { %1597 = vst [vmem:[%s2671_s14 + $0x68] sm:$0xff] %v1581_v60  ;;  %1599 = vst [vmem:[%s2671_s14 + $0x78] sm:$0xff] %v1583_v30 }
 0x477 PF: > { %s18_s27 = sadd.s32 1, %s2016_s27  }
 0x478   : > { %p15_p4 = scmp.ge.s32.totalorder %s18_s27, 4  }
 0x47a   :  { %17 = sbr.rel (!%p15_p4) target bundleno = 1 (0x1), region = 85 }

// kernel: pat_block_forward.10
= control target key start
LH: loop header
LB: loop body
LE: loop exit
PB: predicated region body
PF: predicated region fallthrough
CT: control target
= control target key end

     0   :  { %s4411_s12 = smov 0   ;;  %s5929_s0 = inlined_call_operand.vmem [shape: f32[2,10,10,256], index: 0, kind: input, shape index: {}]   ;;  %s5930_s1 = inlined_call_operand.vmem [shape: bf16[9,256,256], index: 1, kind: input, shape index: {}]   ;;  %s5931_s2 = inlined_call_operand.vmem [shape: f32[1,256], index: 2, kind: input, shape index: {}]   ;;  %s5932_s3 = inlined_call_operand.vmem [shape: f32[2,64,256], index: 3, kind: output, shape index: {}]  }
   0x1 LB: > { %s3196_s13 = sadd.s32 4294967295, %s4389_s12   ;;  %p3200_p0 = scmp.ge.s32.totalorder %s4389_s12, 1  ;;  %s4389_s12 = sphi %s4411_s12, %s13_s12  }
   0x2   : > { %p137_p1 = scmp.lt.s32.totalorder %s4389_s12, 3 }
   0x4   : > { %p138_p2 = pnand %p3200_p0, %p137_p1 }
   0x6   : > { %141 = sbr.rel (%p138_p2) target bundleno = 638 (0x27e), region = 32 }
   0xd   : > { %v3936_v0 = vld [vmem:[%s5930_s1 + $0x4] ss:$8 sps:$4 sm:$0xff]   ;;  %v3940_v2 = vld [vmem:[%s5930_s1] ss:$8 sps:$4 sm:$0xff]   ;;  %v3942_v4 = vld [vmem:[%s5930_s1 + $0x14] ss:$8 sps:$4 sm:$0xff]  }
   0xe   : > { %v3938_v1 = vld [vmem:[%s5930_s1 + $0x404] ss:$8 sps:$4 sm:$0xff]   ;;  %423 = vmatprep.subr.bf16.mxu1 %v3936_v0  ;;  %v3941_v3 = vld [vmem:[%s5930_s1 + $0x400] ss:$8 sps:$4 sm:$0xff]   ;;  %v3944_v5 = vld [vmem:[%s5930_s1 + $0x414] ss:$8 sps:$4 sm:$0xff]  }
   0xf   : > { %1757 = vmatprep.subr.bf16.mxu0 %v3938_v1  ;;  %424 = vmatpush1.bf16.msra.mxu1 %v3940_v2  ;;  %v3946_v6 = vld [vmem:[%s5930_s1 + $0x10] ss:$8 sps:$4 sm:$0xff]   ;;  %v3948_v8 = vld [vmem:[%s5930_s1 + $0x24] ss:$8 sps:$4 sm:$0xff]   ;;  %v3952_v10 = vld [vmem:[%s5930_s1 + $0x20] ss:$8 sps:$4 sm:$0xff]  }
  0x10   : > { %1758 = vmatpush1.bf16.msra.mxu0 %v3941_v3  ;;  %425 = vmatprep.subr.bf16.mxu1 %v3942_v4  ;;  %v3947_v7 = vld [vmem:[%s5930_s1 + $0x410] ss:$8 sps:$4 sm:$0xff]   ;;  %v3950_v9 = vld [vmem:[%s5930_s1 + $0x424] ss:$8 sps:$4 sm:$0xff]   ;;  %v3953_v11 = vld [vmem:[%s5930_s1 + $0x420] ss:$8 sps:$4 sm:$0xff]  }
  0x11   : > { %1759 = vmatprep.subr.bf16.mxu0 %v3944_v5  ;;  %v3954_v12 = vld [vmem:[%s5930_s1 + $0x34] ss:$8 sps:$4 sm:$0xff]   ;;  %v3958_v14 = vld [vmem:[%s5930_s1 + $0x30] ss:$8 sps:$4 sm:$0xff]   ;;  %v3960_v16 = vld [vmem:[%s5930_s1 + $0x44] ss:$8 sps:$4 sm:$0xff]  }
  0x12   : > { %v3956_v13 = vld [vmem:[%s5930_s1 + $0x434] ss:$8 sps:$4 sm:$0xff]   ;;  %v3959_v15 = vld [vmem:[%s5930_s1 + $0x430] ss:$8 sps:$4 sm:$0xff]   ;;  %v3962_v17 = vld [vmem:[%s5930_s1 + $0x444] ss:$8 sps:$4 sm:$0xff]  }
  0x13   : > { %426 = vmatpush1.bf16.msra.mxu1 %v3946_v6  ;;  %v3964_v18 = vld [vmem:[%s5930_s1 + $0x40] ss:$8 sps:$4 sm:$0xff]   ;;  %v3966_v20 = vld [vmem:[%s5930_s1 + $0x54] ss:$8 sps:$4 sm:$0xff]   ;;  %v3970_v22 = vld [vmem:[%s5930_s1 + $0x50] ss:$8 sps:$4 sm:$0xff]  }
  0x14   : > { %1760 = vmatpush1.bf16.msra.mxu0 %v3947_v7  ;;  %427 = vmatprep.subr.bf16.mxu1 %v3948_v8  ;;  %v3965_v19 = vld [vmem:[%s5930_s1 + $0x440] ss:$8 sps:$4 sm:$0xff]   ;;  %v3968_v21 = vld [vmem:[%s5930_s1 + $0x454] ss:$8 sps:$4 sm:$0xff]   ;;  %v3971_v23 = vld [vmem:[%s5930_s1 + $0x450] ss:$8 sps:$4 sm:$0xff]  }
  0x15   : > { %1761 = vmatprep.subr.bf16.mxu0 %v3950_v9  ;;  %v3972_v24 = vld [vmem:[%s5930_s1 + $0x64] ss:$8 sps:$4 sm:$0xff]   ;;  %v3976_v26 = vld [vmem:[%s5930_s1 + $0x60] ss:$8 sps:$4 sm:$0xff]   ;;  %v3978_v28 = vld [vmem:[%s5930_s1 + $0x74] ss:$8 sps:$4 sm:$0xff]  }
  0x16   : > { %v3974_v25 = vld [vmem:[%s5930_s1 + $0x464] ss:$8 sps:$4 sm:$0xff]   ;;  %v3977_v27 = vld [vmem:[%s5930_s1 + $0x460] ss:$8 sps:$4 sm:$0xff]   ;;  %v3980_v29 = vld [vmem:[%s5930_s1 + $0x474] ss:$8 sps:$4 sm:$0xff]  }
  0x17   : > { %428 = vmatpush1.bf16.msra.mxu1 %v3952_v10  ;;  %v3982_v30 = vld [vmem:[%s5930_s1 + $0x70] ss:$8 sps:$4 sm:$0xff]   ;;  %v3984_v32 = vld [vmem:[%s5930_s1 + $0x84] ss:$8 sps:$4 sm:$0xff]   ;;  %p161_p3 = scmp.lt.s32.totalorder %s3196_s13, 1  ;;  %vm544_vm0 = vcmask 1046528  }
  0x18   : > { %1762 = vmatpush1.bf16.msra.mxu0 %v3953_v11  ;;  %429 = vmatprep.subr.bf16.mxu1 %v3954_v12  ;;  %v3983_v31 = vld [vmem:[%s5930_s1 + $0x470] ss:$8 sps:$4 sm:$0xff]   ;;  %v3986_v33 = vld [vmem:[%s5930_s1 + $0x484] ss:$8 sps:$4 sm:$0xff]   ;;  %v3988_v34 = vld [vmem:[%s5930_s1 + $0x80] ss:$8 sps:$4 sm:$0xff]  }
  0x19   : > { %1763 = vmatprep.subr.bf16.mxu0 %v3956_v13  ;;  %v3989_v35 = vld [vmem:[%s5930_s1 + $0x480] ss:$8 sps:$4 sm:$0xff]   ;;  %v3990_v36 = vld [vmem:[%s5930_s1 + $0x94] ss:$8 sps:$4 sm:$0xff]   ;;  %s5951_s13 = smov (!%p161_p3, %s3196_s13), 1  ;;  %vm899_vm1 = vcmask 1045504  }
  0x1a   : > { %v3992_v37 = vld [vmem:[%s5930_s1 + $0x494] ss:$8 sps:$4 sm:$0xff]   ;;  %v3994_v38 = vld [vmem:[%s5930_s1 + $0x90] ss:$8 sps:$4 sm:$0xff]   ;;  %v3996_v40 = vld [vmem:[%s5930_s1 + $0xa4] ss:$8 sps:$4 sm:$0xff]  }
  0x1b   : > { %430 = vmatpush1.bf16.msra.mxu1 %v3958_v14  ;;  %v3995_v39 = vld [vmem:[%s5930_s1 + $0x490] ss:$8 sps:$4 sm:$0xff]   ;;  %s3927_s21 = smul.u32 320, %s5951_s13  ;;  %v3998_v41 = vld [vmem:[%s5930_s1 + $0x4a4] ss:$8 sps:$4 sm:$0xff]   ;;  %s3750_s14 = sshll.u32 %s5951_s13, 7 }
  0x1c   : > { %1764 = vmatpush1.bf16.msra.mxu0 %v3959_v15  ;;  %431 = vmatprep.subr.bf16.mxu1 %v3960_v16  ;;  %v4000_v42 = vld [vmem:[%s5930_s1 + $0xa0] ss:$8 sps:$4 sm:$0xff]   ;;  %v4002_v44 = vld [vmem:[%s5930_s1 + $0xb4] ss:$8 sps:$4 sm:$0xff]   ;;  %v4006_v46 = vld [vmem:[%s5930_s1 + $0xb0] ss:$8 sps:$4 sm:$0xff]   ;;  %s5892_s17 = scalar_lea.vmem %s5932_s3, %s3750_s14 }
  0x1d   : > { %1765 = vmatprep.subr.bf16.mxu0 %v3962_v17  ;;  %v4001_v43 = vld [vmem:[%s5930_s1 + $0x4a0] ss:$8 sps:$4 sm:$0xff]   ;;  %s4564_s5 = scalar_lea.vmem %s5929_s0, %s3927_s21  ;;  %v4004_v45 = vld [vmem:[%s5930_s1 + $0x4b4] ss:$8 sps:$4 sm:$0xff]   ;;  %v4007_v49 = vld [vmem:[%s5930_s1 + $0x4b0] ss:$8 sps:$4 sm:$0xff]  }
  0x1e   : > { %v4573_v47 = vld [vmem:[%s4564_s5 + $0x8] sm:$0xff]  ;;  %v4593_v54 = vld [vmem:[%s4564_s5 + $0x38] sm:$0x3]  ;;  %v4014_v63 = vld [vmem:[%s5930_s1 + $0xd4] ss:$8 sps:$4 sm:$0xff]  }
  0x1f   : > { %432 = vmatpush1.bf16.msra.mxu1 %v3964_v18  ;;  %v4576_v48 = vld [vmem:[%s4564_s5 + $0x28] sm:$0xff]  ;;  %v4596_v55 = vld [vmem:[%s4564_s5 + $0x58] sm:$0x3]  ;;  %v555_v57 = vrot.slane %v4593_v54, 1  ;;  %v4016_v0 = vld [vmem:[%s5930_s1 + $0x4d4] ss:$8 sps:$4 sm:$0xff]  }
  0x20   : > { %1766 = vmatpush1.bf16.msra.mxu0 %v3965_v19  ;;  %433 = vmatprep.subr.bf16.mxu1 %v3966_v20  ;;  %v4008_v50 = vld [vmem:[%s5930_s1 + $0xc4] ss:$8 sps:$4 sm:$0xff]   ;;  %v224_v51 = vpack.c.bf16 %v4576_v48, %v4573_v47  ;;  %v554_v56 = vrot.slane %v4576_v48, 1  ;;  %v561_v59 = vrot.slane %v4596_v55, 1  ;;  %v4012_v60 = vld [vmem:[%s5930_s1 + $0xc0] ss:$8 sps:$4 sm:$0xff]  }
  0x21   : > { %1767 = vmatprep.subr.bf16.mxu0 %v3968_v21  ;;  %v4587_v52 = vld [vmem:[%s4564_s5 + $0x48] sm:$0xff]  ;;  %v4018_v2 = vld [vmem:[%s5930_s1 + $0xd0] ss:$8 sps:$4 sm:$0xff]   ;;  %v175_v6 = vld [vmem:[%s4564_s5 + $0x20] sm:$0xff] }
  0x22   : > { %v4010_v53 = vld [vmem:[%s5930_s1 + $0x4c4] ss:$8 sps:$4 sm:$0xff]   ;;  %455 = vmatprep.mubr.bf16.mxu1 %v224_v51  ;;  %v560_v58 = vrot.slane %v4587_v52, 1  ;;  %v4013_v61 = vld [vmem:[%s5930_s1 + $0x4c0] ss:$8 sps:$4 sm:$0xff]   ;;  %v4609_v62 = vsel %vm544_vm0, %v554_v56, %v555_v57  ;;  %v906_v8 = vrot.slane %v175_v6, 2 }
  0x23   : > { %434 = vmatpush1.bf16.msra.mxu1 %v3970_v22  ;;  %v4019_v3 = vld [vmem:[%s5930_s1 + $0x4d0] ss:$8 sps:$4 sm:$0xff]   ;;  %v4020_v5 = vld [vmem:[%s5930_s1 + $0xe4] ss:$8 sps:$4 sm:$0xff]   ;;  %v4024_v13 = vld [vmem:[%s5930_s1 + $0xe0] ss:$8 sps:$4 sm:$0xff]  }
  0x24   : > { %1768 = vmatpush1.bf16.msra.mxu0 %v3971_v23  ;;  %435 = vmatprep.subr.bf16.mxu1 %v3972_v24  ;;  %v4618_v1 = vsel %vm544_vm0, %v560_v58, %v561_v59  ;;  %v4022_v7 = vld [vmem:[%s5930_s1 + $0x4e4] ss:$8 sps:$4 sm:$0xff]   ;;  %v177_v9 = vld [vmem:[%s4564_s5 + $0x30] sm:$0x3]  ;;  %v4025_v14 = vld [vmem:[%s5930_s1 + $0x4e0] ss:$8 sps:$4 sm:$0xff]  }
  0x25   : > { %1769 = vmatprep.subr.bf16.mxu0 %v3974_v25  ;;  %v1557_v4 = vpack.c.bf16 %v4618_v1, %v4609_v62  ;;  %v4637_v10 = vld [vmem:[%s4564_s5 + $0x40] sm:$0xff]  ;;  %v181_v11 = vld [vmem:[%s4564_s5 + $0x50] sm:$0x3]  ;;  %v907_v12 = vrot.slane %v177_v9, 2  ;;  %v4026_v16 = vld [vmem:[%s5930_s1 + $0xf4] ss:$8 sps:$4 sm:$0xff]  }
  0x26   : > { %v913_v15 = vrot.slane %v181_v11, 2  ;;  %v551_v17 = vrot.slane %v175_v6, 1  ;;  %v552_v18 = vrot.slane %v177_v9, 1  ;;  %v557_v19 = vrot.slane %v4637_v10, 1  ;;  %v4028_v23 = vld [vmem:[%s5930_s1 + $0x4f4] ss:$8 sps:$4 sm:$0xff]  }
  0x27   : > { %436 = vmatpush1.bf16.msra.mxu1 %v3976_v26  ;;  %1789 = vmatprep.mubr.bf16.mxu0 %v1557_v4  ;;  %v558_v20 = vrot.slane %v181_v11, 1  ;;  %v4651_v21 = vsel %vm899_vm1, %v906_v8, %v907_v12  ;;  %v912_v22 = vrot.slane %v4637_v10, 2  ;;  %v4030_v24 = vld [vmem:[%s5930_s1 + $0xf0] ss:$8 sps:$4 sm:$0xff]   ;;  %v4049_v51 = vld [vmem:[%s5930_s1 + $0x524] ss:$8 sps:$4 sm:$0xff]  }
  0x28   : > { %1770 = vmatpush1.bf16.msra.mxu0 %v3977_v27  ;;  %437 = vmatprep.subr.bf16.mxu1 %v3978_v28  ;;  %v4031_v25 = vld [vmem:[%s5930_s1 + $0x4f0] ss:$8 sps:$4 sm:$0xff]   ;;  %v4034_v27 = vld [vmem:[%s5930_s1 + $0x104] ss:$8 sps:$4 sm:$0xff]   ;;  %v4044_v56 = vld [vmem:[%s5930_s1 + $0x120] ss:$8 sps:$4 sm:$0xff]  }
  0x29   : > { %1771 = vmatprep.subr.bf16.mxu0 %v3980_v29  ;;  %v4664_v26 = vsel %vm899_vm1, %v912_v22, %v913_v15  ;;  %v4670_v28 = vld [vmem:[%s4564_s5] sm:$0xff]  ;;  %v4052_v58 = vld [vmem:[%s5930_s1 + $0x134] ss:$8 sps:$4 sm:$0xff]   ;;  %v4758_v4 = vld [vmem:[%s4564_s5 + $0x88] sm:$0xff] }
  0x2a   : > { %v4047_v57 = vld [vmem:[%s5930_s1 + $0x520] ss:$8 sps:$4 sm:$0xff]   ;;  %v4055_v59 = vld [vmem:[%s5930_s1 + $0x534] ss:$8 sps:$4 sm:$0xff]   ;;  %v572_v9 = vrot.slane %v4758_v4, 1 }
  0x2b   : > { %438 = vmatpush1.bf16.msra.mxu1 %v3982_v30  ;;  %v4675_v30 = vld [vmem:[%s4564_s5 + $0x10] sm:$0x3]  ;;  %v4059_v8 = vld [vmem:[%s5930_s1 + $0x540] ss:$8 sps:$4 sm:$0xff]   ;;  %v4064_v12 = vld [vmem:[%s5930_s1 + $0x154] ss:$8 sps:$4 sm:$0xff]  }
  0x2c   : > { %1772 = vmatpush1.bf16.msra.mxu0 %v3983_v31  ;;  %439 = vmatprep.subr.bf16.mxu1 %v3984_v32  ;;  %v4678_v31 = vsel %vm544_vm0, %v551_v17, %v552_v18  ;;  %v4681_v32 = vsel %vm544_vm0, %v557_v19, %v558_v20  ;;  %v4791_v17 = vld [vmem:[%s4564_s5 + $0x80] sm:$0xff]  ;;  %v4794_v18 = vld [vmem:[%s4564_s5 + $0x90] sm:$0x3]  ;;  %v4067_v22 = vld [vmem:[%s5930_s1 + $0x554] ss:$8 sps:$4 sm:$0xff]  }
  0x2d   : > { %1773 = vmatprep.subr.bf16.mxu0 %v3986_v33  ;;  %v4037_v33 = vld [vmem:[%s5930_s1 + $0x504] ss:$8 sps:$4 sm:$0xff]  }
  0x2f   : > { %440 = vmatpush1.bf16.msra.mxu1 %v3988_v34  ;;  %v900_v34 = vrot.slane %v4670_v28, 2 }
  0x30   : > { %1774 = vmatpush1.bf16.msra.mxu0 %v3989_v35  ;;  %441 = vmatprep.subr.bf16.mxu1 %v3990_v36  ;;  %v901_v35 = vrot.slane %v4675_v30, 2  ;;  %v4032_v36 = vld [vmem:[%s5930_s1 + $0x100] ss:$8 sps:$4 sm:$0xff]  }
  0x31   : > { %1775 = vmatprep.subr.bf16.mxu0 %v3992_v37  ;;  %v4692_v37 = vld [vmem:[%s4564_s5 + $0x68] sm:$0xff] }
  0x33   : > { %442 = vmatpush1.bf16.msra.mxu1 %v3994_v38  ;;  %v4035_v38 = vld [vmem:[%s5930_s1 + $0x500] ss:$8 sps:$4 sm:$0xff]  }
  0x34   : > { %1776 = vmatpush1.bf16.msra.mxu0 %v3995_v39  ;;  %443 = vmatprep.subr.bf16.mxu1 %v3996_v40  ;;  %v223_v39 = vpack.c.bf16 %v175_v6, %v4670_v28  ;;  %v1556_v40 = vpack.c.bf16 %v4681_v32, %v4678_v31 }
  0x35   : > { %1777 = vmatprep.subr.bf16.mxu0 %v3998_v41  ;;  %v4040_v41 = vld [vmem:[%s5930_s1 + $0x114] ss:$8 sps:$4 sm:$0xff]  }
  0x37   : > { %444 = vmatpush1.bf16.msra.mxu1 %v4000_v42  ;;  %v4043_v42 = vld [vmem:[%s5930_s1 + $0x514] ss:$8 sps:$4 sm:$0xff]  }
  0x38   : > { %1778 = vmatpush1.bf16.msra.mxu0 %v4001_v43  ;;  %445 = vmatprep.subr.bf16.mxu1 %v4002_v44  ;;  %v4707_v43 = vsel %vm899_vm1, %v900_v34, %v901_v35  ;;  %v4711_v44 = vpack.c.bf16 %v4692_v37, %v4587_v52  ;;  %v548_v34 = vrot.slane %v4573_v47, 1  ;;  %v4065_v35 = vld [vmem:[%s5930_s1 + $0x550] ss:$8 sps:$4 sm:$0xff]   ;;  %v4073_v47 = vld [vmem:[%s5930_s1 + $0x564] ss:$8 sps:$4 sm:$0xff]  }
  0x39   : > { %1779 = vmatprep.subr.bf16.mxu0 %v4004_v45  ;;  %5938 = vst [vmem:[#allocation2_spill] sm:$0xff] %v4707_v43  ;;  %v4957_v45 = vld [vmem:[%s4564_s5 + $0xf0] sm:$0x3] }
  0x3a   : > { %v588_v43 = vrot.slane %v4957_v45, 1 }
  0x3b   : > { %446 = vmatpush1.bf16.msra.mxu1 %v4006_v46  ;;  %v4038_v46 = vld [vmem:[%s5930_s1 + $0x110] ss:$8 sps:$4 sm:$0xff]  }
  0x3c   : > { %1780 = vmatpush1.bf16.msra.mxu0 %v4007_v49  ;;  %447 = vmatprep.subr.bf16.mxu1 %v4008_v50  ;;  %v4041_v49 = vld [vmem:[%s5930_s1 + $0x510] ss:$8 sps:$4 sm:$0xff]   ;;  %v4046_v50 = vld [vmem:[%s5930_s1 + $0x124] ss:$8 sps:$4 sm:$0xff]  }
  0x3d   : > { %1781 = vmatprep.subr.bf16.mxu0 %v4010_v53  ;;  %v4728_v53 = vld [vmem:[%s4564_s5 + $0x78] sm:$0x3] }
  0x3f   : > { %448 = vmatpush1.bf16.msra.mxu1 %v4012_v60  ;;  %v566_v60 = vrot.slane %v4692_v37, 1 }
  0x40   : > { %1782 = vmatpush1.bf16.msra.mxu0 %v4013_v61  ;;  %449 = vmatprep.subr.bf16.mxu1 %v4014_v63  ;;  %v567_v61 = vrot.slane %v4728_v53, 1  ;;  %v4050_v63 = vld [vmem:[%s5930_s1 + $0x130] ss:$8 sps:$4 sm:$0xff]  }
  0x41   : > { %1783 = vmatprep.subr.bf16.mxu0 %v4016_v0  ;;  %v4053_v0 = vld [vmem:[%s5930_s1 + $0x530] ss:$8 sps:$4 sm:$0xff]  }
  0x42   : > { %v4764_v6 = vsel %vm544_vm0, %v566_v60, %v567_v61  ;;  %v4856_v60 = vld [vmem:[%s4564_s5 + $0xa0] sm:$0xff] }
  0x43   : > { %450 = vmatpush1.bf16.msra.mxu1 %v4018_v2  ;;  %v4058_v2 = vld [vmem:[%s5930_s1 + $0x144] ss:$8 sps:$4 sm:$0xff]   ;;  %v4071_v61 = vld [vmem:[%s5930_s1 + $0x560] ss:$8 sps:$4 sm:$0xff]  }
  0x44   : > { %1784 = vmatpush1.bf16.msra.mxu0 %v4019_v3  ;;  %451 = vmatprep.subr.bf16.mxu1 %v4020_v5  ;;  %v4061_v3 = vld [vmem:[%s5930_s1 + $0x544] ss:$8 sps:$4 sm:$0xff]   ;;  %v4761_v5 = vld [vmem:[%s4564_s5 + $0x98] sm:$0x3] }
  0x45   : > { %1785 = vmatprep.subr.bf16.mxu0 %v4022_v7  ;;  %v4056_v7 = vld [vmem:[%s5930_s1 + $0x140] ss:$8 sps:$4 sm:$0xff]   ;;  %v573_v11 = vrot.slane %v4761_v5, 1 }
  0x47   : > { %452 = vmatpush1.bf16.msra.mxu1 %v4024_v13  ;;  %v4778_v13 = vld [vmem:[%s4564_s5 + $0x60] sm:$0xff]  ;;  %v4784_v15 = vsel %vm544_vm0, %v572_v9, %v573_v11  ;;  %v4881_v9 = vld [vmem:[%s4564_s5 + $0xd0] sm:$0x3]  ;;  %v575_v11 = vrot.slane %v4856_v60, 1 }
  0x48   : > { %1786 = vmatpush1.bf16.msra.mxu0 %v4025_v14  ;;  %453 = vmatprep.subr.bf16.mxu1 %v4026_v16  ;;  %v4781_v14 = vld [vmem:[%s4564_s5 + $0x70] sm:$0x3]  ;;  %v4788_v16 = vpack.c.bf16 %v4778_v13, %v4637_v10  ;;  %v563_v19 = vrot.slane %v4778_v13, 1  ;;  %v569_v10 = vrot.slane %v4791_v17, 1 }
  0x49   : > { %1787 = vmatprep.subr.bf16.mxu0 %v4028_v23  ;;  %v564_v20 = vrot.slane %v4781_v14, 1  ;;  %v1559_v23 = vpack.c.bf16 %v4784_v15, %v4764_v6 }
  0x4a   : > { %5939 = vst [vmem:[#allocation3_spill] sm:$0xff] %v4788_v16 }
  0x4b   : > { %454 = vmatpush1.bf16.msra.mxu1 %v4030_v24  ;;  %v570_v24 = vrot.slane %v4794_v18, 1 }
  0x4c   : > { %1788 = vmatpush1.bf16.msra.mxu0 %v4031_v25  ;;  %810 = vmatprep.subr.bf16.mxu1 %v4034_v27  ;;  %v4806_v25 = vld [vmem:[%s4564_s5 + $0x18] sm:$0x3] }
  0x4d   : > { %2055 = vmatprep.subr.bf16.mxu0 %v4037_v33  ;;  %v4062_v27 = vld [vmem:[%s5930_s1 + $0x150] ss:$8 sps:$4 sm:$0xff]   ;;  %v4813_v33 = vsel %vm544_vm0, %v563_v19, %v564_v20  ;;  %v4079_v19 = vld [vmem:[%s5930_s1 + $0x574] ss:$8 sps:$4 sm:$0xff]  }
  0x4e   : > { %456 = vmatmul.mubr.bf16.vlgmr.msra.gmra.mrb[0].mxu1 %v223_v39  ;;  %v4070_v39 = vld [vmem:[%s5930_s1 + $0x164] ss:$8 sps:$4 sm:$0xff]  }
  0x4f   : > { %1790 = vmatmul.mubr.bf16.vlgmr.msra.gmra.mrb[0].mxu0 %v1556_v40  ;;  %811 = vmatpush1.bf16.msra.mxu1 %v4032_v36  ;;  %v4820_v36 = vsel %vm544_vm0, %v569_v10, %v570_v24  ;;  %v909_v10 = vrot.slane %v4576_v48, 2  ;;  %v910_v24 = vrot.slane %v4593_v54, 2  ;;  %v4909_v54 = vld [vmem:[%s4564_s5 + $0xe8] sm:$0xff] }
  0x50   : > { %2056 = vmatpush1.bf16.msra.mxu0 %v4035_v38  ;;  %812 = vmatprep.subr.bf16.mxu1 %v4040_v41  ;;  %v4823_v38 = vld [vmem:[%s4564_s5 + $0xa8] sm:$0xff]  ;;  %v1558_v40 = vpack.c.bf16 %v4820_v36, %v4813_v33 }
  0x51   : > { %2057 = vmatprep.subr.bf16.mxu0 %v4043_v42  ;;  %465 = vmatprep.mubr.bf16.mxu1 %v4711_v44  ;;  %v4835_v41 = vpack.c.bf16 %v4823_v38, %v4758_v4  ;;  %v578_v42 = vrot.slane %v4823_v38, 1  ;;  %v4960_v29 = vsel %vm899_vm1, %v909_v10, %v910_v24  ;;  %v4091_v10 = vld [vmem:[%s5930_s1 + $0x594] ss:$8 sps:$4 sm:$0xff]  }
  0x52   : > { %1799 = vmatprep.mubr.bf16.mxu0 %v1559_v23  ;;  %v582_v23 = vrot.slane %v4881_v9, 1 }
  0x53   : > { %813 = vmatpush1.bf16.msra.mxu1 %v4038_v46  ;;  %5940 = vst [vmem:[#allocation4_spill] sm:$0xff] %v4835_v41  ;;  %v549_v46 = vrot.slane %v4806_v25, 1 }
  0x54   : > { %2058 = vmatpush1.bf16.msra.mxu0 %v4041_v49  ;;  %814 = vmatprep.subr.bf16.mxu1 %v4046_v50  ;;  %v4840_v49 = vld [vmem:[%s4564_s5 + $0xb8] sm:$0x3]  ;;  %v4843_v50 = vld [vmem:[%s4564_s5 + $0xc8] sm:$0xff] }
  0x55   : > { %2059 = vmatprep.subr.bf16.mxu0 %v4049_v51  ;;  %v4846_v51 = vld [vmem:[%s4564_s5 + $0xd8] sm:$0x3] }
  0x56   : > { %466 = vmatmul.mubr.bf16.gmra.mrb[4].mxu1 %v4788_v16 }
  0x57   : > { %815 = vmatpush1.bf16.msra.mxu1 %v4044_v56  ;;  %v4068_v56 = vld [vmem:[%s5930_s1 + $0x160] ss:$8 sps:$4 sm:$0xff]   ;;  %1800 = vmatmul.mubr.bf16.gmra.mrb[4].mxu0 %v1558_v40  ;;  %v915_v40 = vrot.slane %v4587_v52, 2  ;;  %v590_v52 = vrot.slane %v4909_v54, 1 }
  0x58   : > { %2060 = vmatpush1.bf16.msra.mxu0 %v4047_v57  ;;  %816 = vmatprep.subr.bf16.mxu1 %v4052_v58  ;;  %v579_v57 = vrot.slane %v4840_v49, 1  ;;  %v584_v58 = vrot.slane %v4843_v50, 1 }
  0x59   : > { %2061 = vmatprep.subr.bf16.mxu0 %v4055_v59  ;;  %475 = vmatprep.mubr.bf16.mxu1 %v4835_v41  ;;  %v585_v59 = vrot.slane %v4846_v51, 1  ;;  %v4973_v41 = vld [vmem:[%s4564_s5 + $0x110] sm:$0x3] }
  0x5b   : > { %817 = vmatpush1.bf16.msra.mxu1 %v4050_v63  ;;  %v4076_v63 = vld [vmem:[%s5930_s1 + $0x174] ss:$8 sps:$4 sm:$0xff]  }
  0x5c   : > { %2062 = vmatpush1.bf16.msra.mxu0 %v4053_v0  ;;  %818 = vmatprep.subr.bf16.mxu1 %v4058_v2  ;;  %v4866_v0 = vpack.c.bf16 %v4856_v60, %v4791_v17  ;;  %v4869_v2 = vld [vmem:[%s4564_s5 + $0xb0] sm:$0x3] }
  0x5d   : > { %2063 = vmatprep.subr.bf16.mxu0 %v4061_v3  ;;  %v4872_v3 = vsel %vm544_vm0, %v578_v42, %v579_v57  ;;  %v550_v42 = vsel %vm544_vm0, %v548_v34, %v549_v46  ;;  %v4085_v57 = vld [vmem:[%s5930_s1 + $0x584] ss:$8 sps:$4 sm:$0xff]   ;;  %v4927_v34 = vld [vmem:[%s4564_s5 + $0xf8] sm:$0x3] }
  0x5e   : > { %5941 = vst [vmem:[#allocation5_spill] sm:$0xff] %v4866_v0  ;;  %476 = vmatmul.mubr.bf16.gmra.mrb[8].mxu1 %v4866_v0  ;;  %v4930_v46 = vld [vmem:[%s4564_s5 + $0x108] sm:$0xff]  ;;  %v4970_v0 = vld [vmem:[%s4564_s5 + $0x100] sm:$0xff] }
  0x5f   : > { %819 = vmatpush1.bf16.msra.mxu1 %v4056_v7  ;;  %v4875_v7 = vsel %vm544_vm0, %v584_v58, %v585_v59  ;;  %v4923_v59 = vpack.c.bf16 %v4909_v54, %v4843_v50 }
  0x60   : > { %2064 = vmatpush1.bf16.msra.mxu0 %v4059_v8  ;;  %820 = vmatprep.subr.bf16.mxu1 %v4064_v12  ;;  %v4878_v8 = vld [vmem:[%s4564_s5 + $0xc0] sm:$0xff]  ;;  %v576_v12 = vrot.slane %v4869_v2, 1  ;;  %v1561_v20 = vpack.c.bf16 %v4875_v7, %v4872_v3 }
  0x61   : > { %2065 = vmatprep.subr.bf16.mxu0 %v4067_v22  ;;  %v581_v22 = vrot.slane %v4878_v8, 1  ;;  %5942 = vst [vmem:[#allocation6_spill] sm:$0xff] %v4923_v59  ;;  %485 = vmatprep.mubr.bf16.mxu1 %v4923_v59 }
  0x62   : > { %1809 = vmatprep.mubr.bf16.mxu0 %v1561_v20  ;;  %v610_v20 = vpack.c.bf16 %v4609_v62, %v550_v42 }
  0x63   : > { %821 = vmatpush1.bf16.msra.mxu1 %v4062_v27  ;;  %v4074_v27 = vld [vmem:[%s5930_s1 + $0x170] ss:$8 sps:$4 sm:$0xff]   ;;  %v4906_v48 = vsel %vm544_vm0, %v581_v22, %v582_v23  ;;  %v4083_v22 = vld [vmem:[%s5930_s1 + $0x580] ss:$8 sps:$4 sm:$0xff]   ;;  %v4088_v23 = vld [vmem:[%s5930_s1 + $0x194] ss:$8 sps:$4 sm:$0xff]  }
  0x64   : > { %2066 = vmatpush1.bf16.msra.mxu0 %v4065_v35  ;;  %822 = vmatprep.subr.bf16.mxu1 %v4070_v39  ;;  %v4899_v35 = vsel %vm544_vm0, %v575_v11, %v576_v12  ;;  %v916_v39 = vrot.slane %v4596_v55, 2  ;;  %v4082_v55 = vld [vmem:[%s5930_s1 + $0x184] ss:$8 sps:$4 sm:$0xff]   ;;  %v591_v11 = vrot.slane %v4927_v34, 1 }
  0x65   : > { %2067 = vmatprep.subr.bf16.mxu0 %v4073_v47  ;;  %v4077_v47 = vld [vmem:[%s5930_s1 + $0x570] ss:$8 sps:$4 sm:$0xff]   ;;  %v1560_v58 = vpack.c.bf16 %v4906_v48, %v4899_v35 }
  0x66   : > { %v917_v59 = vsel %vm899_vm1, %v915_v40, %v916_v39  ;;  %v4964_v62 = vsel %vm544_vm0, %v590_v52, %v591_v11  ;;  %v1549_v39 = vrot.slane %v4973_v41, 1  ;;  %v4086_v40 = vld [vmem:[%s5930_s1 + $0x190] ss:$8 sps:$4 sm:$0xff]   ;;  %v921_v52 = vrot.slane %v4692_v37, 2  ;;  %v4094_v37 = vld [vmem:[%s5930_s1 + $0x1a4] ss:$8 sps:$4 sm:$0xff]  }
  0x67   : > { %823 = vmatpush1.bf16.msra.mxu1 %v4068_v56  ;;  %v4933_v56 = vld [vmem:[%s4564_s5 + $0x118] sm:$0x3]  ;;  %1810 = vmatmul.mubr.bf16.gmra.mrb[8].mxu0 %v1560_v58  ;;  %v922_v11 = vrot.slane %v4728_v53, 2  ;;  %v4097_v53 = vld [vmem:[%s5930_s1 + $0x5a4] ss:$8 sps:$4 sm:$0xff]  }
  0x68   : > { %2068 = vmatpush1.bf16.msra.mxu0 %v4071_v61  ;;  %824 = vmatprep.subr.bf16.mxu1 %v4076_v63  ;;  %v4080_v61 = vld [vmem:[%s5930_s1 + $0x180] ss:$8 sps:$4 sm:$0xff]   ;;  %v1551_v63 = vrot.slane %v4930_v46, 1  ;;  %v1552_v12 = vrot.slane %v4933_v56, 1 }
  0x69   : > { %2069 = vmatprep.subr.bf16.mxu0 %v4079_v19  ;;  %v4943_v19 = vld [vmem:[%s4564_s5 + $0xe0] sm:$0xff] }
  0x6a   : > { %v4954_v58 = vpack.c.bf16 %v4943_v19, %v4878_v8  ;;  %v4967_v42 = vsel %vm544_vm0, %v1551_v63, %v1552_v12  ;;  %v587_v16 = vrot.slane %v4943_v19, 1  ;;  %v918_v63 = vrot.slane %v4778_v13, 2 }
  0x6b   : > { %825 = vmatpush1.bf16.msra.mxu1 %v4074_v27  ;;  %v1563_v24 = vpack.c.bf16 %v4967_v42, %v4964_v62  ;;  %v1548_v27 = vrot.slane %v4970_v0, 1  ;;  %v919_v12 = vrot.slane %v4781_v14, 2  ;;  %v4092_v14 = vld [vmem:[%s5930_s1 + $0x1a0] ss:$8 sps:$4 sm:$0xff]  }
  0x6c   : > { %2070 = vmatpush1.bf16.msra.mxu0 %v4077_v47  ;;  %826 = vmatprep.subr.bf16.mxu1 %v4082_v55  ;;  %v4986_v47 = vsel %vm544_vm0, %v587_v16, %v588_v43  ;;  %v4089_v43 = vld [vmem:[%s5930_s1 + $0x590] ss:$8 sps:$4 sm:$0xff]  }
  0x6d   : > { %2071 = vmatprep.subr.bf16.mxu0 %v4085_v57  ;;  %486 = vmatmul.mubr.bf16.gmra.mrb[12].mxu1 %v4954_v58  ;;  %v4992_v55 = vsel %vm544_vm0, %v1548_v27, %v1549_v39  ;;  %v1855_v57 = vpack.c.bf16 %v917_v59, %v4960_v29  ;;  %v927_v39 = vrot.slane %v4758_v4, 2  ;;  %v4098_v4 = vld [vmem:[%s5930_s1 + $0x1b0] ss:$8 sps:$4 sm:$0xff]  }
  0x6e   : > { %1819 = vmatprep.mubr.bf16.mxu0 %v1563_v24  ;;  %842 = vmatprep.mubr.bf16.mxu1 %v610_v20  ;;  %v1562_v16 = vpack.c.bf16 %v4992_v55, %v4986_v47  ;;  %v4095_v20 = vld [vmem:[%s5930_s1 + $0x5a0] ss:$8 sps:$4 sm:$0xff]   ;;  %v4103_v24 = vld [vmem:[%s5930_s1 + $0x5b4] ss:$8 sps:$4 sm:$0xff]  }
  0x6f   : > { %827 = vmatpush1.bf16.msra.mxu1 %v4080_v61  ;;  %v5011_v61 = vsel %vm899_vm1, %v921_v52, %v922_v11  ;;  %v933_v52 = vrot.slane %v4823_v38, 2  ;;  %v934_v11 = vrot.slane %v4840_v49, 2  ;;  %v4109_v49 = vld [vmem:[%s5930_s1 + $0x5c4] ss:$8 sps:$4 sm:$0xff]  }
  0x70   : > { %2072 = vmatpush1.bf16.msra.mxu0 %v4083_v22  ;;  %828 = vmatprep.subr.bf16.mxu1 %v4088_v23  ;;  %v5020_v22 = vsel %vm899_vm1, %v918_v63, %v919_v12  ;;  %v5023_v23 = vpack.c.bf16 %v5011_v61, %v917_v59  ;;  %v924_v59 = vrot.slane %v4791_v17, 2 }
  0x71   : > { %2073 = vmatprep.subr.bf16.mxu0 %v4091_v10  ;;  %1820 = vmatmul.mubr.bf16.gmra.mrb[12].mxu0 %v1562_v16  ;;  %v4100_v10 = vld [vmem:[%s5930_s1 + $0x1b4] ss:$8 sps:$4 sm:$0xff]   ;;  %v5033_v27 = vpack.c.bf16 %v5020_v22, %v4664_v26  ;;  %v931_v16 = vrot.slane %v4869_v2, 2  ;;  %v5062_v12 = vsel %vm899_vm1, %v933_v52, %v934_v11  ;;  %v937_v52 = vrot.slane %v4881_v9, 2  ;;  %v4118_v9 = vld [vmem:[%s5930_s1 + $0x1e4] ss:$8 sps:$4 sm:$0xff]  }
  0x72   : > { %2087 = vmatprep.mubr.bf16.mxu0 %v1855_v57  ;;  %v925_v57 = vrot.slane %v4794_v18, 2  ;;  %v4106_v18 = vld [vmem:[%s5930_s1 + $0x1c4] ss:$8 sps:$4 sm:$0xff]   ;;  %v945_v11 = vrot.slane %v4909_v54, 2  ;;  %v545_v54 = vrot.slane %v4670_v28, 1 }
  0x73   : > { %829 = vmatpush1.bf16.msra.mxu1 %v4086_v40  ;;  %v928_v40 = vrot.slane %v4761_v5, 2  ;;  %v4101_v5 = vld [vmem:[%s5930_s1 + $0x5b0] ss:$8 sps:$4 sm:$0xff]   ;;  %v4116_v28 = vld [vmem:[%s5930_s1 + $0x1e0] ss:$8 sps:$4 sm:$0xff]  }
  0x74   : > { %2074 = vmatpush1.bf16.msra.mxu0 %v4089_v43  ;;  %830 = vmatprep.subr.bf16.mxu1 %v4094_v37  ;;  %v930_v43 = vrot.slane %v4856_v60, 2  ;;  %v5059_v63 = vsel %vm899_vm1, %v924_v59, %v925_v57  ;;  %v940_v59 = vrot.slane %v4846_v51, 2  ;;  %v936_v57 = vrot.slane %v4878_v8, 2  ;;  %v4113_v51 = vld [vmem:[%s5930_s1 + $0x5d0] ss:$8 sps:$4 sm:$0xff]  }
  0x75   : > { %2075 = vmatprep.subr.bf16.mxu0 %v4097_v53  ;;  %v5056_v2 = vsel %vm899_vm1, %v927_v39, %v928_v40  ;;  %v4104_v53 = vld [vmem:[%s5930_s1 + $0x1c0] ss:$8 sps:$4 sm:$0xff]   ;;  %v4115_v39 = vld [vmem:[%s5930_s1 + $0x5d4] ss:$8 sps:$4 sm:$0xff]   ;;  %v939_v40 = vrot.slane %v4843_v50, 2 }
  0x76   : > { %v5065_v37 = vsel %vm899_vm1, %v930_v43, %v931_v16  ;;  %v946_v43 = vrot.slane %v4927_v34, 2  ;;  %v942_v16 = vrot.slane %v4943_v19, 2  ;;  %v5112_v19 = vsel %vm899_vm1, %v936_v57, %v937_v52  ;;  %v4122_v57 = vld [vmem:[%s5930_s1 + $0x1f0] ss:$8 sps:$4 sm:$0xff]  }
  0x77   : > { %831 = vmatpush1.bf16.msra.mxu1 %v4092_v14  ;;  %v4107_v14 = vld [vmem:[%s5930_s1 + $0x5c0] ss:$8 sps:$4 sm:$0xff]   ;;  %v5109_v34 = vsel %vm899_vm1, %v939_v40, %v940_v59  ;;  %v4127_v40 = vld [vmem:[%s5930_s1 + $0x5f4] ss:$8 sps:$4 sm:$0xff]   ;;  %v4125_v52 = vld [vmem:[%s5930_s1 + $0x5f0] ss:$8 sps:$4 sm:$0xff]  }
  0x78   : > { %2076 = vmatpush1.bf16.msra.mxu0 %v4095_v20  ;;  %832 = vmatprep.subr.bf16.mxu1 %v4100_v10  ;;  %v5075_v20 = vpack.c.bf16 %v5062_v12, %v5056_v2  ;;  %v5079_v10 = vpack.c.bf16 %v5065_v37, %v5059_v63 }
  0x79   : > { %2077 = vmatprep.subr.bf16.mxu0 %v4103_v24  ;;  %v4112_v24 = vld [vmem:[%s5930_s1 + $0x1d4] ss:$8 sps:$4 sm:$0xff]  }
  0x7b   : > { %833 = vmatpush1.bf16.msra.mxu1 %v4098_v4  ;;  %v943_v4 = vrot.slane %v4957_v45, 2  ;;  %v4121_v45 = vld [vmem:[%s5930_s1 + $0x5e4] ss:$8 sps:$4 sm:$0xff]  }
  0x7c   : > { %2078 = vmatpush1.bf16.msra.mxu0 %v4101_v5  ;;  %834 = vmatprep.subr.bf16.mxu1 %v4106_v18  ;;  %v4110_v5 = vld [vmem:[%s5930_s1 + $0x1d0] ss:$8 sps:$4 sm:$0xff]   ;;  %v5115_v18 = vsel %vm899_vm1, %v945_v11, %v946_v43  ;;  %v4130_v11 = vld [vmem:[%s5930_s1 + $0x204] ss:$8 sps:$4 sm:$0xff]  }
  0x7d   : > { %2079 = vmatprep.subr.bf16.mxu0 %v4109_v49  ;;  %v5118_v49 = vsel %vm899_vm1, %v942_v16, %v943_v4  ;;  %v4133_v43 = vld [vmem:[%s5930_s1 + $0x604] ss:$8 sps:$4 sm:$0xff]   ;;  %v4128_v4 = vld [vmem:[%s5930_s1 + $0x200] ss:$8 sps:$4 sm:$0xff]  }
  0x7f   : > { %835 = vmatpush1.bf16.msra.mxu1 %v4104_v53  ;;  %v546_v53 = vrot.slane %v4675_v30, 1  ;;  %v4124_v30 = vld [vmem:[%s5930_s1 + $0x1f4] ss:$8 sps:$4 sm:$0xff]  }
  0x80   : > { %2080 = vmatpush1.bf16.msra.mxu0 %v4107_v14  ;;  %836 = vmatprep.subr.bf16.mxu1 %v4112_v24  ;;  %v4119_v14 = vld [vmem:[%s5930_s1 + $0x5e0] ss:$8 sps:$4 sm:$0xff]   ;;  %v5129_v24 = vpack.c.bf16 %v5115_v18, %v5109_v34 }
  0x81   : > { %2081 = vmatprep.subr.bf16.mxu0 %v4115_v39  ;;  %v5133_v39 = vpack.c.bf16 %v5118_v49, %v5112_v19  ;;  %v547_v59 = vsel %vm544_vm0, %v545_v54, %v546_v53  ;;  %v5943_v54 = vpack.c.bf16 %v4664_v26, %v4651_v21  ;;  %v4134_v53 = vld [vmem:[%s5930_s1 + $0x210] ss:$8 sps:$4 sm:$0xff]   ;;  %v4145_v26 = vld [vmem:[%s5930_s1 + $0x624] ss:$8 sps:$4 sm:$0xff]  }
  0x82   : > { %v609_v16 = vpack.c.bf16 %v4678_v31, %v547_v59  ;;  %v4139_v31 = vld [vmem:[%s5930_s1 + $0x614] ss:$8 sps:$4 sm:$0xff]   ;;  %v1850_v59 = vrot.slane %v4933_v56, 2  ;;  %v5233_v56 = vpack.c.bf16 %v4899_v35, %v4820_v36  ;;  %v4155_v36 = vld [vmem:[%s5930_s1 + $0x640] ss:$8 sps:$4 sm:$0xff]   ;;  %v1847_v35 = vrot.slane %v4973_v41, 2 }
  0x83   : > { %837 = vmatpush1.bf16.msra.mxu1 %v4110_v5  ;;  %v4131_v5 = vld [vmem:[%s5930_s1 + $0x600] ss:$8 sps:$4 sm:$0xff]  }
  0x84   : > { %2082 = vmatpush1.bf16.msra.mxu0 %v4113_v51  ;;  %838 = vmatprep.subr.bf16.mxu1 %v4118_v9  ;;  %v4136_v51 = vld [vmem:[%s5930_s1 + $0x214] ss:$8 sps:$4 sm:$0xff]   ;;  %v5169_v9 = vpack.c.bf16 %v4764_v6, %v4618_v1  ;;  %v4142_v1 = vld [vmem:[%s5930_s1 + $0x224] ss:$8 sps:$4 sm:$0xff]   ;;  %v5191_v6 = vpack.c.bf16 %v4813_v33, %v4681_v32 }
  0x85   : > { %2083 = vmatprep.subr.bf16.mxu0 %v4121_v45  ;;  %v1857_v45 = vpack.c.bf16 %v5056_v2, %v5011_v61  ;;  %v1856_v61 = vpack.c.bf16 %v5059_v63, %v5020_v22  ;;  %v4140_v2 = vld [vmem:[%s5930_s1 + $0x220] ss:$8 sps:$4 sm:$0xff]   ;;  %v4148_v32 = vld [vmem:[%s5930_s1 + $0x234] ss:$8 sps:$4 sm:$0xff]   ;;  %v5211_v22 = vpack.c.bf16 %v4872_v3, %v4784_v15  ;;  %v1859_v63 = vpack.c.bf16 %v5109_v34, %v5062_v12  ;;  %v4149_v15 = vld [vmem:[%s5930_s1 + $0x630] ss:$8 sps:$4 sm:$0xff]  }
  0x86   : > { %v4151_v33 = vld [vmem:[%s5930_s1 + $0x634] ss:$8 sps:$4 sm:$0xff]   ;;  %v4154_v3 = vld [vmem:[%s5930_s1 + $0x244] ss:$8 sps:$4 sm:$0xff]   ;;  %v1858_v12 = vpack.c.bf16 %v5112_v19, %v5065_v37  ;;  %v1259_v37 = vpack.c.bf16 %v4843_v50, %v4823_v38  ;;  %v1258_v19 = vpack.c.bf16 %v4878_v8, %v4856_v60 }
  0x87   : > { %839 = vmatpush1.bf16.msra.mxu1 %v4116_v28  ;;  %v4137_v28 = vld [vmem:[%s5930_s1 + $0x610] ss:$8 sps:$4 sm:$0xff]   ;;  %v4337_v38 = vld [vmem:[%s5930_s1 + $0x854] ss:$8 sps:$4 sm:$0xff]   ;;  %v4380_v50 = vld [vmem:[%s4564_s5 + $0xe8] sm:$0xff] }
  0x88   : > { %2084 = vmatpush1.bf16.msra.mxu0 %v4119_v14  ;;  %840 = vmatprep.subr.bf16.mxu1 %v4124_v30  ;;  %v4143_v14 = vld [vmem:[%s5930_s1 + $0x620] ss:$8 sps:$4 sm:$0xff]   ;;  %v1256_v30 = vpack.c.bf16 %v4791_v17, %v4778_v13 }
  0x89   : > { %2085 = vmatprep.subr.bf16.mxu0 %v4127_v40  ;;  %v1849_v40 = vrot.slane %v4930_v46, 2  ;;  %v4157_v46 = vld [vmem:[%s5930_s1 + $0x644] ss:$8 sps:$4 sm:$0xff]  }
  0x8a   : > { %v4381_v60 = vld [vmem:[%s4564_s5 + $0xe0] sm:$0xff] }
  0x8b   : > { %841 = vmatpush1.bf16.msra.mxu1 %v4122_v57  ;;  %v4146_v57 = vld [vmem:[%s5930_s1 + $0x230] ss:$8 sps:$4 sm:$0xff]   ;;  %v5238_v34 = vsel %vm899_vm1, %v1849_v40, %v1850_v59  ;;  %v4382_v8 = vld [vmem:[%s4564_s5 + $0x100] sm:$0xff] }
  0x8c   : > { %2086 = vmatpush1.bf16.msra.mxu0 %v4125_v52  ;;  %1165 = vmatprep.subr.bf16.mxu1 %v4130_v11  ;;  %v1846_v52 = vrot.slane %v4970_v0, 2  ;;  %v4152_v11 = vld [vmem:[%s5930_s1 + $0x240] ss:$8 sps:$4 sm:$0xff]   ;;  %v1861_v41 = vpack.c.bf16 %v5238_v34, %v5115_v18  ;;  %v4166_v18 = vld [vmem:[%s5930_s1 + $0x264] ss:$8 sps:$4 sm:$0xff]  }
  0x8d   : > { %2339 = vmatprep.subr.bf16.mxu0 %v4133_v43  ;;  %v4160_v43 = vld [vmem:[%s5930_s1 + $0x254] ss:$8 sps:$4 sm:$0xff]   ;;  %v4182_v40 = vld [vmem:[%s5930_s1 + $0x290] ss:$8 sps:$4 sm:$0xff]  }
  0x8e   : > { %843 = vmatmul.mubr.bf16.vlgmr.msra.gmra.mrb[0].mxu1 %v609_v16  ;;  %v4163_v16 = vld [vmem:[%s5930_s1 + $0x654] ss:$8 sps:$4 sm:$0xff]   ;;  %v4185_v59 = vld [vmem:[%s5930_s1 + $0x690] ss:$8 sps:$4 sm:$0xff]  }
  0x8f   : > { %2088 = vmatmul.mubr.bf16.vlgmr.msra.gmra.mrb[0].mxu0 %v5943_v54  ;;  %1166 = vmatpush1.bf16.msra.mxu1 %v4128_v4  ;;  %v5260_v4 = vpack.c.bf16 %v4964_v62, %v4875_v7  ;;  %v4161_v7 = vld [vmem:[%s5930_s1 + $0x650] ss:$8 sps:$4 sm:$0xff]   ;;  %v5274_v62 = vsel %vm899_vm1, %v1846_v52, %v1847_v35  ;;  %v5285_v54 = vpack.c.bf16 %v4986_v47, %v4906_v48  ;;  %v4172_v48 = vld [vmem:[%s5930_s1 + $0x274] ss:$8 sps:$4 sm:$0xff]   ;;  %v4202_v35 = vld [vmem:[%s5930_s1 + $0x2c4] ss:$8 sps:$4 sm:$0xff]  }
  0x90   : > { %2340 = vmatpush1.bf16.msra.mxu0 %v4131_v5  ;;  %1167 = vmatprep.subr.bf16.mxu1 %v4136_v51  ;;  %v4372_v5 = vld [vmem:[%s4564_s5 + $0x8] sm:$0xff]  ;;  %v4175_v47 = vld [vmem:[%s5930_s1 + $0x674] ss:$8 sps:$4 sm:$0xff]  }
  0x91   : > { %2341 = vmatprep.subr.bf16.mxu0 %v4139_v31  ;;  %852 = vmatprep.mubr.bf16.mxu1 %v5169_v9  ;;  %v903_v51 = vrot.slane %v4372_v5, 2  ;;  %v904_v31 = vrot.slane %v4806_v25, 2  ;;  %v4169_v25 = vld [vmem:[%s5930_s1 + $0x664] ss:$8 sps:$4 sm:$0xff]   ;;  %v4199_v52 = vld [vmem:[%s5930_s1 + $0x6b4] ss:$8 sps:$4 sm:$0xff]  }
  0x92   : > { %2097 = vmatprep.mubr.bf16.mxu0 %v1857_v45  ;;  %v4158_v45 = vld [vmem:[%s5930_s1 + $0x250] ss:$8 sps:$4 sm:$0xff]   ;;  %v4208_v5 = vld [vmem:[%s5930_s1 + $0x2d4] ss:$8 sps:$4 sm:$0xff]  }
  0x93   : > { %1168 = vmatpush1.bf16.msra.mxu1 %v4134_v53  ;;  %v1860_v53 = vpack.c.bf16 %v5274_v62, %v5118_v49 }
  0x94   : > { %2342 = vmatpush1.bf16.msra.mxu0 %v4137_v28  ;;  %1169 = vmatprep.subr.bf16.mxu1 %v4142_v1  ;;  %v905_v28 = vsel %vm899_vm1, %v903_v51, %v904_v31  ;;  %v4164_v1 = vld [vmem:[%s5930_s1 + $0x260] ss:$8 sps:$4 sm:$0xff]   ;;  %v4211_v51 = vld [vmem:[%s5930_s1 + $0x6d4] ss:$8 sps:$4 sm:$0xff]   ;;  %v4206_v31 = vld [vmem:[%s5930_s1 + $0x2d0] ss:$8 sps:$4 sm:$0xff]  }
  0x95   : > { %2343 = vmatprep.subr.bf16.mxu0 %v4145_v26  ;;  %v4167_v26 = vld [vmem:[%s5930_s1 + $0x660] ss:$8 sps:$4 sm:$0xff]   ;;  %v965_v49 = vpack.c.bf16 %v4960_v29, %v905_v28  ;;  %v4181_v29 = vld [vmem:[%s5930_s1 + $0x684] ss:$8 sps:$4 sm:$0xff]   ;;  %v4220_v28 = vld [vmem:[%s5930_s1 + $0x2f4] ss:$8 sps:$4 sm:$0xff]  }
  0x96   : > { %853 = vmatmul.mubr.bf16.gmra.mrb[4].mxu1 %v5191_v6 }
  0x97   : > { %2098 = vmatmul.mubr.bf16.gmra.mrb[4].mxu0 %v1856_v61  ;;  %1170 = vmatpush1.bf16.msra.mxu1 %v4140_v2  ;;  %v4170_v61 = vld [vmem:[%s5930_s1 + $0x270] ss:$8 sps:$4 sm:$0xff]  }
  0x98   : > { %2344 = vmatpush1.bf16.msra.mxu0 %v4143_v14  ;;  %1171 = vmatprep.subr.bf16.mxu1 %v4148_v32  ;;  %v4173_v2 = vld [vmem:[%s5930_s1 + $0x670] ss:$8 sps:$4 sm:$0xff]   ;;  %v4178_v14 = vld [vmem:[%s5930_s1 + $0x284] ss:$8 sps:$4 sm:$0xff]   ;;  %v4176_v32 = vld [vmem:[%s5930_s1 + $0x280] ss:$8 sps:$4 sm:$0xff]  }
  0x99   : > { %2345 = vmatprep.subr.bf16.mxu0 %v4151_v33  ;;  %862 = vmatprep.mubr.bf16.mxu1 %v5211_v22  ;;  %v4179_v33 = vld [vmem:[%s5930_s1 + $0x680] ss:$8 sps:$4 sm:$0xff]  }
  0x9a   : > { %2107 = vmatprep.mubr.bf16.mxu0 %v1859_v63  ;;  %v4184_v63 = vld [vmem:[%s5930_s1 + $0x294] ss:$8 sps:$4 sm:$0xff]  }
  0x9b   : > { %1172 = vmatpush1.bf16.msra.mxu1 %v4146_v57  ;;  %v4190_v57 = vld [vmem:[%s5930_s1 + $0x2a4] ss:$8 sps:$4 sm:$0xff]  }
  0x9c   : > { %2346 = vmatpush1.bf16.msra.mxu0 %v4149_v15  ;;  %1173 = vmatprep.subr.bf16.mxu1 %v4154_v3  ;;  %v4193_v15 = vld [vmem:[%s5930_s1 + $0x6a4] ss:$8 sps:$4 sm:$0xff]   ;;  %v4188_v3 = vld [vmem:[%s5930_s1 + $0x2a0] ss:$8 sps:$4 sm:$0xff]  }
  0x9d   : > { %2347 = vmatprep.subr.bf16.mxu0 %v4157_v46  ;;  %v4191_v46 = vld [vmem:[%s5930_s1 + $0x6a0] ss:$8 sps:$4 sm:$0xff]  }
  0x9e   : > { %863 = vmatmul.mubr.bf16.gmra.mrb[8].mxu1 %v5233_v56 }
  0x9f   : > { %2108 = vmatmul.mubr.bf16.gmra.mrb[8].mxu0 %v1858_v12  ;;  %1174 = vmatpush1.bf16.msra.mxu1 %v4152_v11  ;;  %v4196_v12 = vld [vmem:[%s5930_s1 + $0x2b4] ss:$8 sps:$4 sm:$0xff]   ;;  %v4194_v11 = vld [vmem:[%s5930_s1 + $0x2b0] ss:$8 sps:$4 sm:$0xff]  }
  0xa0   : > { %2348 = vmatpush1.bf16.msra.mxu0 %v4155_v36  ;;  %1175 = vmatprep.subr.bf16.mxu1 %v4160_v43  ;;  %v4197_v36 = vld [vmem:[%s5930_s1 + $0x6b0] ss:$8 sps:$4 sm:$0xff]   ;;  %v4205_v43 = vld [vmem:[%s5930_s1 + $0x6c4] ss:$8 sps:$4 sm:$0xff]  }
  0xa1   : > { %2349 = vmatprep.subr.bf16.mxu0 %v4163_v16  ;;  %872 = vmatprep.mubr.bf16.mxu1 %v5260_v4  ;;  %v4200_v16 = vld [vmem:[%s5930_s1 + $0x2c0] ss:$8 sps:$4 sm:$0xff]  }
  0xa2   : > { %2117 = vmatprep.mubr.bf16.mxu0 %v1861_v41  ;;  %v4203_v41 = vld [vmem:[%s5930_s1 + $0x6c0] ss:$8 sps:$4 sm:$0xff]  }
  0xa3   : > { %1176 = vmatpush1.bf16.msra.mxu1 %v4158_v45  ;;  %v4209_v45 = vld [vmem:[%s5930_s1 + $0x6d0] ss:$8 sps:$4 sm:$0xff]  }
  0xa4   : > { %2350 = vmatpush1.bf16.msra.mxu0 %v4161_v7  ;;  %1177 = vmatprep.subr.bf16.mxu1 %v4166_v18  ;;  %v4214_v7 = vld [vmem:[%s5930_s1 + $0x2e4] ss:$8 sps:$4 sm:$0xff]  }
  0xa5   : > { %2351 = vmatprep.subr.bf16.mxu0 %v4169_v25  ;;  %v4217_v18 = vld [vmem:[%s5930_s1 + $0x6e4] ss:$8 sps:$4 sm:$0xff]   ;;  %v4212_v25 = vld [vmem:[%s5930_s1 + $0x2e0] ss:$8 sps:$4 sm:$0xff]  }
  0xa6   : > { %873 = vmatmul.mubr.bf16.gmra.mrb[12].mxu1 %v5285_v54 }
  0xa7   : > { %2118 = vmatmul.mubr.bf16.gmra.mrb[12].mxu0 %v1860_v53  ;;  %1178 = vmatpush1.bf16.msra.mxu1 %v4164_v1  ;;  %v4215_v53 = vld [vmem:[%s5930_s1 + $0x6e0] ss:$8 sps:$4 sm:$0xff]   ;;  %v4223_v1 = vld [vmem:[%s5930_s1 + $0x6f4] ss:$8 sps:$4 sm:$0xff]  }
  0xa8   : > { %2352 = vmatpush1.bf16.msra.mxu0 %v4167_v26  ;;  %1179 = vmatprep.subr.bf16.mxu1 %v4172_v48  ;;  %v4218_v26 = vld [vmem:[%s5930_s1 + $0x2f0] ss:$8 sps:$4 sm:$0xff]  }
  0xa9   : > { %2353 = vmatprep.subr.bf16.mxu0 %v4175_v47  ;;  %1197 = vmatprep.mubr.bf16.mxu1 %v965_v49  ;;  %v4221_v48 = vld [vmem:[%s5930_s1 + $0x6f0] ss:$8 sps:$4 sm:$0xff]   ;;  %v4226_v47 = vld [vmem:[%s5930_s1 + $0x304] ss:$8 sps:$4 sm:$0xff]  }
  0xaa   : > { %2371 = vmatprep.mubr.bf16.mxu0 %v4711_v44  ;;  %v4187_v44 = vld [vmem:[%s5930_s1 + $0x694] ss:$8 sps:$4 sm:$0xff]   ;;  %v4229_v49 = vld [vmem:[%s5930_s1 + $0x704] ss:$8 sps:$4 sm:$0xff]  }
  0xab   : > { %1180 = vmatpush1.bf16.msra.mxu1 %v4170_v61  ;;  %v4224_v61 = vld [vmem:[%s5930_s1 + $0x300] ss:$8 sps:$4 sm:$0xff]  }
  0xac   : > { %2354 = vmatpush1.bf16.msra.mxu0 %v4173_v2  ;;  %1181 = vmatprep.subr.bf16.mxu1 %v4178_v14  ;;  %v4227_v2 = vld [vmem:[%s5930_s1 + $0x700] ss:$8 sps:$4 sm:$0xff]   ;;  %v4232_v14 = vld [vmem:[%s5930_s1 + $0x314] ss:$8 sps:$4 sm:$0xff]  }
  0xad   : > { %2355 = vmatprep.subr.bf16.mxu0 %v4181_v29  ;;  %v4235_v29 = vld [vmem:[%s5930_s1 + $0x714] ss:$8 sps:$4 sm:$0xff]  }
  0xaf   : > { %1182 = vmatpush1.bf16.msra.mxu1 %v4176_v32  ;;  %v5944_v32 = vld [vmem:[#allocation2_spill] sm:$0xff] }
  0xb0   : > { %2356 = vmatpush1.bf16.msra.mxu0 %v4179_v33  ;;  %1183 = vmatprep.subr.bf16.mxu1 %v4184_v63  ;;  %v5945_v33 = vpack.c.bf16 %v4651_v21, %v5944_v32  ;;  %v5946_v63 = vld [vmem:[#allocation3_spill] sm:$0xff]  ;;  %v4269_v32 = vld [vmem:[%s5930_s1 + $0x770] ss:$8 sps:$4 sm:$0xff]  }
  0xb1   : > { %2357 = vmatprep.subr.bf16.mxu0 %v4187_v44  ;;  %v4230_v44 = vld [vmem:[%s5930_s1 + $0x310] ss:$8 sps:$4 sm:$0xff]   ;;  %v4241_v21 = vld [vmem:[%s5930_s1 + $0x724] ss:$8 sps:$4 sm:$0xff]  }
  0xb3   : > { %1184 = vmatpush1.bf16.msra.mxu1 %v4182_v40  ;;  %v4233_v40 = vld [vmem:[%s5930_s1 + $0x710] ss:$8 sps:$4 sm:$0xff]  }
  0xb4   : > { %2358 = vmatpush1.bf16.msra.mxu0 %v4185_v59  ;;  %1185 = vmatprep.subr.bf16.mxu1 %v4190_v57  ;;  %v4238_v59 = vld [vmem:[%s5930_s1 + $0x324] ss:$8 sps:$4 sm:$0xff]   ;;  %v5947_v57 = vld [vmem:[#allocation4_spill] sm:$0xff] }
  0xb5   : > { %2359 = vmatprep.subr.bf16.mxu0 %v4193_v15  ;;  %v4236_v15 = vld [vmem:[%s5930_s1 + $0x320] ss:$8 sps:$4 sm:$0xff]  }
  0xb7   : > { %1186 = vmatpush1.bf16.msra.mxu1 %v4188_v3  ;;  %v4239_v3 = vld [vmem:[%s5930_s1 + $0x720] ss:$8 sps:$4 sm:$0xff]  }
  0xb8   : > { %2360 = vmatpush1.bf16.msra.mxu0 %v4191_v46  ;;  %1187 = vmatprep.subr.bf16.mxu1 %v4196_v12  ;;  %v4244_v46 = vld [vmem:[%s5930_s1 + $0x334] ss:$8 sps:$4 sm:$0xff]  }
  0xb9   : > { %2361 = vmatprep.subr.bf16.mxu0 %v4199_v52  ;;  %v4247_v12 = vld [vmem:[%s5930_s1 + $0x734] ss:$8 sps:$4 sm:$0xff]  }
  0xba   : > { %v5948_v52 = vld [vmem:[#allocation5_spill] sm:$0xff] }
  0xbb   : > { %1188 = vmatpush1.bf16.msra.mxu1 %v4194_v11  ;;  %v4242_v11 = vld [vmem:[%s5930_s1 + $0x330] ss:$8 sps:$4 sm:$0xff]  }
  0xbc   : > { %2362 = vmatpush1.bf16.msra.mxu0 %v4197_v36  ;;  %1189 = vmatprep.subr.bf16.mxu1 %v4202_v35  ;;  %v4245_v36 = vld [vmem:[%s5930_s1 + $0x730] ss:$8 sps:$4 sm:$0xff]   ;;  %v4250_v35 = vld [vmem:[%s5930_s1 + $0x344] ss:$8 sps:$4 sm:$0xff]  }
  0xbd   : > { %2363 = vmatprep.subr.bf16.mxu0 %v4205_v43  ;;  %v4253_v43 = vld [vmem:[%s5930_s1 + $0x744] ss:$8 sps:$4 sm:$0xff]  }
  0xbf   : > { %1190 = vmatpush1.bf16.msra.mxu1 %v4200_v16  ;;  %v5949_v16 = vld [vmem:[#allocation6_spill] sm:$0xff] }
  0xc0   : > { %2364 = vmatpush1.bf16.msra.mxu0 %v4203_v41  ;;  %1191 = vmatprep.subr.bf16.mxu1 %v4208_v5  ;;  %v5472_v41 = vld [vmem:[%s4564_s5 + $0x128] sm:$0xff] }
  0xc1   : > { %2365 = vmatprep.subr.bf16.mxu0 %v4211_v51  ;;  %v4248_v5 = vld [vmem:[%s5930_s1 + $0x340] ss:$8 sps:$4 sm:$0xff]  }
  0xc2   : > { %v4251_v51 = vld [vmem:[%s5930_s1 + $0x740] ss:$8 sps:$4 sm:$0xff]  }
  0xc3   : > { %1192 = vmatpush1.bf16.msra.mxu1 %v4206_v31  ;;  %v4256_v31 = vld [vmem:[%s5930_s1 + $0x354] ss:$8 sps:$4 sm:$0xff]  }
  0xc4   : > { %2366 = vmatpush1.bf16.msra.mxu0 %v4209_v45  ;;  %1193 = vmatprep.subr.bf16.mxu1 %v4214_v7  ;;  %v4259_v45 = vld [vmem:[%s5930_s1 + $0x754] ss:$8 sps:$4 sm:$0xff]   ;;  %v5487_v7 = vld [vmem:[%s4564_s5 + $0x108] sm:$0xff] }
  0xc5   : > { %2367 = vmatprep.subr.bf16.mxu0 %v4217_v18  ;;  %v2145_v18 = vpack.c.bf16 %v5472_v41, %v5487_v7 }
  0xc7   : > { %1194 = vmatpush1.bf16.msra.mxu1 %v4212_v25  ;;  %v4254_v25 = vld [vmem:[%s5930_s1 + $0x350] ss:$8 sps:$4 sm:$0xff]  }
  0xc8   : > { %2368 = vmatpush1.bf16.msra.mxu0 %v4215_v53  ;;  %1195 = vmatprep.subr.bf16.mxu1 %v4220_v28  ;;  %v4257_v53 = vld [vmem:[%s5930_s1 + $0x750] ss:$8 sps:$4 sm:$0xff]   ;;  %v5500_v28 = vld [vmem:[%s4564_s5 + $0x120] sm:$0xff] }
  0xc9   : > { %2369 = vmatprep.subr.bf16.mxu0 %v4223_v1  ;;  %v4265_v1 = vld [vmem:[%s5930_s1 + $0x764] ss:$8 sps:$4 sm:$0xff]   ;;  %v2432_v17 = vrot.slane %v5500_v28, 1 }
  0xcb   : > { %1196 = vmatpush1.bf16.msra.mxu1 %v4218_v26  ;;  %v2144_v26 = vpack.c.bf16 %v5500_v28, %v4970_v0  ;;  %v4271_v0 = vld [vmem:[%s5930_s1 + $0x774] ss:$8 sps:$4 sm:$0xff]  }
  0xcc   : > { %2370 = vmatpush1.bf16.msra.mxu0 %v4221_v48  ;;  %1455 = vmatprep.subr.bf16.mxu1 %v4226_v47  ;;  %v4260_v48 = vld [vmem:[%s5930_s1 + $0x360] ss:$8 sps:$4 sm:$0xff]  }
  0xcd   : > { %2635 = vmatprep.subr.bf16.mxu0 %v4229_v49  ;;  %v4263_v47 = vld [vmem:[%s5930_s1 + $0x760] ss:$8 sps:$4 sm:$0xff]   ;;  %v4268_v49 = vld [vmem:[%s5930_s1 + $0x374] ss:$8 sps:$4 sm:$0xff]  }
  0xce   : > { %1198 = vmatmul.mubr.bf16.vlgmr.msra.gmra.mrb[0].mxu1 %v5945_v33  ;;  %v4274_v33 = vld [vmem:[%s5930_s1 + $0x384] ss:$8 sps:$4 sm:$0xff]  }
  0xcf   : > { %2372 = vmatmul.mubr.bf16.vlgmr.msra.gmra.mrb[0].mxu0 %v5946_v63  ;;  %1456 = vmatpush1.bf16.msra.mxu1 %v4224_v61  ;;  %v4374_v61 = vld [vmem:[%s4564_s5 + $0x28] sm:$0xff] }
  0xd0   : > { %2636 = vmatpush1.bf16.msra.mxu0 %v4227_v2  ;;  %1457 = vmatprep.subr.bf16.mxu1 %v4232_v14  ;;  %v4375_v2 = vld [vmem:[%s4564_s5 + $0x48] sm:$0xff] }
  0xd1   : > { %2637 = vmatprep.subr.bf16.mxu0 %v4235_v29  ;;  %1207 = vmatprep.mubr.bf16.mxu1 %v5023_v23  ;;  %v1255_v14 = vpack.c.bf16 %v4375_v2, %v4374_v61  ;;  %v4266_v29 = vld [vmem:[%s5930_s1 + $0x370] ss:$8 sps:$4 sm:$0xff]   ;;  %v4277_v63 = vld [vmem:[%s5930_s1 + $0x784] ss:$8 sps:$4 sm:$0xff]  }
  0xd2   : > { %2381 = vmatprep.mubr.bf16.mxu0 %v5947_v57  ;;  %v4281_v57 = vld [vmem:[%s5930_s1 + $0x790] ss:$8 sps:$4 sm:$0xff]   ;;  %v4322_v61 = vld [vmem:[%s5930_s1 + $0x804] ss:$8 sps:$4 sm:$0xff]  }
  0xd3   : > { %1458 = vmatpush1.bf16.msra.mxu1 %v4230_v44  ;;  %v4272_v44 = vld [vmem:[%s5930_s1 + $0x380] ss:$8 sps:$4 sm:$0xff]  }
  0xd4   : > { %2638 = vmatpush1.bf16.msra.mxu0 %v4233_v40  ;;  %1459 = vmatprep.subr.bf16.mxu1 %v4238_v59  ;;  %v4275_v40 = vld [vmem:[%s5930_s1 + $0x780] ss:$8 sps:$4 sm:$0xff]   ;;  %v4280_v59 = vld [vmem:[%s5930_s1 + $0x394] ss:$8 sps:$4 sm:$0xff]  }
  0xd5   : > { %2639 = vmatprep.subr.bf16.mxu0 %v4241_v21  ;;  %v4278_v21 = vld [vmem:[%s5930_s1 + $0x390] ss:$8 sps:$4 sm:$0xff]   ;;  %v4376_v2 = vld [vmem:[%s4564_s5 + $0x20] sm:$0xff] }
  0xd6   : > { %1208 = vmatmul.mubr.bf16.gmra.mrb[4].mxu1 %v5033_v27 }
  0xd7   : > { %2382 = vmatmul.mubr.bf16.gmra.mrb[4].mxu0 %v5948_v52  ;;  %1460 = vmatpush1.bf16.msra.mxu1 %v4236_v15  ;;  %v4286_v15 = vld [vmem:[%s5930_s1 + $0x3a4] ss:$8 sps:$4 sm:$0xff]   ;;  %v4292_v52 = vld [vmem:[%s5930_s1 + $0x3b4] ss:$8 sps:$4 sm:$0xff]  }
  0xd8   : > { %2640 = vmatpush1.bf16.msra.mxu0 %v4239_v3  ;;  %1461 = vmatprep.subr.bf16.mxu1 %v4244_v46  ;;  %v4289_v3 = vld [vmem:[%s5930_s1 + $0x7a4] ss:$8 sps:$4 sm:$0xff]   ;;  %v4284_v46 = vld [vmem:[%s5930_s1 + $0x3a0] ss:$8 sps:$4 sm:$0xff]  }
  0xd9   : > { %2641 = vmatprep.subr.bf16.mxu0 %v4247_v12  ;;  %1217 = vmatprep.mubr.bf16.mxu1 %v5075_v20  ;;  %v4287_v12 = vld [vmem:[%s5930_s1 + $0x7a0] ss:$8 sps:$4 sm:$0xff]  }
  0xda   : > { %2391 = vmatprep.mubr.bf16.mxu0 %v5949_v16  ;;  %v4301_v16 = vld [vmem:[%s5930_s1 + $0x7c4] ss:$8 sps:$4 sm:$0xff]  }
  0xdb   : > { %1462 = vmatpush1.bf16.msra.mxu1 %v4242_v11  ;;  %v4295_v11 = vld [vmem:[%s5930_s1 + $0x7b4] ss:$8 sps:$4 sm:$0xff]  }
  0xdc   : > { %2642 = vmatpush1.bf16.msra.mxu0 %v4245_v36  ;;  %1463 = vmatprep.subr.bf16.mxu1 %v4250_v35  ;;  %v4290_v36 = vld [vmem:[%s5930_s1 + $0x3b0] ss:$8 sps:$4 sm:$0xff]  }
  0xdd   : > { %2643 = vmatprep.subr.bf16.mxu0 %v4253_v43  ;;  %v4293_v35 = vld [vmem:[%s5930_s1 + $0x7b0] ss:$8 sps:$4 sm:$0xff]   ;;  %v4298_v43 = vld [vmem:[%s5930_s1 + $0x3c4] ss:$8 sps:$4 sm:$0xff]  }
  0xde   : > { %1218 = vmatmul.mubr.bf16.gmra.mrb[8].mxu1 %v5079_v10 }
  0xdf   : > { %2392 = vmatmul.mubr.bf16.gmra.mrb[8].mxu0 %v4954_v58  ;;  %1464 = vmatpush1.bf16.msra.mxu1 %v4248_v5  ;;  %v4262_v58 = vld [vmem:[%s5930_s1 + $0x364] ss:$8 sps:$4 sm:$0xff]   ;;  %v4296_v5 = vld [vmem:[%s5930_s1 + $0x3c0] ss:$8 sps:$4 sm:$0xff]  }
  0xe0   : > { %2644 = vmatpush1.bf16.msra.mxu0 %v4251_v51  ;;  %1465 = vmatprep.subr.bf16.mxu1 %v4256_v31  ;;  %v4299_v51 = vld [vmem:[%s5930_s1 + $0x7c0] ss:$8 sps:$4 sm:$0xff]   ;;  %v4304_v31 = vld [vmem:[%s5930_s1 + $0x3d4] ss:$8 sps:$4 sm:$0xff]  }
  0xe1   : > { %2645 = vmatprep.subr.bf16.mxu0 %v4259_v45  ;;  %1227 = vmatprep.mubr.bf16.mxu1 %v5129_v24  ;;  %v4307_v45 = vld [vmem:[%s5930_s1 + $0x7d4] ss:$8 sps:$4 sm:$0xff]  }
  0xe2   : > { %2401 = vmatprep.mubr.bf16.mxu0 %v2145_v18  ;;  %v4302_v18 = vld [vmem:[%s5930_s1 + $0x3d0] ss:$8 sps:$4 sm:$0xff]  }
  0xe3   : > { %1466 = vmatpush1.bf16.msra.mxu1 %v4254_v25  ;;  %v4305_v25 = vld [vmem:[%s5930_s1 + $0x7d0] ss:$8 sps:$4 sm:$0xff]  }
  0xe4   : > { %2646 = vmatpush1.bf16.msra.mxu0 %v4257_v53  ;;  %1467 = vmatprep.subr.bf16.mxu1 %v4262_v58  ;;  %v4310_v53 = vld [vmem:[%s5930_s1 + $0x3e4] ss:$8 sps:$4 sm:$0xff]  }
  0xe5   : > { %2647 = vmatprep.subr.bf16.mxu0 %v4265_v1  ;;  %v4313_v58 = vld [vmem:[%s5930_s1 + $0x7e4] ss:$8 sps:$4 sm:$0xff]   ;;  %v4308_v1 = vld [vmem:[%s5930_s1 + $0x3e0] ss:$8 sps:$4 sm:$0xff]  }
  0xe6   : > { %1228 = vmatmul.mubr.bf16.gmra.mrb[12].mxu1 %v5133_v39 }
  0xe7   : > { %2402 = vmatmul.mubr.bf16.gmra.mrb[12].mxu0 %v2144_v26  ;;  %1468 = vmatpush1.bf16.msra.mxu1 %v4260_v48  ;;  %v4311_v26 = vld [vmem:[%s5930_s1 + $0x7e0] ss:$8 sps:$4 sm:$0xff]   ;;  %v4316_v48 = vld [vmem:[%s5930_s1 + $0x3f4] ss:$8 sps:$4 sm:$0xff]  }
  0xe8   : > { %2648 = vmatpush1.bf16.msra.mxu0 %v4263_v47  ;;  %1469 = vmatprep.subr.bf16.mxu1 %v4268_v49  ;;  %v4319_v47 = vld [vmem:[%s5930_s1 + $0x7f4] ss:$8 sps:$4 sm:$0xff]   ;;  %v4314_v49 = vld [vmem:[%s5930_s1 + $0x3f0] ss:$8 sps:$4 sm:$0xff]  }
  0xe9   : > { %2649 = vmatprep.subr.bf16.mxu0 %v4271_v0  ;;  %1487 = vmatprep.mubr.bf16.mxu1 %v1255_v14  ;;  %v4317_v0 = vld [vmem:[%s5930_s1 + $0x7f0] ss:$8 sps:$4 sm:$0xff]   ;;  %v4377_v14 = vld [vmem:[%s4564_s5 + $0x40] sm:$0xff] }
  0xea   : > { %2667 = vmatprep.mubr.bf16.mxu0 %v5169_v9  ;;  %v4283_v9 = vld [vmem:[%s5930_s1 + $0x794] ss:$8 sps:$4 sm:$0xff]  }
  0xeb   : > { %1470 = vmatpush1.bf16.msra.mxu1 %v4266_v29  ;;  %v1254_v29 = vpack.c.bf16 %v4377_v14, %v4376_v2 }
  0xec   : > { %2650 = vmatpush1.bf16.msra.mxu0 %v4269_v32  ;;  %1471 = vmatprep.subr.bf16.mxu1 %v4274_v33  ;;  %v4320_v32 = vld [vmem:[%s5930_s1 + $0x800] ss:$8 sps:$4 sm:$0xff]   ;;  %v4325_v33 = vld [vmem:[%s5930_s1 + $0x814] ss:$8 sps:$4 sm:$0xff]  }
  0xed   : > { %2651 = vmatprep.subr.bf16.mxu0 %v4277_v63  ;;  %v4378_v63 = vld [vmem:[%s4564_s5 + $0x68] sm:$0xff] }
  0xef   : > { %1472 = vmatpush1.bf16.msra.mxu1 %v4272_v44  ;;  %v4379_v44 = vld [vmem:[%s4564_s5 + $0x88] sm:$0xff] }
  0xf0   : > { %2652 = vmatpush1.bf16.msra.mxu0 %v4275_v40  ;;  %1473 = vmatprep.subr.bf16.mxu1 %v4280_v59  ;;  %v1257_v40 = vpack.c.bf16 %v4379_v44, %v4378_v63  ;;  %v4323_v59 = vld [vmem:[%s5930_s1 + $0x810] ss:$8 sps:$4 sm:$0xff]  }
  0xf1   : > { %2653 = vmatprep.subr.bf16.mxu0 %v4283_v9  ;;  %v4328_v9 = vld [vmem:[%s5930_s1 + $0x824] ss:$8 sps:$4 sm:$0xff]  }
  0xf3   : > { %1474 = vmatpush1.bf16.msra.mxu1 %v4278_v21  ;;  %v5654_v21 = vld [vmem:[%s4564_s5 + $0x138] sm:$0x3] }
  0xf4   : > { %2654 = vmatpush1.bf16.msra.mxu0 %v4281_v57  ;;  %1475 = vmatprep.subr.bf16.mxu1 %v4286_v15  ;;  %v4331_v57 = vld [vmem:[%s5930_s1 + $0x834] ss:$8 sps:$4 sm:$0xff]   ;;  %v2435_v15 = vrot.slane %v5472_v41, 1 }
  0xf5   : > { %2655 = vmatprep.subr.bf16.mxu0 %v4289_v3  ;;  %v4329_v3 = vld [vmem:[%s5930_s1 + $0x830] ss:$8 sps:$4 sm:$0xff]  }
  0xf7   : > { %1476 = vmatpush1.bf16.msra.mxu1 %v4284_v46  ;;  %v4334_v46 = vld [vmem:[%s5930_s1 + $0x844] ss:$8 sps:$4 sm:$0xff]  }
  0xf8   : > { %2656 = vmatpush1.bf16.msra.mxu0 %v4287_v12  ;;  %1477 = vmatprep.subr.bf16.mxu1 %v4292_v52  ;;  %v5672_v12 = vld [vmem:[%s4564_s5 + $0x130] sm:$0x3] }
  0xf9   : > { %2657 = vmatprep.subr.bf16.mxu0 %v4295_v11  ;;  %v4335_v52 = vld [vmem:[%s5930_s1 + $0x850] ss:$8 sps:$4 sm:$0xff]   ;;  %v2725_v2 = vrot.slane %v5672_v12, 2 }
  0xfb   : > { %1478 = vmatpush1.bf16.msra.mxu1 %v4290_v36  ;;  %v4343_v36 = vld [vmem:[%s5930_s1 + $0x874] ss:$8 sps:$4 sm:$0xff]  }
  0xfc   : > { %2658 = vmatpush1.bf16.msra.mxu0 %v4293_v35  ;;  %1479 = vmatprep.subr.bf16.mxu1 %v4298_v43  ;;  %v4346_v35 = vld [vmem:[%s5930_s1 + $0x884] ss:$8 sps:$4 sm:$0xff]   ;;  %v4344_v43 = vld [vmem:[%s5930_s1 + $0x880] ss:$8 sps:$4 sm:$0xff]  }
  0xfd   : > { %2659 = vmatprep.subr.bf16.mxu0 %v4301_v16  ;;  %v4349_v16 = vld [vmem:[%s5930_s1 + $0x894] ss:$8 sps:$4 sm:$0xff]  }
  0xff   : > { %1480 = vmatpush1.bf16.msra.mxu1 %v4296_v5  ;;  %v4350_v5 = vld [vmem:[%s5930_s1 + $0x8a0] ss:$8 sps:$4 sm:$0xff]  }
 0x100   : > { %2660 = vmatpush1.bf16.msra.mxu0 %v4299_v51  ;;  %1481 = vmatprep.subr.bf16.mxu1 %v4304_v31  ;;  %v4355_v51 = vld [vmem:[%s5930_s1 + $0x8b4] ss:$8 sps:$4 sm:$0xff]   ;;  %v4353_v31 = vld [vmem:[%s5930_s1 + $0x8b0] ss:$8 sps:$4 sm:$0xff]  }
 0x101   : > { %2661 = vmatprep.subr.bf16.mxu0 %v4307_v45  ;;  %v4358_v45 = vld [vmem:[%s5930_s1 + $0x8c4] ss:$8 sps:$4 sm:$0xff]  }
 0x103   : > { %1482 = vmatpush1.bf16.msra.mxu1 %v4302_v18  ;;  %v4356_v18 = vld [vmem:[%s5930_s1 + $0x8c0] ss:$8 sps:$4 sm:$0xff]  }
 0x104   : > { %2662 = vmatpush1.bf16.msra.mxu0 %v4305_v25  ;;  %1483 = vmatprep.subr.bf16.mxu1 %v4310_v53  ;;  %v4361_v25 = vld [vmem:[%s5930_s1 + $0x8d4] ss:$8 sps:$4 sm:$0xff]   ;;  %v4359_v53 = vld [vmem:[%s5930_s1 + $0x8d0] ss:$8 sps:$4 sm:$0xff]  }
 0x105   : > { %2663 = vmatprep.subr.bf16.mxu0 %v4313_v58  ;;  %v4364_v58 = vld [vmem:[%s5930_s1 + $0x8e4] ss:$8 sps:$4 sm:$0xff]  }
 0x107   : > { %1484 = vmatpush1.bf16.msra.mxu1 %v4308_v1  ;;  %v4362_v1 = vld [vmem:[%s5930_s1 + $0x8e0] ss:$8 sps:$4 sm:$0xff]  }
 0x108   : > { %2664 = vmatpush1.bf16.msra.mxu0 %v4311_v26  ;;  %1485 = vmatprep.subr.bf16.mxu1 %v4316_v48  ;;  %v2727_v26 = vrot.slane %v5472_v41, 2  ;;  %v4367_v48 = vld [vmem:[%s5930_s1 + $0x8f4] ss:$8 sps:$4 sm:$0xff]   ;;  %v2724_v41 = vrot.slane %v5500_v28, 2 }
 0x109   : > { %2665 = vmatprep.subr.bf16.mxu0 %v4319_v47  ;;  %v2728_v47 = vrot.slane %v5654_v21, 2 }
 0x10a   : > { %v2726_v14 = vsel %vm899_vm1, %v2724_v41, %v2725_v2 }
 0x10b   : > { %1486 = vmatpush1.bf16.msra.mxu1 %v4314_v49  ;;  %v4365_v49 = vld [vmem:[%s5930_s1 + $0x8f0] ss:$8 sps:$4 sm:$0xff]  }
 0x10c   : > { %2666 = vmatpush1.bf16.msra.mxu0 %v4317_v0  ;;  %3751 = vmatprep.subr.bf16.mxu1 %v4322_v61  ;;  %v2729_v0 = vsel %vm899_vm1, %v2727_v26, %v2728_v47 }
 0x10d   : > { %2927 = vmatprep.subr.bf16.mxu0 %v4322_v61  ;;  %v2733_v61 = vpack.c.bf16 %v2729_v0, %v5238_v34  ;;  %v213_v34 = vlaneseq }
 0x10e   : > { %1488 = vmatmul.mubr.bf16.vlgmr.msra.gmra.mrb[0].mxu1 %v1254_v29  ;;  %v2732_v29 = vpack.c.bf16 %v2726_v14, %v5274_v62 }
 0x10f   : > { %2668 = vmatmul.mubr.bf16.vlgmr.msra.gmra.mrb[0].mxu0 %v5191_v6  ;;  %3767 = vmatpush1.bf16.msra.mxu1 %v4320_v32  ;;  %v4326_v6 = vld [vmem:[%s5930_s1 + $0x820] ss:$8 sps:$4 sm:$0xff]   ;;  %v214_v44 = vshrl.u32 %v213_v34, 7 }
 0x110   : > { %2928 = vmatpush1.bf16.msra.mxu0 %v4320_v32  ;;  %3752 = vmatprep.subr.bf16.mxu1 %v4325_v33 }
 0x111   : > { %2929 = vmatprep.subr.bf16.mxu0 %v4325_v33  ;;  %1497 = vmatprep.mubr.bf16.mxu1 %v1257_v40  ;;  %v219_v62 = vsub.s32 1, %v214_v44 }
 0x112   : > { %2677 = vmatprep.mubr.bf16.mxu0 %v5211_v22  ;;  %v2436_v22 = vrot.slane %v5654_v21, 1 }
 0x113   : > { %3768 = vmatpush1.bf16.msra.mxu1 %v4323_v59 }
 0x114   : > { %2930 = vmatpush1.bf16.msra.mxu0 %v4323_v59  ;;  %3753 = vmatprep.subr.bf16.mxu1 %v4328_v9  ;;  %v2437_v13 = vsel %vm544_vm0, %v2435_v15, %v2436_v22 }
 0x115   : > { %2931 = vmatprep.subr.bf16.mxu0 %v4328_v9 }
 0x116   : > { %1498 = vmatmul.mubr.bf16.gmra.mrb[4].mxu1 %v1256_v30  ;;  %v4332_v30 = vld [vmem:[%s5930_s1 + $0x840] ss:$8 sps:$4 sm:$0xff]  }
 0x117   : > { %2678 = vmatmul.mubr.bf16.gmra.mrb[4].mxu0 %v5233_v56  ;;  %3769 = vmatpush1.bf16.msra.mxu1 %v4326_v6  ;;  %v2433_v56 = vrot.slane %v5672_v12, 1 }
 0x118   : > { %2932 = vmatpush1.bf16.msra.mxu0 %v4326_v6  ;;  %3754 = vmatprep.subr.bf16.mxu1 %v4331_v57 }
 0x119   : > { %2933 = vmatprep.subr.bf16.mxu0 %v4331_v57  ;;  %1507 = vmatprep.mubr.bf16.mxu1 %v1259_v37  ;;  %v1261_v37 = vpack.c.bf16 %v5487_v7, %v4380_v50  ;;  %v2434_v11 = vsel %vm544_vm0, %v2432_v17, %v2433_v56  ;;  %v4338_v7 = vld [vmem:[%s5930_s1 + $0x860] ss:$8 sps:$4 sm:$0xff]  }
 0x11a   : > { %2687 = vmatprep.mubr.bf16.mxu0 %v5260_v4  ;;  %v2441_v4 = vpack.c.bf16 %v2437_v13, %v4967_v42  ;;  %v4340_v42 = vld [vmem:[%s5930_s1 + $0x864] ss:$8 sps:$4 sm:$0xff]  }
 0x11b   : > { %3770 = vmatpush1.bf16.msra.mxu1 %v4329_v3 }
 0x11c   : > { %2934 = vmatpush1.bf16.msra.mxu0 %v4329_v3  ;;  %3755 = vmatprep.subr.bf16.mxu1 %v4334_v46 }
 0x11d   : > { %2935 = vmatprep.subr.bf16.mxu0 %v4334_v46 }
 0x11e   : > { %1508 = vmatmul.mubr.bf16.gmra.mrb[8].mxu1 %v1258_v19  ;;  %v1260_v19 = vpack.c.bf16 %v4382_v8, %v4381_v60 }
 0x11f   : > { %2688 = vmatmul.mubr.bf16.gmra.mrb[8].mxu0 %v5285_v54  ;;  %3771 = vmatpush1.bf16.msra.mxu1 %v4332_v30  ;;  %v2440_v54 = vpack.c.bf16 %v2434_v11, %v4992_v55  ;;  %v4341_v55 = vld [vmem:[%s5930_s1 + $0x870] ss:$8 sps:$4 sm:$0xff]  }
 0x120   : > { %2936 = vmatpush1.bf16.msra.mxu0 %v4332_v30  ;;  %3756 = vmatprep.subr.bf16.mxu1 %v4337_v38 }
 0x121   : > { %2937 = vmatprep.subr.bf16.mxu0 %v4337_v38  ;;  %1517 = vmatprep.mubr.bf16.mxu1 %v1261_v37 }
 0x122   : > { %2697 = vmatprep.mubr.bf16.mxu0 %v2441_v4 }
 0x123   : > { %3772 = vmatpush1.bf16.msra.mxu1 %v4335_v52 }
 0x124   : > { %2938 = vmatpush1.bf16.msra.mxu0 %v4335_v52  ;;  %3757 = vmatprep.subr.bf16.mxu1 %v4340_v42 }
 0x125   : > { %2939 = vmatprep.subr.bf16.mxu0 %v4340_v42 }
 0x126   : > { %1518 = vmatmul.mubr.bf16.gmra.mrb[12].mxu1 %v1260_v19 }
 0x127   : > { %2698 = vmatmul.mubr.bf16.gmra.mrb[12].mxu0 %v2440_v54  ;;  %3773 = vmatpush1.bf16.msra.mxu1 %v4338_v7 }
 0x128   : > { %2940 = vmatpush1.bf16.msra.mxu0 %v4338_v7  ;;  %3758 = vmatprep.subr.bf16.mxu1 %v4343_v36 }
 0x129   : > { %2941 = vmatprep.subr.bf16.mxu0 %v4343_v36  ;;  %2959 = vmatprep.mubr.bf16.mxu0 %v5023_v23  ;;  %v4347_v23 = vld [vmem:[%s5930_s1 + $0x890] ss:$8 sps:$4 sm:$0xff]  }
 0x12a   : > { %2979 = vmatprep.mubr.bf16.mxu1 %v5129_v24  ;;  %v4352_v24 = vld [vmem:[%s5930_s1 + $0x8a4] ss:$8 sps:$4 sm:$0xff]  }
 0x12b   : > { %3774 = vmatpush1.bf16.msra.mxu1 %v4341_v55 }
 0x12c   : > { %2942 = vmatpush1.bf16.msra.mxu0 %v4341_v55  ;;  %3759 = vmatprep.subr.bf16.mxu1 %v4346_v35 }
 0x12d   : > { %2943 = vmatprep.subr.bf16.mxu0 %v4346_v35 }
 0x12f   : > { %3775 = vmatpush1.bf16.msra.mxu1 %v4344_v43 }
 0x130   : > { %2944 = vmatpush1.bf16.msra.mxu0 %v4344_v43  ;;  %3760 = vmatprep.subr.bf16.mxu1 %v4349_v16 }
 0x131   : > { %2945 = vmatprep.subr.bf16.mxu0 %v4349_v16 }
 0x133   : > { %3776 = vmatpush1.bf16.msra.mxu1 %v4347_v23 }
 0x134   : > { %2946 = vmatpush1.bf16.msra.mxu0 %v4347_v23  ;;  %3761 = vmatprep.subr.bf16.mxu1 %v4352_v24 }
 0x135   : > { %2947 = vmatprep.subr.bf16.mxu0 %v4352_v24 }
 0x137   : > { %3777 = vmatpush1.bf16.msra.mxu1 %v4350_v5 }
 0x138   : > { %2948 = vmatpush1.bf16.msra.mxu0 %v4350_v5  ;;  %3762 = vmatprep.subr.bf16.mxu1 %v4355_v51 }
 0x139   : > { %2949 = vmatprep.subr.bf16.mxu0 %v4355_v51 }
 0x13b   : > { %3778 = vmatpush1.bf16.msra.mxu1 %v4353_v31 }
 0x13c   : > { %2950 = vmatpush1.bf16.msra.mxu0 %v4353_v31  ;;  %3763 = vmatprep.subr.bf16.mxu1 %v4358_v45 }
 0x13d   : > { %2951 = vmatprep.subr.bf16.mxu0 %v4358_v45 }
 0x13f   : > { %3779 = vmatpush1.bf16.msra.mxu1 %v4356_v18 }
 0x140   : > { %2952 = vmatpush1.bf16.msra.mxu0 %v4356_v18  ;;  %3764 = vmatprep.subr.bf16.mxu1 %v4361_v25 }
 0x141   : > { %2953 = vmatprep.subr.bf16.mxu0 %v4361_v25 }
 0x143   : > { %3780 = vmatpush1.bf16.msra.mxu1 %v4359_v53 }
 0x144   : > { %2954 = vmatpush1.bf16.msra.mxu0 %v4359_v53  ;;  %3765 = vmatprep.subr.bf16.mxu1 %v4364_v58 }
 0x145   : > { %2955 = vmatprep.subr.bf16.mxu0 %v4364_v58 }
 0x147   : > { %3781 = vmatpush1.bf16.msra.mxu1 %v4362_v1 }
 0x148   : > { %2956 = vmatpush1.bf16.msra.mxu0 %v4362_v1  ;;  %3766 = vmatprep.subr.bf16.mxu1 %v4367_v48 }
 0x149   : > { %2957 = vmatprep.subr.bf16.mxu0 %v4367_v48 }
 0x14b   : > { %3782 = vmatpush1.bf16.msra.mxu1 %v4365_v49 }
 0x14c   : > { %2958 = vmatpush1.bf16.msra.mxu0 %v4365_v49 }
 0x14e   : > { %2980 = vmatmul.mubr.bf16.vlgmr.msra.gmra.mrb[16].mxu1 %v5133_v39 }
 0x14f   : > { %2960 = vmatmul.mubr.bf16.vlgmr.msra.gmra.mrb[0].mxu0 %v5033_v27  ;;  %2989 = vmatprep.mubr.bf16.mxu1 %v2733_v61 }
 0x150   : > { %2969 = vmatprep.mubr.bf16.mxu0 %v5075_v20  ;;  %v215_v20 = vsub.s32 0, %v214_v44 }
 0x156   : > { %2990 = vmatmul.mubr.bf16.gmra.mrb[20].mxu1 %v2732_v29 }
 0x157   : > { %2970 = vmatmul.mubr.bf16.gmra.mrb[4].mxu0 %v5079_v10  ;;  %v211_v10 = vld [vmem:[%s5931_s2] sm:$0x3] }
 0x158   : > { %v216_v9 = vrot.slane %v211_v10, %v215_v20  ;;  %v5786_v6 = vrot.slane %v211_v10, %v219_v62 }
 0x1e1   : > { %v1489_v28 = vpop.f32.mrb[0].mxu1 }
 0x1e2   : > { %v1491_v32 = vpop.f32.mrb[1].mxu1  ;;  %v3783_v31 = vadd.f32 %v1489_v28, %v216_v9 }
 0x1e3   : > { %v1493_v33 = vpop.f32.mrb[2].mxu1  ;;  %v3785_v45 = vadd.f32 %v1491_v32, %v5786_v6 }
 0x1e4   : > { %v1495_v63 = vpop.f32.mrb[3].mxu1  ;;  %v3787_v53 = vadd.f32 %v1493_v33, %v216_v9 }
 0x1e5   : > { %v3789_v47 = vadd.f32 %v1495_v63, %v5786_v6 }
 0x1e9   : > { %v5775_v40 = vpop.f32.mrb[4].mxu1 }
 0x1ea   : > { %v5777_v27 = vpop.f32.mrb[5].mxu1  ;;  %v3791_v63 = vadd.f32 %v5775_v40, %v216_v9 }
 0x1eb   : > { %v5779_v39 = vpop.f32.mrb[6].mxu1  ;;  %v3793_v20 = vadd.f32 %v5777_v27, %v5786_v6 }
 0x1ec   : > { %v5781_v59 = vpop.f32.mrb[7].mxu1 }
 0x1f1   : > { %v1509_v21 = vpop.f32.mrb[8].mxu1 }
 0x1f2   : > { %v2689_v57 = vpop.f32.mrb[8].mxu0  ;;  %v3799_v15 = vadd.f32 %v1509_v21, %v216_v9  ;;  %v1511_v22 = vpop.f32.mrb[9].mxu1  ;;  %v3795_v21 = vadd.f32 %v5779_v39, %v216_v9 }
 0x1f3   : > { %v2691_v3 = vpop.f32.mrb[9].mxu0  ;;  %v3802_v46 = vadd.f32 %v1511_v22, %v5786_v6  ;;  %v1513_v12 = vpop.f32.mrb[10].mxu1 }
 0x1f4   : > { %v2693_v13 = vpop.f32.mrb[10].mxu0  ;;  %v3800_v17 = vadd.f32 %v3799_v15, %v2689_v57  ;;  %v3805_v30 = vadd.f32 %v1513_v12, %v216_v9  ;;  %v1515_v56 = vpop.f32.mrb[11].mxu1 }
 0x1f5   : > { %v2695_v38 = vpop.f32.mrb[11].mxu0  ;;  %v3803_v50 = vadd.f32 %v3802_v46, %v2691_v3  ;;  %v3808_v37 = vadd.f32 %v1515_v56, %v5786_v6  ;;  %v3797_v46 = vadd.f32 %v5781_v59, %v5786_v6 }
 0x1f6   : > { %v3806_v4 = vadd.f32 %v3805_v30, %v2693_v13 }
 0x1f7   : > { %v3809_v52 = vadd.f32 %v3808_v37, %v2695_v38 }
 0x1f9   : > { %v1519_v11 = vpop.f32.mrb[12].mxu1 }
 0x1fa   : > { %v2699_v42 = vpop.f32.mrb[12].mxu0  ;;  %v3811_v60 = vadd.f32 %v1519_v11, %v216_v9  ;;  %v1521_v8 = vpop.f32.mrb[13].mxu1 }
 0x1fb   : > { %v2701_v19 = vpop.f32.mrb[13].mxu0  ;;  %v3814_v54 = vadd.f32 %v1521_v8, %v5786_v6  ;;  %v1523_v7 = vpop.f32.mrb[14].mxu1 }
 0x1fc   : > { %v2703_v36 = vpop.f32.mrb[14].mxu0  ;;  %v3812_v55 = vadd.f32 %v3811_v60, %v2699_v42  ;;  %v3817_v35 = vadd.f32 %v1523_v7, %v216_v9  ;;  %v1525_v43 = vpop.f32.mrb[15].mxu1 }
 0x1fd   : > { %v2705_v16 = vpop.f32.mrb[15].mxu0  ;;  %v3815_v23 = vadd.f32 %v3814_v54, %v2701_v19  ;;  %v3820_v24 = vadd.f32 %v1525_v43, %v5786_v6 }
 0x1fe   : > { %v3818_v5 = vadd.f32 %v3817_v35, %v2703_v36 }
 0x1ff   : > { %v3821_v51 = vadd.f32 %v3820_v24, %v2705_v16 }
 0x221   : > { %v2981_v25 = vpop.f32.mrb[16].mxu1 }
 0x222   : > { %v2961_v18 = vpop.f32.mrb[0].mxu0  ;;  %v5795_v1 = vadd.f32 %v3800_v17, %v2981_v25  ;;  %v2983_v48 = vpop.f32.mrb[17].mxu1 }
 0x223   : > { %v5793_v58 = vadd.f32 %v3783_v31, %v2961_v18  ;;  %v2963_v26 = vpop.f32.mrb[1].mxu0  ;;  %v5800_v0 = vadd.f32 %v3803_v50, %v2983_v48  ;;  %v2985_v61 = vpop.f32.mrb[18].mxu1 }
 0x224   : > { %v5798_v49 = vadd.f32 %v3785_v45, %v2963_v26  ;;  %v2965_v41 = vpop.f32.mrb[2].mxu0  ;;  %v3807_v14 = vadd.f32 %v3806_v4, %v2985_v61  ;;  %v2987_v28 = vpop.f32.mrb[19].mxu1 }
 0x225   : > { %v3788_v2 = vadd.f32 %v3787_v53, %v2965_v41  ;;  %v2967_v29 = vpop.f32.mrb[3].mxu0  ;;  %v5804_v33 = vadd.f32 %v3809_v52, %v2987_v28 }
 0x226   : > { %v5802_v32 = vadd.f32 %v3789_v47, %v2967_v29 }
 0x227   : > { %v3016_v34 = vadd.f32 %v3788_v2, %v5793_v58 }
 0x228   : > { %v3029_v44 = vadd.f32 %v5802_v32, %v5798_v49 }
 0x229   : > { %v2991_v62 = vpop.f32.mrb[20].mxu1 }
 0x22a   : > { %v2971_v10 = vpop.f32.mrb[4].mxu0  ;;  %v3813_v15 = vadd.f32 %v3812_v55, %v2991_v62  ;;  %v2993_v3 = vpop.f32.mrb[21].mxu1 }
 0x22b   : > { %v3792_v57 = vadd.f32 %v3791_v63, %v2971_v10  ;;  %v2973_v22 = vpop.f32.mrb[5].mxu0  ;;  %v3816_v13 = vadd.f32 %v3815_v23, %v2993_v3  ;;  %v2995_v30 = vpop.f32.mrb[22].mxu1 }
 0x22c   : > { %v3794_v12 = vadd.f32 %v3793_v20, %v2973_v22  ;;  %v2975_v17 = vpop.f32.mrb[6].mxu0  ;;  %v3819_v38 = vadd.f32 %v3818_v5, %v2995_v30  ;;  %v2997_v27 = vpop.f32.mrb[23].mxu1 }
 0x22d   : > { %v3017_v56 = vadd.f32 %v3792_v57, %v3016_v34  ;;  %v3796_v40 = vadd.f32 %v3795_v21, %v2975_v17  ;;  %v2977_v50 = vpop.f32.mrb[7].mxu0  ;;  %v3822_v52 = vadd.f32 %v3821_v51, %v2997_v27 }
 0x22e   : > { %v3030_v37 = vadd.f32 %v3794_v12, %v3029_v44  ;;  %v3798_v4 = vadd.f32 %v3797_v46, %v2977_v50 }
 0x22f   : > { %v3018_v39 = vadd.f32 %v3796_v40, %v3017_v56 }
 0x230   : > { %v3031_v9 = vadd.f32 %v3798_v4, %v3030_v37 }
 0x231   : > { %v3019_v11 = vadd.f32 %v5795_v1, %v3018_v39 }
 0x232   : > { %v3032_v42 = vadd.f32 %v5800_v0, %v3031_v9 }
 0x233   : > { %v3020_v60 = vadd.f32 %v3807_v14, %v3019_v11 }
 0x234   : > { %v3033_v59 = vadd.f32 %v5804_v33, %v3032_v42 }
 0x235   : > { %v3021_v6 = vadd.f32 %v3813_v15, %v3020_v60 }
 0x236   : > { %v3034_v8 = vadd.f32 %v3816_v13, %v3033_v59 }
 0x237   : > { %v3022_v19 = vadd.f32 %v3819_v38, %v3021_v6 }
 0x238   : > { %v3035_v54 = vadd.f32 %v3822_v52, %v3034_v8 }
 0x239   : > { %v3023_v7 = vrot.slane %v3022_v19, 4 }
 0x23a   : > { %v3036_v36 = vrot.slane %v3035_v54, 4 }
 0x23b   : > { %v3024_v55 = vadd.f32 %v3023_v7, %v3022_v19 }
 0x23c   : > { %v3037_v35 = vadd.f32 %v3036_v36, %v3035_v54 }
 0x23d   : > { %v3025_v43 = vrot.slane %v3024_v55, 2 }
 0x23e   : > { %v3038_v16 = vrot.slane %v3037_v35, 2 }
 0x23f   : > { %v3026_v23 = vadd.f32 %v3025_v43, %v3024_v55 }
 0x240   : > { %v3039_v24 = vadd.f32 %v3038_v16, %v3037_v35 }
 0x241   : > { %v3027_v5 = vrot.slane %v3026_v23, 1 }
 0x242   : > { %v3040_v51 = vrot.slane %v3039_v24, 1 }
 0x243   : > { %v3028_v31 = vadd.f32 %v3027_v5, %v3026_v23 }
 0x244   : > { %v3041_v45 = vadd.f32 %v3040_v51, %v3039_v24 }
 0x245   : > { %v3043_v18 = vmul.f32 0.015625, %v3028_v31 }
 0x246   : > { %v3044_v25 = vmul.f32 0.015625, %v3041_v45 }
 0x247   : > { %v5819_v53 = vsub.f32 %v5793_v58, %v3043_v18  ;;  %v5821_v26 = vsub.f32 %v3788_v2, %v3043_v18  ;;  %v5823_v48 = vsub.f32 %v3792_v57, %v3043_v18  ;;  %v5825_v47 = vsub.f32 %v3796_v40, %v3043_v18 }
 0x248   : > { %v5828_v41 = vsub.f32 %v5795_v1, %v3043_v18  ;;  %v5830_v61 = vsub.f32 %v3807_v14, %v3043_v18  ;;  %v5832_v29 = vsub.f32 %v3813_v15, %v3043_v18  ;;  %v5834_v28 = vsub.f32 %v3819_v38, %v3043_v18 }
 0x249   : > { %v3061_v34 = vmul.f32 %v5819_v53, %v5819_v53  ;;  %v3063_v58 = vmul.f32 %v5821_v26, %v5821_v26  ;;  %v3065_v2 = vmul.f32 %v5823_v48, %v5823_v48  ;;  %v3067_v44 = vmul.f32 %v5825_v47, %v5825_v47 }
 0x24a   : > { %v5845_v14 = vsub.f32 %v5798_v49, %v3044_v25  ;;  %v5848_v63 = vsub.f32 %v5802_v32, %v3044_v25  ;;  %v5850_v20 = vsub.f32 %v3794_v12, %v3044_v25  ;;  %v5852_v10 = vsub.f32 %v3798_v4, %v3044_v25 }
 0x24b   : > { %v3077_v1 = vadd.f32 %v3063_v58, %v3061_v34  ;;  %v5855_v62 = vsub.f32 %v5800_v0, %v3044_v25  ;;  %v5858_v21 = vsub.f32 %v5804_v33, %v3044_v25  ;;  %v5860_v57 = vsub.f32 %v3816_v13, %v3044_v25 }
 0x24c   : > { %v5862_v22 = vsub.f32 %v3822_v52, %v3044_v25  ;;  %v3062_v49 = vmul.f32 %v5845_v14, %v5845_v14  ;;  %v3064_v32 = vmul.f32 %v5848_v63, %v5848_v63  ;;  %v3069_v3 = vmul.f32 %v5828_v41, %v5828_v41 }
 0x24d   : > { %v3078_v15 = vadd.f32 %v3077_v1, %v3065_v2  ;;  %v3066_v0 = vmul.f32 %v5850_v20, %v5850_v20  ;;  %v3071_v12 = vmul.f32 %v5830_v61, %v5830_v61  ;;  %v3068_v17 = vmul.f32 %v5852_v10, %v5852_v10 }
 0x24e   : > { %v3090_v33 = vadd.f32 %v3064_v32, %v3062_v49  ;;  %v3073_v56 = vmul.f32 %v5832_v29, %v5832_v29  ;;  %v3070_v38 = vmul.f32 %v5855_v62, %v5855_v62  ;;  %v3075_v27 = vmul.f32 %v5834_v28, %v5834_v28 }
 0x24f   : > { %v3079_v46 = vadd.f32 %v3078_v15, %v3067_v44  ;;  %v3072_v4 = vmul.f32 %v5858_v21, %v5858_v21  ;;  %v3074_v9 = vmul.f32 %v5860_v57, %v5860_v57  ;;  %v3076_v60 = vmul.f32 %v5862_v22, %v5862_v22 }
 0x250   : > { %v3091_v30 = vadd.f32 %v3090_v33, %v3066_v0 }
 0x251   : > { %v3080_v13 = vadd.f32 %v3079_v46, %v3069_v3 }
 0x252   : > { %v3092_v50 = vadd.f32 %v3091_v30, %v3068_v17 }
 0x253   : > { %v3081_v40 = vadd.f32 %v3080_v13, %v3071_v12 }
 0x254   : > { %v3093_v52 = vadd.f32 %v3092_v50, %v3070_v38 }
 0x255   : > { %v3082_v37 = vadd.f32 %v3081_v40, %v3073_v56 }
 0x256   : > { %v3094_v11 = vadd.f32 %v3093_v52, %v3072_v4 }
 0x257   : > { %v3083_v39 = vadd.f32 %v3082_v37, %v3075_v27 }
 0x258   : > { %v3095_v59 = vadd.f32 %v3094_v11, %v3074_v9 }
 0x259   : > { %v3084_v42 = vrot.slane %v3083_v39, 4 }
 0x25a   : > { %v3096_v8 = vadd.f32 %v3095_v59, %v3076_v60 }
 0x25b   : > { %v3085_v6 = vadd.f32 %v3084_v42, %v3083_v39 }
 0x25c   : > { %v3097_v54 = vrot.slane %v3096_v8, 4 }
 0x25d   : > { %v3086_v19 = vrot.slane %v3085_v6, 2 }
 0x25e   : > { %v3098_v36 = vadd.f32 %v3097_v54, %v3096_v8 }
 0x25f   : > { %v3087_v7 = vadd.f32 %v3086_v19, %v3085_v6 }
 0x260   : > { %v3099_v35 = vrot.slane %v3098_v36, 2 }
 0x261   : > { %v3088_v55 = vrot.slane %v3087_v7, 1 }
 0x262   : > { %v3100_v16 = vadd.f32 %v3099_v35, %v3098_v36 }
 0x263   : > { %v3089_v43 = vadd.f32 %v3088_v55, %v3087_v7 }
 0x264   : > { %v3101_v24 = vrot.slane %v3100_v16, 1 }
 0x265   : > { %v3103_v23 = vmul.f32 0.015625, %v3089_v43 }
 0x266   : > { %v3102_v51 = vadd.f32 %v3101_v24, %v3100_v16 }
 0x267   : > { %v3105_v5 = vadd.f32 1e-05, %v3103_v23 }
 0x268   : > { %v3104_v31 = vmul.f32 0.015625, %v3102_v51 }
 0x269   : > { %4368 = vrsqrt.f32 %v3105_v5 }
 0x26a   : > { %v3106_v45 = vadd.f32 1e-05, %v3104_v31 }
 0x26c   : > { %4370 = vrsqrt.f32 %v3106_v45 }
 0x273   : > { %v4369_v18 = vpop.eup %4368 }
 0x274   : > { %v3109_v25 = vmul.f32 %v4369_v18, %v5819_v53  ;;  %v3111_v34 = vmul.f32 %v4369_v18, %v5821_v26  ;;  %v3113_v58 = vmul.f32 %v4369_v18, %v5823_v48  ;;  %v3115_v2 = vmul.f32 %v4369_v18, %v5825_v47 }
 0x275   : > { %v3117_v44 = vmul.f32 %v4369_v18, %v5828_v41  ;;  %v3119_v1 = vmul.f32 %v4369_v18, %v5830_v61  ;;  %v3121_v15 = vmul.f32 %v4369_v18, %v5832_v29  ;;  %v3123_v49 = vmul.f32 %v4369_v18, %v5834_v28 }
 0x276   : > { %3125 = vst [vmem:[%s5892_s17] sm:$0xff] %v3109_v25  ;;  %3127 = vst [vmem:[%s5892_s17 + $0x10] sm:$0xff] %v3111_v34  ;;  %v4371_v53 = vpop.eup %4370 }
 0x277   : > { %3129 = vst [vmem:[%s5892_s17 + $0x20] sm:$0xff] %v3113_v58  ;;  %3131 = vst [vmem:[%s5892_s17 + $0x30] sm:$0xff] %v3115_v2  ;;  %v3110_v26 = vmul.f32 %v4371_v53, %v5845_v14  ;;  %v3112_v48 = vmul.f32 %v4371_v53, %v5848_v63  ;;  %v3114_v47 = vmul.f32 %v4371_v53, %v5850_v20 }
 0x278   : > { %3133 = vst [vmem:[%s5892_s17 + $0x40] sm:$0xff] %v3117_v44  ;;  %3135 = vst [vmem:[%s5892_s17 + $0x50] sm:$0xff] %v3119_v1  ;;  %v3116_v41 = vmul.f32 %v4371_v53, %v5852_v10  ;;  %v3118_v61 = vmul.f32 %v4371_v53, %v5855_v62  ;;  %v3120_v29 = vmul.f32 %v4371_v53, %v5858_v21 }
 0x279   : > { %3137 = vst [vmem:[%s5892_s17 + $0x60] sm:$0xff] %v3121_v15  ;;  %3139 = vst [vmem:[%s5892_s17 + $0x70] sm:$0xff] %v3123_v49  ;;  %v3122_v28 = vmul.f32 %v4371_v53, %v5860_v57  ;;  %v3124_v32 = vmul.f32 %v4371_v53, %v5862_v22 }
 0x27a   : > { %3126 = vst [vmem:[%s5892_s17 + $0x8] sm:$0xff] %v3110_v26  ;;  %3128 = vst [vmem:[%s5892_s17 + $0x18] sm:$0xff] %v3112_v48 }
 0x27b   : > { %3130 = vst [vmem:[%s5892_s17 + $0x28] sm:$0xff] %v3114_v47  ;;  %3132 = vst [vmem:[%s5892_s17 + $0x38] sm:$0xff] %v3116_v41 }
 0x27c   : > { %3134 = vst [vmem:[%s5892_s17 + $0x48] sm:$0xff] %v3118_v61  ;;  %3136 = vst [vmem:[%s5892_s17 + $0x58] sm:$0xff] %v3120_v29 }
 0x27d   : > { %3138 = vst [vmem:[%s5892_s17 + $0x68] sm:$0xff] %v3122_v28  ;;  %3140 = vst [vmem:[%s5892_s17 + $0x78] sm:$0xff] %v3124_v32 }
 0x27e PF: > { %s13_s12 = sadd.s32 1, %s4389_s12  }
 0x27f   : > { %p10_p4 = scmp.ge.s32.totalorder %s13_s12, 4  }
 0x281   :  { %12 = sbr.rel (!%p10_p4) target bundleno = 1 (0x1), region = 70 }

// kernel: pat_block_forward.15
= control target key start
LH: loop header
LB: loop body
LE: loop exit
PB: predicated region body
PF: predicated region fallthrough
CT: control target
= control target key end

     0   :  { %s954_s12 = smov 0   ;;  %s1182_s0 = inlined_call_operand.vmem [shape: f32[32,512], index: 0, kind: input, shape index: {}]   ;;  %s1183_s1 = inlined_call_operand.vmem [shape: bf16[512,256], index: 1, kind: input, shape index: {}]   ;;  %s1184_s2 = inlined_call_operand.vmem [shape: f32[1,256], index: 2, kind: input, shape index: {}]   ;;  %s1185_s3 = inlined_call_operand.vmem [shape: f32[32,256], index: 3, kind: output, shape index: {}]  }
   0x1 LB: > { %s735_s13 = sadd.s32 4294967295, %s932_s12   ;;  %p739_p0 = scmp.ge.s32.totalorder %s932_s12, 1  ;;  %s932_s12 = sphi %s954_s12, %s13_s12  }
   0x2   : > { %p139_p1 = scmp.lt.s32.totalorder %s932_s12, 3 }
   0x4   : > { %p140_p2 = pnand %p739_p0, %p139_p1 }
   0x5   : > { %v830_v0 = vld [vmem:[%s1183_s1 + $0x4] ss:$8 sps:$4 sm:$0xff] (!%p140_p2)   ;;  %v834_v2 = vld [vmem:[%s1183_s1] ss:$8 sps:$4 sm:$0xff] (!%p140_p2)   ;;  %v836_v4 = vld [vmem:[%s1183_s1 + $0x14] ss:$8 sps:$4 sm:$0xff] (!%p140_p2)  }
   0x6   : > { %143 = sbr.rel (%p140_p2) target bundleno = 290 (0x122), region = 32  ;;  %v832_v1 = vld [vmem:[%s1183_s1 + $0x104] ss:$8 sps:$4 sm:$0xff] (!%p140_p2)   ;;  %587 = vmatprep.subr.bf16.mxu1 (!%p140_p2), %v830_v0  ;;  %v835_v3 = vld [vmem:[%s1183_s1 + $0x100] ss:$8 sps:$4 sm:$0xff] (!%p140_p2)   ;;  %s740_s24 = sshll.u32 (!%p140_p2), %s735_s13, 1 }
   0x7   : > { %630 = vmatprep.subr.bf16.mxu0 (!%p140_p2), %v832_v1  ;;  %588 = vmatpush1.bf16.msra.mxu1 (!%p140_p2), %v834_v2  ;;  %v838_v5 = vld [vmem:[%s1183_s1 + $0x114] ss:$8 sps:$4 sm:$0xff] (!%p140_p2)   ;;  %v840_v6 = vld [vmem:[%s1183_s1 + $0x10] ss:$8 sps:$4 sm:$0xff] (!%p140_p2)   ;;  %v842_v8 = vld [vmem:[%s1183_s1 + $0x24] ss:$8 sps:$4 sm:$0xff] (!%p140_p2)  }
   0x8   : > { %631 = vmatpush1.bf16.msra.mxu0 (!%p140_p2), %v835_v3  ;;  %589 = vmatprep.subr.bf16.mxu1 (!%p140_p2), %v836_v4  ;;  %v841_v7 = vld [vmem:[%s1183_s1 + $0x110] ss:$8 sps:$4 sm:$0xff] (!%p140_p2)   ;;  %v844_v9 = vld [vmem:[%s1183_s1 + $0x124] ss:$8 sps:$4 sm:$0xff] (!%p140_p2)   ;;  %v846_v10 = vld [vmem:[%s1183_s1 + $0x20] ss:$8 sps:$4 sm:$0xff] (!%p140_p2)  }
   0x9   : > { %632 = vmatprep.subr.bf16.mxu0 (!%p140_p2), %v838_v5  ;;  %v847_v11 = vld [vmem:[%s1183_s1 + $0x120] ss:$8 sps:$4 sm:$0xff] (!%p140_p2)   ;;  %v848_v12 = vld [vmem:[%s1183_s1 + $0x34] ss:$8 sps:$4 sm:$0xff] (!%p140_p2)   ;;  %v852_v14 = vld [vmem:[%s1183_s1 + $0x30] ss:$8 sps:$4 sm:$0xff] (!%p140_p2)  }
   0xa   : > { %v850_v13 = vld [vmem:[%s1183_s1 + $0x134] ss:$8 sps:$4 sm:$0xff] (!%p140_p2)   ;;  %v853_v15 = vld [vmem:[%s1183_s1 + $0x130] ss:$8 sps:$4 sm:$0xff] (!%p140_p2)   ;;  %v854_v16 = vld [vmem:[%s1183_s1 + $0x44] ss:$8 sps:$4 sm:$0xff] (!%p140_p2)  }
   0xb   : > { %590 = vmatpush1.bf16.msra.mxu1 (!%p140_p2), %v840_v6  ;;  %v856_v17 = vld [vmem:[%s1183_s1 + $0x144] ss:$8 sps:$4 sm:$0xff] (!%p140_p2)   ;;  %v858_v18 = vld [vmem:[%s1183_s1 + $0x40] ss:$8 sps:$4 sm:$0xff] (!%p140_p2)   ;;  %v860_v20 = vld [vmem:[%s1183_s1 + $0x54] ss:$8 sps:$4 sm:$0xff] (!%p140_p2)  }
   0xc   : > { %633 = vmatpush1.bf16.msra.mxu0 (!%p140_p2), %v841_v7  ;;  %591 = vmatprep.subr.bf16.mxu1 (!%p140_p2), %v842_v8  ;;  %v859_v19 = vld [vmem:[%s1183_s1 + $0x140] ss:$8 sps:$4 sm:$0xff] (!%p140_p2)   ;;  %v862_v21 = vld [vmem:[%s1183_s1 + $0x154] ss:$8 sps:$4 sm:$0xff] (!%p140_p2)   ;;  %v864_v22 = vld [vmem:[%s1183_s1 + $0x50] ss:$8 sps:$4 sm:$0xff] (!%p140_p2)  }
   0xd   : > { %634 = vmatprep.subr.bf16.mxu0 %v844_v9  ;;  %v865_v23 = vld [vmem:[%s1183_s1 + $0x150] ss:$8 sps:$4 sm:$0xff]   ;;  %v866_v24 = vld [vmem:[%s1183_s1 + $0x64] ss:$8 sps:$4 sm:$0xff]   ;;  %v870_v26 = vld [vmem:[%s1183_s1 + $0x60] ss:$8 sps:$4 sm:$0xff]  }
   0xe   : > { %v868_v25 = vld [vmem:[%s1183_s1 + $0x164] ss:$8 sps:$4 sm:$0xff]   ;;  %v871_v27 = vld [vmem:[%s1183_s1 + $0x160] ss:$8 sps:$4 sm:$0xff]   ;;  %v872_v28 = vld [vmem:[%s1183_s1 + $0x74] ss:$8 sps:$4 sm:$0xff]  }
   0xf   : > { %592 = vmatpush1.bf16.msra.mxu1 %v846_v10  ;;  %v874_v29 = vld [vmem:[%s1183_s1 + $0x174] ss:$8 sps:$4 sm:$0xff]   ;;  %v876_v30 = vld [vmem:[%s1183_s1 + $0x70] ss:$8 sps:$4 sm:$0xff]   ;;  %v878_v32 = vld [vmem:[%s1183_s1 + $0x84] ss:$8 sps:$4 sm:$0xff]  }
  0x10   : > { %635 = vmatpush1.bf16.msra.mxu0 %v847_v11  ;;  %593 = vmatprep.subr.bf16.mxu1 %v848_v12  ;;  %v877_v31 = vld [vmem:[%s1183_s1 + $0x170] ss:$8 sps:$4 sm:$0xff]   ;;  %p166_p3 = scmp.lt.s32.totalorder %s740_s24, 3  ;;  %v880_v33 = vld [vmem:[%s1183_s1 + $0x184] ss:$8 sps:$4 sm:$0xff]   ;;  %v257_v12 = vlaneseq }
  0x11   : > { %636 = vmatprep.subr.bf16.mxu0 %v850_v13  ;;  %v882_v34 = vld [vmem:[%s1183_s1 + $0x80] ss:$8 sps:$4 sm:$0xff]   ;;  %v884_v36 = vld [vmem:[%s1183_s1 + $0x94] ss:$8 sps:$4 sm:$0xff]   ;;  %v888_v38 = vld [vmem:[%s1183_s1 + $0x90] ss:$8 sps:$4 sm:$0xff]  }
  0x12   : > { %v883_v35 = vld [vmem:[%s1183_s1 + $0x180] ss:$8 sps:$4 sm:$0xff]   ;;  %s1187_s24 = smov (!%p166_p3, %s740_s24), 3  ;;  %v886_v37 = vld [vmem:[%s1183_s1 + $0x194] ss:$8 sps:$4 sm:$0xff]   ;;  %v258_v13 = vshrl.u32 %v257_v12, 7 }
  0x13   : > { %594 = vmatpush1.bf16.msra.mxu1 %v852_v14  ;;  %v889_v39 = vld [vmem:[%s1183_s1 + $0x190] ss:$8 sps:$4 sm:$0xff]   ;;  %v890_v40 = vld [vmem:[%s1183_s1 + $0xa4] ss:$8 sps:$4 sm:$0xff]   ;;  %s812_s21 = sshll.u32 %s1187_s24, 5 }
  0x14   : > { %637 = vmatpush1.bf16.msra.mxu0 %v853_v15  ;;  %595 = vmatprep.subr.bf16.mxu1 %v854_v16  ;;  %v892_v41 = vld [vmem:[%s1183_s1 + $0x1a4] ss:$8 sps:$4 sm:$0xff]   ;;  %v894_v42 = vld [vmem:[%s1183_s1 + $0xa0] ss:$8 sps:$4 sm:$0xff]   ;;  %s1102_s4 = scalar_lea.vmem %s1182_s0, %s812_s21  ;;  %v896_v44 = vld [vmem:[%s1183_s1 + $0xb4] ss:$8 sps:$4 sm:$0xff]  }
  0x15   : > { %638 = vmatprep.subr.bf16.mxu0 %v856_v17  ;;  %v895_v43 = vld [vmem:[%s1183_s1 + $0x1a0] ss:$8 sps:$4 sm:$0xff]   ;;  %v898_v45 = vld [vmem:[%s1183_s1 + $0x1b4] ss:$8 sps:$4 sm:$0xff]   ;;  %v900_v50 = vld [vmem:[%s1183_s1 + $0xb0] ss:$8 sps:$4 sm:$0xff]  }
  0x16   : > { %v180_v46 = vld [vmem:[%s1102_s4 + $0x8] sm:$0xff]  ;;  %v182_v48 = vld [vmem:[%s1102_s4 + $0x18] sm:$0xff]  ;;  %v179_v6 = vld [vmem:[%s1102_s4] sm:$0xff]  ;;  %v259_v14 = vsub.s32 0, %v258_v13  ;;  %v263_v16 = vsub.s32 1, %v258_v13 }
  0x17   : > { %596 = vmatpush1.bf16.msra.mxu1 %v858_v18  ;;  %v184_v47 = vld [vmem:[%s1102_s4 + $0x28] sm:$0xff]  ;;  %v186_v49 = vld [vmem:[%s1102_s4 + $0x38] sm:$0xff]  ;;  %v183_v7 = vld [vmem:[%s1102_s4 + $0x20] sm:$0xff] }
  0x18   : > { %639 = vmatpush1.bf16.msra.mxu0 %v859_v19  ;;  %597 = vmatprep.subr.bf16.mxu1 %v860_v20  ;;  %v901_v51 = vld [vmem:[%s1183_s1 + $0x1b0] ss:$8 sps:$4 sm:$0xff]   ;;  %v188_v52 = vpack.c.bf16 %v184_v47, %v180_v46  ;;  %v190_v53 = vpack.c.bf16 %v186_v49, %v182_v48  ;;  %v902_v54 = vld [vmem:[%s1183_s1 + $0xc4] ss:$8 sps:$4 sm:$0xff]   ;;  %v906_v56 = vld [vmem:[%s1183_s1 + $0xc0] ss:$8 sps:$4 sm:$0xff]   ;;  %v187_v10 = vpack.c.bf16 %v183_v7, %v179_v6 }
  0x19   : > { %640 = vmatprep.subr.bf16.mxu0 %v862_v21  ;;  %v904_v55 = vld [vmem:[%s1183_s1 + $0x1c4] ss:$8 sps:$4 sm:$0xff]   ;;  %v907_v57 = vld [vmem:[%s1183_s1 + $0x1c0] ss:$8 sps:$4 sm:$0xff]   ;;  %v908_v58 = vld [vmem:[%s1183_s1 + $0xd4] ss:$8 sps:$4 sm:$0xff]  }
  0x1a   : > { %619 = vmatprep.mubr.bf16.mxu1 %v188_v52  ;;  %662 = vmatprep.mubr.bf16.mxu0 %v190_v53  ;;  %v910_v59 = vld [vmem:[%s1183_s1 + $0x1d4] ss:$8 sps:$4 sm:$0xff]   ;;  %v912_v60 = vld [vmem:[%s1183_s1 + $0xd0] ss:$8 sps:$4 sm:$0xff]   ;;  %v914_v62 = vld [vmem:[%s1183_s1 + $0xe4] ss:$8 sps:$4 sm:$0xff]  }
  0x1b   : > { %598 = vmatpush1.bf16.msra.mxu1 %v864_v22  ;;  %v913_v61 = vld [vmem:[%s1183_s1 + $0x1d0] ss:$8 sps:$4 sm:$0xff]   ;;  %v916_v63 = vld [vmem:[%s1183_s1 + $0x1e4] ss:$8 sps:$4 sm:$0xff]   ;;  %v918_v0 = vld [vmem:[%s1183_s1 + $0xe0] ss:$8 sps:$4 sm:$0xff]  }
  0x1c   : > { %641 = vmatpush1.bf16.msra.mxu0 %v865_v23  ;;  %599 = vmatprep.subr.bf16.mxu1 %v866_v24  ;;  %v919_v1 = vld [vmem:[%s1183_s1 + $0x1e0] ss:$8 sps:$4 sm:$0xff]   ;;  %v920_v2 = vld [vmem:[%s1183_s1 + $0xf4] ss:$8 sps:$4 sm:$0xff]   ;;  %v924_v4 = vld [vmem:[%s1183_s1 + $0xf0] ss:$8 sps:$4 sm:$0xff]  }
  0x1d   : > { %642 = vmatprep.subr.bf16.mxu0 %v868_v25  ;;  %v922_v3 = vld [vmem:[%s1183_s1 + $0x1f4] ss:$8 sps:$4 sm:$0xff]   ;;  %v925_v5 = vld [vmem:[%s1183_s1 + $0x1f0] ss:$8 sps:$4 sm:$0xff]   ;;  %v255_v15 = vld [vmem:[%s1184_s2] sm:$0x3] }
  0x1e   : > { %v181_v8 = vld [vmem:[%s1102_s4 + $0x10] sm:$0xff]  ;;  %v260_v17 = vrot.slane %v255_v15, %v259_v14  ;;  %v264_v18 = vrot.slane %v255_v15, %v263_v16 }
  0x1f   : > { %600 = vmatpush1.bf16.msra.mxu1 %v870_v26  ;;  %v185_v9 = vld [vmem:[%s1102_s4 + $0x30] sm:$0xff]  ;;  %s813_s4 = sshll.u32 %s1187_s24, 4 }
  0x20   : > { %643 = vmatpush1.bf16.msra.mxu0 %v871_v27  ;;  %601 = vmatprep.subr.bf16.mxu1 %v872_v28  ;;  %v189_v11 = vpack.c.bf16 %v185_v9, %v181_v8  ;;  %s177_s27 = scalar_lea.vmem %s1185_s3, %s813_s4 }
  0x21   : > { %644 = vmatprep.subr.bf16.mxu0 %v874_v29 }
  0x23   : > { %602 = vmatpush1.bf16.msra.mxu1 %v876_v30 }
  0x24   : > { %645 = vmatpush1.bf16.msra.mxu0 %v877_v31  ;;  %603 = vmatprep.subr.bf16.mxu1 %v878_v32 }
  0x25   : > { %646 = vmatprep.subr.bf16.mxu0 %v880_v33 }
  0x27   : > { %604 = vmatpush1.bf16.msra.mxu1 %v882_v34 }
  0x28   : > { %647 = vmatpush1.bf16.msra.mxu0 %v883_v35  ;;  %605 = vmatprep.subr.bf16.mxu1 %v884_v36 }
  0x29   : > { %648 = vmatprep.subr.bf16.mxu0 %v886_v37 }
  0x2b   : > { %606 = vmatpush1.bf16.msra.mxu1 %v888_v38 }
  0x2c   : > { %649 = vmatpush1.bf16.msra.mxu0 %v889_v39  ;;  %607 = vmatprep.subr.bf16.mxu1 %v890_v40 }
  0x2d   : > { %650 = vmatprep.subr.bf16.mxu0 %v892_v41 }
  0x2f   : > { %608 = vmatpush1.bf16.msra.mxu1 %v894_v42 }
  0x30   : > { %651 = vmatpush1.bf16.msra.mxu0 %v895_v43  ;;  %609 = vmatprep.subr.bf16.mxu1 %v896_v44 }
  0x31   : > { %652 = vmatprep.subr.bf16.mxu0 %v898_v45 }
  0x33   : > { %610 = vmatpush1.bf16.msra.mxu1 %v900_v50 }
  0x34   : > { %653 = vmatpush1.bf16.msra.mxu0 %v901_v51  ;;  %611 = vmatprep.subr.bf16.mxu1 %v902_v54 }
  0x35   : > { %654 = vmatprep.subr.bf16.mxu0 %v904_v55 }
  0x37   : > { %612 = vmatpush1.bf16.msra.mxu1 %v906_v56 }
  0x38   : > { %655 = vmatpush1.bf16.msra.mxu0 %v907_v57  ;;  %613 = vmatprep.subr.bf16.mxu1 %v908_v58 }
  0x39   : > { %656 = vmatprep.subr.bf16.mxu0 %v910_v59 }
  0x3b   : > { %614 = vmatpush1.bf16.msra.mxu1 %v912_v60 }
  0x3c   : > { %657 = vmatpush1.bf16.msra.mxu0 %v913_v61  ;;  %615 = vmatprep.subr.bf16.mxu1 %v914_v62 }
  0x3d   : > { %658 = vmatprep.subr.bf16.mxu0 %v916_v63 }
  0x3f   : > { %616 = vmatpush1.bf16.msra.mxu1 %v918_v0 }
  0x40   : > { %659 = vmatpush1.bf16.msra.mxu0 %v919_v1  ;;  %617 = vmatprep.subr.bf16.mxu1 %v920_v2 }
  0x41   : > { %660 = vmatprep.subr.bf16.mxu0 %v922_v3 }
  0x43   : > { %618 = vmatpush1.bf16.msra.mxu1 %v924_v4 }
  0x44   : > { %661 = vmatpush1.bf16.msra.mxu0 %v925_v5 }
  0x46   : > { %620 = vmatmul.mubr.bf16.vlgmr.msra.gmra.mrb[0].mxu1 %v187_v10 }
  0x47   : > { %663 = vmatmul.mubr.bf16.vlgmr.msra.gmra.mrb[0].mxu0 %v189_v11 }
 0x119   : > { %v621_v19 = vpop.f32.mrb[0].mxu1 }
 0x11a   : > { %v664_v20 = vpop.f32.mrb[0].mxu0  ;;  %v622_v21 = vadd.f32 %v621_v19, %v260_v17  ;;  %v623_v22 = vpop.f32.mrb[1].mxu1 }
 0x11b   : > { %v666_v23 = vpop.f32.mrb[1].mxu0  ;;  %v624_v24 = vadd.f32 %v623_v22, %v264_v18  ;;  %v625_v25 = vpop.f32.mrb[2].mxu1 }
 0x11c   : > { %v668_v26 = vpop.f32.mrb[2].mxu0  ;;  %v665_v27 = vadd.f32 %v664_v20, %v622_v21  ;;  %v626_v28 = vadd.f32 %v625_v25, %v260_v17  ;;  %v627_v29 = vpop.f32.mrb[3].mxu1 }
 0x11d   : > { %v670_v30 = vpop.f32.mrb[3].mxu0  ;;  %v667_v31 = vadd.f32 %v666_v23, %v624_v24  ;;  %v628_v32 = vadd.f32 %v627_v29, %v264_v18 }
 0x11e   : > { %673 = vst [vmem:[%s177_s27] sm:$0xff] %v665_v27  ;;  %v669_v33 = vadd.f32 %v668_v26, %v626_v28 }
 0x11f   : > { %674 = vst [vmem:[%s177_s27 + $0x8] sm:$0xff] %v667_v31  ;;  %v671_v34 = vadd.f32 %v670_v30, %v628_v32 }
 0x120   : > { %675 = vst [vmem:[%s177_s27 + $0x10] sm:$0xff] %v669_v33 }
 0x121   : > { %676 = vst [vmem:[%s177_s27 + $0x18] sm:$0xff] %v671_v34 }
 0x122 PF: > { %s13_s12 = sadd.s32 1, %s932_s12  }
 0x123   : > { %p10_p4 = scmp.ge.s32.totalorder %s13_s12, 4  }
 0x125   :  { %12 = sbr.rel (!%p10_p4) target bundleno = 1 (0x1), region = 62 }

// kernel: pat_block_forward.17
= control target key start
LH: loop header
LB: loop body
LE: loop exit
PB: predicated region body
PF: predicated region fallthrough
CT: control target
= control target key end

     0   :  { %s2946_s12 = smov 0   ;;  %s4034_s0 = inlined_call_operand.vmem [shape: f32[128,512], index: 0, kind: input, shape index: {}]   ;;  %s4035_s1 = inlined_call_operand.vmem [shape: bf16[512,1024], index: 1, kind: input, shape index: {}]   ;;  %s4036_s2 = inlined_call_operand.vmem [shape: f32[1,1024], index: 2, kind: input, shape index: {}]   ;;  %s4037_s3 = inlined_call_operand.vmem [shape: f32[128,1024], index: 3, kind: output, shape index: {}]  }
   0x1 LB: > { %s2511_s13 = sadd.s32 4294967295, %s2924_s12   ;;  %p2515_p0 = scmp.ge.s32.totalorder %s2924_s12, 1  ;;  %s2924_s12 = sphi %s2946_s12, %s13_s12  }
   0x2   : > { %p139_p1 = scmp.lt.s32.totalorder %s2924_s12, 3 }
   0x4   : > { %p140_p2 = pnand %p2515_p0, %p139_p1 }
   0x5   : > { %v227_v0 = vld [vmem:[%s4035_s1] sm:$0xff] (!%p140_p2)  ;;  %v228_v2 = vld [vmem:[%s4035_s1 + $0x8] sm:$0xff] (!%p140_p2)  ;;  %s2516_s11 = sshll.u32 (!%p140_p2), %s2511_s13, 3 }
   0x6   : > { %143 = sbr.rel (%p140_p2) target bundleno = 507 (0x1fb), region = 32  ;;  %v231_v1 = vld [vmem:[%s4035_s1 + $0x20] sm:$0xff] (!%p140_p2)  ;;  %v232_v4 = vld [vmem:[%s4035_s1 + $0x28] sm:$0xff] (!%p140_p2)  ;;  %p166_p3 = scmp.lt.s32.totalorder (!%p140_p2), %s2516_s11, 15 }
   0x7   : > { %v2523_v3 = vcombine.high (!%p140_p2), %v227_v0, %v231_v1  ;;  %v2522_v5 = vcombine.low (!%p140_p2), %v227_v0, %v231_v1  ;;  %v235_v6 = vld [vmem:[%s4035_s1 + $0x40] sm:$0xff] (!%p140_p2)  ;;  %v2525_v8 = vcombine.high (!%p140_p2), %v228_v2, %v232_v4  ;;  %v2524_v9 = vcombine.low (!%p140_p2), %v228_v2, %v232_v4  ;;  %v236_v11 = vld [vmem:[%s4035_s1 + $0x48] sm:$0xff] (!%p140_p2) }
   0x8   : > { %v239_v7 = vld [vmem:[%s4035_s1 + $0x60] sm:$0xff] (!%p140_p2)  ;;  %v240_v12 = vld [vmem:[%s4035_s1 + $0x68] sm:$0xff] (!%p140_p2) }
   0x9   : > { %v2531_v10 = vcombine.high (!%p140_p2), %v235_v6, %v239_v7  ;;  %v243_v13 = vld [vmem:[%s4035_s1 + $0x80] sm:$0xff] (!%p140_p2)  ;;  %1805 = vmatprep.subr.bf16.mxu0 (!%p140_p2), %v2523_v3  ;;  %v2533_v14 = vcombine.high (!%p140_p2), %v236_v11, %v240_v12  ;;  %v244_v16 = vld [vmem:[%s4035_s1 + $0x88] sm:$0xff] (!%p140_p2)  ;;  %1951 = vmatprep.subr.bf16.mxu1 (!%p140_p2), %v2525_v8  ;;  %v2530_v18 = vcombine.low (!%p140_p2), %v235_v6, %v239_v7 }
   0xa   : > { %v247_v15 = vld [vmem:[%s4035_s1 + $0xa0] sm:$0xff] (!%p140_p2)  ;;  %v248_v17 = vld [vmem:[%s4035_s1 + $0xa8] sm:$0xff] (!%p140_p2)  ;;  %1806 = vmatpush1.bf16.msra.mxu0 (!%p140_p2), %v2522_v5  ;;  %1952 = vmatpush1.bf16.msra.mxu1 (!%p140_p2), %v2524_v9  ;;  %v2532_v19 = vcombine.low (!%p140_p2), %v236_v11, %v240_v12 }
   0xb   : > { %1807 = vmatprep.subr.bf16.mxu0 (!%p140_p2), %v2531_v10  ;;  %v2539_v20 = vcombine.high (!%p140_p2), %v243_v13, %v247_v15  ;;  %1953 = vmatprep.subr.bf16.mxu1 (!%p140_p2), %v2533_v14  ;;  %v2541_v21 = vcombine.high (!%p140_p2), %v244_v16, %v248_v17  ;;  %v251_v22 = vld [vmem:[%s4035_s1 + $0xc0] sm:$0xff] (!%p140_p2)  ;;  %v252_v24 = vld [vmem:[%s4035_s1 + $0xc8] sm:$0xff] (!%p140_p2)  ;;  %v2538_v26 = vcombine.low (!%p140_p2), %v243_v13, %v247_v15 }
   0xc   : > { %v255_v23 = vld [vmem:[%s4035_s1 + $0xe0] sm:$0xff] (!%p140_p2)  ;;  %v256_v25 = vld [vmem:[%s4035_s1 + $0xe8] sm:$0xff] (!%p140_p2)  ;;  %v2540_v27 = vcombine.low (!%p140_p2), %v244_v16, %v248_v17 }
   0xd   : > { %v2547_v28 = vcombine.high %v251_v22, %v255_v23  ;;  %v2549_v29 = vcombine.high %v252_v24, %v256_v25  ;;  %v259_v30 = vld [vmem:[%s4035_s1 + $0x100] sm:$0xff]  ;;  %v260_v32 = vld [vmem:[%s4035_s1 + $0x108] sm:$0xff]  ;;  %s4039_s11 = smov (!%p166_p3, %s2516_s11), 15  ;;  %v2546_v34 = vcombine.low %v251_v22, %v255_v23  ;;  %v2548_v35 = vcombine.low %v252_v24, %v256_v25 }
   0xe   : > { %1808 = vmatpush1.bf16.msra.mxu0 %v2530_v18  ;;  %1954 = vmatpush1.bf16.msra.mxu1 %v2532_v19  ;;  %v263_v31 = vld [vmem:[%s4035_s1 + $0x120] sm:$0xff]  ;;  %v264_v33 = vld [vmem:[%s4035_s1 + $0x128] sm:$0xff]  ;;  %s2780_s10 = sshll.u32 %s4039_s11, 5  ;;  %s2781_s18 = sshll.u32 %s4039_s11, 6 }
   0xf   : > { %1809 = vmatprep.subr.bf16.mxu0 %v2539_v20  ;;  %1955 = vmatprep.subr.bf16.mxu1 %v2541_v21  ;;  %v2555_v36 = vcombine.high %v259_v30, %v263_v31  ;;  %v2557_v37 = vcombine.high %v260_v32, %v264_v33  ;;  %v267_v38 = vld [vmem:[%s4035_s1 + $0x140] sm:$0xff]  ;;  %v268_v40 = vld [vmem:[%s4035_s1 + $0x148] sm:$0xff]  ;;  %v2554_v42 = vcombine.low %v259_v30, %v263_v31  ;;  %s3038_s20 = scalar_lea.vmem %s4034_s0, %s2780_s10  ;;  %s3885_s13 = scalar_lea.vmem %s4037_s3, %s2781_s18 }
  0x10   : > { %v271_v39 = vld [vmem:[%s4035_s1 + $0x160] sm:$0xff]  ;;  %v272_v41 = vld [vmem:[%s4035_s1 + $0x168] sm:$0xff]  ;;  %v2556_v43 = vcombine.low %v260_v32, %v264_v33 }
  0x11   : > { %v2563_v44 = vcombine.high %v267_v38, %v271_v39  ;;  %v2565_v45 = vcombine.high %v268_v40, %v272_v41  ;;  %v275_v46 = vld [vmem:[%s4035_s1 + $0x180] sm:$0xff]  ;;  %v276_v48 = vld [vmem:[%s4035_s1 + $0x188] sm:$0xff]  ;;  %v2562_v50 = vcombine.low %v267_v38, %v271_v39  ;;  %v2564_v51 = vcombine.low %v268_v40, %v272_v41 }
  0x12   : > { %1810 = vmatpush1.bf16.msra.mxu0 %v2538_v26  ;;  %1956 = vmatpush1.bf16.msra.mxu1 %v2540_v27  ;;  %v279_v47 = vld [vmem:[%s4035_s1 + $0x1a0] sm:$0xff]  ;;  %v280_v49 = vld [vmem:[%s4035_s1 + $0x1a8] sm:$0xff] }
  0x13   : > { %1811 = vmatprep.subr.bf16.mxu0 %v2547_v28  ;;  %1957 = vmatprep.subr.bf16.mxu1 %v2549_v29  ;;  %v2571_v52 = vcombine.high %v275_v46, %v279_v47  ;;  %v180_v53 = vld [vmem:[%s3038_s20 + $0x8] sm:$0xff]  ;;  %v2573_v55 = vcombine.high %v276_v48, %v280_v49  ;;  %v283_v56 = vld [vmem:[%s4035_s1 + $0x1c0] sm:$0xff]  ;;  %v2570_v61 = vcombine.low %v275_v46, %v279_v47 }
  0x14   : > { %v184_v54 = vld [vmem:[%s3038_s20 + $0x28] sm:$0xff]  ;;  %v287_v57 = vld [vmem:[%s4035_s1 + $0x1e0] sm:$0xff]  ;;  %v2572_v62 = vcombine.low %v276_v48, %v280_v49 }
  0x15   : > { %v3054_v58 = vpack.c.bf16 %v184_v54, %v180_v53  ;;  %v284_v59 = vld [vmem:[%s4035_s1 + $0x1c8] sm:$0xff]  ;;  %v2579_v63 = vcombine.high %v283_v56, %v287_v57  ;;  %v291_v1 = vld [vmem:[%s4035_s1 + $0x200] sm:$0xff]  ;;  %v2578_v5 = vcombine.low %v283_v56, %v287_v57 }
  0x16   : > { %1812 = vmatpush1.bf16.msra.mxu0 %v2546_v34  ;;  %1958 = vmatpush1.bf16.msra.mxu1 %v2548_v35  ;;  %v288_v60 = vld [vmem:[%s4035_s1 + $0x1e8] sm:$0xff]  ;;  %v295_v2 = vld [vmem:[%s4035_s1 + $0x220] sm:$0xff] }
  0x17   : > { %1813 = vmatprep.subr.bf16.mxu0 %v2555_v36  ;;  %1959 = vmatprep.subr.bf16.mxu1 %v2557_v37  ;;  %v2581_v0 = vcombine.high %v284_v59, %v288_v60  ;;  %v292_v3 = vld [vmem:[%s4035_s1 + $0x208] sm:$0xff]  ;;  %v2580_v6 = vcombine.low %v284_v59, %v288_v60  ;;  %v2587_v7 = vcombine.high %v291_v1, %v295_v2  ;;  %v299_v9 = vld [vmem:[%s4035_s1 + $0x240] sm:$0xff] }
  0x18   : > { %1837 = vmatprep.mubr.bf16.mxu0 %v3054_v58  ;;  %1983 = vmatprep.mubr.bf16.mxu1 %v3054_v58  ;;  %v296_v4 = vld [vmem:[%s4035_s1 + $0x228] sm:$0xff]  ;;  %v303_v10 = vld [vmem:[%s4035_s1 + $0x260] sm:$0xff]  ;;  %v2586_v13 = vcombine.low %v291_v1, %v295_v2 }
  0x19   : > { %v2589_v8 = vcombine.high %v292_v3, %v296_v4  ;;  %v300_v11 = vld [vmem:[%s4035_s1 + $0x248] sm:$0xff]  ;;  %v2588_v14 = vcombine.low %v292_v3, %v296_v4  ;;  %v2595_v15 = vcombine.high %v299_v9, %v303_v10  ;;  %v307_v17 = vld [vmem:[%s4035_s1 + $0x280] sm:$0xff]  ;;  %v2594_v21 = vcombine.low %v299_v9, %v303_v10 }
  0x1a   : > { %1814 = vmatpush1.bf16.msra.mxu0 %v2554_v42  ;;  %1960 = vmatpush1.bf16.msra.mxu1 %v2556_v43  ;;  %v304_v12 = vld [vmem:[%s4035_s1 + $0x268] sm:$0xff]  ;;  %v311_v18 = vld [vmem:[%s4035_s1 + $0x2a0] sm:$0xff] }
  0x1b   : > { %1815 = vmatprep.subr.bf16.mxu0 %v2563_v44  ;;  %1961 = vmatprep.subr.bf16.mxu1 %v2565_v45  ;;  %v2597_v16 = vcombine.high %v300_v11, %v304_v12  ;;  %v308_v19 = vld [vmem:[%s4035_s1 + $0x288] sm:$0xff]  ;;  %v2596_v22 = vcombine.low %v300_v11, %v304_v12  ;;  %v2603_v23 = vcombine.high %v307_v17, %v311_v18  ;;  %v315_v25 = vld [vmem:[%s4035_s1 + $0x2c0] sm:$0xff] }
  0x1c   : > { %v312_v20 = vld [vmem:[%s4035_s1 + $0x2a8] sm:$0xff]  ;;  %v319_v26 = vld [vmem:[%s4035_s1 + $0x2e0] sm:$0xff]  ;;  %v2602_v29 = vcombine.low %v307_v17, %v311_v18 }
  0x1d   : > { %v2605_v24 = vcombine.high %v308_v19, %v312_v20  ;;  %v316_v27 = vld [vmem:[%s4035_s1 + $0x2c8] sm:$0xff]  ;;  %v2604_v30 = vcombine.low %v308_v19, %v312_v20  ;;  %v2611_v31 = vcombine.high %v315_v25, %v319_v26  ;;  %v323_v33 = vld [vmem:[%s4035_s1 + $0x300] sm:$0xff]  ;;  %v2610_v37 = vcombine.low %v315_v25, %v319_v26 }
  0x1e   : > { %1816 = vmatpush1.bf16.msra.mxu0 %v2562_v50  ;;  %1962 = vmatpush1.bf16.msra.mxu1 %v2564_v51  ;;  %v320_v28 = vld [vmem:[%s4035_s1 + $0x2e8] sm:$0xff]  ;;  %v327_v34 = vld [vmem:[%s4035_s1 + $0x320] sm:$0xff] }
  0x1f   : > { %1817 = vmatprep.subr.bf16.mxu0 %v2571_v52  ;;  %1963 = vmatprep.subr.bf16.mxu1 %v2573_v55  ;;  %v2613_v32 = vcombine.high %v316_v27, %v320_v28  ;;  %v324_v35 = vld [vmem:[%s4035_s1 + $0x308] sm:$0xff]  ;;  %v2612_v38 = vcombine.low %v316_v27, %v320_v28  ;;  %v2619_v39 = vcombine.high %v323_v33, %v327_v34  ;;  %v331_v41 = vld [vmem:[%s4035_s1 + $0x340] sm:$0xff] }
  0x20   : > { %v328_v36 = vld [vmem:[%s4035_s1 + $0x328] sm:$0xff]  ;;  %v335_v42 = vld [vmem:[%s4035_s1 + $0x360] sm:$0xff]  ;;  %v2618_v45 = vcombine.low %v323_v33, %v327_v34 }
  0x21   : > { %v2621_v40 = vcombine.high %v324_v35, %v328_v36  ;;  %v332_v43 = vld [vmem:[%s4035_s1 + $0x348] sm:$0xff]  ;;  %v2620_v46 = vcombine.low %v324_v35, %v328_v36  ;;  %v2627_v47 = vcombine.high %v331_v41, %v335_v42  ;;  %v339_v49 = vld [vmem:[%s4035_s1 + $0x380] sm:$0xff]  ;;  %v2626_v53 = vcombine.low %v331_v41, %v335_v42 }
  0x22   : > { %1818 = vmatpush1.bf16.msra.mxu0 %v2570_v61  ;;  %1964 = vmatpush1.bf16.msra.mxu1 %v2572_v62  ;;  %v336_v44 = vld [vmem:[%s4035_s1 + $0x368] sm:$0xff]  ;;  %v343_v50 = vld [vmem:[%s4035_s1 + $0x3a0] sm:$0xff] }
  0x23   : > { %1819 = vmatprep.subr.bf16.mxu0 %v2579_v63  ;;  %1965 = vmatprep.subr.bf16.mxu1 %v2581_v0  ;;  %v2629_v48 = vcombine.high %v332_v43, %v336_v44  ;;  %v340_v51 = vld [vmem:[%s4035_s1 + $0x388] sm:$0xff]  ;;  %v2628_v54 = vcombine.low %v332_v43, %v336_v44  ;;  %v2635_v55 = vcombine.high %v339_v49, %v343_v50  ;;  %v347_v57 = vld [vmem:[%s4035_s1 + $0x3c0] sm:$0xff] }
  0x24   : > { %v344_v52 = vld [vmem:[%s4035_s1 + $0x3a8] sm:$0xff]  ;;  %v351_v59 = vld [vmem:[%s4035_s1 + $0x3e0] sm:$0xff]  ;;  %v2634_v62 = vcombine.low %v339_v49, %v343_v50 }
  0x25   : > { %v2637_v56 = vcombine.high %v340_v51, %v344_v52  ;;  %v348_v60 = vld [vmem:[%s4035_s1 + $0x3c8] sm:$0xff]  ;;  %v2636_v63 = vcombine.low %v340_v51, %v344_v52  ;;  %v2643_v0 = vcombine.high %v347_v57, %v351_v59  ;;  %v355_v2 = vld [vmem:[%s4035_s1 + $0x400] sm:$0xff] }
  0x26   : > { %1820 = vmatpush1.bf16.msra.mxu0 %v2578_v5  ;;  %1966 = vmatpush1.bf16.msra.mxu1 %v2580_v6  ;;  %v352_v61 = vld [vmem:[%s4035_s1 + $0x3e8] sm:$0xff]  ;;  %v359_v3 = vld [vmem:[%s4035_s1 + $0x420] sm:$0xff]  ;;  %v2642_v6 = vcombine.low %v347_v57, %v351_v59 }
  0x27   : > { %1821 = vmatprep.subr.bf16.mxu0 %v2587_v7  ;;  %1967 = vmatprep.subr.bf16.mxu1 %v2589_v8  ;;  %v2645_v1 = vcombine.high %v348_v60, %v352_v61  ;;  %v356_v4 = vld [vmem:[%s4035_s1 + $0x408] sm:$0xff]  ;;  %v179_v7 = vld [vmem:[%s3038_s20] sm:$0xff]  ;;  %v2644_v9 = vcombine.low %v348_v60, %v352_v61  ;;  %v2651_v10 = vcombine.high %v355_v2, %v359_v3 }
  0x28   : > { %v360_v5 = vld [vmem:[%s4035_s1 + $0x428] sm:$0xff]  ;;  %v183_v8 = vld [vmem:[%s3038_s20 + $0x20] sm:$0xff]  ;;  %v2650_v19 = vcombine.low %v355_v2, %v359_v3 }
  0x29   : > { %v2653_v11 = vcombine.high %v356_v4, %v360_v5  ;;  %v363_v12 = vld [vmem:[%s4035_s1 + $0x440] sm:$0xff]  ;;  %v188_v17 = vld [vmem:[%s3038_s20 + $0x48] sm:$0xff]  ;;  %v2652_v20 = vcombine.low %v356_v4, %v360_v5 }
  0x2a   : > { %1822 = vmatpush1.bf16.msra.mxu0 %v2586_v13  ;;  %1968 = vmatpush1.bf16.msra.mxu1 %v2588_v14  ;;  %v367_v13 = vld [vmem:[%s4035_s1 + $0x460] sm:$0xff]  ;;  %v364_v14 = vld [vmem:[%s4035_s1 + $0x448] sm:$0xff] }
  0x2b   : > { %1823 = vmatprep.subr.bf16.mxu0 %v2595_v15  ;;  %1969 = vmatprep.subr.bf16.mxu1 %v2597_v16  ;;  %v3183_v15 = vpack.c.bf16 %v183_v8, %v179_v7  ;;  %v368_v16 = vld [vmem:[%s4035_s1 + $0x468] sm:$0xff]  ;;  %v2658_v28 = vcombine.low %v363_v12, %v367_v13  ;;  %v379_v34 = vld [vmem:[%s4035_s1 + $0x4c0] sm:$0xff] }
  0x2c   : > { %v192_v18 = vld [vmem:[%s3038_s20 + $0x68] sm:$0xff]  ;;  %v383_v35 = vld [vmem:[%s4035_s1 + $0x4e0] sm:$0xff] }
  0x2d   : > { %v3196_v25 = vpack.c.bf16 %v192_v18, %v188_v17  ;;  %v372_v26 = vld [vmem:[%s4035_s1 + $0x488] sm:$0xff]  ;;  %v2675_v43 = vcombine.high %v379_v34, %v383_v35  ;;  %v2674_v50 = vcombine.low %v379_v34, %v383_v35  ;;  %v195_v51 = vld [vmem:[%s3038_s20 + $0x80] sm:$0xff] }
  0x2e   : > { %1824 = vmatpush1.bf16.msra.mxu0 %v2594_v21  ;;  %1970 = vmatpush1.bf16.msra.mxu1 %v2596_v22  ;;  %v2659_v21 = vcombine.high %v363_v12, %v367_v13  ;;  %v2661_v22 = vcombine.high %v364_v14, %v368_v16  ;;  %v376_v27 = vld [vmem:[%s4035_s1 + $0x4a8] sm:$0xff]  ;;  %v199_v52 = vld [vmem:[%s3038_s20 + $0xa0] sm:$0xff] }
  0x2f   : > { %1825 = vmatprep.subr.bf16.mxu0 %v2603_v23  ;;  %1971 = vmatprep.subr.bf16.mxu1 %v2605_v24  ;;  %v371_v23 = vld [vmem:[%s4035_s1 + $0x480] sm:$0xff]  ;;  %v2669_v33 = vcombine.high %v372_v26, %v376_v27  ;;  %v380_v36 = vld [vmem:[%s4035_s1 + $0x4c8] sm:$0xff]  ;;  %v2668_v42 = vcombine.low %v372_v26, %v376_v27  ;;  %v3258_v61 = vpack.c.bf16 %v199_v52, %v195_v51 }
  0x30   : > { %v375_v24 = vld [vmem:[%s4035_s1 + $0x4a0] sm:$0xff]  ;;  %v392_v49 = vld [vmem:[%s4035_s1 + $0x528] sm:$0xff] }
  0x31   : > { %v2666_v41 = vcombine.low %v371_v23, %v375_v24  ;;  %v399_v57 = vld [vmem:[%s4035_s1 + $0x560] sm:$0xff]  ;;  %v396_v59 = vld [vmem:[%s4035_s1 + $0x548] sm:$0xff] }
  0x32   : > { %1826 = vmatpush1.bf16.msra.mxu0 %v2602_v29  ;;  %1972 = vmatpush1.bf16.msra.mxu1 %v2604_v30  ;;  %v187_v29 = vld [vmem:[%s3038_s20 + $0x40] sm:$0xff]  ;;  %v400_v60 = vld [vmem:[%s4035_s1 + $0x568] sm:$0xff] }
  0x33   : > { %1827 = vmatprep.subr.bf16.mxu0 %v2611_v31  ;;  %1973 = vmatprep.subr.bf16.mxu1 %v2613_v32  ;;  %v191_v30 = vld [vmem:[%s3038_s20 + $0x60] sm:$0xff]  ;;  %v2660_v31 = vcombine.low %v364_v14, %v368_v16  ;;  %v2667_v32 = vcombine.high %v371_v23, %v375_v24  ;;  %v2693_v3 = vcombine.high %v396_v59, %v400_v60  ;;  %v404_v7 = vld [vmem:[%s4035_s1 + $0x588] sm:$0xff] }
  0x34   : > { %v403_v4 = vld [vmem:[%s4035_s1 + $0x580] sm:$0xff]  ;;  %v408_v8 = vld [vmem:[%s4035_s1 + $0x5a8] sm:$0xff]  ;;  %v2692_v12 = vcombine.low %v396_v59, %v400_v60 }
  0x35   : > { %v407_v5 = vld [vmem:[%s4035_s1 + $0x5a0] sm:$0xff]  ;;  %v2701_v14 = vcombine.high %v404_v7, %v408_v8  ;;  %v412_v18 = vld [vmem:[%s4035_s1 + $0x5c8] sm:$0xff]  ;;  %v2700_v24 = vcombine.low %v404_v7, %v408_v8 }
  0x36   : > { %1828 = vmatpush1.bf16.msra.mxu0 %v2610_v37  ;;  %1974 = vmatpush1.bf16.msra.mxu1 %v2612_v38  ;;  %v384_v37 = vld [vmem:[%s4035_s1 + $0x4e8] sm:$0xff]  ;;  %v3222_v38 = vpack.c.bf16 %v191_v30, %v187_v29  ;;  %v2699_v13 = vcombine.high %v403_v4, %v407_v5  ;;  %v411_v16 = vld [vmem:[%s4035_s1 + $0x5c0] sm:$0xff]  ;;  %v2698_v23 = vcombine.low %v403_v4, %v407_v5 }
  0x37   : > { %1829 = vmatprep.subr.bf16.mxu0 %v2619_v39  ;;  %1975 = vmatprep.subr.bf16.mxu1 %v2621_v40  ;;  %v196_v39 = vld [vmem:[%s3038_s20 + $0x88] sm:$0xff]  ;;  %v2677_v44 = vcombine.high %v380_v36, %v384_v37  ;;  %v415_v17 = vld [vmem:[%s4035_s1 + $0x5e0] sm:$0xff] }
  0x38   : > { %v200_v40 = vld [vmem:[%s3038_s20 + $0xa8] sm:$0xff]  ;;  %v2707_v26 = vcombine.high %v411_v16, %v415_v17  ;;  %v423_v29 = vld [vmem:[%s4035_s1 + $0x620] sm:$0xff] }
  0x39   : > { %v448_v59 = vld [vmem:[%s4035_s1 + $0x6e8] sm:$0xff] }
  0x3a   : > { %1830 = vmatpush1.bf16.msra.mxu0 %v2618_v45  ;;  %1976 = vmatpush1.bf16.msra.mxu1 %v2620_v46  ;;  %v387_v45 = vld [vmem:[%s4035_s1 + $0x500] sm:$0xff]  ;;  %v456_v4 = vld [vmem:[%s4035_s1 + $0x728] sm:$0xff] }
  0x3b   : > { %1831 = vmatprep.subr.bf16.mxu0 %v2627_v47  ;;  %1977 = vmatprep.subr.bf16.mxu1 %v2629_v48  ;;  %v391_v46 = vld [vmem:[%s4035_s1 + $0x520] sm:$0xff]  ;;  %v3232_v47 = vpack.c.bf16 %v200_v40, %v196_v39  ;;  %v388_v48 = vld [vmem:[%s4035_s1 + $0x508] sm:$0xff] }
  0x3c   : > { %v431_v39 = vld [vmem:[%s4035_s1 + $0x660] sm:$0xff]  ;;  %v428_v40 = vld [vmem:[%s4035_s1 + $0x648] sm:$0xff] }
  0x3e   : > { %1832 = vmatpush1.bf16.msra.mxu0 %v2626_v53  ;;  %1978 = vmatpush1.bf16.msra.mxu1 %v2628_v54  ;;  %v2676_v53 = vcombine.low %v380_v36, %v384_v37  ;;  %v2683_v54 = vcombine.high %v387_v45, %v391_v46  ;;  %v427_v37 = vld [vmem:[%s4035_s1 + $0x640] sm:$0xff] }
  0x3f   : > { %1833 = vmatprep.subr.bf16.mxu0 %v2635_v55  ;;  %1979 = vmatprep.subr.bf16.mxu1 %v2637_v56  ;;  %v2685_v55 = vcombine.high %v388_v48, %v392_v49  ;;  %v395_v56 = vld [vmem:[%s4035_s1 + $0x540] sm:$0xff]  ;;  %v2722_v51 = vcombine.low %v427_v37, %v431_v39 }
  0x40   : > { %v2691_v2 = vcombine.high %v395_v56, %v399_v57 }
  0x42   : > { %1834 = vmatpush1.bf16.msra.mxu0 %v2634_v62  ;;  %1980 = vmatpush1.bf16.msra.mxu1 %v2636_v63  ;;  %v204_v62 = vld [vmem:[%s3038_s20 + $0xc8] sm:$0xff] }
  0x43   : > { %1835 = vmatprep.subr.bf16.mxu0 %v2643_v0  ;;  %1981 = vmatprep.subr.bf16.mxu1 %v2645_v1  ;;  %v208_v63 = vld [vmem:[%s3038_s20 + $0xe8] sm:$0xff]  ;;  %v2682_v0 = vcombine.low %v387_v45, %v391_v46  ;;  %v2684_v1 = vcombine.low %v388_v48, %v392_v49  ;;  %v435_v46 = vld [vmem:[%s4035_s1 + $0x680] sm:$0xff] }
  0x44   : > { %v439_v48 = vld [vmem:[%s4035_s1 + $0x6a0] sm:$0xff]  ;;  %v436_v49 = vld [vmem:[%s4035_s1 + $0x688] sm:$0xff] }
  0x45   : > { %v2730_v60 = vcombine.low %v435_v46, %v439_v48 }
  0x46   : > { %1836 = vmatpush1.bf16.msra.mxu0 %v2642_v6  ;;  %1982 = vmatpush1.bf16.msra.mxu1 %v2644_v9  ;;  %v3268_v6 = vpack.c.bf16 %v208_v63, %v204_v62  ;;  %v2690_v9 = vcombine.low %v395_v56, %v399_v57  ;;  %v447_v56 = vld [vmem:[%s4035_s1 + $0x6e0] sm:$0xff]  ;;  %v444_v57 = vld [vmem:[%s4035_s1 + $0x6c8] sm:$0xff] }
  0x47   : > { %1878 = vmatprep.subr.bf16.mxu0 %v2651_v10  ;;  %2024 = vmatprep.subr.bf16.mxu1 %v2653_v11  ;;  %v203_v10 = vld [vmem:[%s3038_s20 + $0xc0] sm:$0xff]  ;;  %v2740_v7 = vcombine.low %v444_v57, %v448_v59 }
  0x48   : > { %v207_v11 = vld [vmem:[%s3038_s20 + $0xe0] sm:$0xff] }
  0x49   : > { %1838 = vmatmul.mubr.bf16.vlgmr.msra.gmra.mrb[0].mxu0 %v3183_v15  ;;  %1984 = vmatmul.mubr.bf16.vlgmr.msra.gmra.mrb[0].mxu1 %v3183_v15 }
  0x4a   : > { %1879 = vmatpush1.bf16.msra.mxu0 %v2650_v19  ;;  %2025 = vmatpush1.bf16.msra.mxu1 %v2652_v20  ;;  %v416_v19 = vld [vmem:[%s4035_s1 + $0x5e8] sm:$0xff]  ;;  %v3294_v20 = vpack.c.bf16 %v207_v11, %v203_v10  ;;  %v459_v10 = vld [vmem:[%s4035_s1 + $0x740] sm:$0xff] }
  0x4b   : > { %1880 = vmatprep.subr.bf16.mxu0 %v2659_v21  ;;  %2026 = vmatprep.subr.bf16.mxu1 %v2661_v22  ;;  %v182_v21 = vld [vmem:[%s3038_s20 + $0x18] sm:$0xff]  ;;  %v2709_v27 = vcombine.high %v412_v18, %v416_v19  ;;  %v2708_v34 = vcombine.low %v412_v18, %v416_v19  ;;  %v463_v11 = vld [vmem:[%s4035_s1 + $0x760] sm:$0xff] }
  0x4c   : > { %1847 = vmatprep.mubr.bf16.mxu0 %v3196_v25  ;;  %1993 = vmatprep.mubr.bf16.mxu1 %v3196_v25  ;;  %v186_v22 = vld [vmem:[%s3038_s20 + $0x38] sm:$0xff]  ;;  %v467_v19 = vld [vmem:[%s4035_s1 + $0x780] sm:$0xff] }
  0x4d   : > { %v3304_v30 = vpack.c.bf16 %v186_v22, %v182_v21  ;;  %v471_v21 = vld [vmem:[%s4035_s1 + $0x7a0] sm:$0xff]  ;;  %v468_v22 = vld [vmem:[%s4035_s1 + $0x788] sm:$0xff] }
  0x4e   : > { %1881 = vmatpush1.bf16.msra.mxu0 %v2658_v28  ;;  %2027 = vmatpush1.bf16.msra.mxu1 %v2660_v31  ;;  %v419_v28 = vld [vmem:[%s4035_s1 + $0x600] sm:$0xff]  ;;  %v420_v31 = vld [vmem:[%s4035_s1 + $0x608] sm:$0xff] }
  0x4f   : > { %1882 = vmatprep.subr.bf16.mxu0 %v2667_v32  ;;  %2028 = vmatprep.subr.bf16.mxu1 %v2669_v33  ;;  %v424_v32 = vld [vmem:[%s4035_s1 + $0x628] sm:$0xff]  ;;  %v2706_v33 = vcombine.low %v411_v16, %v415_v17  ;;  %v2715_v35 = vcombine.high %v419_v28, %v423_v29  ;;  %v2755_v17 = vcombine.high %v459_v10, %v463_v11 }
  0x50   : > { %v2717_v36 = vcombine.high %v420_v31, %v424_v32 }
  0x51   : > { %1848 = vmatmul.mubr.bf16.gmra.mrb[4].mxu0 %v3222_v38  ;;  %1994 = vmatmul.mubr.bf16.gmra.mrb[4].mxu1 %v3222_v38 }
  0x52   : > { %1883 = vmatpush1.bf16.msra.mxu0 %v2666_v41  ;;  %2029 = vmatpush1.bf16.msra.mxu1 %v2668_v42  ;;  %v432_v41 = vld [vmem:[%s4035_s1 + $0x668] sm:$0xff]  ;;  %v2714_v42 = vcombine.low %v419_v28, %v423_v29  ;;  %v475_v29 = vld [vmem:[%s4035_s1 + $0x7c0] sm:$0xff] }
  0x53   : > { %1884 = vmatprep.subr.bf16.mxu0 %v2675_v43  ;;  %2030 = vmatprep.subr.bf16.mxu1 %v2677_v44  ;;  %v2716_v43 = vcombine.low %v420_v31, %v424_v32  ;;  %v2723_v44 = vcombine.high %v427_v37, %v431_v39  ;;  %v2725_v45 = vcombine.high %v428_v40, %v432_v41  ;;  %v479_v31 = vld [vmem:[%s4035_s1 + $0x7e0] sm:$0xff]  ;;  %v476_v32 = vld [vmem:[%s4035_s1 + $0x7c8] sm:$0xff]  ;;  %v229_v39 = vld [vmem:[%s4035_s1 + $0x10] sm:$0xff] }
  0x54   : > { %1857 = vmatprep.mubr.bf16.mxu0 %v3232_v47  ;;  %2003 = vmatprep.mubr.bf16.mxu1 %v3232_v47  ;;  %v2724_v52 = vcombine.low %v428_v40, %v432_v41  ;;  %v233_v40 = vld [vmem:[%s4035_s1 + $0x30] sm:$0xff]  ;;  %v230_v41 = vld [vmem:[%s4035_s1 + $0x18] sm:$0xff] }
  0x56   : > { %1885 = vmatpush1.bf16.msra.mxu0 %v2674_v50  ;;  %2031 = vmatpush1.bf16.msra.mxu1 %v2676_v53  ;;  %v440_v50 = vld [vmem:[%s4035_s1 + $0x6a8] sm:$0xff]  ;;  %v2731_v53 = vcombine.high %v435_v46, %v439_v48  ;;  %v2527_v48 = vcombine.high %v229_v39, %v233_v40 }
  0x57   : > { %1886 = vmatprep.subr.bf16.mxu0 %v2683_v54  ;;  %2032 = vmatprep.subr.bf16.mxu1 %v2685_v55  ;;  %v2733_v54 = vcombine.high %v436_v49, %v440_v50  ;;  %v443_v55 = vld [vmem:[%s4035_s1 + $0x6c0] sm:$0xff]  ;;  %v2732_v62 = vcombine.low %v436_v49, %v440_v50  ;;  %v237_v50 = vld [vmem:[%s4035_s1 + $0x50] sm:$0xff] }
  0x58   : > { %v2739_v63 = vcombine.high %v443_v55, %v447_v56  ;;  %v2738_v5 = vcombine.low %v443_v55, %v447_v56  ;;  %v190_v55 = vld [vmem:[%s3038_s20 + $0x58] sm:$0xff] }
  0x59   : > { %1858 = vmatmul.mubr.bf16.gmra.mrb[8].mxu0 %v3258_v61  ;;  %2004 = vmatmul.mubr.bf16.gmra.mrb[8].mxu1 %v3258_v61  ;;  %v194_v56 = vld [vmem:[%s3038_s20 + $0x78] sm:$0xff] }
  0x5a   : > { %1887 = vmatpush1.bf16.msra.mxu0 %v2682_v0  ;;  %2033 = vmatpush1.bf16.msra.mxu1 %v2684_v1  ;;  %v2741_v0 = vcombine.high %v444_v57, %v448_v59  ;;  %v451_v1 = vld [vmem:[%s4035_s1 + $0x700] sm:$0xff]  ;;  %v2526_v57 = vcombine.low %v229_v39, %v233_v40  ;;  %v273_v39 = vld [vmem:[%s4035_s1 + $0x170] sm:$0xff]  ;;  %v270_v40 = vld [vmem:[%s4035_s1 + $0x158] sm:$0xff] }
  0x5b   : > { %1888 = vmatprep.subr.bf16.mxu0 %v2691_v2  ;;  %2034 = vmatprep.subr.bf16.mxu1 %v2693_v3  ;;  %v455_v2 = vld [vmem:[%s4035_s1 + $0x720] sm:$0xff]  ;;  %v452_v3 = vld [vmem:[%s4035_s1 + $0x708] sm:$0xff] }
  0x5c   : > { %1867 = vmatprep.mubr.bf16.mxu0 %v3268_v6  ;;  %2013 = vmatprep.mubr.bf16.mxu1 %v3268_v6  ;;  %v2747_v8 = vcombine.high %v451_v1, %v455_v2  ;;  %v2748_v16 = vcombine.low %v452_v3, %v456_v4 }
  0x5e   : > { %1889 = vmatpush1.bf16.msra.mxu0 %v2690_v9  ;;  %2035 = vmatpush1.bf16.msra.mxu1 %v2692_v12  ;;  %v2749_v9 = vcombine.high %v452_v3, %v456_v4  ;;  %v460_v12 = vld [vmem:[%s4035_s1 + $0x748] sm:$0xff]  ;;  %v250_v3 = vld [vmem:[%s4035_s1 + $0xb8] sm:$0xff] }
  0x5f   : > { %1890 = vmatprep.subr.bf16.mxu0 %v2699_v13  ;;  %2036 = vmatprep.subr.bf16.mxu1 %v2701_v14  ;;  %v464_v13 = vld [vmem:[%s4035_s1 + $0x768] sm:$0xff]  ;;  %v2746_v14 = vcombine.low %v451_v1, %v455_v2  ;;  %v249_v1 = vld [vmem:[%s4035_s1 + $0xb0] sm:$0xff]  ;;  %v246_v2 = vld [vmem:[%s4035_s1 + $0x98] sm:$0xff] }
  0x60   : > { %v2757_v18 = vcombine.high %v460_v12, %v464_v13 }
  0x61   : > { %1868 = vmatmul.mubr.bf16.gmra.mrb[12].mxu0 %v3294_v20  ;;  %2014 = vmatmul.mubr.bf16.gmra.mrb[12].mxu1 %v3294_v20 }
  0x62   : > { %1891 = vmatpush1.bf16.msra.mxu0 %v2698_v23  ;;  %2037 = vmatpush1.bf16.msra.mxu1 %v2700_v24  ;;  %v472_v23 = vld [vmem:[%s4035_s1 + $0x7a8] sm:$0xff]  ;;  %v2754_v24 = vcombine.low %v459_v10, %v463_v11  ;;  %v2545_v10 = vcombine.high %v246_v2, %v250_v3  ;;  %v253_v11 = vld [vmem:[%s4035_s1 + $0xd0] sm:$0xff] }
  0x63   : > { %1892 = vmatprep.subr.bf16.mxu0 %v2707_v26  ;;  %2038 = vmatprep.subr.bf16.mxu1 %v2709_v27  ;;  %v2756_v26 = vcombine.low %v460_v12, %v464_v13  ;;  %v2763_v27 = vcombine.high %v467_v19, %v471_v21  ;;  %v2765_v28 = vcombine.high %v468_v22, %v472_v23  ;;  %v257_v12 = vld [vmem:[%s4035_s1 + $0xf0] sm:$0xff]  ;;  %v254_v13 = vld [vmem:[%s4035_s1 + $0xd8] sm:$0xff] }
  0x64   : > { %1910 = vmatprep.mubr.bf16.mxu0 %v3304_v30  ;;  %2056 = vmatprep.mubr.bf16.mxu1 %v3304_v30 }
  0x66   : > { %1893 = vmatpush1.bf16.msra.mxu0 %v2706_v33  ;;  %2039 = vmatpush1.bf16.msra.mxu1 %v2708_v34  ;;  %v480_v33 = vld [vmem:[%s4035_s1 + $0x7e8] sm:$0xff]  ;;  %v2762_v34 = vcombine.low %v467_v19, %v471_v21  ;;  %v2544_v21 = vcombine.low %v246_v2, %v250_v3  ;;  %v289_v2 = vld [vmem:[%s4035_s1 + $0x1f0] sm:$0xff] }
  0x67   : > { %1894 = vmatprep.subr.bf16.mxu0 %v2715_v35  ;;  %2040 = vmatprep.subr.bf16.mxu1 %v2717_v36  ;;  %v2764_v35 = vcombine.low %v468_v22, %v472_v23  ;;  %v2771_v36 = vcombine.high %v475_v29, %v479_v31  ;;  %v2773_v37 = vcombine.high %v476_v32, %v480_v33 }
  0x68   : > { %v2772_v46 = vcombine.low %v476_v32, %v480_v33  ;;  %v2551_v22 = vcombine.high %v253_v11, %v257_v12  ;;  %v197_v32 = vld [vmem:[%s3038_s20 + $0x90] sm:$0xff] }
  0x69   : > { %v201_v33 = vld [vmem:[%s3038_s20 + $0xb0] sm:$0xff] }
  0x6a   : > { %1895 = vmatpush1.bf16.msra.mxu0 %v2714_v42  ;;  %2041 = vmatpush1.bf16.msra.mxu1 %v2716_v43  ;;  %v234_v42 = vld [vmem:[%s4035_s1 + $0x38] sm:$0xff]  ;;  %v2770_v43 = vcombine.low %v475_v29, %v479_v31  ;;  %v2550_v31 = vcombine.low %v253_v11, %v257_v12  ;;  %v293_v11 = vld [vmem:[%s4035_s1 + $0x210] sm:$0xff] }
  0x6b   : > { %1896 = vmatprep.subr.bf16.mxu0 %v2723_v44  ;;  %2042 = vmatprep.subr.bf16.mxu1 %v2725_v45  ;;  %v181_v44 = vld [vmem:[%s3038_s20 + $0x10] sm:$0xff]  ;;  %v2529_v49 = vcombine.high %v230_v41, %v234_v42  ;;  %v2528_v59 = vcombine.low %v230_v41, %v234_v42  ;;  %v266_v29 = vld [vmem:[%s4035_s1 + $0x138] sm:$0xff]  ;;  %v3495_v41 = vpack.c.bf16 %v201_v33, %v197_v32 }
  0x6c   : > { %v185_v45 = vld [vmem:[%s3038_s20 + $0x30] sm:$0xff]  ;;  %v274_v42 = vld [vmem:[%s4035_s1 + $0x178] sm:$0xff] }
  0x6d   : > { %v297_v12 = vld [vmem:[%s4035_s1 + $0x230] sm:$0xff] }
  0x6e   : > { %1897 = vmatpush1.bf16.msra.mxu0 %v2722_v51  ;;  %2043 = vmatpush1.bf16.msra.mxu1 %v2724_v52  ;;  %v241_v51 = vld [vmem:[%s4035_s1 + $0x70] sm:$0xff]  ;;  %v238_v52 = vld [vmem:[%s4035_s1 + $0x58] sm:$0xff] }
  0x6f   : > { %1898 = vmatprep.subr.bf16.mxu0 %v2731_v53  ;;  %2044 = vmatprep.subr.bf16.mxu1 %v2733_v54  ;;  %v3423_v53 = vpack.c.bf16 %v185_v45, %v181_v44  ;;  %v242_v54 = vld [vmem:[%s4035_s1 + $0x78] sm:$0xff]  ;;  %v2534_v4 = vcombine.low %v237_v50, %v241_v51  ;;  %v309_v33 = vld [vmem:[%s4035_s1 + $0x290] sm:$0xff] }
  0x70   : > { %v210_v44 = vld [vmem:[%s3038_s20 + $0xf8] sm:$0xff] }
  0x72   : > { %1899 = vmatpush1.bf16.msra.mxu0 %v2730_v60  ;;  %2045 = vmatpush1.bf16.msra.mxu1 %v2732_v62  ;;  %v2535_v60 = vcombine.high %v237_v50, %v241_v51  ;;  %v2537_v62 = vcombine.high %v238_v52, %v242_v54  ;;  %v277_v51 = vld [vmem:[%s4035_s1 + $0x190] sm:$0xff] }
  0x73   : > { %1900 = vmatprep.subr.bf16.mxu0 %v2739_v63  ;;  %2046 = vmatprep.subr.bf16.mxu1 %v2741_v0  ;;  %v3430_v63 = vpack.c.bf16 %v194_v56, %v190_v55  ;;  %v245_v0 = vld [vmem:[%s4035_s1 + $0x90] sm:$0xff]  ;;  %v282_v55 = vld [vmem:[%s4035_s1 + $0x1b8] sm:$0xff] }
  0x74   : > { %v2542_v19 = vcombine.low %v245_v0, %v249_v1 }
  0x76   : > { %1901 = vmatpush1.bf16.msra.mxu0 %v2738_v5  ;;  %2047 = vmatpush1.bf16.msra.mxu1 %v2740_v7  ;;  %v189_v5 = vld [vmem:[%s3038_s20 + $0x50] sm:$0xff] }
  0x77   : > { %1902 = vmatprep.subr.bf16.mxu0 %v2747_v8  ;;  %2048 = vmatprep.subr.bf16.mxu1 %v2749_v9  ;;  %v193_v7 = vld [vmem:[%s3038_s20 + $0x70] sm:$0xff]  ;;  %v2536_v8 = vcombine.low %v238_v52, %v242_v54  ;;  %v2543_v9 = vcombine.high %v245_v0, %v249_v1  ;;  %v278_v54 = vld [vmem:[%s4035_s1 + $0x198] sm:$0xff] }
  0x78   : > { %v281_v52 = vld [vmem:[%s4035_s1 + $0x1b0] sm:$0xff]  ;;  %v2577_v0 = vcombine.high %v278_v54, %v282_v55 }
  0x79   : > { %v285_v1 = vld [vmem:[%s4035_s1 + $0x1d0] sm:$0xff] }
  0x7a   : > { %1903 = vmatpush1.bf16.msra.mxu0 %v2746_v14  ;;  %2049 = vmatpush1.bf16.msra.mxu1 %v2748_v16  ;;  %v3459_v14 = vpack.c.bf16 %v193_v7, %v189_v5  ;;  %v258_v16 = vld [vmem:[%s4035_s1 + $0xf8] sm:$0xff]  ;;  %v2574_v7 = vcombine.low %v277_v51, %v281_v52 }
  0x7b   : > { %1904 = vmatprep.subr.bf16.mxu0 %v2755_v17  ;;  %2050 = vmatprep.subr.bf16.mxu1 %v2757_v18  ;;  %v198_v17 = vld [vmem:[%s3038_s20 + $0x98] sm:$0xff]  ;;  %v2553_v23 = vcombine.high %v254_v13, %v258_v16 }
  0x7c   : > { %v202_v18 = vld [vmem:[%s3038_s20 + $0xb8] sm:$0xff] }
  0x7d   : > { %v290_v5 = vld [vmem:[%s4035_s1 + $0x1f8] sm:$0xff] }
  0x7e   : > { %1905 = vmatpush1.bf16.msra.mxu0 %v2754_v24  ;;  %2051 = vmatpush1.bf16.msra.mxu1 %v2756_v26  ;;  %v3466_v24 = vpack.c.bf16 %v202_v18, %v198_v17  ;;  %v261_v26 = vld [vmem:[%s4035_s1 + $0x110] sm:$0xff]  ;;  %v2582_v17 = vcombine.low %v285_v1, %v289_v2 }
  0x7f   : > { %1906 = vmatprep.subr.bf16.mxu0 %v2763_v27  ;;  %2052 = vmatprep.subr.bf16.mxu1 %v2765_v28  ;;  %v265_v27 = vld [vmem:[%s4035_s1 + $0x130] sm:$0xff]  ;;  %v262_v28 = vld [vmem:[%s4035_s1 + $0x118] sm:$0xff] }
  0x80   : > { %v2558_v45 = vcombine.low %v261_v26, %v265_v27 }
  0x82   : > { %1907 = vmatpush1.bf16.msra.mxu0 %v2762_v34  ;;  %2053 = vmatpush1.bf16.msra.mxu1 %v2764_v35  ;;  %v2552_v34 = vcombine.low %v254_v13, %v258_v16  ;;  %v2559_v35 = vcombine.high %v261_v26, %v265_v27  ;;  %v294_v13 = vld [vmem:[%s4035_s1 + $0x218] sm:$0xff] }
  0x83   : > { %1908 = vmatprep.subr.bf16.mxu0 %v2771_v36  ;;  %2054 = vmatprep.subr.bf16.mxu1 %v2773_v37  ;;  %v2561_v36 = vcombine.high %v262_v28, %v266_v29  ;;  %v269_v37 = vld [vmem:[%s4035_s1 + $0x150] sm:$0xff]  ;;  %v298_v16 = vld [vmem:[%s4035_s1 + $0x238] sm:$0xff] }
  0x84   : > { %v2566_v56 = vcombine.low %v269_v37, %v273_v39  ;;  %v302_v26 = vld [vmem:[%s4035_s1 + $0x258] sm:$0xff] }
  0x85   : > { %v306_v27 = vld [vmem:[%s4035_s1 + $0x278] sm:$0xff] }
  0x86   : > { %1909 = vmatpush1.bf16.msra.mxu0 %v2770_v43  ;;  %2055 = vmatpush1.bf16.msra.mxu1 %v2772_v46  ;;  %v206_v43 = vld [vmem:[%s3038_s20 + $0xd8] sm:$0xff]  ;;  %v2560_v46 = vcombine.low %v262_v28, %v266_v29  ;;  %v2590_v28 = vcombine.low %v293_v11, %v297_v12  ;;  %v2592_v29 = vcombine.low %v294_v13, %v298_v16 }
  0x87   : > { %2097 = vmatprep.subr.bf16.mxu0 %v2527_v48  ;;  %2243 = vmatprep.subr.bf16.mxu1 %v2529_v49  ;;  %v2567_v48 = vcombine.high %v269_v37, %v273_v39  ;;  %v2569_v49 = vcombine.high %v270_v40, %v274_v42  ;;  %v3502_v50 = vpack.c.bf16 %v210_v44, %v206_v43  ;;  %v321_v43 = vld [vmem:[%s4035_s1 + $0x2f0] sm:$0xff]  ;;  %v318_v44 = vld [vmem:[%s4035_s1 + $0x2d8] sm:$0xff] }
  0x88   : > { %v2601_v32 = vcombine.high %v302_v26, %v306_v27  ;;  %v2600_v37 = vcombine.low %v302_v26, %v306_v27  ;;  %v354_v26 = vld [vmem:[%s4035_s1 + $0x3f8] sm:$0xff] }
  0x89   : > { %1911 = vmatmul.mubr.bf16.vlgmr.msra.gmra.mrb[0].mxu0 %v3423_v53  ;;  %2057 = vmatmul.mubr.bf16.vlgmr.msra.gmra.mrb[0].mxu1 %v3423_v53 }
  0x8a   : > { %2098 = vmatpush1.bf16.msra.mxu0 %v2526_v57  ;;  %2244 = vmatpush1.bf16.msra.mxu1 %v2528_v59  ;;  %v205_v57 = vld [vmem:[%s3038_s20 + $0xd0] sm:$0xff] }
  0x8b   : > { %2099 = vmatprep.subr.bf16.mxu0 %v2535_v60  ;;  %2245 = vmatprep.subr.bf16.mxu1 %v2537_v62  ;;  %v209_v59 = vld [vmem:[%s3038_s20 + $0xf0] sm:$0xff]  ;;  %v2568_v60 = vcombine.low %v270_v40, %v274_v42  ;;  %v2575_v62 = vcombine.high %v277_v51, %v281_v52 }
  0x8c   : > { %1920 = vmatprep.mubr.bf16.mxu0 %v3430_v63  ;;  %2066 = vmatprep.mubr.bf16.mxu1 %v3430_v63  ;;  %v3528_v3 = vpack.c.bf16 %v209_v59, %v205_v57  ;;  %v317_v42 = vld [vmem:[%s4035_s1 + $0x2d0] sm:$0xff] }
  0x8d   : > { %v325_v52 = vld [vmem:[%s4035_s1 + $0x310] sm:$0xff]  ;;  %v2614_v57 = vcombine.low %v317_v42, %v321_v43 }
  0x8e   : > { %2100 = vmatpush1.bf16.msra.mxu0 %v2534_v4  ;;  %2246 = vmatpush1.bf16.msra.mxu1 %v2536_v8  ;;  %v286_v4 = vld [vmem:[%s4035_s1 + $0x1d8] sm:$0xff]  ;;  %v2576_v8 = vcombine.low %v278_v54, %v282_v55  ;;  %v329_v54 = vld [vmem:[%s4035_s1 + $0x330] sm:$0xff] }
  0x8f   : > { %2101 = vmatprep.subr.bf16.mxu0 %v2543_v9  ;;  %2247 = vmatprep.subr.bf16.mxu1 %v2545_v10  ;;  %v2583_v9 = vcombine.high %v285_v1, %v289_v2  ;;  %v2585_v10 = vcombine.high %v286_v4, %v290_v5  ;;  %v2584_v18 = vcombine.low %v286_v4, %v290_v5  ;;  %v326_v55 = vld [vmem:[%s4035_s1 + $0x318] sm:$0xff]  ;;  %v337_v1 = vld [vmem:[%s4035_s1 + $0x370] sm:$0xff] }
  0x90   : > { %v334_v2 = vld [vmem:[%s4035_s1 + $0x358] sm:$0xff]  ;;  %v2622_v5 = vcombine.low %v325_v52, %v329_v54 }
  0x91   : > { %1921 = vmatmul.mubr.bf16.gmra.mrb[4].mxu0 %v3459_v14  ;;  %2067 = vmatmul.mubr.bf16.gmra.mrb[4].mxu1 %v3459_v14  ;;  %v338_v4 = vld [vmem:[%s4035_s1 + $0x378] sm:$0xff] }
  0x92   : > { %2102 = vmatpush1.bf16.msra.mxu0 %v2542_v19  ;;  %2248 = vmatpush1.bf16.msra.mxu1 %v2544_v21  ;;  %v2591_v19 = vcombine.high %v293_v11, %v297_v12  ;;  %v2593_v21 = vcombine.high %v294_v13, %v298_v16  ;;  %v345_v11 = vld [vmem:[%s4035_s1 + $0x3b0] sm:$0xff]  ;;  %v342_v12 = vld [vmem:[%s4035_s1 + $0x398] sm:$0xff] }
  0x93   : > { %2103 = vmatprep.subr.bf16.mxu0 %v2551_v22  ;;  %2249 = vmatprep.subr.bf16.mxu1 %v2553_v23  ;;  %v301_v22 = vld [vmem:[%s4035_s1 + $0x250] sm:$0xff]  ;;  %v346_v13 = vld [vmem:[%s4035_s1 + $0x3b8] sm:$0xff] }
  0x94   : > { %1930 = vmatprep.mubr.bf16.mxu0 %v3466_v24  ;;  %2076 = vmatprep.mubr.bf16.mxu1 %v3466_v24  ;;  %v305_v23 = vld [vmem:[%s4035_s1 + $0x270] sm:$0xff] }
  0x96   : > { %2104 = vmatpush1.bf16.msra.mxu0 %v2550_v31  ;;  %2250 = vmatpush1.bf16.msra.mxu1 %v2552_v34  ;;  %v2599_v31 = vcombine.high %v301_v22, %v305_v23  ;;  %v313_v34 = vld [vmem:[%s4035_s1 + $0x2b0] sm:$0xff] }
  0x97   : > { %2105 = vmatprep.subr.bf16.mxu0 %v2559_v35  ;;  %2251 = vmatprep.subr.bf16.mxu1 %v2561_v36  ;;  %v314_v35 = vld [vmem:[%s4035_s1 + $0x2b8] sm:$0xff]  ;;  %v2598_v36 = vcombine.low %v301_v22, %v305_v23  ;;  %v2607_v39 = vcombine.high %v309_v33, %v313_v34  ;;  %v353_v22 = vld [vmem:[%s4035_s1 + $0x3f0] sm:$0xff] }
  0x98   : > { %v350_v23 = vld [vmem:[%s4035_s1 + $0x3d8] sm:$0xff] }
  0x99   : > { %1931 = vmatmul.mubr.bf16.gmra.mrb[8].mxu0 %v3495_v41  ;;  %2077 = vmatmul.mubr.bf16.gmra.mrb[8].mxu1 %v3495_v41 }
  0x9a   : > { %2106 = vmatpush1.bf16.msra.mxu0 %v2558_v45  ;;  %2252 = vmatpush1.bf16.msra.mxu1 %v2560_v46  ;;  %v322_v45 = vld [vmem:[%s4035_s1 + $0x2f8] sm:$0xff]  ;;  %v2606_v46 = vcombine.low %v309_v33, %v313_v34  ;;  %v361_v33 = vld [vmem:[%s4035_s1 + $0x430] sm:$0xff] }
  0x9b   : > { %2107 = vmatprep.subr.bf16.mxu0 %v2567_v48  ;;  %2253 = vmatprep.subr.bf16.mxu1 %v2569_v49  ;;  %v2615_v49 = vcombine.high %v317_v42, %v321_v43  ;;  %v2617_v51 = vcombine.high %v318_v44, %v322_v45  ;;  %v2616_v59 = vcombine.low %v318_v44, %v322_v45  ;;  %v358_v34 = vld [vmem:[%s4035_s1 + $0x418] sm:$0xff]  ;;  %v369_v42 = vld [vmem:[%s4035_s1 + $0x470] sm:$0xff] }
  0x9c   : > { %1940 = vmatprep.mubr.bf16.mxu0 %v3502_v50  ;;  %2086 = vmatprep.mubr.bf16.mxu1 %v3502_v50  ;;  %v366_v43 = vld [vmem:[%s4035_s1 + $0x458] sm:$0xff] }
  0x9d   : > { %v370_v44 = vld [vmem:[%s4035_s1 + $0x478] sm:$0xff] }
  0x9e   : > { %2108 = vmatpush1.bf16.msra.mxu0 %v2566_v56  ;;  %2254 = vmatpush1.bf16.msra.mxu1 %v2568_v60  ;;  %v330_v56 = vld [vmem:[%s4035_s1 + $0x338] sm:$0xff]  ;;  %v2623_v60 = vcombine.high %v325_v52, %v329_v54  ;;  %v377_v52 = vld [vmem:[%s4035_s1 + $0x4b0] sm:$0xff] }
  0x9f   : > { %2109 = vmatprep.subr.bf16.mxu0 %v2575_v62  ;;  %2255 = vmatprep.subr.bf16.mxu1 %v2577_v0  ;;  %v2625_v62 = vcombine.high %v326_v55, %v330_v56  ;;  %v333_v0 = vld [vmem:[%s4035_s1 + $0x350] sm:$0xff]  ;;  %v374_v54 = vld [vmem:[%s4035_s1 + $0x498] sm:$0xff] }
  0xa0   : > { %v2630_v16 = vcombine.low %v333_v0, %v337_v1 }
  0xa1   : > { %1941 = vmatmul.mubr.bf16.gmra.mrb[12].mxu0 %v3528_v3  ;;  %2087 = vmatmul.mubr.bf16.gmra.mrb[12].mxu1 %v3528_v3 }
  0xa2   : > { %2110 = vmatpush1.bf16.msra.mxu0 %v2574_v7  ;;  %2256 = vmatpush1.bf16.msra.mxu1 %v2576_v8  ;;  %v2624_v7 = vcombine.low %v326_v55, %v330_v56  ;;  %v2631_v8 = vcombine.high %v333_v0, %v337_v1  ;;  %v378_v55 = vld [vmem:[%s4035_s1 + $0x4b8] sm:$0xff]  ;;  %v385_v0 = vld [vmem:[%s4035_s1 + $0x4f0] sm:$0xff] }
  0xa3   : > { %2111 = vmatprep.subr.bf16.mxu0 %v2583_v9  ;;  %2257 = vmatprep.subr.bf16.mxu1 %v2585_v10  ;;  %v2633_v9 = vcombine.high %v334_v2, %v338_v4  ;;  %v341_v10 = vld [vmem:[%s4035_s1 + $0x390] sm:$0xff]  ;;  %v386_v1 = vld [vmem:[%s4035_s1 + $0x4f8] sm:$0xff] }
  0xa4   : > { %2129 = vmatprep.mubr.bf16.mxu0 %v3054_v58  ;;  %2275 = vmatprep.mubr.bf16.mxu1 %v3054_v58  ;;  %v310_v58 = vld [vmem:[%s4035_s1 + $0x298] sm:$0xff]  ;;  %v2638_v27 = vcombine.low %v341_v10, %v345_v11 }
  0xa5   : > { %v2609_v40 = vcombine.high %v310_v58, %v314_v35  ;;  %v2608_v48 = vcombine.low %v310_v58, %v314_v35  ;;  %v362_v58 = vld [vmem:[%s4035_s1 + $0x438] sm:$0xff] }
  0xa6   : > { %2112 = vmatpush1.bf16.msra.mxu0 %v2582_v17  ;;  %2258 = vmatpush1.bf16.msra.mxu1 %v2584_v18  ;;  %v2632_v17 = vcombine.low %v334_v2, %v338_v4  ;;  %v2639_v18 = vcombine.high %v341_v10, %v345_v11  ;;  %v2672_v4 = vcombine.low %v374_v54, %v378_v55  ;;  %v394_v10 = vld [vmem:[%s4035_s1 + $0x538] sm:$0xff] }
  0xa7   : > { %2113 = vmatprep.subr.bf16.mxu0 %v2591_v19  ;;  %2259 = vmatprep.subr.bf16.mxu1 %v2593_v21  ;;  %v2641_v19 = vcombine.high %v342_v12, %v346_v13  ;;  %v349_v21 = vld [vmem:[%s4035_s1 + $0x3d0] sm:$0xff] }
  0xa8   : > { %v2646_v35 = vcombine.low %v349_v21, %v353_v22 }
  0xaa   : > { %2114 = vmatpush1.bf16.msra.mxu0 %v2590_v28  ;;  %2260 = vmatpush1.bf16.msra.mxu1 %v2592_v29  ;;  %v2640_v28 = vcombine.low %v342_v12, %v346_v13  ;;  %v2647_v29 = vcombine.high %v349_v21, %v353_v22 }
  0xab   : > { %2115 = vmatprep.subr.bf16.mxu0 %v2599_v31  ;;  %2261 = vmatprep.subr.bf16.mxu1 %v2601_v32  ;;  %v2649_v31 = vcombine.high %v350_v23, %v354_v26  ;;  %v357_v32 = vld [vmem:[%s4035_s1 + $0x410] sm:$0xff] }
  0xac   : > { %v2654_v45 = vcombine.low %v357_v32, %v361_v33 }
  0xae   : > { %2116 = vmatpush1.bf16.msra.mxu0 %v2598_v36  ;;  %2262 = vmatpush1.bf16.msra.mxu1 %v2600_v37  ;;  %v2648_v36 = vcombine.low %v350_v23, %v354_v26  ;;  %v2655_v37 = vcombine.high %v357_v32, %v361_v33 }
  0xaf   : > { %2117 = vmatprep.subr.bf16.mxu0 %v2607_v39  ;;  %2263 = vmatprep.subr.bf16.mxu1 %v2609_v40  ;;  %v2657_v39 = vcombine.high %v358_v34, %v362_v58  ;;  %v365_v40 = vld [vmem:[%s4035_s1 + $0x450] sm:$0xff] }
  0xb0   : > { %v2662_v56 = vcombine.low %v365_v40, %v369_v42 }
  0xb2   : > { %2118 = vmatpush1.bf16.msra.mxu0 %v2606_v46  ;;  %2264 = vmatpush1.bf16.msra.mxu1 %v2608_v48  ;;  %v2656_v46 = vcombine.low %v358_v34, %v362_v58  ;;  %v2663_v48 = vcombine.high %v365_v40, %v369_v42  ;;  %v413_v58 = vld [vmem:[%s4035_s1 + $0x5d0] sm:$0xff] }
  0xb3   : > { %2119 = vmatprep.subr.bf16.mxu0 %v2615_v49  ;;  %2265 = vmatprep.subr.bf16.mxu1 %v2617_v51  ;;  %v2665_v49 = vcombine.high %v366_v43, %v370_v44  ;;  %v373_v51 = vld [vmem:[%s4035_s1 + $0x490] sm:$0xff] }
  0xb4   : > { %v2670_v2 = vcombine.low %v373_v51, %v377_v52 }
  0xb6   : > { %2120 = vmatpush1.bf16.msra.mxu0 %v2614_v57  ;;  %2266 = vmatpush1.bf16.msra.mxu1 %v2616_v59  ;;  %v2664_v57 = vcombine.low %v366_v43, %v370_v44  ;;  %v2671_v59 = vcombine.high %v373_v51, %v377_v52  ;;  %v421_v43 = vld [vmem:[%s4035_s1 + $0x610] sm:$0xff] }
  0xb7   : > { %2121 = vmatprep.subr.bf16.mxu0 %v2623_v60  ;;  %2267 = vmatprep.subr.bf16.mxu1 %v2625_v62  ;;  %v2673_v60 = vcombine.high %v374_v54, %v378_v55  ;;  %v381_v62 = vld [vmem:[%s4035_s1 + $0x4d0] sm:$0xff]  ;;  %v434_v55 = vld [vmem:[%s4035_s1 + $0x678] sm:$0xff] }
  0xb8   : > { %v2678_v11 = vcombine.low %v381_v62, %v385_v0  ;;  %v425_v44 = vld [vmem:[%s4035_s1 + $0x630] sm:$0xff] }
  0xb9   : > { %v429_v52 = vld [vmem:[%s4035_s1 + $0x650] sm:$0xff] }
  0xba   : > { %2122 = vmatpush1.bf16.msra.mxu0 %v2622_v5  ;;  %2268 = vmatpush1.bf16.msra.mxu1 %v2624_v7  ;;  %v2679_v5 = vcombine.high %v381_v62, %v385_v0  ;;  %v433_v54 = vld [vmem:[%s4035_s1 + $0x670] sm:$0xff] }
  0xbb   : > { %2123 = vmatprep.subr.bf16.mxu0 %v2631_v8  ;;  %2269 = vmatprep.subr.bf16.mxu1 %v2633_v9  ;;  %v389_v8 = vld [vmem:[%s4035_s1 + $0x510] sm:$0xff] }
  0xbc   : > { %v393_v9 = vld [vmem:[%s4035_s1 + $0x530] sm:$0xff] }
  0xbd   : > { %v2687_v13 = vcombine.high %v389_v8, %v393_v9  ;;  %v2686_v21 = vcombine.low %v389_v8, %v393_v9  ;;  %v437_v62 = vld [vmem:[%s4035_s1 + $0x690] sm:$0xff]  ;;  %v446_v9 = vld [vmem:[%s4035_s1 + $0x6d8] sm:$0xff] }
  0xbe   : > { %2124 = vmatpush1.bf16.msra.mxu0 %v2630_v16  ;;  %2270 = vmatpush1.bf16.msra.mxu1 %v2632_v17  ;;  %v397_v17 = vld [vmem:[%s4035_s1 + $0x550] sm:$0xff] }
  0xbf   : > { %2125 = vmatprep.subr.bf16.mxu0 %v2639_v18  ;;  %2271 = vmatprep.subr.bf16.mxu1 %v2641_v19  ;;  %v401_v18 = vld [vmem:[%s4035_s1 + $0x570] sm:$0xff]  ;;  %v402_v19 = vld [vmem:[%s4035_s1 + $0x578] sm:$0xff] }
  0xc0   : > { %v2695_v23 = vcombine.high %v397_v17, %v401_v18  ;;  %v441_v0 = vld [vmem:[%s4035_s1 + $0x6b0] sm:$0xff] }
  0xc1   : > { %v449_v8 = vld [vmem:[%s4035_s1 + $0x6f0] sm:$0xff] }
  0xc2   : > { %2126 = vmatpush1.bf16.msra.mxu0 %v2638_v27  ;;  %2272 = vmatpush1.bf16.msra.mxu1 %v2640_v28  ;;  %v405_v27 = vld [vmem:[%s4035_s1 + $0x590] sm:$0xff] }
  0xc3   : > { %2127 = vmatprep.subr.bf16.mxu0 %v2647_v29  ;;  %2273 = vmatprep.subr.bf16.mxu1 %v2649_v31  ;;  %v409_v28 = vld [vmem:[%s4035_s1 + $0x5b0] sm:$0xff]  ;;  %v410_v29 = vld [vmem:[%s4035_s1 + $0x5b8] sm:$0xff]  ;;  %v2694_v31 = vcombine.low %v397_v17, %v401_v18 }
  0xc4   : > { %v2703_v33 = vcombine.high %v405_v27, %v409_v28  ;;  %v457_v17 = vld [vmem:[%s4035_s1 + $0x730] sm:$0xff]  ;;  %v454_v18 = vld [vmem:[%s4035_s1 + $0x718] sm:$0xff] }
  0xc6   : > { %2128 = vmatpush1.bf16.msra.mxu0 %v2646_v35  ;;  %2274 = vmatpush1.bf16.msra.mxu1 %v2648_v36  ;;  %v417_v35 = vld [vmem:[%s4035_s1 + $0x5f0] sm:$0xff]  ;;  %v418_v36 = vld [vmem:[%s4035_s1 + $0x5f8] sm:$0xff] }
  0xc7   : > { %2170 = vmatprep.subr.bf16.mxu0 %v2655_v37  ;;  %2316 = vmatprep.subr.bf16.mxu1 %v2657_v39  ;;  %v2702_v37 = vcombine.low %v405_v27, %v409_v28  ;;  %v2711_v40 = vcombine.high %v413_v58, %v417_v35  ;;  %v465_v27 = vld [vmem:[%s4035_s1 + $0x770] sm:$0xff]  ;;  %v462_v28 = vld [vmem:[%s4035_s1 + $0x758] sm:$0xff] }
  0xc9   : > { %2130 = vmatmul.mubr.bf16.vlgmr.msra.gmra.mrb[16].mxu0 %v3183_v15  ;;  %2276 = vmatmul.mubr.bf16.vlgmr.msra.gmra.mrb[16].mxu1 %v3183_v15  ;;  %v382_v15 = vld [vmem:[%s4035_s1 + $0x4d8] sm:$0xff] }
  0xca   : > { %2171 = vmatpush1.bf16.msra.mxu0 %v2654_v45  ;;  %2317 = vmatpush1.bf16.msra.mxu1 %v2656_v46  ;;  %v2681_v7 = vcombine.high %v382_v15, %v386_v1  ;;  %v2680_v12 = vcombine.low %v382_v15, %v386_v1  ;;  %v426_v45 = vld [vmem:[%s4035_s1 + $0x638] sm:$0xff]  ;;  %v2710_v46 = vcombine.low %v413_v58, %v417_v35  ;;  %v473_v58 = vld [vmem:[%s4035_s1 + $0x7b0] sm:$0xff] }
  0xcb   : > { %2172 = vmatprep.subr.bf16.mxu0 %v2663_v48  ;;  %2318 = vmatprep.subr.bf16.mxu1 %v2665_v49  ;;  %v2719_v49 = vcombine.high %v421_v43, %v425_v44  ;;  %v442_v15 = vld [vmem:[%s4035_s1 + $0x6b8] sm:$0xff]  ;;  %v2726_v1 = vcombine.low %v429_v52, %v433_v54 }
  0xcc   : > { %2139 = vmatprep.mubr.bf16.mxu0 %v3196_v25  ;;  %2285 = vmatprep.mubr.bf16.mxu1 %v3196_v25  ;;  %v390_v25 = vld [vmem:[%s4035_s1 + $0x518] sm:$0xff] }
  0xcd   : > { %v2689_v16 = vcombine.high %v390_v25, %v394_v10  ;;  %v2688_v22 = vcombine.low %v390_v25, %v394_v10  ;;  %v450_v25 = vld [vmem:[%s4035_s1 + $0x6f8] sm:$0xff]  ;;  %v2734_v10 = vcombine.low %v437_v62, %v441_v0 }
  0xce   : > { %2173 = vmatpush1.bf16.msra.mxu0 %v2662_v56  ;;  %2319 = vmatpush1.bf16.msra.mxu1 %v2664_v57  ;;  %v2718_v56 = vcombine.low %v421_v43, %v425_v44  ;;  %v470_v35 = vld [vmem:[%s4035_s1 + $0x798] sm:$0xff]  ;;  %v481_v43 = vld [vmem:[%s4035_s1 + $0x7f0] sm:$0xff] }
  0xcf   : > { %2174 = vmatprep.subr.bf16.mxu0 %v2671_v59  ;;  %2320 = vmatprep.subr.bf16.mxu1 %v2673_v60  ;;  %v2727_v59 = vcombine.high %v429_v52, %v433_v54  ;;  %v478_v44 = vld [vmem:[%s4035_s1 + $0x7d8] sm:$0xff] }
  0xd1   : > { %2140 = vmatmul.mubr.bf16.gmra.mrb[20].mxu0 %v3222_v38  ;;  %2286 = vmatmul.mubr.bf16.gmra.mrb[20].mxu1 %v3222_v38  ;;  %v398_v38 = vld [vmem:[%s4035_s1 + $0x558] sm:$0xff] }
  0xd2   : > { %2175 = vmatpush1.bf16.msra.mxu0 %v2670_v2  ;;  %2321 = vmatpush1.bf16.msra.mxu1 %v2672_v4  ;;  %v2697_v26 = vcombine.high %v398_v38, %v402_v19  ;;  %v2696_v32 = vcombine.low %v398_v38, %v402_v19  ;;  %v2735_v4 = vcombine.high %v437_v62, %v441_v0  ;;  %v458_v38 = vld [vmem:[%s4035_s1 + $0x738] sm:$0xff] }
  0xd3   : > { %2176 = vmatprep.subr.bf16.mxu0 %v2679_v5  ;;  %2322 = vmatprep.subr.bf16.mxu1 %v2681_v7  ;;  %v445_v7 = vld [vmem:[%s4035_s1 + $0x6d0] sm:$0xff] }
  0xd4   : > { %2149 = vmatprep.mubr.bf16.mxu0 %v3232_v47  ;;  %2295 = vmatprep.mubr.bf16.mxu1 %v3232_v47  ;;  %v406_v47 = vld [vmem:[%s4035_s1 + $0x598] sm:$0xff]  ;;  %v2742_v19 = vcombine.low %v445_v7, %v449_v8 }
  0xd5   : > { %v2705_v34 = vcombine.high %v406_v47, %v410_v29  ;;  %v2704_v39 = vcombine.low %v406_v47, %v410_v29  ;;  %v466_v47 = vld [vmem:[%s4035_s1 + $0x778] sm:$0xff] }
  0xd6   : > { %2177 = vmatpush1.bf16.msra.mxu0 %v2678_v11  ;;  %2323 = vmatpush1.bf16.msra.mxu1 %v2680_v12  ;;  %v2743_v12 = vcombine.high %v445_v7, %v449_v8 }
  0xd7   : > { %2178 = vmatprep.subr.bf16.mxu0 %v2687_v13  ;;  %2324 = vmatprep.subr.bf16.mxu1 %v2689_v16  ;;  %v2745_v13 = vcombine.high %v446_v9, %v450_v25  ;;  %v453_v16 = vld [vmem:[%s4035_s1 + $0x710] sm:$0xff] }
  0xd8   : > { %v2750_v29 = vcombine.low %v453_v16, %v457_v17 }
  0xd9   : > { %2150 = vmatmul.mubr.bf16.gmra.mrb[24].mxu0 %v3258_v61  ;;  %2296 = vmatmul.mubr.bf16.gmra.mrb[24].mxu1 %v3258_v61  ;;  %v414_v61 = vld [vmem:[%s4035_s1 + $0x5d8] sm:$0xff] }
  0xda   : > { %2179 = vmatpush1.bf16.msra.mxu0 %v2686_v21  ;;  %2325 = vmatpush1.bf16.msra.mxu1 %v2688_v22  ;;  %v2713_v42 = vcombine.high %v414_v61, %v418_v36  ;;  %v2712_v48 = vcombine.low %v414_v61, %v418_v36  ;;  %v2744_v21 = vcombine.low %v446_v9, %v450_v25  ;;  %v474_v61 = vld [vmem:[%s4035_s1 + $0x7b8] sm:$0xff] }
  0xdb   : > { %2180 = vmatprep.subr.bf16.mxu0 %v2695_v23  ;;  %2326 = vmatprep.subr.bf16.mxu1 %v2697_v26  ;;  %v2751_v22 = vcombine.high %v453_v16, %v457_v17  ;;  %v2753_v23 = vcombine.high %v454_v18, %v458_v38  ;;  %v461_v26 = vld [vmem:[%s4035_s1 + $0x750] sm:$0xff] }
  0xdc   : > { %2159 = vmatprep.mubr.bf16.mxu0 %v3268_v6  ;;  %2305 = vmatprep.mubr.bf16.mxu1 %v3268_v6  ;;  %v422_v6 = vld [vmem:[%s4035_s1 + $0x618] sm:$0xff]  ;;  %v2758_v36 = vcombine.low %v461_v26, %v465_v27 }
  0xdd   : > { %v2721_v51 = vcombine.high %v422_v6, %v426_v45  ;;  %v2720_v57 = vcombine.low %v422_v6, %v426_v45  ;;  %v482_v6 = vld [vmem:[%s4035_s1 + $0x7f8] sm:$0xff] }
  0xde   : > { %2181 = vmatpush1.bf16.msra.mxu0 %v2694_v31  ;;  %2327 = vmatpush1.bf16.msra.mxu1 %v2696_v32  ;;  %v2752_v31 = vcombine.low %v454_v18, %v458_v38  ;;  %v2759_v32 = vcombine.high %v461_v26, %v465_v27  ;;  %v2776_v52 = vcombine.low %v478_v44, %v482_v6 }
  0xdf   : > { %2182 = vmatprep.subr.bf16.mxu0 %v2703_v33  ;;  %2328 = vmatprep.subr.bf16.mxu1 %v2705_v34  ;;  %v2761_v33 = vcombine.high %v462_v28, %v466_v47  ;;  %v469_v34 = vld [vmem:[%s4035_s1 + $0x790] sm:$0xff] }
  0xe0   : > { %v2766_v45 = vcombine.low %v469_v34, %v473_v58 }
  0xe1   : > { %2160 = vmatmul.mubr.bf16.gmra.mrb[28].mxu0 %v3294_v20  ;;  %2306 = vmatmul.mubr.bf16.gmra.mrb[28].mxu1 %v3294_v20  ;;  %v430_v20 = vld [vmem:[%s4035_s1 + $0x658] sm:$0xff] }
  0xe2   : > { %2183 = vmatpush1.bf16.msra.mxu0 %v2702_v37  ;;  %2329 = vmatpush1.bf16.msra.mxu1 %v2704_v39  ;;  %v2729_v60 = vcombine.high %v430_v20, %v434_v55  ;;  %v2728_v2 = vcombine.low %v430_v20, %v434_v55  ;;  %v2760_v37 = vcombine.low %v462_v28, %v466_v47 }
  0xe3   : > { %2184 = vmatprep.subr.bf16.mxu0 %v2711_v40  ;;  %2330 = vmatprep.subr.bf16.mxu1 %v2713_v42  ;;  %v2767_v39 = vcombine.high %v469_v34, %v473_v58  ;;  %v2769_v40 = vcombine.high %v470_v35, %v474_v61  ;;  %v477_v42 = vld [vmem:[%s4035_s1 + $0x7d0] sm:$0xff] }
  0xe4   : > { %2202 = vmatprep.mubr.bf16.mxu0 %v3304_v30  ;;  %2348 = vmatprep.mubr.bf16.mxu1 %v3304_v30  ;;  %v438_v30 = vld [vmem:[%s4035_s1 + $0x698] sm:$0xff] }
  0xe5   : > { %v2737_v5 = vcombine.high %v438_v30, %v442_v15  ;;  %v2736_v11 = vcombine.low %v438_v30, %v442_v15 }
  0xe6   : > { %2185 = vmatpush1.bf16.msra.mxu0 %v2710_v46  ;;  %2331 = vmatpush1.bf16.msra.mxu1 %v2712_v48  ;;  %v2768_v46 = vcombine.low %v470_v35, %v474_v61  ;;  %v2775_v48 = vcombine.high %v477_v42, %v481_v43 }
  0xe7   : > { %2186 = vmatprep.subr.bf16.mxu0 %v2719_v49  ;;  %2332 = vmatprep.subr.bf16.mxu1 %v2721_v51  ;;  %v2777_v49 = vcombine.high %v478_v44, %v482_v6  ;;  %v2774_v51 = vcombine.low %v477_v42, %v481_v43 }
  0xea   : > { %2187 = vmatpush1.bf16.msra.mxu0 %v2718_v56  ;;  %2333 = vmatpush1.bf16.msra.mxu1 %v2720_v57 }
  0xeb   : > { %2188 = vmatprep.subr.bf16.mxu0 %v2727_v59  ;;  %2334 = vmatprep.subr.bf16.mxu1 %v2729_v60 }
  0xee   : > { %2189 = vmatpush1.bf16.msra.mxu0 %v2726_v1  ;;  %2335 = vmatpush1.bf16.msra.mxu1 %v2728_v2 }
  0xef   : > { %2190 = vmatprep.subr.bf16.mxu0 %v2735_v4  ;;  %2336 = vmatprep.subr.bf16.mxu1 %v2737_v5 }
  0xf2   : > { %2191 = vmatpush1.bf16.msra.mxu0 %v2734_v10  ;;  %2337 = vmatpush1.bf16.msra.mxu1 %v2736_v11 }
  0xf3   : > { %2192 = vmatprep.subr.bf16.mxu0 %v2743_v12  ;;  %2338 = vmatprep.subr.bf16.mxu1 %v2745_v13 }
  0xf6   : > { %2193 = vmatpush1.bf16.msra.mxu0 %v2742_v19  ;;  %2339 = vmatpush1.bf16.msra.mxu1 %v2744_v21 }
  0xf7   : > { %2194 = vmatprep.subr.bf16.mxu0 %v2751_v22  ;;  %2340 = vmatprep.subr.bf16.mxu1 %v2753_v23 }
  0xfa   : > { %2195 = vmatpush1.bf16.msra.mxu0 %v2750_v29  ;;  %2341 = vmatpush1.bf16.msra.mxu1 %v2752_v31 }
  0xfb   : > { %2196 = vmatprep.subr.bf16.mxu0 %v2759_v32  ;;  %2342 = vmatprep.subr.bf16.mxu1 %v2761_v33 }
  0xfe   : > { %2197 = vmatpush1.bf16.msra.mxu0 %v2758_v36  ;;  %2343 = vmatpush1.bf16.msra.mxu1 %v2760_v37 }
  0xff   : > { %2198 = vmatprep.subr.bf16.mxu0 %v2767_v39  ;;  %2344 = vmatprep.subr.bf16.mxu1 %v2769_v40 }
 0x102   : > { %2199 = vmatpush1.bf16.msra.mxu0 %v2766_v45  ;;  %2345 = vmatpush1.bf16.msra.mxu1 %v2768_v46 }
 0x103   : > { %2200 = vmatprep.subr.bf16.mxu0 %v2775_v48  ;;  %2346 = vmatprep.subr.bf16.mxu1 %v2777_v49 }
 0x106   : > { %2201 = vmatpush1.bf16.msra.mxu0 %v2774_v51  ;;  %2347 = vmatpush1.bf16.msra.mxu1 %v2776_v52 }
 0x109   : > { %2203 = vmatmul.mubr.bf16.vlgmr.msra.gmra.mrb[16].mxu0 %v3423_v53  ;;  %2349 = vmatmul.mubr.bf16.vlgmr.msra.gmra.mrb[16].mxu1 %v3423_v53  ;;  %v485_v53 = vlaneseq }
 0x10a   : > { %2212 = vmatprep.mubr.bf16.mxu0 %v3430_v63  ;;  %2358 = vmatprep.mubr.bf16.mxu1 %v3430_v63 }
 0x10b   : > { %v3858_v63 = vshrl.u32 %v485_v53, 7 }
 0x10d   : > { %v491_v54 = vsub.s32 1, %v3858_v63 }
 0x111   : > { %2213 = vmatmul.mubr.bf16.gmra.mrb[20].mxu0 %v3459_v14  ;;  %2359 = vmatmul.mubr.bf16.gmra.mrb[20].mxu1 %v3459_v14  ;;  %v487_v14 = vsub.s32 0, %v3858_v63 }
 0x112   : > { %2222 = vmatprep.mubr.bf16.mxu0 %v3466_v24  ;;  %2368 = vmatprep.mubr.bf16.mxu1 %v3466_v24  ;;  %v3864_v24 = vld [vmem:[%s4036_s2] sm:$0xff] }
 0x113   : > { %v3871_v20 = vrot.slane %v3864_v24, %v487_v14  ;;  %v3877_v55 = vrot.slane %v3864_v24, %v491_v54 }
 0x119   : > { %2223 = vmatmul.mubr.bf16.gmra.mrb[24].mxu0 %v3495_v41  ;;  %2369 = vmatmul.mubr.bf16.gmra.mrb[24].mxu1 %v3495_v41  ;;  %v495_v41 = vsub.s32 2, %v3858_v63 }
 0x11a   : > { %2232 = vmatprep.mubr.bf16.mxu0 %v3502_v50  ;;  %2378 = vmatprep.mubr.bf16.mxu1 %v3502_v50  ;;  %v499_v50 = vsub.s32 3, %v3858_v63 }
 0x11c   : > { %v3880_v56 = vrot.slane %v3864_v24, %v499_v50 }
 0x121   : > { %2233 = vmatmul.mubr.bf16.gmra.mrb[28].mxu0 %v3528_v3  ;;  %2379 = vmatmul.mubr.bf16.gmra.mrb[28].mxu1 %v3528_v3  ;;  %v3874_v3 = vrot.slane %v3864_v24, %v495_v41 }
 0x15c   : > { %v1912_v57 = vpop.f32.mrb[0].mxu0  ;;  %v2058_v60 = vpop.f32.mrb[0].mxu1 }
 0x15d   : > { %v2782_v59 = vadd.f32 %v1912_v57, %v3871_v20  ;;  %v1914_v62 = vpop.f32.mrb[1].mxu0  ;;  %v2798_v0 = vadd.f32 %v2058_v60, %v3874_v3  ;;  %v2060_v15 = vpop.f32.mrb[1].mxu1 }
 0x15e   : > { %v2783_v30 = vadd.f32 %v1914_v62, %v3877_v55  ;;  %v1916_v1 = vpop.f32.mrb[2].mxu0  ;;  %v2799_v2 = vadd.f32 %v2060_v15, %v3880_v56  ;;  %v2062_v5 = vpop.f32.mrb[2].mxu1  ;;  %v503_v15 = vsub.s32 4, %v3858_v63 }
 0x15f   : > { %2389 = vst [vmem:[%s3885_s13] sm:$0xff] %v2782_v59  ;;  %v2784_v4 = vadd.f32 %v1916_v1, %v3871_v20  ;;  %v1918_v7 = vpop.f32.mrb[3].mxu0  ;;  %2391 = vst [vmem:[%s3885_s13 + $0x10] sm:$0xff] %v2798_v0  ;;  %v2800_v8 = vadd.f32 %v2062_v5, %v3874_v3  ;;  %v2064_v25 = vpop.f32.mrb[3].mxu1  ;;  %v507_v1 = vsub.s32 5, %v3858_v63 }
 0x160   : > { %2390 = vst [vmem:[%s3885_s13 + $0x8] sm:$0xff] %v2783_v30  ;;  %v2785_v9 = vadd.f32 %v1918_v7, %v3877_v55  ;;  %2392 = vst [vmem:[%s3885_s13 + $0x18] sm:$0xff] %v2799_v2  ;;  %v2801_v10 = vadd.f32 %v2064_v25, %v3880_v56  ;;  %v515_v2 = vsub.s32 7, %v3858_v63 }
 0x161   : > { %2397 = vst [vmem:[%s3885_s13 + $0x40] sm:$0xff] %v2784_v4  ;;  %2399 = vst [vmem:[%s3885_s13 + $0x50] sm:$0xff] %v2800_v8 }
 0x162   : > { %2398 = vst [vmem:[%s3885_s13 + $0x48] sm:$0xff] %v2785_v9  ;;  %2400 = vst [vmem:[%s3885_s13 + $0x58] sm:$0xff] %v2801_v10  ;;  %v3965_v4 = vrot.slane %v3864_v24, %v515_v2 }
 0x164   : > { %v1922_v11 = vpop.f32.mrb[4].mxu0  ;;  %v2068_v13 = vpop.f32.mrb[4].mxu1 }
 0x165   : > { %v2786_v12 = vadd.f32 %v1922_v11, %v3871_v20  ;;  %v1924_v16 = vpop.f32.mrb[5].mxu0  ;;  %v2802_v17 = vadd.f32 %v2068_v13, %v3874_v3  ;;  %v2070_v38 = vpop.f32.mrb[5].mxu1 }
 0x166   : > { %v2787_v18 = vadd.f32 %v1924_v16, %v3877_v55  ;;  %v1926_v19 = vpop.f32.mrb[6].mxu0  ;;  %v2803_v21 = vadd.f32 %v2070_v38, %v3880_v56  ;;  %v2072_v23 = vpop.f32.mrb[6].mxu1 }
 0x167   : > { %2405 = vst [vmem:[%s3885_s13 + $0x80] sm:$0xff] %v2786_v12  ;;  %v2788_v22 = vadd.f32 %v1926_v19, %v3871_v20  ;;  %v1928_v26 = vpop.f32.mrb[7].mxu0  ;;  %2407 = vst [vmem:[%s3885_s13 + $0x90] sm:$0xff] %v2802_v17  ;;  %v2804_v27 = vadd.f32 %v2072_v23, %v3874_v3  ;;  %v2074_v47 = vpop.f32.mrb[7].mxu1 }
 0x168   : > { %2406 = vst [vmem:[%s3885_s13 + $0x88] sm:$0xff] %v2787_v18  ;;  %v2789_v28 = vadd.f32 %v1928_v26, %v3877_v55  ;;  %2408 = vst [vmem:[%s3885_s13 + $0x98] sm:$0xff] %v2803_v21  ;;  %v2805_v29 = vadd.f32 %v2074_v47, %v3880_v56 }
 0x169   : > { %2413 = vst [vmem:[%s3885_s13 + $0xc0] sm:$0xff] %v2788_v22  ;;  %2415 = vst [vmem:[%s3885_s13 + $0xd0] sm:$0xff] %v2804_v27 }
 0x16a   : > { %2414 = vst [vmem:[%s3885_s13 + $0xc8] sm:$0xff] %v2789_v28  ;;  %2416 = vst [vmem:[%s3885_s13 + $0xd8] sm:$0xff] %v2805_v29 }
 0x16c   : > { %v1932_v31 = vpop.f32.mrb[8].mxu0  ;;  %v2078_v33 = vpop.f32.mrb[8].mxu1 }
 0x16d   : > { %v2790_v32 = vadd.f32 %v1932_v31, %v3871_v20  ;;  %v1934_v34 = vpop.f32.mrb[9].mxu0  ;;  %v2806_v58 = vadd.f32 %v2078_v33, %v3874_v3  ;;  %v2080_v61 = vpop.f32.mrb[9].mxu1 }
 0x16e   : > { %v2791_v35 = vadd.f32 %v1934_v34, %v3877_v55  ;;  %v1936_v36 = vpop.f32.mrb[10].mxu0  ;;  %v2807_v37 = vadd.f32 %v2080_v61, %v3880_v56  ;;  %v2082_v40 = vpop.f32.mrb[10].mxu1 }
 0x16f   : > { %2421 = vst [vmem:[%s3885_s13 + $0x100] sm:$0xff] %v2790_v32  ;;  %v2792_v39 = vadd.f32 %v1936_v36, %v3871_v20  ;;  %v1938_v42 = vpop.f32.mrb[11].mxu0  ;;  %2423 = vst [vmem:[%s3885_s13 + $0x110] sm:$0xff] %v2806_v58  ;;  %v2808_v43 = vadd.f32 %v2082_v40, %v3874_v3  ;;  %v2084_v6 = vpop.f32.mrb[11].mxu1 }
 0x170   : > { %2422 = vst [vmem:[%s3885_s13 + $0x108] sm:$0xff] %v2791_v35  ;;  %v2793_v44 = vadd.f32 %v1938_v42, %v3877_v55  ;;  %2424 = vst [vmem:[%s3885_s13 + $0x118] sm:$0xff] %v2807_v37  ;;  %v2809_v45 = vadd.f32 %v2084_v6, %v3880_v56 }
 0x171   : > { %2429 = vst [vmem:[%s3885_s13 + $0x140] sm:$0xff] %v2792_v39  ;;  %2431 = vst [vmem:[%s3885_s13 + $0x150] sm:$0xff] %v2808_v43 }
 0x172   : > { %2430 = vst [vmem:[%s3885_s13 + $0x148] sm:$0xff] %v2793_v44  ;;  %2432 = vst [vmem:[%s3885_s13 + $0x158] sm:$0xff] %v2809_v45 }
 0x174   : > { %v1942_v46 = vpop.f32.mrb[12].mxu0  ;;  %v2088_v49 = vpop.f32.mrb[12].mxu1 }
 0x175   : > { %v2794_v48 = vadd.f32 %v1942_v46, %v3871_v20  ;;  %v1944_v51 = vpop.f32.mrb[13].mxu0  ;;  %v2810_v52 = vadd.f32 %v2088_v49, %v3874_v3  ;;  %v2090_v14 = vpop.f32.mrb[13].mxu1 }
 0x176   : > { %v2795_v53 = vadd.f32 %v1944_v51, %v3877_v55  ;;  %v1946_v41 = vpop.f32.mrb[14].mxu0  ;;  %v2811_v54 = vadd.f32 %v2090_v14, %v3880_v56  ;;  %v2092_v57 = vpop.f32.mrb[14].mxu1 }
 0x177   : > { %2437 = vst [vmem:[%s3885_s13 + $0x180] sm:$0xff] %v2794_v48  ;;  %v2796_v50 = vadd.f32 %v1946_v41, %v3871_v20  ;;  %v1948_v59 = vpop.f32.mrb[15].mxu0  ;;  %2439 = vst [vmem:[%s3885_s13 + $0x190] sm:$0xff] %v2810_v52  ;;  %v2812_v60 = vadd.f32 %v2092_v57, %v3874_v3  ;;  %v2094_v0 = vpop.f32.mrb[15].mxu1  ;;  %v511_v20 = vsub.s32 6, %v3858_v63  ;;  %v3956_v3 = vrot.slane %v3864_v24, %v503_v15 }
 0x178   : > { %2438 = vst [vmem:[%s3885_s13 + $0x188] sm:$0xff] %v2795_v53  ;;  %v2797_v62 = vadd.f32 %v1948_v59, %v3877_v55  ;;  %2440 = vst [vmem:[%s3885_s13 + $0x198] sm:$0xff] %v2811_v54  ;;  %v2813_v30 = vadd.f32 %v2094_v0, %v3880_v56  ;;  %v3962_v56 = vrot.slane %v3864_v24, %v507_v1 }
 0x179   : > { %2445 = vst [vmem:[%s3885_s13 + $0x1c0] sm:$0xff] %v2796_v50  ;;  %2447 = vst [vmem:[%s3885_s13 + $0x1d0] sm:$0xff] %v2812_v60  ;;  %v3959_v55 = vrot.slane %v3864_v24, %v511_v20 }
 0x17a   : > { %2446 = vst [vmem:[%s3885_s13 + $0x1c8] sm:$0xff] %v2797_v62  ;;  %2448 = vst [vmem:[%s3885_s13 + $0x1d8] sm:$0xff] %v2813_v30 }
 0x1dc   : > { %v2204_v5 = vpop.f32.mrb[16].mxu0  ;;  %v2350_v8 = vpop.f32.mrb[16].mxu1 }
 0x1dd   : > { %v2814_v7 = vadd.f32 %v2204_v5, %v3956_v3  ;;  %v2206_v63 = vpop.f32.mrb[17].mxu0  ;;  %v2830_v9 = vadd.f32 %v2350_v8, %v3959_v55  ;;  %v2352_v10 = vpop.f32.mrb[17].mxu1 }
 0x1de   : > { %v2815_v25 = vadd.f32 %v2206_v63, %v3962_v56  ;;  %v2208_v11 = vpop.f32.mrb[18].mxu0  ;;  %v2831_v24 = vadd.f32 %v2352_v10, %v3965_v4  ;;  %v2354_v13 = vpop.f32.mrb[18].mxu1 }
 0x1df   : > { %2393 = vst [vmem:[%s3885_s13 + $0x20] sm:$0xff] %v2814_v7  ;;  %v2816_v12 = vadd.f32 %v2208_v11, %v3956_v3  ;;  %v2210_v16 = vpop.f32.mrb[19].mxu0  ;;  %2395 = vst [vmem:[%s3885_s13 + $0x30] sm:$0xff] %v2830_v9  ;;  %v2832_v17 = vadd.f32 %v2354_v13, %v3959_v55  ;;  %v2356_v38 = vpop.f32.mrb[19].mxu1 }
 0x1e0   : > { %2394 = vst [vmem:[%s3885_s13 + $0x28] sm:$0xff] %v2815_v25  ;;  %v2817_v18 = vadd.f32 %v2210_v16, %v3962_v56  ;;  %2396 = vst [vmem:[%s3885_s13 + $0x38] sm:$0xff] %v2831_v24  ;;  %v2833_v19 = vadd.f32 %v2356_v38, %v3965_v4 }
 0x1e1   : > { %2401 = vst [vmem:[%s3885_s13 + $0x60] sm:$0xff] %v2816_v12  ;;  %2403 = vst [vmem:[%s3885_s13 + $0x70] sm:$0xff] %v2832_v17 }
 0x1e2   : > { %2402 = vst [vmem:[%s3885_s13 + $0x68] sm:$0xff] %v2817_v18  ;;  %2404 = vst [vmem:[%s3885_s13 + $0x78] sm:$0xff] %v2833_v19 }
 0x1e4   : > { %v2214_v21 = vpop.f32.mrb[20].mxu0  ;;  %v2360_v23 = vpop.f32.mrb[20].mxu1 }
 0x1e5   : > { %v2818_v22 = vadd.f32 %v2214_v21, %v3956_v3  ;;  %v2216_v26 = vpop.f32.mrb[21].mxu0  ;;  %v2834_v27 = vadd.f32 %v2360_v23, %v3959_v55  ;;  %v2362_v47 = vpop.f32.mrb[21].mxu1 }
 0x1e6   : > { %v2819_v28 = vadd.f32 %v2216_v26, %v3962_v56  ;;  %v2218_v29 = vpop.f32.mrb[22].mxu0  ;;  %v2835_v31 = vadd.f32 %v2362_v47, %v3965_v4  ;;  %v2364_v33 = vpop.f32.mrb[22].mxu1 }
 0x1e7   : > { %2409 = vst [vmem:[%s3885_s13 + $0xa0] sm:$0xff] %v2818_v22  ;;  %v2820_v32 = vadd.f32 %v2218_v29, %v3956_v3  ;;  %v2220_v34 = vpop.f32.mrb[23].mxu0  ;;  %2411 = vst [vmem:[%s3885_s13 + $0xb0] sm:$0xff] %v2834_v27  ;;  %v2836_v58 = vadd.f32 %v2364_v33, %v3959_v55  ;;  %v2366_v61 = vpop.f32.mrb[23].mxu1 }
 0x1e8   : > { %2410 = vst [vmem:[%s3885_s13 + $0xa8] sm:$0xff] %v2819_v28  ;;  %v2821_v35 = vadd.f32 %v2220_v34, %v3962_v56  ;;  %2412 = vst [vmem:[%s3885_s13 + $0xb8] sm:$0xff] %v2835_v31  ;;  %v2837_v36 = vadd.f32 %v2366_v61, %v3965_v4 }
 0x1e9   : > { %2417 = vst [vmem:[%s3885_s13 + $0xe0] sm:$0xff] %v2820_v32  ;;  %2419 = vst [vmem:[%s3885_s13 + $0xf0] sm:$0xff] %v2836_v58 }
 0x1ea   : > { %2418 = vst [vmem:[%s3885_s13 + $0xe8] sm:$0xff] %v2821_v35  ;;  %2420 = vst [vmem:[%s3885_s13 + $0xf8] sm:$0xff] %v2837_v36 }
 0x1ec   : > { %v2224_v37 = vpop.f32.mrb[24].mxu0  ;;  %v2370_v40 = vpop.f32.mrb[24].mxu1 }
 0x1ed   : > { %v2822_v39 = vadd.f32 %v2224_v37, %v3956_v3  ;;  %v2226_v42 = vpop.f32.mrb[25].mxu0  ;;  %v2838_v43 = vadd.f32 %v2370_v40, %v3959_v55  ;;  %v2372_v6 = vpop.f32.mrb[25].mxu1 }
 0x1ee   : > { %v2823_v44 = vadd.f32 %v2226_v42, %v3962_v56  ;;  %v2228_v45 = vpop.f32.mrb[26].mxu0  ;;  %v2839_v46 = vadd.f32 %v2372_v6, %v3965_v4  ;;  %v2374_v49 = vpop.f32.mrb[26].mxu1 }
 0x1ef   : > { %2425 = vst [vmem:[%s3885_s13 + $0x120] sm:$0xff] %v2822_v39  ;;  %v2824_v48 = vadd.f32 %v2228_v45, %v3956_v3  ;;  %v2230_v51 = vpop.f32.mrb[27].mxu0  ;;  %2427 = vst [vmem:[%s3885_s13 + $0x130] sm:$0xff] %v2838_v43  ;;  %v2840_v52 = vadd.f32 %v2374_v49, %v3959_v55  ;;  %v2376_v14 = vpop.f32.mrb[27].mxu1 }
 0x1f0   : > { %2426 = vst [vmem:[%s3885_s13 + $0x128] sm:$0xff] %v2823_v44  ;;  %v2825_v53 = vadd.f32 %v2230_v51, %v3962_v56  ;;  %2428 = vst [vmem:[%s3885_s13 + $0x138] sm:$0xff] %v2839_v46  ;;  %v2841_v41 = vadd.f32 %v2376_v14, %v3965_v4 }
 0x1f1   : > { %2433 = vst [vmem:[%s3885_s13 + $0x160] sm:$0xff] %v2824_v48  ;;  %2435 = vst [vmem:[%s3885_s13 + $0x170] sm:$0xff] %v2840_v52 }
 0x1f2   : > { %2434 = vst [vmem:[%s3885_s13 + $0x168] sm:$0xff] %v2825_v53  ;;  %2436 = vst [vmem:[%s3885_s13 + $0x178] sm:$0xff] %v2841_v41 }
 0x1f4   : > { %v2234_v54 = vpop.f32.mrb[28].mxu0  ;;  %v2380_v57 = vpop.f32.mrb[28].mxu1 }
 0x1f5   : > { %v2826_v50 = vadd.f32 %v2234_v54, %v3956_v3  ;;  %v2236_v59 = vpop.f32.mrb[29].mxu0  ;;  %v2842_v60 = vadd.f32 %v2380_v57, %v3959_v55  ;;  %v2382_v0 = vpop.f32.mrb[29].mxu1 }
 0x1f6   : > { %v2827_v62 = vadd.f32 %v2236_v59, %v3962_v56  ;;  %v2238_v30 = vpop.f32.mrb[30].mxu0  ;;  %v2843_v15 = vadd.f32 %v2382_v0, %v3965_v4  ;;  %v2384_v1 = vpop.f32.mrb[30].mxu1 }
 0x1f7   : > { %2441 = vst [vmem:[%s3885_s13 + $0x1a0] sm:$0xff] %v2826_v50  ;;  %v2828_v20 = vadd.f32 %v2238_v30, %v3956_v3  ;;  %v2240_v2 = vpop.f32.mrb[31].mxu0  ;;  %2443 = vst [vmem:[%s3885_s13 + $0x1b0] sm:$0xff] %v2842_v60  ;;  %v2844_v5 = vadd.f32 %v2384_v1, %v3959_v55  ;;  %v2386_v8 = vpop.f32.mrb[31].mxu1 }
 0x1f8   : > { %2442 = vst [vmem:[%s3885_s13 + $0x1a8] sm:$0xff] %v2827_v62  ;;  %v2829_v7 = vadd.f32 %v2240_v2, %v3962_v56  ;;  %2444 = vst [vmem:[%s3885_s13 + $0x1b8] sm:$0xff] %v2843_v15  ;;  %v2845_v63 = vadd.f32 %v2386_v8, %v3965_v4 }
 0x1f9   : > { %2449 = vst [vmem:[%s3885_s13 + $0x1e0] sm:$0xff] %v2828_v20  ;;  %2451 = vst [vmem:[%s3885_s13 + $0x1f0] sm:$0xff] %v2844_v5 }
 0x1fa   : > { %2450 = vst [vmem:[%s3885_s13 + $0x1e8] sm:$0xff] %v2829_v7  ;;  %2452 = vst [vmem:[%s3885_s13 + $0x1f8] sm:$0xff] %v2845_v63 }
 0x1fb PF: > { %s13_s12 = sadd.s32 1, %s2924_s12  }
 0x1fc   : > { %p10_p4 = scmp.ge.s32.totalorder %s13_s12, 4  }
 0x1fe   :  { %12 = sbr.rel (!%p10_p4) target bundleno = 1 (0x1), region = 62 }

// kernel: pat_block_forward.14
= control target key start
LH: loop header
LB: loop body
LE: loop exit
PB: predicated region body
PF: predicated region fallthrough
CT: control target
= control target key end

     0   :  { %s625_s12 = smov 0   ;;  %s754_s0 = inlined_call_operand.vmem [shape: f32[32,256], index: 0, kind: input, shape index: {}]   ;;  %s755_s1 = inlined_call_operand.vmem [shape: bf16[256,256], index: 1, kind: input, shape index: {}]   ;;  %s756_s2 = inlined_call_operand.vmem [shape: f32[1,256], index: 2, kind: input, shape index: {}]   ;;  %s757_s3 = inlined_call_operand.vmem [shape: f32[32,256], index: 3, kind: output, shape index: {}]  }
   0x1 LB: > { %s494_s13 = sadd.s32 4294967295, %s603_s12   ;;  %p498_p0 = scmp.ge.s32.totalorder %s603_s12, 1  ;;  %s603_s12 = sphi %s625_s12, %s13_s12  }
   0x2   : > { %p139_p1 = scmp.lt.s32.totalorder %s603_s12, 3 }
   0x4   : > { %p140_p2 = pnand %p498_p0, %p139_p1 }
   0x5   : > { %v549_v0 = vld [vmem:[%s755_s1 + $0x4] ss:$8 sps:$4 sm:$0xff] (!%p140_p2)   ;;  %v551_v1 = vld [vmem:[%s755_s1] ss:$8 sps:$4 sm:$0xff] (!%p140_p2)   ;;  %v552_v2 = vld [vmem:[%s755_s1 + $0x14] ss:$8 sps:$4 sm:$0xff] (!%p140_p2)   ;;  %v219_v38 = vlaneseq (!%p140_p2) }
   0x6   : > { %143 = sbr.rel (%p140_p2) target bundleno = 288 (0x120), region = 32  ;;  %389 = vmatprep.subr.bf16.mxu0 (!%p140_p2), %v549_v0  ;;  %v554_v3 = vld [vmem:[%s755_s1 + $0x10] ss:$8 sps:$4 sm:$0xff] (!%p140_p2)   ;;  %v555_v4 = vld [vmem:[%s755_s1 + $0x24] ss:$8 sps:$4 sm:$0xff] (!%p140_p2)   ;;  %s499_s24 = sshll.u32 (!%p140_p2), %s494_s13, 1 }
   0x7   : > { %390 = vmatpush1.bf16.msra.mxu0 (!%p140_p2), %v551_v1  ;;  %v557_v5 = vld [vmem:[%s755_s1 + $0x20] ss:$8 sps:$4 sm:$0xff] (!%p140_p2)   ;;  %p166_p3 = scmp.lt.s32.totalorder (!%p140_p2), %s499_s24, 3  ;;  %v558_v6 = vld [vmem:[%s755_s1 + $0x34] ss:$8 sps:$4 sm:$0xff] (!%p140_p2)   ;;  %v220_v39 = vshrl.u32 (!%p140_p2), %v219_v38, 7 }
   0x8   : > { %391 = vmatprep.subr.bf16.mxu0 (!%p140_p2), %v552_v2  ;;  %v560_v7 = vld [vmem:[%s755_s1 + $0x30] ss:$8 sps:$4 sm:$0xff] (!%p140_p2)   ;;  %v561_v8 = vld [vmem:[%s755_s1 + $0x44] ss:$8 sps:$4 sm:$0xff] (!%p140_p2)   ;;  %v563_v9 = vld [vmem:[%s755_s1 + $0x40] ss:$8 sps:$4 sm:$0xff] (!%p140_p2)  }
   0x9   : > { %v564_v10 = vld [vmem:[%s755_s1 + $0x54] ss:$8 sps:$4 sm:$0xff] (!%p140_p2)   ;;  %v566_v11 = vld [vmem:[%s755_s1 + $0x50] ss:$8 sps:$4 sm:$0xff] (!%p140_p2)   ;;  %v567_v12 = vld [vmem:[%s755_s1 + $0x64] ss:$8 sps:$4 sm:$0xff] (!%p140_p2)  }
   0xa   : > { %v569_v16 = vld [vmem:[%s755_s1 + $0x60] ss:$8 sps:$4 sm:$0xff] (!%p140_p2)   ;;  %v570_v17 = vld [vmem:[%s755_s1 + $0x74] ss:$8 sps:$4 sm:$0xff] (!%p140_p2)   ;;  %v572_v18 = vld [vmem:[%s755_s1 + $0x70] ss:$8 sps:$4 sm:$0xff] (!%p140_p2)  }
   0xb   : > { %392 = vmatpush1.bf16.msra.mxu0 (!%p140_p2), %v554_v3  ;;  %v573_v19 = vld [vmem:[%s755_s1 + $0x84] ss:$8 sps:$4 sm:$0xff] (!%p140_p2)   ;;  %v575_v20 = vld [vmem:[%s755_s1 + $0x80] ss:$8 sps:$4 sm:$0xff] (!%p140_p2)   ;;  %v576_v21 = vld [vmem:[%s755_s1 + $0x94] ss:$8 sps:$4 sm:$0xff] (!%p140_p2)  }
   0xc   : > { %393 = vmatprep.subr.bf16.mxu0 (!%p140_p2), %v555_v4  ;;  %v578_v22 = vld [vmem:[%s755_s1 + $0x90] ss:$8 sps:$4 sm:$0xff] (!%p140_p2)   ;;  %v579_v23 = vld [vmem:[%s755_s1 + $0xa4] ss:$8 sps:$4 sm:$0xff] (!%p140_p2)   ;;  %v581_v24 = vld [vmem:[%s755_s1 + $0xa0] ss:$8 sps:$4 sm:$0xff] (!%p140_p2)  }
   0xd   : > { %s759_s24 = smov (!%p166_p3, %s499_s24), 3  ;;  %v582_v25 = vld [vmem:[%s755_s1 + $0xb4] ss:$8 sps:$4 sm:$0xff]   ;;  %v584_v26 = vld [vmem:[%s755_s1 + $0xb0] ss:$8 sps:$4 sm:$0xff]   ;;  %v221_v40 = vsub.s32 0, %v220_v39 }
   0xe   : > { %s539_s8 = sshll.u32 %s759_s24, 4  ;;  %v585_v27 = vld [vmem:[%s755_s1 + $0xc4] ss:$8 sps:$4 sm:$0xff]   ;;  %v587_v28 = vld [vmem:[%s755_s1 + $0xc0] ss:$8 sps:$4 sm:$0xff]   ;;  %v225_v42 = vsub.s32 1, %v220_v39 }
   0xf   : > { %394 = vmatpush1.bf16.msra.mxu0 %v557_v5  ;;  %s674_s14 = scalar_lea.vmem %s754_s0, %s539_s8  ;;  %v588_v29 = vld [vmem:[%s755_s1 + $0xd4] ss:$8 sps:$4 sm:$0xff]   ;;  %v590_v30 = vld [vmem:[%s755_s1 + $0xd0] ss:$8 sps:$4 sm:$0xff]   ;;  %v591_v31 = vld [vmem:[%s755_s1 + $0xe4] ss:$8 sps:$4 sm:$0xff]   ;;  %s177_s15 = scalar_lea.vmem %s757_s3, %s539_s8 }
  0x10   : > { %395 = vmatprep.subr.bf16.mxu0 %v558_v6  ;;  %v180_v13 = vld [vmem:[%s674_s14 + $0x8] sm:$0xff]  ;;  %v182_v14 = vld [vmem:[%s674_s14 + $0x18] sm:$0xff]  ;;  %v179_v35 = vld [vmem:[%s674_s14] sm:$0xff] }
  0x11   : > { %v184_v15 = vpack.c.bf16 %v182_v14, %v180_v13  ;;  %v593_v32 = vld [vmem:[%s755_s1 + $0xe0] ss:$8 sps:$4 sm:$0xff]   ;;  %v594_v33 = vld [vmem:[%s755_s1 + $0xf4] ss:$8 sps:$4 sm:$0xff]   ;;  %v596_v34 = vld [vmem:[%s755_s1 + $0xf0] ss:$8 sps:$4 sm:$0xff]  }
  0x12   : > { %v181_v36 = vld [vmem:[%s674_s14 + $0x10] sm:$0xff]  ;;  %v217_v41 = vld [vmem:[%s756_s2] sm:$0x3] }
  0x13   : > { %396 = vmatpush1.bf16.msra.mxu0 %v560_v7  ;;  %421 = vmatprep.mubr.bf16.mxu0 %v184_v15  ;;  %v183_v37 = vpack.c.bf16 %v181_v36, %v179_v35  ;;  %v222_v43 = vrot.slane %v217_v41, %v221_v40  ;;  %v226_v44 = vrot.slane %v217_v41, %v225_v42 }
  0x14   : > { %397 = vmatprep.subr.bf16.mxu0 %v561_v8 }
  0x17   : > { %398 = vmatpush1.bf16.msra.mxu0 %v563_v9 }
  0x18   : > { %399 = vmatprep.subr.bf16.mxu0 %v564_v10 }
  0x1b   : > { %400 = vmatpush1.bf16.msra.mxu0 %v566_v11 }
  0x1c   : > { %401 = vmatprep.subr.bf16.mxu0 %v567_v12 }
  0x1f   : > { %402 = vmatpush1.bf16.msra.mxu0 %v569_v16 }
  0x20   : > { %403 = vmatprep.subr.bf16.mxu0 %v570_v17 }
  0x23   : > { %404 = vmatpush1.bf16.msra.mxu0 %v572_v18 }
  0x24   : > { %405 = vmatprep.subr.bf16.mxu0 %v573_v19 }
  0x27   : > { %406 = vmatpush1.bf16.msra.mxu0 %v575_v20 }
  0x28   : > { %407 = vmatprep.subr.bf16.mxu0 %v576_v21 }
  0x2b   : > { %408 = vmatpush1.bf16.msra.mxu0 %v578_v22 }
  0x2c   : > { %409 = vmatprep.subr.bf16.mxu0 %v579_v23 }
  0x2f   : > { %410 = vmatpush1.bf16.msra.mxu0 %v581_v24 }
  0x30   : > { %411 = vmatprep.subr.bf16.mxu0 %v582_v25 }
  0x33   : > { %412 = vmatpush1.bf16.msra.mxu0 %v584_v26 }
  0x34   : > { %413 = vmatprep.subr.bf16.mxu0 %v585_v27 }
  0x37   : > { %414 = vmatpush1.bf16.msra.mxu0 %v587_v28 }
  0x38   : > { %415 = vmatprep.subr.bf16.mxu0 %v588_v29 }
  0x3b   : > { %416 = vmatpush1.bf16.msra.mxu0 %v590_v30 }
  0x3c   : > { %417 = vmatprep.subr.bf16.mxu0 %v591_v31 }
  0x3f   : > { %418 = vmatpush1.bf16.msra.mxu0 %v593_v32 }
  0x40   : > { %419 = vmatprep.subr.bf16.mxu0 %v594_v33 }
  0x43   : > { %420 = vmatpush1.bf16.msra.mxu0 %v596_v34 }
  0x46   : > { %422 = vmatmul.mubr.bf16.vlgmr.msra.gmra.mrb[0].mxu0 %v183_v37 }
 0x119   : > { %v423_v45 = vpop.f32.mrb[0].mxu0 }
 0x11a   : > { %v424_v46 = vadd.f32 %v423_v45, %v222_v43  ;;  %v425_v47 = vpop.f32.mrb[1].mxu0 }
 0x11b   : > { %v426_v48 = vadd.f32 %v425_v47, %v226_v44  ;;  %v427_v49 = vpop.f32.mrb[2].mxu0 }
 0x11c   : > { %432 = vst [vmem:[%s177_s15] sm:$0xff] %v424_v46  ;;  %v428_v50 = vadd.f32 %v427_v49, %v222_v43  ;;  %v429_v51 = vpop.f32.mrb[3].mxu0 }
 0x11d   : > { %433 = vst [vmem:[%s177_s15 + $0x8] sm:$0xff] %v426_v48  ;;  %v430_v52 = vadd.f32 %v429_v51, %v226_v44 }
 0x11e   : > { %434 = vst [vmem:[%s177_s15 + $0x10] sm:$0xff] %v428_v50 }
 0x11f   : > { %435 = vst [vmem:[%s177_s15 + $0x18] sm:$0xff] %v430_v52 }
 0x120 PF: > { %s13_s12 = sadd.s32 1, %s603_s12  }
 0x121   : > { %p10_p4 = scmp.ge.s32.totalorder %s13_s12, 4  }
 0x123   :  { %12 = sbr.rel (!%p10_p4) target bundleno = 1 (0x1), region = 62 }

// kernel: pat_block_forward.16
= control target key start
LH: loop header
LB: loop body
LE: loop exit
PB: predicated region body
PF: predicated region fallthrough
CT: control target
= control target key end

     0   :  { %s1606_s12 = smov 0   ;;  %s2246_s0 = inlined_call_operand.vmem [shape: f32[128,256], index: 0, kind: input, shape index: {}]   ;;  %s2247_s1 = inlined_call_operand.vmem [shape: bf16[256,1024], index: 1, kind: input, shape index: {}]   ;;  %s2248_s2 = inlined_call_operand.vmem [shape: f32[1,1024], index: 2, kind: input, shape index: {}]   ;;  %s2249_s3 = inlined_call_operand.vmem [shape: f32[128,1024], index: 3, kind: output, shape index: {}]  }
   0x1 LB: > { %s1427_s13 = sadd.s32 4294967295, %s1584_s12   ;;  %p1431_p0 = scmp.ge.s32.totalorder %s1584_s12, 1  ;;  %s1584_s12 = sphi %s1606_s12, %s13_s12  }
   0x2   : > { %p139_p1 = scmp.lt.s32.totalorder %s1584_s12, 3 }
   0x4   : > { %p140_p2 = pnand %p1431_p0, %p139_p1 }
   0x5   : > { %v203_v0 = vld [vmem:[%s2247_s1] sm:$0xff] (!%p140_p2)  ;;  %v204_v2 = vld [vmem:[%s2247_s1 + $0x8] sm:$0xff] (!%p140_p2)  ;;  %s1432_s11 = sshll.u32 (!%p140_p2), %s1427_s13, 3 }
   0x6   : > { %143 = sbr.rel (%p140_p2) target bundleno = 379 (0x17b), region = 32  ;;  %v207_v1 = vld [vmem:[%s2247_s1 + $0x20] sm:$0xff] (!%p140_p2)  ;;  %v208_v4 = vld [vmem:[%s2247_s1 + $0x28] sm:$0xff] (!%p140_p2)  ;;  %p166_p3 = scmp.lt.s32.totalorder (!%p140_p2), %s1432_s11, 15 }
   0x7   : > { %v1439_v3 = vcombine.high (!%p140_p2), %v203_v0, %v207_v1  ;;  %v1438_v5 = vcombine.low (!%p140_p2), %v203_v0, %v207_v1  ;;  %v211_v6 = vld [vmem:[%s2247_s1 + $0x40] sm:$0xff] (!%p140_p2)  ;;  %v1441_v8 = vcombine.high (!%p140_p2), %v204_v2, %v208_v4  ;;  %v1440_v9 = vcombine.low (!%p140_p2), %v204_v2, %v208_v4  ;;  %v212_v11 = vld [vmem:[%s2247_s1 + $0x48] sm:$0xff] (!%p140_p2) }
   0x8   : > { %v215_v7 = vld [vmem:[%s2247_s1 + $0x60] sm:$0xff] (!%p140_p2)  ;;  %v216_v12 = vld [vmem:[%s2247_s1 + $0x68] sm:$0xff] (!%p140_p2) }
   0x9   : > { %v1447_v10 = vcombine.high (!%p140_p2), %v211_v6, %v215_v7  ;;  %v219_v13 = vld [vmem:[%s2247_s1 + $0x80] sm:$0xff] (!%p140_p2)  ;;  %1013 = vmatprep.subr.bf16.mxu0 (!%p140_p2), %v1439_v3  ;;  %v1449_v14 = vcombine.high (!%p140_p2), %v212_v11, %v216_v12  ;;  %v220_v16 = vld [vmem:[%s2247_s1 + $0x88] sm:$0xff] (!%p140_p2)  ;;  %1086 = vmatprep.subr.bf16.mxu1 (!%p140_p2), %v1441_v8  ;;  %v1446_v18 = vcombine.low (!%p140_p2), %v211_v6, %v215_v7 }
   0xa   : > { %v223_v15 = vld [vmem:[%s2247_s1 + $0xa0] sm:$0xff] (!%p140_p2)  ;;  %v224_v17 = vld [vmem:[%s2247_s1 + $0xa8] sm:$0xff] (!%p140_p2)  ;;  %1014 = vmatpush1.bf16.msra.mxu0 (!%p140_p2), %v1438_v5  ;;  %1087 = vmatpush1.bf16.msra.mxu1 (!%p140_p2), %v1440_v9  ;;  %v1448_v19 = vcombine.low (!%p140_p2), %v212_v11, %v216_v12 }
   0xb   : > { %1015 = vmatprep.subr.bf16.mxu0 (!%p140_p2), %v1447_v10  ;;  %v1455_v20 = vcombine.high (!%p140_p2), %v219_v13, %v223_v15  ;;  %1088 = vmatprep.subr.bf16.mxu1 (!%p140_p2), %v1449_v14  ;;  %v1457_v21 = vcombine.high (!%p140_p2), %v220_v16, %v224_v17  ;;  %v227_v22 = vld [vmem:[%s2247_s1 + $0xc0] sm:$0xff] (!%p140_p2)  ;;  %v228_v24 = vld [vmem:[%s2247_s1 + $0xc8] sm:$0xff] (!%p140_p2)  ;;  %v1454_v26 = vcombine.low (!%p140_p2), %v219_v13, %v223_v15 }
   0xc   : > { %v231_v23 = vld [vmem:[%s2247_s1 + $0xe0] sm:$0xff] (!%p140_p2)  ;;  %v232_v25 = vld [vmem:[%s2247_s1 + $0xe8] sm:$0xff] (!%p140_p2)  ;;  %v1456_v27 = vcombine.low (!%p140_p2), %v220_v16, %v224_v17 }
   0xd   : > { %v1463_v28 = vcombine.high %v227_v22, %v231_v23  ;;  %v1465_v29 = vcombine.high %v228_v24, %v232_v25  ;;  %v235_v30 = vld [vmem:[%s2247_s1 + $0x100] sm:$0xff]  ;;  %v236_v32 = vld [vmem:[%s2247_s1 + $0x108] sm:$0xff]  ;;  %s2251_s11 = smov (!%p166_p3, %s1432_s11), 15  ;;  %v1462_v34 = vcombine.low %v227_v22, %v231_v23  ;;  %v1464_v35 = vcombine.low %v228_v24, %v232_v25 }
   0xe   : > { %1016 = vmatpush1.bf16.msra.mxu0 %v1446_v18  ;;  %1089 = vmatpush1.bf16.msra.mxu1 %v1448_v19  ;;  %v239_v31 = vld [vmem:[%s2247_s1 + $0x120] sm:$0xff]  ;;  %v240_v33 = vld [vmem:[%s2247_s1 + $0x128] sm:$0xff]  ;;  %s1568_s10 = sshll.u32 %s2251_s11, 4  ;;  %s1569_s4 = sshll.u32 %s2251_s11, 6 }
   0xf   : > { %1017 = vmatprep.subr.bf16.mxu0 %v1455_v20  ;;  %1090 = vmatprep.subr.bf16.mxu1 %v1457_v21  ;;  %v1471_v36 = vcombine.high %v235_v30, %v239_v31  ;;  %v1473_v37 = vcombine.high %v236_v32, %v240_v33  ;;  %v243_v38 = vld [vmem:[%s2247_s1 + $0x140] sm:$0xff]  ;;  %v244_v40 = vld [vmem:[%s2247_s1 + $0x148] sm:$0xff]  ;;  %v1470_v42 = vcombine.low %v235_v30, %v239_v31  ;;  %s1698_s20 = scalar_lea.vmem %s2246_s0, %s1568_s10  ;;  %s2097_s7 = scalar_lea.vmem %s2249_s3, %s1569_s4 }
  0x10   : > { %v247_v39 = vld [vmem:[%s2247_s1 + $0x160] sm:$0xff]  ;;  %v248_v41 = vld [vmem:[%s2247_s1 + $0x168] sm:$0xff]  ;;  %v1472_v43 = vcombine.low %v236_v32, %v240_v33  ;;  %v182_v54 = vld [vmem:[%s1698_s20 + $0x18] sm:$0xff] }
  0x11   : > { %v1479_v44 = vcombine.high %v243_v38, %v247_v39  ;;  %v1481_v45 = vcombine.high %v244_v40, %v248_v41  ;;  %v251_v46 = vld [vmem:[%s2247_s1 + $0x180] sm:$0xff]  ;;  %v252_v48 = vld [vmem:[%s2247_s1 + $0x188] sm:$0xff]  ;;  %v1478_v50 = vcombine.low %v243_v38, %v247_v39  ;;  %v1480_v51 = vcombine.low %v244_v40, %v248_v41 }
  0x12   : > { %1018 = vmatpush1.bf16.msra.mxu0 %v1454_v26  ;;  %1091 = vmatpush1.bf16.msra.mxu1 %v1456_v27  ;;  %v255_v47 = vld [vmem:[%s2247_s1 + $0x1a0] sm:$0xff]  ;;  %v256_v49 = vld [vmem:[%s2247_s1 + $0x1a8] sm:$0xff] }
  0x13   : > { %1019 = vmatprep.subr.bf16.mxu0 %v1463_v28  ;;  %1092 = vmatprep.subr.bf16.mxu1 %v1465_v29  ;;  %v1487_v52 = vcombine.high %v251_v46, %v255_v47  ;;  %v180_v53 = vld [vmem:[%s1698_s20 + $0x8] sm:$0xff]  ;;  %v1489_v55 = vcombine.high %v252_v48, %v256_v49  ;;  %v259_v56 = vld [vmem:[%s2247_s1 + $0x1c0] sm:$0xff]  ;;  %v1486_v61 = vcombine.low %v251_v46, %v255_v47 }
  0x14   : > { %v263_v57 = vld [vmem:[%s2247_s1 + $0x1e0] sm:$0xff]  ;;  %v1714_v58 = vpack.c.bf16 %v182_v54, %v180_v53  ;;  %v260_v59 = vld [vmem:[%s2247_s1 + $0x1c8] sm:$0xff]  ;;  %v1488_v62 = vcombine.low %v252_v48, %v256_v49 }
  0x15   : > { %v264_v60 = vld [vmem:[%s2247_s1 + $0x1e8] sm:$0xff]  ;;  %v1495_v63 = vcombine.high %v259_v56, %v263_v57  ;;  %v267_v1 = vld [vmem:[%s2247_s1 + $0x200] sm:$0xff]  ;;  %v1494_v5 = vcombine.low %v259_v56, %v263_v57 }
  0x16   : > { %1020 = vmatpush1.bf16.msra.mxu0 %v1462_v34  ;;  %1093 = vmatpush1.bf16.msra.mxu1 %v1464_v35  ;;  %v1497_v0 = vcombine.high %v260_v59, %v264_v60  ;;  %v271_v2 = vld [vmem:[%s2247_s1 + $0x220] sm:$0xff]  ;;  %v268_v3 = vld [vmem:[%s2247_s1 + $0x208] sm:$0xff]  ;;  %v1496_v6 = vcombine.low %v260_v59, %v264_v60 }
  0x17   : > { %1021 = vmatprep.subr.bf16.mxu0 %v1471_v36  ;;  %1094 = vmatprep.subr.bf16.mxu1 %v1473_v37  ;;  %v272_v4 = vld [vmem:[%s2247_s1 + $0x228] sm:$0xff]  ;;  %v1503_v7 = vcombine.high %v267_v1, %v271_v2  ;;  %v275_v9 = vld [vmem:[%s2247_s1 + $0x240] sm:$0xff]  ;;  %v1502_v13 = vcombine.low %v267_v1, %v271_v2  ;;  %v205_v2 = vld [vmem:[%s2247_s1 + $0x10] sm:$0xff] }
  0x18   : > { %1045 = vmatprep.mubr.bf16.mxu0 %v1714_v58  ;;  %1118 = vmatprep.mubr.bf16.mxu1 %v1714_v58  ;;  %v1505_v8 = vcombine.high %v268_v3, %v272_v4  ;;  %v279_v10 = vld [vmem:[%s2247_s1 + $0x260] sm:$0xff]  ;;  %v276_v11 = vld [vmem:[%s2247_s1 + $0x248] sm:$0xff]  ;;  %v1504_v14 = vcombine.low %v268_v3, %v272_v4  ;;  %v209_v3 = vld [vmem:[%s2247_s1 + $0x30] sm:$0xff] }
  0x19   : > { %v280_v12 = vld [vmem:[%s2247_s1 + $0x268] sm:$0xff]  ;;  %v1511_v15 = vcombine.high %v275_v9, %v279_v10  ;;  %v283_v17 = vld [vmem:[%s2247_s1 + $0x280] sm:$0xff]  ;;  %v1510_v21 = vcombine.low %v275_v9, %v279_v10  ;;  %v206_v4 = vld [vmem:[%s2247_s1 + $0x18] sm:$0xff]  ;;  %v1443_v10 = vcombine.high %v205_v2, %v209_v3 }
  0x1a   : > { %1022 = vmatpush1.bf16.msra.mxu0 %v1470_v42  ;;  %1095 = vmatpush1.bf16.msra.mxu1 %v1472_v43  ;;  %v1513_v16 = vcombine.high %v276_v11, %v280_v12  ;;  %v287_v18 = vld [vmem:[%s2247_s1 + $0x2a0] sm:$0xff]  ;;  %v284_v19 = vld [vmem:[%s2247_s1 + $0x288] sm:$0xff]  ;;  %v1512_v22 = vcombine.low %v276_v11, %v280_v12  ;;  %v213_v12 = vld [vmem:[%s2247_s1 + $0x50] sm:$0xff] }
  0x1b   : > { %1023 = vmatprep.subr.bf16.mxu0 %v1479_v44  ;;  %1096 = vmatprep.subr.bf16.mxu1 %v1481_v45  ;;  %v288_v20 = vld [vmem:[%s2247_s1 + $0x2a8] sm:$0xff]  ;;  %v1519_v23 = vcombine.high %v283_v17, %v287_v18  ;;  %v291_v25 = vld [vmem:[%s2247_s1 + $0x2c0] sm:$0xff]  ;;  %v1518_v29 = vcombine.low %v283_v17, %v287_v18  ;;  %v186_v18 = vld [vmem:[%s1698_s20 + $0x38] sm:$0xff] }
  0x1c   : > { %v1521_v24 = vcombine.high %v284_v19, %v288_v20  ;;  %v295_v26 = vld [vmem:[%s2247_s1 + $0x2e0] sm:$0xff]  ;;  %v292_v27 = vld [vmem:[%s2247_s1 + $0x2c8] sm:$0xff]  ;;  %v1520_v30 = vcombine.low %v284_v19, %v288_v20  ;;  %v1442_v19 = vcombine.low %v205_v2, %v209_v3 }
  0x1d   : > { %v296_v28 = vld [vmem:[%s2247_s1 + $0x2e8] sm:$0xff]  ;;  %v1527_v31 = vcombine.high %v291_v25, %v295_v26  ;;  %v299_v33 = vld [vmem:[%s2247_s1 + $0x300] sm:$0xff]  ;;  %v1526_v37 = vcombine.low %v291_v25, %v295_v26  ;;  %v222_v26 = vld [vmem:[%s2247_s1 + $0x98] sm:$0xff] }
  0x1e   : > { %1024 = vmatpush1.bf16.msra.mxu0 %v1478_v50  ;;  %1097 = vmatpush1.bf16.msra.mxu1 %v1480_v51  ;;  %v1529_v32 = vcombine.high %v292_v27, %v296_v28  ;;  %v303_v34 = vld [vmem:[%s2247_s1 + $0x320] sm:$0xff]  ;;  %v300_v35 = vld [vmem:[%s2247_s1 + $0x308] sm:$0xff]  ;;  %v1528_v38 = vcombine.low %v292_v27, %v296_v28  ;;  %v226_v27 = vld [vmem:[%s2247_s1 + $0xb8] sm:$0xff] }
  0x1f   : > { %1025 = vmatprep.subr.bf16.mxu0 %v1487_v52  ;;  %1098 = vmatprep.subr.bf16.mxu1 %v1489_v55  ;;  %v304_v36 = vld [vmem:[%s2247_s1 + $0x328] sm:$0xff]  ;;  %v1535_v39 = vcombine.high %v299_v33, %v303_v34  ;;  %v307_v41 = vld [vmem:[%s2247_s1 + $0x340] sm:$0xff]  ;;  %v1534_v45 = vcombine.low %v299_v33, %v303_v34  ;;  %v1461_v33 = vcombine.high %v222_v26, %v226_v27  ;;  %v229_v34 = vld [vmem:[%s2247_s1 + $0xd0] sm:$0xff] }
  0x20   : > { %v1537_v40 = vcombine.high %v300_v35, %v304_v36  ;;  %v311_v42 = vld [vmem:[%s2247_s1 + $0x360] sm:$0xff]  ;;  %v308_v43 = vld [vmem:[%s2247_s1 + $0x348] sm:$0xff]  ;;  %v1536_v46 = vcombine.low %v300_v35, %v304_v36  ;;  %v233_v35 = vld [vmem:[%s2247_s1 + $0xf0] sm:$0xff] }
  0x21   : > { %v312_v44 = vld [vmem:[%s2247_s1 + $0x368] sm:$0xff]  ;;  %v1543_v47 = vcombine.high %v307_v41, %v311_v42  ;;  %v315_v49 = vld [vmem:[%s2247_s1 + $0x380] sm:$0xff]  ;;  %v1542_v53 = vcombine.low %v307_v41, %v311_v42  ;;  %v230_v36 = vld [vmem:[%s2247_s1 + $0xd8] sm:$0xff]  ;;  %v1460_v42 = vcombine.low %v222_v26, %v226_v27 }
  0x22   : > { %1026 = vmatpush1.bf16.msra.mxu0 %v1486_v61  ;;  %1099 = vmatpush1.bf16.msra.mxu1 %v1488_v62  ;;  %v1545_v48 = vcombine.high %v308_v43, %v312_v44  ;;  %v319_v50 = vld [vmem:[%s2247_s1 + $0x3a0] sm:$0xff]  ;;  %v316_v51 = vld [vmem:[%s2247_s1 + $0x388] sm:$0xff]  ;;  %v1544_v54 = vcombine.low %v308_v43, %v312_v44  ;;  %v1467_v43 = vcombine.high %v229_v34, %v233_v35  ;;  %v269_v26 = vld [vmem:[%s2247_s1 + $0x210] sm:$0xff] }
  0x23   : > { %1027 = vmatprep.subr.bf16.mxu0 %v1495_v63  ;;  %1100 = vmatprep.subr.bf16.mxu1 %v1497_v0  ;;  %v320_v52 = vld [vmem:[%s2247_s1 + $0x3a8] sm:$0xff]  ;;  %v1551_v55 = vcombine.high %v315_v49, %v319_v50  ;;  %v323_v57 = vld [vmem:[%s2247_s1 + $0x3c0] sm:$0xff]  ;;  %v1550_v62 = vcombine.low %v315_v49, %v319_v50  ;;  %v242_v49 = vld [vmem:[%s2247_s1 + $0x138] sm:$0xff]  ;;  %v1466_v50 = vcombine.low %v229_v34, %v233_v35 }
  0x24   : > { %v1553_v56 = vcombine.high %v316_v51, %v320_v52  ;;  %v327_v59 = vld [vmem:[%s2247_s1 + $0x3e0] sm:$0xff]  ;;  %v324_v60 = vld [vmem:[%s2247_s1 + $0x3c8] sm:$0xff]  ;;  %v1552_v63 = vcombine.low %v316_v51, %v320_v52  ;;  %v189_v52 = vld [vmem:[%s1698_s20 + $0x50] sm:$0xff] }
  0x25   : > { %v328_v61 = vld [vmem:[%s2247_s1 + $0x3e8] sm:$0xff]  ;;  %v1559_v0 = vcombine.high %v323_v57, %v327_v59  ;;  %v187_v51 = vld [vmem:[%s1698_s20 + $0x40] sm:$0xff]  ;;  %v273_v27 = vld [vmem:[%s2247_s1 + $0x230] sm:$0xff] }
  0x26   : > { %1028 = vmatpush1.bf16.msra.mxu0 %v1494_v5  ;;  %1101 = vmatpush1.bf16.msra.mxu1 %v1496_v6  ;;  %v1561_v1 = vcombine.high %v324_v60, %v328_v61  ;;  %v210_v5 = vld [vmem:[%s2247_s1 + $0x38] sm:$0xff]  ;;  %v1558_v6 = vcombine.low %v323_v57, %v327_v59  ;;  %v1560_v9 = vcombine.low %v324_v60, %v328_v61  ;;  %v184_v17 = vld [vmem:[%s1698_s20 + $0x28] sm:$0xff]  ;;  %v249_v57 = vld [vmem:[%s2247_s1 + $0x170] sm:$0xff] }
  0x27   : > { %1029 = vmatprep.subr.bf16.mxu0 %v1503_v7  ;;  %1102 = vmatprep.subr.bf16.mxu1 %v1505_v8  ;;  %v179_v7 = vld [vmem:[%s1698_s20] sm:$0xff]  ;;  %v181_v8 = vld [vmem:[%s1698_s20 + $0x10] sm:$0xff]  ;;  %v1445_v11 = vcombine.high %v206_v4, %v210_v5  ;;  %v1444_v20 = vcombine.low %v206_v4, %v210_v5  ;;  %v1856_v25 = vpack.c.bf16 %v186_v18, %v184_v17  ;;  %v246_v59 = vld [vmem:[%s2247_s1 + $0x158] sm:$0xff] }
  0x28   : > { %v250_v60 = vld [vmem:[%s2247_s1 + $0x178] sm:$0xff]  ;;  %v1918_v61 = vpack.c.bf16 %v189_v52, %v187_v51  ;;  %v253_v4 = vld [vmem:[%s2247_s1 + $0x190] sm:$0xff] }
  0x29   : > { %v1485_v3 = vcombine.high %v246_v59, %v250_v60  ;;  %v257_v5 = vld [vmem:[%s2247_s1 + $0x1b0] sm:$0xff]  ;;  %v262_v18 = vld [vmem:[%s2247_s1 + $0x1d8] sm:$0xff] }
  0x2a   : > { %1030 = vmatpush1.bf16.msra.mxu0 %v1502_v13  ;;  %1103 = vmatpush1.bf16.msra.mxu1 %v1504_v14  ;;  %v217_v13 = vld [vmem:[%s2247_s1 + $0x70] sm:$0xff]  ;;  %v214_v14 = vld [vmem:[%s2247_s1 + $0x58] sm:$0xff] }
  0x2b   : > { %1031 = vmatprep.subr.bf16.mxu0 %v1511_v15  ;;  %1104 = vmatprep.subr.bf16.mxu1 %v1513_v16  ;;  %v1843_v15 = vpack.c.bf16 %v181_v8, %v179_v7  ;;  %v218_v16 = vld [vmem:[%s2247_s1 + $0x78] sm:$0xff]  ;;  %v1450_v28 = vcombine.low %v213_v12, %v217_v13  ;;  %v265_v17 = vld [vmem:[%s2247_s1 + $0x1f0] sm:$0xff] }
  0x2c   : > { %v254_v7 = vld [vmem:[%s2247_s1 + $0x198] sm:$0xff]  ;;  %v277_v34 = vld [vmem:[%s2247_s1 + $0x250] sm:$0xff] }
  0x2d   : > { %v258_v8 = vld [vmem:[%s2247_s1 + $0x1b8] sm:$0xff]  ;;  %v281_v35 = vld [vmem:[%s2247_s1 + $0x270] sm:$0xff] }
  0x2e   : > { %1032 = vmatpush1.bf16.msra.mxu0 %v1510_v21  ;;  %1105 = vmatpush1.bf16.msra.mxu1 %v1512_v22  ;;  %v1451_v21 = vcombine.high %v213_v12, %v217_v13  ;;  %v1453_v22 = vcombine.high %v214_v14, %v218_v16  ;;  %v1484_v12 = vcombine.low %v246_v59, %v250_v60  ;;  %v293_v51 = vld [vmem:[%s2247_s1 + $0x2d0] sm:$0xff] }
  0x2f   : > { %1033 = vmatprep.subr.bf16.mxu0 %v1519_v23  ;;  %1106 = vmatprep.subr.bf16.mxu1 %v1521_v24  ;;  %v221_v23 = vld [vmem:[%s2247_s1 + $0x90] sm:$0xff]  ;;  %v1491_v13 = vcombine.high %v253_v4, %v257_v5 }
  0x30   : > { %v225_v24 = vld [vmem:[%s2247_s1 + $0xb0] sm:$0xff] }
  0x31   : > { %v1458_v41 = vcombine.low %v221_v23, %v225_v24  ;;  %v297_v52 = vld [vmem:[%s2247_s1 + $0x2f0] sm:$0xff] }
  0x32   : > { %1034 = vmatpush1.bf16.msra.mxu0 %v1518_v29  ;;  %1107 = vmatpush1.bf16.msra.mxu1 %v1520_v30  ;;  %v183_v29 = vld [vmem:[%s1698_s20 + $0x20] sm:$0xff]  ;;  %v185_v30 = vld [vmem:[%s1698_s20 + $0x30] sm:$0xff] }
  0x33   : > { %1035 = vmatprep.subr.bf16.mxu0 %v1527_v31  ;;  %1108 = vmatprep.subr.bf16.mxu1 %v1529_v32  ;;  %v1452_v31 = vcombine.low %v214_v14, %v218_v16  ;;  %v1459_v32 = vcombine.high %v221_v23, %v225_v24  ;;  %v1493_v14 = vcombine.high %v254_v7, %v258_v8  ;;  %v261_v16 = vld [vmem:[%s2247_s1 + $0x1d0] sm:$0xff] }
  0x34   : > { %v1499_v23 = vcombine.high %v261_v16, %v265_v17  ;;  %v301_v60 = vld [vmem:[%s2247_s1 + $0x310] sm:$0xff] }
  0x36   : > { %1036 = vmatpush1.bf16.msra.mxu0 %v1526_v37  ;;  %1109 = vmatpush1.bf16.msra.mxu1 %v1528_v38  ;;  %v234_v37 = vld [vmem:[%s2247_s1 + $0xf8] sm:$0xff]  ;;  %v1882_v38 = vpack.c.bf16 %v185_v30, %v183_v29  ;;  %v1498_v30 = vcombine.low %v261_v16, %v265_v17  ;;  %v321_v16 = vld [vmem:[%s2247_s1 + $0x3b0] sm:$0xff] }
  0x37   : > { %1037 = vmatprep.subr.bf16.mxu0 %v1535_v39  ;;  %1110 = vmatprep.subr.bf16.mxu1 %v1537_v40  ;;  %v188_v39 = vld [vmem:[%s1698_s20 + $0x48] sm:$0xff]  ;;  %v190_v40 = vld [vmem:[%s1698_s20 + $0x58] sm:$0xff]  ;;  %v1469_v44 = vcombine.high %v230_v36, %v234_v37 }
  0x38   : > { %v274_v29 = vld [vmem:[%s2247_s1 + $0x238] sm:$0xff] }
  0x39   : > { %v318_v17 = vld [vmem:[%s2247_s1 + $0x398] sm:$0xff] }
  0x3a   : > { %1038 = vmatpush1.bf16.msra.mxu0 %v1534_v45  ;;  %1111 = vmatpush1.bf16.msra.mxu1 %v1536_v46  ;;  %v237_v45 = vld [vmem:[%s2247_s1 + $0x110] sm:$0xff] }
  0x3b   : > { %1039 = vmatprep.subr.bf16.mxu0 %v1543_v47  ;;  %1112 = vmatprep.subr.bf16.mxu1 %v1545_v48  ;;  %v241_v46 = vld [vmem:[%s2247_s1 + $0x130] sm:$0xff]  ;;  %v1892_v47 = vpack.c.bf16 %v190_v40, %v188_v39  ;;  %v238_v48 = vld [vmem:[%s2247_s1 + $0x118] sm:$0xff]  ;;  %v1506_v39 = vcombine.low %v269_v26, %v273_v27 }
  0x3e   : > { %1040 = vmatpush1.bf16.msra.mxu0 %v1542_v53  ;;  %1113 = vmatpush1.bf16.msra.mxu1 %v1544_v54  ;;  %v1468_v53 = vcombine.low %v230_v36, %v234_v37  ;;  %v1475_v54 = vcombine.high %v237_v45, %v241_v46  ;;  %v278_v36 = vld [vmem:[%s2247_s1 + $0x258] sm:$0xff] }
  0x3f   : > { %1041 = vmatprep.subr.bf16.mxu0 %v1551_v55  ;;  %1114 = vmatprep.subr.bf16.mxu1 %v1553_v56  ;;  %v1477_v55 = vcombine.high %v238_v48, %v242_v49  ;;  %v245_v56 = vld [vmem:[%s2247_s1 + $0x150] sm:$0xff]  ;;  %v282_v37 = vld [vmem:[%s2247_s1 + $0x278] sm:$0xff] }
  0x40   : > { %v1483_v2 = vcombine.high %v245_v56, %v249_v57 }
  0x42   : > { %1042 = vmatpush1.bf16.msra.mxu0 %v1550_v62  ;;  %1115 = vmatpush1.bf16.msra.mxu1 %v1552_v63  ;;  %v192_v62 = vld [vmem:[%s1698_s20 + $0x68] sm:$0xff]  ;;  %v194_v63 = vld [vmem:[%s1698_s20 + $0x78] sm:$0xff] }
  0x43   : > { %1043 = vmatprep.subr.bf16.mxu0 %v1559_v0  ;;  %1116 = vmatprep.subr.bf16.mxu1 %v1561_v1  ;;  %v1474_v0 = vcombine.low %v237_v45, %v241_v46  ;;  %v1476_v1 = vcombine.low %v238_v48, %v242_v49  ;;  %v290_v45 = vld [vmem:[%s2247_s1 + $0x2b8] sm:$0xff]  ;;  %v1514_v46 = vcombine.low %v277_v34, %v281_v35 }
  0x44   : > { %v1516_v48 = vcombine.low %v278_v36, %v282_v37 }
  0x46   : > { %1044 = vmatpush1.bf16.msra.mxu0 %v1558_v6  ;;  %1117 = vmatpush1.bf16.msra.mxu1 %v1560_v9  ;;  %v1928_v6 = vpack.c.bf16 %v194_v63, %v192_v62  ;;  %v1482_v9 = vcombine.low %v245_v56, %v249_v57  ;;  %v1531_v57 = vcombine.high %v293_v51, %v297_v52  ;;  %v305_v62 = vld [vmem:[%s2247_s1 + $0x330] sm:$0xff]  ;;  %v302_v63 = vld [vmem:[%s2247_s1 + $0x318] sm:$0xff] }
  0x47   : > { %1159 = vmatprep.subr.bf16.mxu0 %v1443_v10  ;;  %1232 = vmatprep.subr.bf16.mxu1 %v1445_v11  ;;  %v191_v10 = vld [vmem:[%s1698_s20 + $0x60] sm:$0xff]  ;;  %v193_v11 = vld [vmem:[%s1698_s20 + $0x70] sm:$0xff] }
  0x49   : > { %1046 = vmatmul.mubr.bf16.vlgmr.msra.gmra.mrb[0].mxu0 %v1843_v15  ;;  %1119 = vmatmul.mubr.bf16.vlgmr.msra.gmra.mrb[0].mxu1 %v1843_v15 }
  0x4a   : > { %1160 = vmatpush1.bf16.msra.mxu0 %v1442_v19  ;;  %1233 = vmatpush1.bf16.msra.mxu1 %v1444_v20  ;;  %v266_v19 = vld [vmem:[%s2247_s1 + $0x1f8] sm:$0xff]  ;;  %v1954_v20 = vpack.c.bf16 %v193_v11, %v191_v10  ;;  %v1538_v10 = vcombine.low %v301_v60, %v305_v62 }
  0x4b   : > { %1161 = vmatprep.subr.bf16.mxu0 %v1451_v21  ;;  %1234 = vmatprep.subr.bf16.mxu1 %v1453_v22  ;;  %v1490_v21 = vcombine.low %v253_v4, %v257_v5  ;;  %v1492_v22 = vcombine.low %v254_v7, %v258_v8  ;;  %v1501_v24 = vcombine.high %v262_v18, %v266_v19  ;;  %v309_v5 = vld [vmem:[%s2247_s1 + $0x350] sm:$0xff]  ;;  %v310_v8 = vld [vmem:[%s2247_s1 + $0x358] sm:$0xff] }
  0x4c   : > { %1055 = vmatprep.mubr.bf16.mxu0 %v1856_v25  ;;  %1128 = vmatprep.mubr.bf16.mxu1 %v1856_v25  ;;  %v313_v7 = vld [vmem:[%s2247_s1 + $0x370] sm:$0xff] }
  0x4e   : > { %1162 = vmatpush1.bf16.msra.mxu0 %v1450_v28  ;;  %1235 = vmatpush1.bf16.msra.mxu1 %v1452_v31  ;;  %v270_v28 = vld [vmem:[%s2247_s1 + $0x218] sm:$0xff]  ;;  %v1500_v31 = vcombine.low %v262_v18, %v266_v19  ;;  %v1546_v19 = vcombine.low %v309_v5, %v313_v7 }
  0x4f   : > { %1163 = vmatprep.subr.bf16.mxu0 %v1459_v32  ;;  %1236 = vmatprep.subr.bf16.mxu1 %v1461_v33  ;;  %v1507_v32 = vcombine.high %v269_v26, %v273_v27  ;;  %v1509_v33 = vcombine.high %v270_v28, %v274_v29  ;;  %v1508_v40 = vcombine.low %v270_v28, %v274_v29  ;;  %v322_v18 = vld [vmem:[%s2247_s1 + $0x3b8] sm:$0xff]  ;;  %v329_v26 = vld [vmem:[%s2247_s1 + $0x3f0] sm:$0xff] }
  0x50   : > { %v326_v27 = vld [vmem:[%s2247_s1 + $0x3d8] sm:$0xff] }
  0x51   : > { %1056 = vmatmul.mubr.bf16.gmra.mrb[4].mxu0 %v1882_v38  ;;  %1129 = vmatmul.mubr.bf16.gmra.mrb[4].mxu1 %v1882_v38  ;;  %v330_v28 = vld [vmem:[%s2247_s1 + $0x3f8] sm:$0xff] }
  0x52   : > { %1164 = vmatpush1.bf16.msra.mxu0 %v1458_v41  ;;  %1237 = vmatpush1.bf16.msra.mxu1 %v1460_v42  ;;  %v1515_v41 = vcombine.high %v277_v34, %v281_v35  ;;  %v1517_v42 = vcombine.high %v278_v36, %v282_v37  ;;  %v1564_v34 = vcombine.low %v326_v27, %v330_v28 }
  0x53   : > { %1165 = vmatprep.subr.bf16.mxu0 %v1467_v43  ;;  %1238 = vmatprep.subr.bf16.mxu1 %v1469_v44  ;;  %v285_v43 = vld [vmem:[%s2247_s1 + $0x290] sm:$0xff] }
  0x54   : > { %1065 = vmatprep.mubr.bf16.mxu0 %v1892_v47  ;;  %1138 = vmatprep.mubr.bf16.mxu1 %v1892_v47  ;;  %v289_v44 = vld [vmem:[%s2247_s1 + $0x2b0] sm:$0xff] }
  0x55   : > { %v1523_v49 = vcombine.high %v285_v43, %v289_v44 }
  0x56   : > { %1166 = vmatpush1.bf16.msra.mxu0 %v1466_v50  ;;  %1239 = vmatpush1.bf16.msra.mxu1 %v1468_v53  ;;  %v294_v53 = vld [vmem:[%s2247_s1 + $0x2d8] sm:$0xff] }
  0x57   : > { %1167 = vmatprep.subr.bf16.mxu0 %v1475_v54  ;;  %1240 = vmatprep.subr.bf16.mxu1 %v1477_v55  ;;  %v298_v54 = vld [vmem:[%s2247_s1 + $0x2f8] sm:$0xff]  ;;  %v1522_v55 = vcombine.low %v285_v43, %v289_v44 }
  0x58   : > { %v1533_v59 = vcombine.high %v294_v53, %v298_v54 }
  0x59   : > { %1066 = vmatmul.mubr.bf16.gmra.mrb[8].mxu0 %v1918_v61  ;;  %1139 = vmatmul.mubr.bf16.gmra.mrb[8].mxu1 %v1918_v61 }
  0x5a   : > { %1168 = vmatpush1.bf16.msra.mxu0 %v1474_v0  ;;  %1241 = vmatpush1.bf16.msra.mxu1 %v1476_v1  ;;  %v306_v0 = vld [vmem:[%s2247_s1 + $0x338] sm:$0xff]  ;;  %v1530_v1 = vcombine.low %v293_v51, %v297_v52 }
  0x5b   : > { %1169 = vmatprep.subr.bf16.mxu0 %v1483_v2  ;;  %1242 = vmatprep.subr.bf16.mxu1 %v1485_v3  ;;  %v1532_v2 = vcombine.low %v294_v53, %v298_v54  ;;  %v1539_v3 = vcombine.high %v301_v60, %v305_v62  ;;  %v1541_v4 = vcombine.high %v302_v63, %v306_v0 }
  0x5c   : > { %1075 = vmatprep.mubr.bf16.mxu0 %v1928_v6  ;;  %1148 = vmatprep.mubr.bf16.mxu1 %v1928_v6  ;;  %v1540_v11 = vcombine.low %v302_v63, %v306_v0 }
  0x5e   : > { %1170 = vmatpush1.bf16.msra.mxu0 %v1482_v9  ;;  %1243 = vmatpush1.bf16.msra.mxu1 %v1484_v12  ;;  %v314_v9 = vld [vmem:[%s2247_s1 + $0x378] sm:$0xff]  ;;  %v1547_v12 = vcombine.high %v309_v5, %v313_v7 }
  0x5f   : > { %1171 = vmatprep.subr.bf16.mxu0 %v1491_v13  ;;  %1244 = vmatprep.subr.bf16.mxu1 %v1493_v14  ;;  %v1549_v13 = vcombine.high %v310_v8, %v314_v9  ;;  %v317_v14 = vld [vmem:[%s2247_s1 + $0x390] sm:$0xff] }
  0x60   : > { %v1554_v29 = vcombine.low %v317_v14, %v321_v16 }
  0x61   : > { %1076 = vmatmul.mubr.bf16.gmra.mrb[12].mxu0 %v1954_v20  ;;  %1149 = vmatmul.mubr.bf16.gmra.mrb[12].mxu1 %v1954_v20 }
  0x62   : > { %1172 = vmatpush1.bf16.msra.mxu0 %v1490_v21  ;;  %1245 = vmatpush1.bf16.msra.mxu1 %v1492_v22  ;;  %v1548_v21 = vcombine.low %v310_v8, %v314_v9  ;;  %v1555_v22 = vcombine.high %v317_v14, %v321_v16 }
  0x63   : > { %1173 = vmatprep.subr.bf16.mxu0 %v1499_v23  ;;  %1246 = vmatprep.subr.bf16.mxu1 %v1501_v24  ;;  %v1557_v23 = vcombine.high %v318_v17, %v322_v18  ;;  %v325_v24 = vld [vmem:[%s2247_s1 + $0x3d0] sm:$0xff] }
  0x64   : > { %1191 = vmatprep.mubr.bf16.mxu0 %v1714_v58  ;;  %1264 = vmatprep.mubr.bf16.mxu1 %v1714_v58  ;;  %v286_v58 = vld [vmem:[%s2247_s1 + $0x298] sm:$0xff] }
  0x65   : > { %v1525_v50 = vcombine.high %v286_v58, %v290_v45  ;;  %v1524_v56 = vcombine.low %v286_v58, %v290_v45 }
  0x66   : > { %1174 = vmatpush1.bf16.msra.mxu0 %v1498_v30  ;;  %1247 = vmatpush1.bf16.msra.mxu1 %v1500_v31  ;;  %v1556_v30 = vcombine.low %v318_v17, %v322_v18  ;;  %v1563_v31 = vcombine.high %v325_v24, %v329_v26 }
  0x67   : > { %1175 = vmatprep.subr.bf16.mxu0 %v1507_v32  ;;  %1248 = vmatprep.subr.bf16.mxu1 %v1509_v33  ;;  %v1565_v32 = vcombine.high %v326_v27, %v330_v28  ;;  %v1562_v33 = vcombine.low %v325_v24, %v329_v26 }
  0x6a   : > { %1176 = vmatpush1.bf16.msra.mxu0 %v1506_v39  ;;  %1249 = vmatpush1.bf16.msra.mxu1 %v1508_v40 }
  0x6b   : > { %1177 = vmatprep.subr.bf16.mxu0 %v1515_v41  ;;  %1250 = vmatprep.subr.bf16.mxu1 %v1517_v42 }
  0x6e   : > { %1178 = vmatpush1.bf16.msra.mxu0 %v1514_v46  ;;  %1251 = vmatpush1.bf16.msra.mxu1 %v1516_v48 }
  0x6f   : > { %1179 = vmatprep.subr.bf16.mxu0 %v1523_v49  ;;  %1252 = vmatprep.subr.bf16.mxu1 %v1525_v50 }
  0x72   : > { %1180 = vmatpush1.bf16.msra.mxu0 %v1522_v55  ;;  %1253 = vmatpush1.bf16.msra.mxu1 %v1524_v56 }
  0x73   : > { %1181 = vmatprep.subr.bf16.mxu0 %v1531_v57  ;;  %1254 = vmatprep.subr.bf16.mxu1 %v1533_v59 }
  0x76   : > { %1182 = vmatpush1.bf16.msra.mxu0 %v1530_v1  ;;  %1255 = vmatpush1.bf16.msra.mxu1 %v1532_v2 }
  0x77   : > { %1183 = vmatprep.subr.bf16.mxu0 %v1539_v3  ;;  %1256 = vmatprep.subr.bf16.mxu1 %v1541_v4 }
  0x7a   : > { %1184 = vmatpush1.bf16.msra.mxu0 %v1538_v10  ;;  %1257 = vmatpush1.bf16.msra.mxu1 %v1540_v11 }
  0x7b   : > { %1185 = vmatprep.subr.bf16.mxu0 %v1547_v12  ;;  %1258 = vmatprep.subr.bf16.mxu1 %v1549_v13 }
  0x7e   : > { %1186 = vmatpush1.bf16.msra.mxu0 %v1546_v19  ;;  %1259 = vmatpush1.bf16.msra.mxu1 %v1548_v21 }
  0x7f   : > { %1187 = vmatprep.subr.bf16.mxu0 %v1555_v22  ;;  %1260 = vmatprep.subr.bf16.mxu1 %v1557_v23 }
  0x82   : > { %1188 = vmatpush1.bf16.msra.mxu0 %v1554_v29  ;;  %1261 = vmatpush1.bf16.msra.mxu1 %v1556_v30 }
  0x83   : > { %1189 = vmatprep.subr.bf16.mxu0 %v1563_v31  ;;  %1262 = vmatprep.subr.bf16.mxu1 %v1565_v32 }
  0x86   : > { %1190 = vmatpush1.bf16.msra.mxu0 %v1562_v33  ;;  %1263 = vmatpush1.bf16.msra.mxu1 %v1564_v34 }
  0x89   : > { %1192 = vmatmul.mubr.bf16.vlgmr.msra.gmra.mrb[16].mxu0 %v1843_v15  ;;  %1265 = vmatmul.mubr.bf16.vlgmr.msra.gmra.mrb[16].mxu1 %v1843_v15  ;;  %v333_v15 = vlaneseq }
  0x8a   : > { %1201 = vmatprep.mubr.bf16.mxu0 %v1856_v25  ;;  %1274 = vmatprep.mubr.bf16.mxu1 %v1856_v25 }
  0x8b   : > { %v2070_v25 = vshrl.u32 %v333_v15, 7 }
  0x8d   : > { %v339_v35 = vsub.s32 1, %v2070_v25 }
  0x91   : > { %1202 = vmatmul.mubr.bf16.gmra.mrb[20].mxu0 %v1882_v38  ;;  %1275 = vmatmul.mubr.bf16.gmra.mrb[20].mxu1 %v1882_v38  ;;  %v335_v38 = vsub.s32 0, %v2070_v25 }
  0x92   : > { %1211 = vmatprep.mubr.bf16.mxu0 %v1892_v47  ;;  %1284 = vmatprep.mubr.bf16.mxu1 %v1892_v47  ;;  %v2076_v47 = vld [vmem:[%s2248_s2] sm:$0xff] }
  0x93   : > { %v2083_v36 = vrot.slane %v2076_v47, %v335_v38  ;;  %v2089_v37 = vrot.slane %v2076_v47, %v339_v35 }
  0x99   : > { %1212 = vmatmul.mubr.bf16.gmra.mrb[24].mxu0 %v1918_v61  ;;  %1285 = vmatmul.mubr.bf16.gmra.mrb[24].mxu1 %v1918_v61  ;;  %v343_v61 = vsub.s32 2, %v2070_v25 }
  0x9a   : > { %1221 = vmatprep.mubr.bf16.mxu0 %v1928_v6  ;;  %1294 = vmatprep.mubr.bf16.mxu1 %v1928_v6  ;;  %v347_v6 = vsub.s32 3, %v2070_v25 }
  0x9c   : > { %v2092_v39 = vrot.slane %v2076_v47, %v347_v6 }
  0xa1   : > { %1222 = vmatmul.mubr.bf16.gmra.mrb[28].mxu0 %v1954_v20  ;;  %1295 = vmatmul.mubr.bf16.gmra.mrb[28].mxu1 %v1954_v20  ;;  %v2086_v20 = vrot.slane %v2076_v47, %v343_v61 }
 0x11c   : > { %v1047_v40 = vpop.f32.mrb[0].mxu0  ;;  %v1120_v42 = vpop.f32.mrb[0].mxu1 }
 0x11d   : > { %v1048_v41 = vadd.f32 %v1047_v40, %v2083_v36  ;;  %v1049_v43 = vpop.f32.mrb[1].mxu0  ;;  %v1121_v44 = vadd.f32 %v1120_v42, %v2086_v20  ;;  %v1122_v45 = vpop.f32.mrb[1].mxu1 }
 0x11e   : > { %v1050_v58 = vadd.f32 %v1049_v43, %v2089_v37  ;;  %v1051_v46 = vpop.f32.mrb[2].mxu0  ;;  %v1123_v48 = vadd.f32 %v1122_v45, %v2092_v39  ;;  %v1124_v50 = vpop.f32.mrb[2].mxu1  ;;  %v351_v45 = vsub.s32 4, %v2070_v25 }
 0x11f   : > { %1305 = vst [vmem:[%s2097_s7] sm:$0xff] %v1048_v41  ;;  %v1052_v49 = vadd.f32 %v1051_v46, %v2083_v36  ;;  %v1053_v51 = vpop.f32.mrb[3].mxu0  ;;  %1307 = vst [vmem:[%s2097_s7 + $0x10] sm:$0xff] %v1121_v44  ;;  %v1125_v52 = vadd.f32 %v1124_v50, %v2086_v20  ;;  %v1126_v54 = vpop.f32.mrb[3].mxu1  ;;  %v355_v46 = vsub.s32 5, %v2070_v25 }
 0x120   : > { %1306 = vst [vmem:[%s2097_s7 + $0x8] sm:$0xff] %v1050_v58  ;;  %v1054_v53 = vadd.f32 %v1053_v51, %v2089_v37  ;;  %1308 = vst [vmem:[%s2097_s7 + $0x18] sm:$0xff] %v1123_v48  ;;  %v1127_v55 = vadd.f32 %v1126_v54, %v2092_v39  ;;  %v363_v48 = vsub.s32 7, %v2070_v25 }
 0x121   : > { %1313 = vst [vmem:[%s2097_s7 + $0x40] sm:$0xff] %v1052_v49  ;;  %1315 = vst [vmem:[%s2097_s7 + $0x50] sm:$0xff] %v1125_v52 }
 0x122   : > { %1314 = vst [vmem:[%s2097_s7 + $0x48] sm:$0xff] %v1054_v53  ;;  %1316 = vst [vmem:[%s2097_s7 + $0x58] sm:$0xff] %v1127_v55  ;;  %v2177_v49 = vrot.slane %v2076_v47, %v363_v48 }
 0x124   : > { %v1057_v56 = vpop.f32.mrb[4].mxu0  ;;  %v1130_v59 = vpop.f32.mrb[4].mxu1 }
 0x125   : > { %v1058_v57 = vadd.f32 %v1057_v56, %v2083_v36  ;;  %v1059_v60 = vpop.f32.mrb[5].mxu0  ;;  %v1131_v62 = vadd.f32 %v1130_v59, %v2086_v20  ;;  %v1132_v0 = vpop.f32.mrb[5].mxu1 }
 0x126   : > { %v1060_v63 = vadd.f32 %v1059_v60, %v2089_v37  ;;  %v1061_v1 = vpop.f32.mrb[6].mxu0  ;;  %v1133_v2 = vadd.f32 %v1132_v0, %v2092_v39  ;;  %v1134_v4 = vpop.f32.mrb[6].mxu1 }
 0x127   : > { %1321 = vst [vmem:[%s2097_s7 + $0x80] sm:$0xff] %v1058_v57  ;;  %v1062_v3 = vadd.f32 %v1061_v1, %v2083_v36  ;;  %v1063_v5 = vpop.f32.mrb[7].mxu0  ;;  %1323 = vst [vmem:[%s2097_s7 + $0x90] sm:$0xff] %v1131_v62  ;;  %v1135_v7 = vadd.f32 %v1134_v4, %v2086_v20  ;;  %v1136_v9 = vpop.f32.mrb[7].mxu1 }
 0x128   : > { %1322 = vst [vmem:[%s2097_s7 + $0x88] sm:$0xff] %v1060_v63  ;;  %v1064_v8 = vadd.f32 %v1063_v5, %v2089_v37  ;;  %1324 = vst [vmem:[%s2097_s7 + $0x98] sm:$0xff] %v1133_v2  ;;  %v1137_v10 = vadd.f32 %v1136_v9, %v2092_v39 }
 0x129   : > { %1329 = vst [vmem:[%s2097_s7 + $0xc0] sm:$0xff] %v1062_v3  ;;  %1331 = vst [vmem:[%s2097_s7 + $0xd0] sm:$0xff] %v1135_v7 }
 0x12a   : > { %1330 = vst [vmem:[%s2097_s7 + $0xc8] sm:$0xff] %v1064_v8  ;;  %1332 = vst [vmem:[%s2097_s7 + $0xd8] sm:$0xff] %v1137_v10 }
 0x12c   : > { %v1067_v11 = vpop.f32.mrb[8].mxu0  ;;  %v1140_v13 = vpop.f32.mrb[8].mxu1 }
 0x12d   : > { %v1068_v12 = vadd.f32 %v1067_v11, %v2083_v36  ;;  %v1069_v14 = vpop.f32.mrb[9].mxu0  ;;  %v1141_v16 = vadd.f32 %v1140_v13, %v2086_v20  ;;  %v1142_v18 = vpop.f32.mrb[9].mxu1 }
 0x12e   : > { %v1070_v17 = vadd.f32 %v1069_v14, %v2089_v37  ;;  %v1071_v19 = vpop.f32.mrb[10].mxu0  ;;  %v1143_v21 = vadd.f32 %v1142_v18, %v2092_v39  ;;  %v1144_v23 = vpop.f32.mrb[10].mxu1 }
 0x12f   : > { %1337 = vst [vmem:[%s2097_s7 + $0x100] sm:$0xff] %v1068_v12  ;;  %v1072_v22 = vadd.f32 %v1071_v19, %v2083_v36  ;;  %v1073_v24 = vpop.f32.mrb[11].mxu0  ;;  %1339 = vst [vmem:[%s2097_s7 + $0x110] sm:$0xff] %v1141_v16  ;;  %v1145_v26 = vadd.f32 %v1144_v23, %v2086_v20  ;;  %v1146_v28 = vpop.f32.mrb[11].mxu1 }
 0x130   : > { %1338 = vst [vmem:[%s2097_s7 + $0x108] sm:$0xff] %v1070_v17  ;;  %v1074_v27 = vadd.f32 %v1073_v24, %v2089_v37  ;;  %1340 = vst [vmem:[%s2097_s7 + $0x118] sm:$0xff] %v1143_v21  ;;  %v1147_v29 = vadd.f32 %v1146_v28, %v2092_v39 }
 0x131   : > { %1345 = vst [vmem:[%s2097_s7 + $0x140] sm:$0xff] %v1072_v22  ;;  %1347 = vst [vmem:[%s2097_s7 + $0x150] sm:$0xff] %v1145_v26 }
 0x132   : > { %1346 = vst [vmem:[%s2097_s7 + $0x148] sm:$0xff] %v1074_v27  ;;  %1348 = vst [vmem:[%s2097_s7 + $0x158] sm:$0xff] %v1147_v29 }
 0x134   : > { %v1077_v30 = vpop.f32.mrb[12].mxu0  ;;  %v1150_v32 = vpop.f32.mrb[12].mxu1 }
 0x135   : > { %v1078_v31 = vadd.f32 %v1077_v30, %v2083_v36  ;;  %v1079_v33 = vpop.f32.mrb[13].mxu0  ;;  %v1151_v34 = vadd.f32 %v1150_v32, %v2086_v20  ;;  %v1152_v38 = vpop.f32.mrb[13].mxu1 }
 0x136   : > { %v1080_v15 = vadd.f32 %v1079_v33, %v2089_v37  ;;  %v1081_v61 = vpop.f32.mrb[14].mxu0  ;;  %v1153_v35 = vadd.f32 %v1152_v38, %v2092_v39  ;;  %v1154_v40 = vpop.f32.mrb[14].mxu1 }
 0x137   : > { %1353 = vst [vmem:[%s2097_s7 + $0x180] sm:$0xff] %v1078_v31  ;;  %v1082_v6 = vadd.f32 %v1081_v61, %v2083_v36  ;;  %v1083_v41 = vpop.f32.mrb[15].mxu0  ;;  %1355 = vst [vmem:[%s2097_s7 + $0x190] sm:$0xff] %v1151_v34  ;;  %v1155_v42 = vadd.f32 %v1154_v40, %v2086_v20  ;;  %v1156_v44 = vpop.f32.mrb[15].mxu1  ;;  %v359_v36 = vsub.s32 6, %v2070_v25  ;;  %v2168_v20 = vrot.slane %v2076_v47, %v351_v45 }
 0x138   : > { %1354 = vst [vmem:[%s2097_s7 + $0x188] sm:$0xff] %v1080_v15  ;;  %v1084_v43 = vadd.f32 %v1083_v41, %v2089_v37  ;;  %1356 = vst [vmem:[%s2097_s7 + $0x198] sm:$0xff] %v1153_v35  ;;  %v1157_v58 = vadd.f32 %v1156_v44, %v2092_v39  ;;  %v2174_v39 = vrot.slane %v2076_v47, %v355_v46 }
 0x139   : > { %1361 = vst [vmem:[%s2097_s7 + $0x1c0] sm:$0xff] %v1082_v6  ;;  %1363 = vst [vmem:[%s2097_s7 + $0x1d0] sm:$0xff] %v1155_v42  ;;  %v2171_v37 = vrot.slane %v2076_v47, %v359_v36 }
 0x13a   : > { %1362 = vst [vmem:[%s2097_s7 + $0x1c8] sm:$0xff] %v1084_v43  ;;  %1364 = vst [vmem:[%s2097_s7 + $0x1d8] sm:$0xff] %v1157_v58 }
 0x15c   : > { %v1193_v50 = vpop.f32.mrb[16].mxu0  ;;  %v1266_v52 = vpop.f32.mrb[16].mxu1 }
 0x15d   : > { %v1194_v51 = vadd.f32 %v1193_v50, %v2168_v20  ;;  %v1195_v25 = vpop.f32.mrb[17].mxu0  ;;  %v1267_v53 = vadd.f32 %v1266_v52, %v2171_v37  ;;  %v1268_v55 = vpop.f32.mrb[17].mxu1 }
 0x15e   : > { %v1196_v54 = vadd.f32 %v1195_v25, %v2174_v39  ;;  %v1197_v56 = vpop.f32.mrb[18].mxu0  ;;  %v1269_v47 = vadd.f32 %v1268_v55, %v2177_v49  ;;  %v1270_v59 = vpop.f32.mrb[18].mxu1 }
 0x15f   : > { %1309 = vst [vmem:[%s2097_s7 + $0x20] sm:$0xff] %v1194_v51  ;;  %v1198_v57 = vadd.f32 %v1197_v56, %v2168_v20  ;;  %v1199_v60 = vpop.f32.mrb[19].mxu0  ;;  %1311 = vst [vmem:[%s2097_s7 + $0x30] sm:$0xff] %v1267_v53  ;;  %v1271_v62 = vadd.f32 %v1270_v59, %v2171_v37  ;;  %v1272_v0 = vpop.f32.mrb[19].mxu1 }
 0x160   : > { %1310 = vst [vmem:[%s2097_s7 + $0x28] sm:$0xff] %v1196_v54  ;;  %v1200_v63 = vadd.f32 %v1199_v60, %v2174_v39  ;;  %1312 = vst [vmem:[%s2097_s7 + $0x38] sm:$0xff] %v1269_v47  ;;  %v1273_v1 = vadd.f32 %v1272_v0, %v2177_v49 }
 0x161   : > { %1317 = vst [vmem:[%s2097_s7 + $0x60] sm:$0xff] %v1198_v57  ;;  %1319 = vst [vmem:[%s2097_s7 + $0x70] sm:$0xff] %v1271_v62 }
 0x162   : > { %1318 = vst [vmem:[%s2097_s7 + $0x68] sm:$0xff] %v1200_v63  ;;  %1320 = vst [vmem:[%s2097_s7 + $0x78] sm:$0xff] %v1273_v1 }
 0x164   : > { %v1203_v2 = vpop.f32.mrb[20].mxu0  ;;  %v1276_v4 = vpop.f32.mrb[20].mxu1 }
 0x165   : > { %v1204_v3 = vadd.f32 %v1203_v2, %v2168_v20  ;;  %v1205_v5 = vpop.f32.mrb[21].mxu0  ;;  %v1277_v7 = vadd.f32 %v1276_v4, %v2171_v37  ;;  %v1278_v9 = vpop.f32.mrb[21].mxu1 }
 0x166   : > { %v1206_v8 = vadd.f32 %v1205_v5, %v2174_v39  ;;  %v1207_v10 = vpop.f32.mrb[22].mxu0  ;;  %v1279_v11 = vadd.f32 %v1278_v9, %v2177_v49  ;;  %v1280_v13 = vpop.f32.mrb[22].mxu1 }
 0x167   : > { %1325 = vst [vmem:[%s2097_s7 + $0xa0] sm:$0xff] %v1204_v3  ;;  %v1208_v12 = vadd.f32 %v1207_v10, %v2168_v20  ;;  %v1209_v14 = vpop.f32.mrb[23].mxu0  ;;  %1327 = vst [vmem:[%s2097_s7 + $0xb0] sm:$0xff] %v1277_v7  ;;  %v1281_v16 = vadd.f32 %v1280_v13, %v2171_v37  ;;  %v1282_v18 = vpop.f32.mrb[23].mxu1 }
 0x168   : > { %1326 = vst [vmem:[%s2097_s7 + $0xa8] sm:$0xff] %v1206_v8  ;;  %v1210_v17 = vadd.f32 %v1209_v14, %v2174_v39  ;;  %1328 = vst [vmem:[%s2097_s7 + $0xb8] sm:$0xff] %v1279_v11  ;;  %v1283_v19 = vadd.f32 %v1282_v18, %v2177_v49 }
 0x169   : > { %1333 = vst [vmem:[%s2097_s7 + $0xe0] sm:$0xff] %v1208_v12  ;;  %1335 = vst [vmem:[%s2097_s7 + $0xf0] sm:$0xff] %v1281_v16 }
 0x16a   : > { %1334 = vst [vmem:[%s2097_s7 + $0xe8] sm:$0xff] %v1210_v17  ;;  %1336 = vst [vmem:[%s2097_s7 + $0xf8] sm:$0xff] %v1283_v19 }
 0x16c   : > { %v1213_v21 = vpop.f32.mrb[24].mxu0  ;;  %v1286_v23 = vpop.f32.mrb[24].mxu1 }
 0x16d   : > { %v1214_v22 = vadd.f32 %v1213_v21, %v2168_v20  ;;  %v1215_v24 = vpop.f32.mrb[25].mxu0  ;;  %v1287_v26 = vadd.f32 %v1286_v23, %v2171_v37  ;;  %v1288_v28 = vpop.f32.mrb[25].mxu1 }
 0x16e   : > { %v1216_v27 = vadd.f32 %v1215_v24, %v2174_v39  ;;  %v1217_v29 = vpop.f32.mrb[26].mxu0  ;;  %v1289_v30 = vadd.f32 %v1288_v28, %v2177_v49  ;;  %v1290_v32 = vpop.f32.mrb[26].mxu1 }
 0x16f   : > { %1341 = vst [vmem:[%s2097_s7 + $0x120] sm:$0xff] %v1214_v22  ;;  %v1218_v31 = vadd.f32 %v1217_v29, %v2168_v20  ;;  %v1219_v33 = vpop.f32.mrb[27].mxu0  ;;  %1343 = vst [vmem:[%s2097_s7 + $0x130] sm:$0xff] %v1287_v26  ;;  %v1291_v34 = vadd.f32 %v1290_v32, %v2171_v37  ;;  %v1292_v38 = vpop.f32.mrb[27].mxu1 }
 0x170   : > { %1342 = vst [vmem:[%s2097_s7 + $0x128] sm:$0xff] %v1216_v27  ;;  %v1220_v15 = vadd.f32 %v1219_v33, %v2174_v39  ;;  %1344 = vst [vmem:[%s2097_s7 + $0x138] sm:$0xff] %v1289_v30  ;;  %v1293_v61 = vadd.f32 %v1292_v38, %v2177_v49 }
 0x171   : > { %1349 = vst [vmem:[%s2097_s7 + $0x160] sm:$0xff] %v1218_v31  ;;  %1351 = vst [vmem:[%s2097_s7 + $0x170] sm:$0xff] %v1291_v34 }
 0x172   : > { %1350 = vst [vmem:[%s2097_s7 + $0x168] sm:$0xff] %v1220_v15  ;;  %1352 = vst [vmem:[%s2097_s7 + $0x178] sm:$0xff] %v1293_v61 }
 0x174   : > { %v1223_v35 = vpop.f32.mrb[28].mxu0  ;;  %v1296_v40 = vpop.f32.mrb[28].mxu1 }
 0x175   : > { %v1224_v6 = vadd.f32 %v1223_v35, %v2168_v20  ;;  %v1225_v41 = vpop.f32.mrb[29].mxu0  ;;  %v1297_v42 = vadd.f32 %v1296_v40, %v2171_v37  ;;  %v1298_v44 = vpop.f32.mrb[29].mxu1 }
 0x176   : > { %v1226_v43 = vadd.f32 %v1225_v41, %v2174_v39  ;;  %v1227_v58 = vpop.f32.mrb[30].mxu0  ;;  %v1299_v45 = vadd.f32 %v1298_v44, %v2177_v49  ;;  %v1300_v46 = vpop.f32.mrb[30].mxu1 }
 0x177   : > { %1357 = vst [vmem:[%s2097_s7 + $0x1a0] sm:$0xff] %v1224_v6  ;;  %v1228_v36 = vadd.f32 %v1227_v58, %v2168_v20  ;;  %v1229_v48 = vpop.f32.mrb[31].mxu0  ;;  %1359 = vst [vmem:[%s2097_s7 + $0x1b0] sm:$0xff] %v1297_v42  ;;  %v1301_v50 = vadd.f32 %v1300_v46, %v2171_v37  ;;  %v1302_v52 = vpop.f32.mrb[31].mxu1 }
 0x178   : > { %1358 = vst [vmem:[%s2097_s7 + $0x1a8] sm:$0xff] %v1226_v43  ;;  %v1230_v51 = vadd.f32 %v1229_v48, %v2174_v39  ;;  %1360 = vst [vmem:[%s2097_s7 + $0x1b8] sm:$0xff] %v1299_v45  ;;  %v1303_v25 = vadd.f32 %v1302_v52, %v2177_v49 }
 0x179   : > { %1365 = vst [vmem:[%s2097_s7 + $0x1e0] sm:$0xff] %v1228_v36  ;;  %1367 = vst [vmem:[%s2097_s7 + $0x1f0] sm:$0xff] %v1301_v50 }
 0x17a   : > { %1366 = vst [vmem:[%s2097_s7 + $0x1e8] sm:$0xff] %v1230_v51  ;;  %1368 = vst [vmem:[%s2097_s7 + $0x1f8] sm:$0xff] %v1303_v25 }
 0x17b PF: > { %s13_s12 = sadd.s32 1, %s1584_s12  }
 0x17c   : > { %p10_p4 = scmp.ge.s32.totalorder %s13_s12, 4  }
 0x17e   :  { %12 = sbr.rel (!%p10_p4) target bundleno = 1 (0x1), region = 62 }

</bundles_post_ra>
